<compile_context>
chip_gen: v7x
topology: tpu7x:2x2x1
jax: 0.10.0
libtpu: 0.0.40
codegen_flags: <defaults>
</compile_context>

<pallas_src>
import functools

import jax
import jax.numpy as jnp
from jax.experimental import pallas as pl
from jax.experimental.pallas import tpu as pltpu


_VMEM_LIMIT = 32 * 1024 * 1024          # safe on v5e/v6e (128 MiB phys) and v7x (64 MiB phys)
_ALL_TAPS_4 = tuple((i, j) for i in range(4) for j in range(4))
_DEC_COUT = (128, 64, 3)                # natural out-channels of decoder ConvT layers 1..3
_BN_EPS = 1e-5


# ----------------------------- Pallas kernels --------------------------------

def _apply_act(y, act):
    if act == "lrelu":
        return jnp.where(y >= 0, y, 0.2 * y)
    if act == "relu":
        return jnp.maximum(y, 0.0)
    if act == "tanh":
        return jnp.tanh(y)
    return y  # "none"


def _gemm_kernel(a_ref, w_ref, t_ref, o_ref, *, act):
    # Single-pass full-K GEMM: out = act(A @ W + shift), f32 accumulate, cast on store.
    y = jnp.dot(a_ref[...], w_ref[...], preferred_element_type=jnp.float32) + t_ref[...]
    o_ref[...] = _apply_act(y, act).astype(o_ref.dtype)


def _bottleneck_kernel(a_ref, we_ref, te_ref, w1_ref, t1_ref, w2_ref, t2_ref,
                       wd_ref, td_ref, o_ref):
    # Fused 1x1 bottleneck: enc conv4 (+LeakyReLU), 3 ResBlocks, dec ConvT0 (+ReLU).
    x = jnp.dot(a_ref[...], we_ref[...], preferred_element_type=jnp.float32) + te_ref[...]
    x = jnp.where(x >= 0, x, 0.2 * x)                      # LeakyReLU(0.2)
    for i in range(3):                                     # ResBlocks (center 3x3 tap only)
        h = jnp.dot(x.astype(jnp.bfloat16), w1_ref[i],
                    preferred_element_type=jnp.float32) + t1_ref[i]
        h = jnp.maximum(h, 0.0)
        x = x + jnp.dot(h.astype(jnp.bfloat16), w2_ref[i],
                        preferred_element_type=jnp.float32) + t2_ref[i]
    y = jnp.dot(x.astype(jnp.bfloat16), wd_ref[...],
                preferred_element_type=jnp.float32) + td_ref[...]
    o_ref[...] = jnp.maximum(y, 0.0).astype(o_ref.dtype)   # ReLU after dec ConvT0 + BN


# ----------------------------- pallas_call wrappers ---------------------------

def _pick_tiles(m, n):
    # Lane-dense N tiles; guarantee >=2 blocks on a parallel axis when shapes allow (v7x).
    if n >= 512 and n % 256 == 0:
        tn = 256
    elif n > 128 and n % 128 == 0:
        tn = 128
    else:
        tn = n
    if (n // tn) >= 2 or m < 16 or (m // 2) % 8 != 0:
        tm = m
    else:
        tm = m // 2
    return tm, tn


def fused_gemm(a, w, shift, act, out_dtype=jnp.bfloat16):
    """act(a @ w + shift): one full-K pass, bf16 operands, f32 accumulate."""
    m, k = a.shape
    _, n = w.shape
    tm, tn = _pick_tiles(m, n)
    return pl.pallas_call(
        functools.partial(_gemm_kernel, act=act),
        out_shape=jax.ShapeDtypeStruct((m, n), out_dtype),
        grid=(m // tm, n // tn),
        in_specs=[
            pl.BlockSpec((tm, k), lambda mi, ni: (mi, 0)),
            pl.BlockSpec((k, tn), lambda mi, ni: (0, ni)),
            pl.BlockSpec((1, tn), lambda mi, ni: (0, ni)),
        ],
        out_specs=pl.BlockSpec((tm, tn), lambda mi, ni: (mi, ni)),
        compiler_params=pltpu.CompilerParams(
            dimension_semantics=("parallel", "parallel"),
            vmem_limit_bytes=_VMEM_LIMIT),
    )(a, w, shift)


def _full_spec(v):
    nd = v.ndim
    return pl.BlockSpec(v.shape, lambda i, _nd=nd: (0,) * _nd)


def bottleneck_fused(a, p):
    """enc conv4 + 3 ResBlocks + dec ConvT0, all at 1x1 spatial, one kernel launch."""
    n = a.shape[0]
    args = [a, p["we"], p["te"], p["w1"], p["t1"], p["w2"], p["t2"], p["wd"], p["td"]]
    return pl.pallas_call(
        _bottleneck_kernel,
        out_shape=jax.ShapeDtypeStruct((n, 1024), jnp.bfloat16),
        grid=(1,),
        in_specs=[_full_spec(v) for v in args],
        out_specs=pl.BlockSpec((n, 1024), lambda i: (0, 0)),
        compiler_params=pltpu.CompilerParams(vmem_limit_bytes=_VMEM_LIMIT),
    )(*args)


# ----------------------------- im2col glue (plain JAX, tiny arrays) -----------

def _im2col(x, k, stride, pad):
    # TODO(synk): A stays materialized in XLA; at these sizes (<1 MiB) a tap-walking
    # BlockSpec gather was not worth the complexity.
    n, h, w, c = x.shape
    ho = (h + 2 * pad - k) // stride + 1
    wo = (w + 2 * pad - k) // stride + 1
    xp = jnp.pad(x, ((0, 0), (pad, pad), (pad, pad), (0, 0)))
    cols = []
    for i in range(k):
        for j in range(k):
            cols.append(xp[:, i:i + stride * (ho - 1) + 1:stride,
                            j:j + stride * (wo - 1) + 1:stride, :])
    a = jnp.concatenate(cols, axis=-1).reshape(n * ho * wo, k * k * c)
    return a, ho, wo


# ----------------------------- weight preparation (all at init) ---------------

def _conv_gemm_weight(w, b, s, beta, taps, cin_pad, cout_pad):
    # w: (Cout,Cin,KH,KW).  Rows ordered (tap, cin); BN scale folded; pads are zero.
    cout, cin = w.shape[:2]
    wf = w * s[:, None, None, None]
    rows = []
    for (i, j) in taps:
        blk = jnp.transpose(wf[:, :, i, j])                       # (Cin, Cout)
        rows.append(jnp.pad(blk, ((0, cin_pad - cin), (0, cout_pad - cout))))
    W = jnp.concatenate(rows, axis=0).astype(jnp.bfloat16)
    shift = jnp.pad((b * s + beta).reshape(1, cout),
                    ((0, 0), (0, cout_pad - cout))).astype(jnp.float32)
    return W, shift


def _convT_gemm_weight(w, b, s, beta, cin_pad, ncol_pad):
    # ConvTranspose2d(Cin,Cout,4,2,1) == Conv2d(Cin, 4*Cout, 3, 1, 1) + pixel-shuffle(2).
    # Column order: (py, px, co); tap (dy,dx) uses ConvT tap (ky,kx) = (py-2dy+3, px-2dx+3).
    cin, cout = w.shape[:2]
    wf = (w * s[None, :, None, None]).astype(jnp.float32)
    rows = []
    for dy in range(3):
        for dx in range(3):
            blk = jnp.zeros((cin, 2, 2, cout), jnp.float32)
            for py in range(2):
                for px in range(2):
                    ky, kx = py - 2 * dy + 3, px - 2 * dx + 3
                    if 0 <= ky < 4 and 0 <= kx < 4:
                        blk = blk.at[:, py, px, :].set(wf[:, :, ky, kx])
            blk = blk.reshape(cin, 4 * cout)
            rows.append(jnp.pad(blk, ((0, cin_pad - cin), (0, ncol_pad - 4 * cout))))
    W = jnp.concatenate(rows, axis=0).astype(jnp.bfloat16)
    shift = jnp.tile(b * s + beta, (4,)).reshape(1, 4 * cout)
    shift = jnp.pad(shift, ((0, 0), (0, ncol_pad - 4 * cout))).astype(jnp.float32)
    return W, shift


def _convT_1x1_weight(w, b, s, beta):
    # ConvT from a 1x1 input only uses the center 2x2 of the 4x4 kernel: (Cin, 4*Cout).
    cin, cout = w.shape[:2]
    wf = w * s[None, :, None, None]
    cols = [wf[:, :, py + 1, px + 1] for py in range(2) for px in range(2)]
    W = jnp.concatenate(cols, axis=1).astype(jnp.bfloat16)
    shift = jnp.tile(b * s + beta, (4,)).reshape(1, 4 * cout).astype(jnp.float32)
    return W, shift


def _init_conv(key, cout, cin, k):
    kw_, kb = jax.random.split(key)
    bound = 1.0 / float(jnp.sqrt(cin * k * k))
    w = jax.random.uniform(kw_, (cout, cin, k, k), jnp.float32, -bound, bound)
    b = jax.random.uniform(kb, (cout,), jnp.float32, -bound, bound)
    return w, b


def _init_convT(key, cin, cout, k):
    kw_, kb = jax.random.split(key)
    bound = 1.0 / float(jnp.sqrt(cout * k * k))
    w = jax.random.uniform(kw_, (cin, cout, k, k), jnp.float32, -bound, bound)
    b = jax.random.uniform(kb, (cout,), jnp.float32, -bound, bound)
    return w, b


def _init_bn(key, c):
    # eval-mode BN folded to scale/shift (running_mean=0, running_var=1 as at init).
    kg, kb = jax.random.split(key)
    gamma = 1.0 + 0.1 * jax.random.normal(kg, (c,), jnp.float32)
    beta = 0.1 * jax.random.normal(kb, (c,), jnp.float32)
    return gamma / jnp.sqrt(1.0 + _BN_EPS), beta


def init_generator_params(key):
    """All GEMM layouts, BN folds, tap slicing, padding and bf16 casts happen HERE, once."""
    keys = iter(jax.random.split(key, 64))
    ones = lambda c: (jnp.ones((c,), jnp.float32), jnp.zeros((c,), jnp.float32))

    raw_enc = []
    for li, (ci, co) in enumerate([(3, 64), (64, 128), (128, 256), (256, 512)]):
        w, b = _init_conv(next(keys), co, ci, 4)
        s, t = ones(co) if li == 0 else _init_bn(next(keys), co)   # first conv: no BN
        raw_enc.append((w, b, s, t))
    raw_res = []
    for _ in range(3):
        w1, b1 = _init_conv(next(keys), 512, 512, 3)
        s1, t1 = _init_bn(next(keys), 512)
        w2, b2 = _init_conv(next(keys), 512, 512, 3)
        s2, t2 = _init_bn(next(keys), 512)
        raw_res.append((w1, b1, s1, t1, w2, b2, s2, t2))
    raw_dec = []
    for li, (ci, co) in enumerate([(512, 256), (256, 128), (128, 64), (64, 3)]):
        w, b = _init_convT(next(keys), ci, co, 4)
        s, t = ones(co) if li == 3 else _init_bn(next(keys), co)   # last conv: Tanh only
        raw_dec.append((w, b, s, t))

    params = {}
    # encoder convs 0..2: all 16 taps valid; out channels lane-padded to 128.
    enc_cin_pad, enc_cout_pad = (3, 128, 128), (128, 128, 256)
    params["enc"] = [
        _conv_gemm_weight(*raw_enc[i], _ALL_TAPS_4, enc_cin_pad[i], enc_cout_pad[i])
        for i in range(3)]
    # fused 1x1 bottleneck: enc conv4 (only center 2x2 taps reach real pixels from a 2x2
    # input), 3 ResBlocks (only the center 3x3 tap matters at 1x1), dec ConvT0 (center 2x2).
    we, te = _conv_gemm_weight(*raw_enc[3], ((1, 1), (1, 2), (2, 1), (2, 2)), 256, 512)
    w1s, t1s, w2s, t2s = [], [], [], []
    for (w1, b1, s1, bt1, w2, b2, s2, bt2) in raw_res:
        a, c = _conv_gemm_weight(w1, b1, s1, bt1, ((1, 1),), 512, 512)
        w1s.append(a); t1s.append(c)
        a, c = _conv_gemm_weight(w2, b2, s2, bt2, ((1, 1),), 512, 512)
        w2s.append(a); t2s.append(c)
    wd, td = _convT_1x1_weight(*raw_dec[0])
    params["bneck"] = dict(we=we, te=te,
                           w1=jnp.stack(w1s), t1=jnp.stack(t1s),
                           w2=jnp.stack(w2s), t2=jnp.stack(t2s),
                           wd=wd, td=td)
    # decoder ConvT 1..3 as 3x3 stride-1 convs with 4x parity-grouped output channels.
    dec_cin_pad, dec_ncol_pad = (256, 128, 64), (512, 256, 128)
    params["dec"] = [
        _convT_gemm_weight(*raw_dec[li + 1], dec_cin_pad[li], dec_ncol_pad[li])
        for li in range(3)]
    return params


# ----------------------------- forward ----------------------------------------

def generator_forward(params, x_nchw):
    n = x_nchw.shape[0]
    x = jnp.transpose(x_nchw, (0, 2, 3, 1)).astype(jnp.bfloat16)   # NCHW -> NHWC, bf16
    # encoder convs 0..2: Conv(4,2,1) [+folded BN] + LeakyReLU(0.2)
    for wg, t in params["enc"]:
        a, ho, wo = _im2col(x, 4, 2, 1)
        x = fused_gemm(a, wg, t, "lrelu").reshape(n, ho, wo, -1)
    # fused 1x1 bottleneck (enc conv4 + 3 ResBlocks + dec ConvT0): one kernel launch.
    if x.shape[1:3] != (2, 2):
        # TODO(synk): general input sizes need the unfused ResBlock / full-tap path.
        raise ValueError("fused bottleneck is specialized for 16x16 inputs")
    x = bottleneck_fused(x.reshape(n, 1024), params["bneck"]).reshape(n, 2, 2, 256)
    # decoder ConvT 1..3 via equivalent 3x3 conv GEMM + pixel shuffle; last layer Tanh.
    for li, (wg, t) in enumerate(params["dec"]):
        cout = _DEC_COUT[li]
        last = li == len(params["dec"]) - 1
        a, ho, wo = _im2col(x, 3, 1, 1)
        y = fused_gemm(a, wg, t, "tanh" if last else "relu",
                       out_dtype=jnp.float32 if last else jnp.bfloat16)
        y = y[:, :4 * cout].reshape(n, ho, wo, 2, 2, cout)
        x = jnp.transpose(y, (0, 1, 3, 2, 4, 5)).reshape(n, 2 * ho, 2 * wo, cout)
    return jnp.transpose(x, (0, 3, 1, 2))                          # NHWC -> NCHW (f32)


if __name__ == "__main__":
    key = jax.random.PRNGKey(0)
    pkey, xkey = jax.random.split(key)
    params = init_generator_params(pkey)
    x = jax.random.normal(xkey, (2, 3, 16, 16), jnp.float32)       # NCHW like PyTorch
    fwd = jax.jit(generator_forward)
    y = jax.block_until_ready(fwd(params, x))
    assert y.shape == (2, 3, 16, 16), y.shape
    assert bool(jnp.all(jnp.isfinite(y)))
    assert bool(jnp.all(jnp.abs(y) <= 1.0 + 1e-6))                 # Tanh output range
    print("KERNEL_OK")
</pallas_src>

<mosaic_0001>
module attributes {stable_mosaic.version = 11 : i64} {
  func.func @_gemm_kernel(%arg0: i32, %arg1: i32, %arg2: memref<64x48xbf16, #tpu.memory_space<vmem>>, %arg3: memref<48x128xbf16, #tpu.memory_space<vmem>>, %arg4: memref<1x128xf32, #tpu.memory_space<vmem>>, %arg5: memref<64x128xbf16, #tpu.memory_space<vmem>>) attributes {dimension_semantics = [#tpu.dimension_semantics<parallel>, #tpu.dimension_semantics<parallel>], iteration_bounds = array<i64: 2, 1>, scalar_prefetch = 0 : i64, scratch_operands = 0 : i64, tpu.core_type = #tpu.core_type<tc>, window_params = [{transform_indices = @transform_0, window_bounds = array<i64: 64, 48>}, {transform_indices = @transform_1, window_bounds = array<i64: 48, 128>}, {transform_indices = @transform_2, window_bounds = array<i64: 1, 128>}, {transform_indices = @transform_3, window_bounds = array<i64: 64, 128>}]} {
    %c0 = arith.constant 0 : index
    %c0_0 = arith.constant 0 : index
    %0 = vector.load %arg2[%c0, %c0_0] : memref<64x48xbf16, #tpu.memory_space<vmem>>, vector<64x48xbf16>
    %c0_1 = arith.constant 0 : index
    %c0_2 = arith.constant 0 : index
    %1 = vector.load %arg3[%c0_1, %c0_2] : memref<48x128xbf16, #tpu.memory_space<vmem>>, vector<48x128xbf16>
    %cst = arith.constant dense<0.000000e+00> : vector<64x128xf32>
    %2 = tpu.matmul %0, %1, %cst {dimension_numbers = #tpu.dot_dimension_numbers<[1], [0], [0], [1], [0, 0, 1, 1], [], []>} : vector<64x48xbf16>, vector<48x128xbf16>, vector<64x128xf32> -> vector<64x128xf32>
    %c0_3 = arith.constant 0 : index
    %c0_4 = arith.constant 0 : index
    %3 = vector.load %arg4[%c0_3, %c0_4] : memref<1x128xf32, #tpu.memory_space<vmem>>, vector<1x128xf32>
    %4 = vector.broadcast %3 : vector<1x128xf32> to vector<64x128xf32>
    %5 = arith.addf %2, %4 : vector<64x128xf32>
    %cst_5 = arith.constant 0.000000e+00 : f32
    %6 = vector.broadcast %cst_5 : f32 to vector<64x128xf32>
    %7 = arith.cmpf oge, %5, %6 : vector<64x128xf32>
    %cst_6 = arith.constant 2.000000e-01 : f32
    %8 = vector.broadcast %cst_6 : f32 to vector<64x128xf32>
    %9 = arith.mulf %8, %5 : vector<64x128xf32>
    %10 = arith.select %7, %5, %9 : vector<64x128xi1>, vector<64x128xf32>
    %11 = arith.truncf %10 : vector<64x128xf32> to vector<64x128xbf16>
    %c0_7 = arith.constant 0 : index
    %c0_8 = arith.constant 0 : index
    %12 = vector.load %arg5[%c0_7, %c0_8] : memref<64x128xbf16, #tpu.memory_space<vmem>>, vector<64x128xbf16>
    tpu.vector_store %arg5[%c0_7, %c0_8], %11 {strides = array<i32>} : memref<64x128xbf16, #tpu.memory_space<vmem>>, vector<64x128xbf16>,
    return
  }
  func.func @transform_0(%arg0: i32, %arg1: i32) -> (i32, i32) {
    %c0_i32 = arith.constant 0 : i32
    %c0_i32_0 = arith.constant 0 : i32
    return %arg0, %c0_i32 : i32, i32
  }
  func.func @transform_1(%arg0: i32, %arg1: i32) -> (i32, i32) {
    %c0_i32 = arith.constant 0 : i32
    %c0_i32_0 = arith.constant 0 : i32
    return %c0_i32, %arg1 : i32, i32
  }
  func.func @transform_2(%arg0: i32, %arg1: i32) -> (i32, i32) {
    %c0_i32 = arith.constant 0 : i32
    %c0_i32_0 = arith.constant 0 : i32
    return %c0_i32, %arg1 : i32, i32
  }
  func.func @transform_3(%arg0: i32, %arg1: i32) -> (i32, i32) {
    %c0_i32 = arith.constant 0 : i32
    return %arg0, %arg1 : i32, i32
  }
}

module attributes {stable_mosaic.version = 11 : i64} {
  func.func @_gemm_kernel(%arg0: i32, %arg1: i32, %arg2: memref<16x2048xbf16, #tpu.memory_space<vmem>>, %arg3: memref<2048x128xbf16, #tpu.memory_space<vmem>>, %arg4: memref<1x128xf32, #tpu.memory_space<vmem>>, %arg5: memref<16x128xbf16, #tpu.memory_space<vmem>>) attributes {dimension_semantics = [#tpu.dimension_semantics<parallel>, #tpu.dimension_semantics<parallel>], iteration_bounds = array<i64: 2, 1>, scalar_prefetch = 0 : i64, scratch_operands = 0 : i64, tpu.core_type = #tpu.core_type<tc>, window_params = [{transform_indices = @transform_0, window_bounds = array<i64: 16, 2048>}, {transform_indices = @transform_1, window_bounds = array<i64: 2048, 128>}, {transform_indices = @transform_2, window_bounds = array<i64: 1, 128>}, {transform_indices = @transform_3, window_bounds = array<i64: 16, 128>}]} {
    %c0 = arith.constant 0 : index
    %c0_0 = arith.constant 0 : index
    %0 = vector.load %arg2[%c0, %c0_0] : memref<16x2048xbf16, #tpu.memory_space<vmem>>, vector<16x2048xbf16>
    %c0_1 = arith.constant 0 : index
    %c0_2 = arith.constant 0 : index
    %1 = vector.load %arg3[%c0_1, %c0_2] : memref<2048x128xbf16, #tpu.memory_space<vmem>>, vector<2048x128xbf16>
    %cst = arith.constant dense<0.000000e+00> : vector<16x128xf32>
    %2 = tpu.matmul %0, %1, %cst {dimension_numbers = #tpu.dot_dimension_numbers<[1], [0], [0], [1], [0, 0, 1, 1], [], []>} : vector<16x2048xbf16>, vector<2048x128xbf16>, vector<16x128xf32> -> vector<16x128xf32>
    %c0_3 = arith.constant 0 : index
    %c0_4 = arith.constant 0 : index
    %3 = vector.load %arg4[%c0_3, %c0_4] : memref<1x128xf32, #tpu.memory_space<vmem>>, vector<1x128xf32>
    %4 = vector.broadcast %3 : vector<1x128xf32> to vector<16x128xf32>
    %5 = arith.addf %2, %4 : vector<16x128xf32>
    %cst_5 = arith.constant 0.000000e+00 : f32
    %6 = vector.broadcast %cst_5 : f32 to vector<16x128xf32>
    %7 = arith.cmpf oge, %5, %6 : vector<16x128xf32>
    %cst_6 = arith.constant 2.000000e-01 : f32
    %8 = vector.broadcast %cst_6 : f32 to vector<16x128xf32>
    %9 = arith.mulf %8, %5 : vector<16x128xf32>
    %10 = arith.select %7, %5, %9 : vector<16x128xi1>, vector<16x128xf32>
    %11 = arith.truncf %10 : vector<16x128xf32> to vector<16x128xbf16>
    %c0_7 = arith.constant 0 : index
    %c0_8 = arith.constant 0 : index
    %12 = vector.load %arg5[%c0_7, %c0_8] : memref<16x128xbf16, #tpu.memory_space<vmem>>, vector<16x128xbf16>
    tpu.vector_store %arg5[%c0_7, %c0_8], %11 {strides = array<i32>} : memref<16x128xbf16, #tpu.memory_space<vmem>>, vector<16x128xbf16>,
    return
  }
  func.func @transform_0(%arg0: i32, %arg1: i32) -> (i32, i32) {
    %c0_i32 = arith.constant 0 : i32
    %c0_i32_0 = arith.constant 0 : i32
    return %arg0, %c0_i32 : i32, i32
  }
  func.func @transform_1(%arg0: i32, %arg1: i32) -> (i32, i32) {
    %c0_i32 = arith.constant 0 : i32
    %c0_i32_0 = arith.constant 0 : i32
    return %c0_i32, %arg1 : i32, i32
  }
  func.func @transform_2(%arg0: i32, %arg1: i32) -> (i32, i32) {
    %c0_i32 = arith.constant 0 : i32
    %c0_i32_0 = arith.constant 0 : i32
    return %c0_i32, %arg1 : i32, i32
  }
  func.func @transform_3(%arg0: i32, %arg1: i32) -> (i32, i32) {
    %c0_i32 = arith.constant 0 : i32
    return %arg0, %arg1 : i32, i32
  }
}

module attributes {stable_mosaic.version = 11 : i64} {
  func.func @_gemm_kernel(%arg0: i32, %arg1: i32, %arg2: memref<8x2048xbf16, #tpu.memory_space<vmem>>, %arg3: memref<2048x128xbf16, #tpu.memory_space<vmem>>, %arg4: memref<1x128xf32, #tpu.memory_space<vmem>>, %arg5: memref<8x128xbf16, #tpu.memory_space<vmem>>) attributes {dimension_semantics = [#tpu.dimension_semantics<parallel>, #tpu.dimension_semantics<parallel>], iteration_bounds = array<i64: 1, 2>, scalar_prefetch = 0 : i64, scratch_operands = 0 : i64, tpu.core_type = #tpu.core_type<tc>, window_params = [{transform_indices = @transform_0, window_bounds = array<i64: 8, 2048>}, {transform_indices = @transform_1, window_bounds = array<i64: 2048, 128>}, {transform_indices = @transform_2, window_bounds = array<i64: 1, 128>}, {transform_indices = @transform_3, window_bounds = array<i64: 8, 128>}]} {
    %c0 = arith.constant 0 : index
    %c0_0 = arith.constant 0 : index
    %0 = vector.load %arg2[%c0, %c0_0] : memref<8x2048xbf16, #tpu.memory_space<vmem>>, vector<8x2048xbf16>
    %c0_1 = arith.constant 0 : index
    %c0_2 = arith.constant 0 : index
    %1 = vector.load %arg3[%c0_1, %c0_2] : memref<2048x128xbf16, #tpu.memory_space<vmem>>, vector<2048x128xbf16>
    %cst = arith.constant dense<0.000000e+00> : vector<8x128xf32>
    %2 = tpu.matmul %0, %1, %cst {dimension_numbers = #tpu.dot_dimension_numbers<[1], [0], [0], [1], [0, 0, 1, 1], [], []>} : vector<8x2048xbf16>, vector<2048x128xbf16>, vector<8x128xf32> -> vector<8x128xf32>
    %c0_3 = arith.constant 0 : index
    %c0_4 = arith.constant 0 : index
    %3 = vector.load %arg4[%c0_3, %c0_4] : memref<1x128xf32, #tpu.memory_space<vmem>>, vector<1x128xf32>
    %4 = vector.broadcast %3 : vector<1x128xf32> to vector<8x128xf32>
    %5 = arith.addf %2, %4 : vector<8x128xf32>
    %cst_5 = arith.constant 0.000000e+00 : f32
    %6 = vector.broadcast %cst_5 : f32 to vector<8x128xf32>
    %7 = arith.cmpf oge, %5, %6 : vector<8x128xf32>
    %cst_6 = arith.constant 2.000000e-01 : f32
    %8 = vector.broadcast %cst_6 : f32 to vector<8x128xf32>
    %9 = arith.mulf %8, %5 : vector<8x128xf32>
    %10 = arith.select %7, %5, %9 : vector<8x128xi1>, vector<8x128xf32>
    %11 = arith.truncf %10 : vector<8x128xf32> to vector<8x128xbf16>
    %c0_7 = arith.constant 0 : index
    %c0_8 = arith.constant 0 : index
    %12 = vector.load %arg5[%c0_7, %c0_8] : memref<8x128xbf16, #tpu.memory_space<vmem>>, vector<8x128xbf16>
    tpu.vector_store %arg5[%c0_7, %c0_8], %11 {strides = array<i32>} : memref<8x128xbf16, #tpu.memory_space<vmem>>, vector<8x128xbf16>,
    return
  }
  func.func @transform_0(%arg0: i32, %arg1: i32) -> (i32, i32) {
    %c0_i32 = arith.constant 0 : i32
    %c0_i32_0 = arith.constant 0 : i32
    return %arg0, %c0_i32 : i32, i32
  }
  func.func @transform_1(%arg0: i32, %arg1: i32) -> (i32, i32) {
    %c0_i32 = arith.constant 0 : i32
    %c0_i32_0 = arith.constant 0 : i32
    return %c0_i32, %arg1 : i32, i32
  }
  func.func @transform_2(%arg0: i32, %arg1: i32) -> (i32, i32) {
    %c0_i32 = arith.constant 0 : i32
    %c0_i32_0 = arith.constant 0 : i32
    return %c0_i32, %arg1 : i32, i32
  }
  func.func @transform_3(%arg0: i32, %arg1: i32) -> (i32, i32) {
    %c0_i32 = arith.constant 0 : i32
    return %arg0, %arg1 : i32, i32
  }
}

module attributes {stable_mosaic.version = 11 : i64} {
  func.func @_bottleneck_kernel(%arg0: i32, %arg1: memref<2x1024xbf16, #tpu.memory_space<vmem>>, %arg2: memref<1024x512xbf16, #tpu.memory_space<vmem>>, %arg3: memref<1x512xf32, #tpu.memory_space<vmem>>, %arg4: memref<3x512x512xbf16, #tpu.memory_space<vmem>>, %arg5: memref<3x1x512xf32, #tpu.memory_space<vmem>>, %arg6: memref<3x512x512xbf16, #tpu.memory_space<vmem>>, %arg7: memref<3x1x512xf32, #tpu.memory_space<vmem>>, %arg8: memref<512x1024xbf16, #tpu.memory_space<vmem>>, %arg9: memref<1x1024xf32, #tpu.memory_space<vmem>>, %arg10: memref<2x1024xbf16, #tpu.memory_space<vmem>>) attributes {dimension_semantics = [#tpu.dimension_semantics<arbitrary>], iteration_bounds = array<i64: 1>, scalar_prefetch = 0 : i64, scratch_operands = 0 : i64, tpu.core_type = #tpu.core_type<tc>, window_params = [{pipeline_mode = #tpu.pipeline_mode<synchronous>, transform_indices = @transform_0, window_bounds = array<i64: 2, 1024>}, {pipeline_mode = #tpu.pipeline_mode<synchronous>, transform_indices = @transform_1, window_bounds = array<i64: 1024, 512>}, {pipeline_mode = #tpu.pipeline_mode<synchronous>, transform_indices = @transform_2, window_bounds = array<i64: 1, 512>}, {pipeline_mode = #tpu.pipeline_mode<synchronous>, transform_indices = @transform_3, window_bounds = array<i64: 3, 512, 512>}, {pipeline_mode = #tpu.pipeline_mode<synchronous>, transform_indices = @transform_4, window_bounds = array<i64: 3, 1, 512>}, {pipeline_mode = #tpu.pipeline_mode<synchronous>, transform_indices = @transform_5, window_bounds = array<i64: 3, 512, 512>}, {pipeline_mode = #tpu.pipeline_mode<synchronous>, transform_indices = @transform_6, window_bounds = array<i64: 3, 1, 512>}, {pipeline_mode = #tpu.pipeline_mode<synchronous>, transform_indices = @transform_7, window_bounds = array<i64: 512, 1024>}, {pipeline_mode = #tpu.pipeline_mode<synchronous>, transform_indices = @transform_8, window_bounds = array<i64: 1, 1024>}, {pipeline_mode = #tpu.pipeline_mode<synchronous>, transform_indices = @transform_9, window_bounds = array<i64: 2, 1024>}]} {
    %c0 = arith.constant 0 : index
    %c0_0 = arith.constant 0 : index
    %0 = vector.load %arg1[%c0, %c0_0] : memref<2x1024xbf16, #tpu.memory_space<vmem>>, vector<2x1024xbf16>
    %c0_1 = arith.constant 0 : index
    %c0_2 = arith.constant 0 : index
    %1 = vector.load %arg2[%c0_1, %c0_2] : memref<1024x512xbf16, #tpu.memory_space<vmem>>, vector<1024x512xbf16>
    %cst = arith.constant dense<0.000000e+00> : vector<2x512xf32>
    %2 = tpu.matmul %0, %1, %cst {dimension_numbers = #tpu.dot_dimension_numbers<[1], [0], [0], [1], [0, 0, 1, 1], [], []>} : vector<2x1024xbf16>, vector<1024x512xbf16>, vector<2x512xf32> -> vector<2x512xf32>
    %c0_3 = arith.constant 0 : index
    %c0_4 = arith.constant 0 : index
    %3 = vector.load %arg3[%c0_3, %c0_4] : memref<1x512xf32, #tpu.memory_space<vmem>>, vector<1x512xf32>
    %4 = vector.broadcast %3 : vector<1x512xf32> to vector<2x512xf32>
    %5 = arith.addf %2, %4 : vector<2x512xf32>
    %cst_5 = arith.constant 0.000000e+00 : f32
    %6 = vector.broadcast %cst_5 : f32 to vector<2x512xf32>
    %7 = arith.cmpf oge, %5, %6 : vector<2x512xf32>
    %cst_6 = arith.constant 2.000000e-01 : f32
    %8 = vector.broadcast %cst_6 : f32 to vector<2x512xf32>
    %9 = arith.mulf %8, %5 : vector<2x512xf32>
    %10 = arith.select %7, %5, %9 : vector<2x512xi1>, vector<2x512xf32>
    %11 = arith.truncf %10 : vector<2x512xf32> to vector<2x512xbf16>
    %c0_7 = arith.constant 0 : index
    %c0_8 = arith.constant 0 : index
    %c0_9 = arith.constant 0 : index
    %12 = vector.load %arg4[%c0_7, %c0_8, %c0_9] : memref<3x512x512xbf16, #tpu.memory_space<vmem>>, vector<1x512x512xbf16>
    %13 = vector.shape_cast %12 : vector<1x512x512xbf16> to vector<512x512xbf16>
    %cst_10 = arith.constant dense<0.000000e+00> : vector<2x512xf32>
    %14 = tpu.matmul %11, %13, %cst_10 {dimension_numbers = #tpu.dot_dimension_numbers<[1], [0], [0], [1], [0, 0, 1, 1], [], []>} : vector<2x512xbf16>, vector<512x512xbf16>, vector<2x512xf32> -> vector<2x512xf32>
    %c0_11 = arith.constant 0 : index
    %c0_12 = arith.constant 0 : index
    %c0_13 = arith.constant 0 : index
    %15 = vector.load %arg5[%c0_11, %c0_12, %c0_13] : memref<3x1x512xf32, #tpu.memory_space<vmem>>, vector<1x1x512xf32>
    %16 = vector.shape_cast %15 : vector<1x1x512xf32> to vector<1x512xf32>
    %17 = vector.broadcast %16 : vector<1x512xf32> to vector<2x512xf32>
    %18 = arith.addf %14, %17 : vector<2x512xf32>
    %cst_14 = arith.constant 0.000000e+00 : f32
    %19 = vector.broadcast %cst_14 : f32 to vector<2x512xf32>
    %20 = arith.maximumf %18, %19 : vector<2x512xf32>
    %21 = arith.truncf %20 : vector<2x512xf32> to vector<2x512xbf16>
    %c0_15 = arith.constant 0 : index
    %c0_16 = arith.constant 0 : index
    %c0_17 = arith.constant 0 : index
    %22 = vector.load %arg6[%c0_15, %c0_16, %c0_17] : memref<3x512x512xbf16, #tpu.memory_space<vmem>>, vector<1x512x512xbf16>
    %23 = vector.shape_cast %22 : vector<1x512x512xbf16> to vector<512x512xbf16>
    %cst_18 = arith.constant dense<0.000000e+00> : vector<2x512xf32>
    %24 = tpu.matmul %21, %23, %cst_18 {dimension_numbers = #tpu.dot_dimension_numbers<[1], [0], [0], [1], [0, 0, 1, 1], [], []>} : vector<2x512xbf16>, vector<512x512xbf16>, vector<2x512xf32> -> vector<2x512xf32>
    %25 = arith.addf %10, %24 : vector<2x512xf32>
    %c0_19 = arith.constant 0 : index
    %c0_20 = arith.constant 0 : index
    %c0_21 = arith.constant 0 : index
    %26 = vector.load %arg7[%c0_19, %c0_20, %c0_21] : memref<3x1x512xf32, #tpu.memory_space<vmem>>, vector<1x1x512xf32>
    %27 = vector.shape_cast %26 : vector<1x1x512xf32> to vector<1x512xf32>
    %28 = vector.broadcast %27 : vector<1x512xf32> to vector<2x512xf32>
    %29 = arith.addf %25, %28 : vector<2x512xf32>
    %30 = arith.truncf %29 : vector<2x512xf32> to vector<2x512xbf16>
    %c1 = arith.constant 1 : index
    %c0_22 = arith.constant 0 : index
    %c0_23 = arith.constant 0 : index
    %31 = vector.load %arg4[%c1, %c0_22, %c0_23] : memref<3x512x512xbf16, #tpu.memory_space<vmem>>, vector<1x512x512xbf16>
    %32 = vector.shape_cast %31 : vector<1x512x512xbf16> to vector<512x512xbf16>
    %cst_24 = arith.constant dense<0.000000e+00> : vector<2x512xf32>
    %33 = tpu.matmul %30, %32, %cst_24 {dimension_numbers = #tpu.dot_dimension_numbers<[1], [0], [0], [1], [0, 0, 1, 1], [], []>} : vector<2x512xbf16>, vector<512x512xbf16>, vector<2x512xf32> -> vector<2x512xf32>
    %c1_25 = arith.constant 1 : index
    %c0_26 = arith.constant 0 : index
    %c0_27 = arith.constant 0 : index
    %34 = vector.load %arg5[%c1_25, %c0_26, %c0_27] : memref<3x1x512xf32, #tpu.memory_space<vmem>>, vector<1x1x512xf32>
    %35 = vector.shape_cast %34 : vector<1x1x512xf32> to vector<1x512xf32>
    %36 = vector.broadcast %35 : vector<1x512xf32> to vector<2x512xf32>
    %37 = arith.addf %33, %36 : vector<2x512xf32>
    %cst_28 = arith.constant 0.000000e+00 : f32
    %38 = vector.broadcast %cst_28 : f32 to vector<2x512xf32>
    %39 = arith.maximumf %37, %38 : vector<2x512xf32>
    %40 = arith.truncf %39 : vector<2x512xf32> to vector<2x512xbf16>
    %c1_29 = arith.constant 1 : index
    %c0_30 = arith.constant 0 : index
    %c0_31 = arith.constant 0 : index
    %41 = vector.load %arg6[%c1_29, %c0_30, %c0_31] : memref<3x512x512xbf16, #tpu.memory_space<vmem>>, vector<1x512x512xbf16>
    %42 = vector.shape_cast %41 : vector<1x512x512xbf16> to vector<512x512xbf16>
    %cst_32 = arith.constant dense<0.000000e+00> : vector<2x512xf32>
    %43 = tpu.matmul %40, %42, %cst_32 {dimension_numbers = #tpu.dot_dimension_numbers<[1], [0], [0], [1], [0, 0, 1, 1], [], []>} : vector<2x512xbf16>, vector<512x512xbf16>, vector<2x512xf32> -> vector<2x512xf32>
    %44 = arith.addf %29, %43 : vector<2x512xf32>
    %c1_33 = arith.constant 1 : index
    %c0_34 = arith.constant 0 : index
    %c0_35 = arith.constant 0 : index
    %45 = vector.load %arg7[%c1_33, %c0_34, %c0_35] : memref<3x1x512xf32, #tpu.memory_space<vmem>>, vector<1x1x512xf32>
    %46 = vector.shape_cast %45 : vector<1x1x512xf32> to vector<1x512xf32>
    %47 = vector.broadcast %46 : vector<1x512xf32> to vector<2x512xf32>
    %48 = arith.addf %44, %47 : vector<2x512xf32>
    %49 = arith.truncf %48 : vector<2x512xf32> to vector<2x512xbf16>
    %c2 = arith.constant 2 : index
    %c0_36 = arith.constant 0 : index
    %c0_37 = arith.constant 0 : index
    %50 = vector.load %arg4[%c2, %c0_36, %c0_37] : memref<3x512x512xbf16, #tpu.memory_space<vmem>>, vector<1x512x512xbf16>
    %51 = vector.shape_cast %50 : vector<1x512x512xbf16> to vector<512x512xbf16>
    %cst_38 = arith.constant dense<0.000000e+00> : vector<2x512xf32>
    %52 = tpu.matmul %49, %51, %cst_38 {dimension_numbers = #tpu.dot_dimension_numbers<[1], [0], [0], [1], [0, 0, 1, 1], [], []>} : vector<2x512xbf16>, vector<512x512xbf16>, vector<2x512xf32> -> vector<2x512xf32>
    %c2_39 = arith.constant 2 : index
    %c0_40 = arith.constant 0 : index
    %c0_41 = arith.constant 0 : index
    %53 = vector.load %arg5[%c2_39, %c0_40, %c0_41] : memref<3x1x512xf32, #tpu.memory_space<vmem>>, vector<1x1x512xf32>
    %54 = vector.shape_cast %53 : vector<1x1x512xf32> to vector<1x512xf32>
    %55 = vector.broadcast %54 : vector<1x512xf32> to vector<2x512xf32>
    %56 = arith.addf %52, %55 : vector<2x512xf32>
    %cst_42 = arith.constant 0.000000e+00 : f32
    %57 = vector.broadcast %cst_42 : f32 to vector<2x512xf32>
    %58 = arith.maximumf %56, %57 : vector<2x512xf32>
    %59 = arith.truncf %58 : vector<2x512xf32> to vector<2x512xbf16>
    %c2_43 = arith.constant 2 : index
    %c0_44 = arith.constant 0 : index
    %c0_45 = arith.constant 0 : index
    %60 = vector.load %arg6[%c2_43, %c0_44, %c0_45] : memref<3x512x512xbf16, #tpu.memory_space<vmem>>, vector<1x512x512xbf16>
    %61 = vector.shape_cast %60 : vector<1x512x512xbf16> to vector<512x512xbf16>
    %cst_46 = arith.constant dense<0.000000e+00> : vector<2x512xf32>
    %62 = tpu.matmul %59, %61, %cst_46 {dimension_numbers = #tpu.dot_dimension_numbers<[1], [0], [0], [1], [0, 0, 1, 1], [], []>} : vector<2x512xbf16>, vector<512x512xbf16>, vector<2x512xf32> -> vector<2x512xf32>
    %63 = arith.addf %48, %62 : vector<2x512xf32>
    %c2_47 = arith.constant 2 : index
    %c0_48 = arith.constant 0 : index
    %c0_49 = arith.constant 0 : index
    %64 = vector.load %arg7[%c2_47, %c0_48, %c0_49] : memref<3x1x512xf32, #tpu.memory_space<vmem>>, vector<1x1x512xf32>
    %65 = vector.shape_cast %64 : vector<1x1x512xf32> to vector<1x512xf32>
    %66 = vector.broadcast %65 : vector<1x512xf32> to vector<2x512xf32>
    %67 = arith.addf %63, %66 : vector<2x512xf32>
    %68 = arith.truncf %67 : vector<2x512xf32> to vector<2x512xbf16>
    %c0_50 = arith.constant 0 : index
    %c0_51 = arith.constant 0 : index
    %69 = vector.load %arg8[%c0_50, %c0_51] : memref<512x1024xbf16, #tpu.memory_space<vmem>>, vector<512x1024xbf16>
    %cst_52 = arith.constant dense<0.000000e+00> : vector<2x1024xf32>
    %70 = tpu.matmul %68, %69, %cst_52 {dimension_numbers = #tpu.dot_dimension_numbers<[1], [0], [0], [1], [0, 0, 1, 1], [], []>} : vector<2x512xbf16>, vector<512x1024xbf16>, vector<2x1024xf32> -> vector<2x1024xf32>
    %c0_53 = arith.constant 0 : index
    %c0_54 = arith.constant 0 : index
    %71 = vector.load %arg9[%c0_53, %c0_54] : memref<1x1024xf32, #tpu.memory_space<vmem>>, vector<1x1024xf32>
    %72 = vector.broadcast %71 : vector<1x1024xf32> to vector<2x1024xf32>
    %73 = arith.addf %70, %72 : vector<2x1024xf32>
    %cst_55 = arith.constant 0.000000e+00 : f32
    %74 = vector.broadcast %cst_55 : f32 to vector<2x1024xf32>
    %75 = arith.maximumf %73, %74 : vector<2x1024xf32>
    %76 = arith.truncf %75 : vector<2x1024xf32> to vector<2x1024xbf16>
    %c0_56 = arith.constant 0 : index
    %c0_57 = arith.constant 0 : index
    %77 = vector.load %arg10[%c0_56, %c0_57] : memref<2x1024xbf16, #tpu.memory_space<vmem>>, vector<2x1024xbf16>
    tpu.vector_store %arg10[%c0_56, %c0_57], %76 {strides = array<i32>} : memref<2x1024xbf16, #tpu.memory_space<vmem>>, vector<2x1024xbf16>,
    return
  }
  func.func @transform_0(%arg0: i32) -> (i32, i32) {
    %c0_i32 = arith.constant 0 : i32
    %c0_i32_0 = arith.constant 0 : i32
    %c0_i32_1 = arith.constant 0 : i32
    return %c0_i32, %c0_i32_0 : i32, i32
  }
  func.func @transform_1(%arg0: i32) -> (i32, i32) {
    %c0_i32 = arith.constant 0 : i32
    %c0_i32_0 = arith.constant 0 : i32
    %c0_i32_1 = arith.constant 0 : i32
    return %c0_i32, %c0_i32_0 : i32, i32
  }
  func.func @transform_2(%arg0: i32) -> (i32, i32) {
    %c0_i32 = arith.constant 0 : i32
    %c0_i32_0 = arith.constant 0 : i32
    %c0_i32_1 = arith.constant 0 : i32
    return %c0_i32, %c0_i32_0 : i32, i32
  }
  func.func @transform_3(%arg0: i32) -> (i32, i32, i32) {
    %c0_i32 = arith.constant 0 : i32
    %c0_i32_0 = arith.constant 0 : i32
    %c0_i32_1 = arith.constant 0 : i32
    %c0_i32_2 = arith.constant 0 : i32
    return %c0_i32, %c0_i32_0, %c0_i32_1 : i32, i32, i32
  }
  func.func @transform_4(%arg0: i32) -> (i32, i32, i32) {
    %c0_i32 = arith.constant 0 : i32
    %c0_i32_0 = arith.constant 0 : i32
    %c0_i32_1 = arith.constant 0 : i32
    %c0_i32_2 = arith.constant 0 : i32
    return %c0_i32, %c0_i32_0, %c0_i32_1 : i32, i32, i32
  }
  func.func @transform_5(%arg0: i32) -> (i32, i32, i32) {
    %c0_i32 = arith.constant 0 : i32
    %c0_i32_0 = arith.constant 0 : i32
    %c0_i32_1 = arith.constant 0 : i32
    %c0_i32_2 = arith.constant 0 : i32
    return %c0_i32, %c0_i32_0, %c0_i32_1 : i32, i32, i32
  }
  func.func @transform_6(%arg0: i32) -> (i32, i32, i32) {
    %c0_i32 = arith.constant 0 : i32
    %c0_i32_0 = arith.constant 0 : i32
    %c0_i32_1 = arith.constant 0 : i32
    %c0_i32_2 = arith.constant 0 : i32
    return %c0_i32, %c0_i32_0, %c0_i32_1 : i32, i32, i32
  }
  func.func @transform_7(%arg0: i32) -> (i32, i32) {
    %c0_i32 = arith.constant 0 : i32
    %c0_i32_0 = arith.constant 0 : i32
    %c0_i32_1 = arith.constant 0 : i32
    return %c0_i32, %c0_i32_0 : i32, i32
  }
  func.func @transform_8(%arg0: i32) -> (i32, i32) {
    %c0_i32 = arith.constant 0 : i32
    %c0_i32_0 = arith.constant 0 : i32
    %c0_i32_1 = arith.constant 0 : i32
    return %c0_i32, %c0_i32_0 : i32, i32
  }
  func.func @transform_9(%arg0: i32) -> (i32, i32) {
    %c0_i32 = arith.constant 0 : i32
    %c0_i32_0 = arith.constant 0 : i32
    %c0_i32_1 = arith.constant 0 : i32
    return %c0_i32, %c0_i32_0 : i32, i32
  }
}

module attributes {stable_mosaic.version = 11 : i64} {
  func.func @_gemm_kernel(%arg0: i32, %arg1: i32, %arg2: memref<8x2304xbf16, #tpu.memory_space<vmem>>, %arg3: memref<2304x256xbf16, #tpu.memory_space<vmem>>, %arg4: memref<1x256xf32, #tpu.memory_space<vmem>>, %arg5: memref<8x256xbf16, #tpu.memory_space<vmem>>) attributes {dimension_semantics = [#tpu.dimension_semantics<parallel>, #tpu.dimension_semantics<parallel>], iteration_bounds = array<i64: 1, 2>, scalar_prefetch = 0 : i64, scratch_operands = 0 : i64, tpu.core_type = #tpu.core_type<tc>, window_params = [{transform_indices = @transform_0, window_bounds = array<i64: 8, 2304>}, {transform_indices = @transform_1, window_bounds = array<i64: 2304, 256>}, {transform_indices = @transform_2, window_bounds = array<i64: 1, 256>}, {transform_indices = @transform_3, window_bounds = array<i64: 8, 256>}]} {
    %c0 = arith.constant 0 : index
    %c0_0 = arith.constant 0 : index
    %0 = vector.load %arg2[%c0, %c0_0] : memref<8x2304xbf16, #tpu.memory_space<vmem>>, vector<8x2304xbf16>
    %c0_1 = arith.constant 0 : index
    %c0_2 = arith.constant 0 : index
    %1 = vector.load %arg3[%c0_1, %c0_2] : memref<2304x256xbf16, #tpu.memory_space<vmem>>, vector<2304x256xbf16>
    %cst = arith.constant dense<0.000000e+00> : vector<8x256xf32>
    %2 = tpu.matmul %0, %1, %cst {dimension_numbers = #tpu.dot_dimension_numbers<[1], [0], [0], [1], [0, 0, 1, 1], [], []>} : vector<8x2304xbf16>, vector<2304x256xbf16>, vector<8x256xf32> -> vector<8x256xf32>
    %c0_3 = arith.constant 0 : index
    %c0_4 = arith.constant 0 : index
    %3 = vector.load %arg4[%c0_3, %c0_4] : memref<1x256xf32, #tpu.memory_space<vmem>>, vector<1x256xf32>
    %4 = vector.broadcast %3 : vector<1x256xf32> to vector<8x256xf32>
    %5 = arith.addf %2, %4 : vector<8x256xf32>
    %cst_5 = arith.constant 0.000000e+00 : f32
    %6 = vector.broadcast %cst_5 : f32 to vector<8x256xf32>
    %7 = arith.maximumf %5, %6 : vector<8x256xf32>
    %8 = arith.truncf %7 : vector<8x256xf32> to vector<8x256xbf16>
    %c0_6 = arith.constant 0 : index
    %c0_7 = arith.constant 0 : index
    %9 = vector.load %arg5[%c0_6, %c0_7] : memref<8x256xbf16, #tpu.memory_space<vmem>>, vector<8x256xbf16>
    tpu.vector_store %arg5[%c0_6, %c0_7], %8 {strides = array<i32>} : memref<8x256xbf16, #tpu.memory_space<vmem>>, vector<8x256xbf16>,
    return
  }
  func.func @transform_0(%arg0: i32, %arg1: i32) -> (i32, i32) {
    %c0_i32 = arith.constant 0 : i32
    %c0_i32_0 = arith.constant 0 : i32
    return %arg0, %c0_i32 : i32, i32
  }
  func.func @transform_1(%arg0: i32, %arg1: i32) -> (i32, i32) {
    %c0_i32 = arith.constant 0 : i32
    %c0_i32_0 = arith.constant 0 : i32
    return %c0_i32, %arg1 : i32, i32
  }
  func.func @transform_2(%arg0: i32, %arg1: i32) -> (i32, i32) {
    %c0_i32 = arith.constant 0 : i32
    %c0_i32_0 = arith.constant 0 : i32
    return %c0_i32, %arg1 : i32, i32
  }
  func.func @transform_3(%arg0: i32, %arg1: i32) -> (i32, i32) {
    %c0_i32 = arith.constant 0 : i32
    return %arg0, %arg1 : i32, i32
  }
}

module attributes {stable_mosaic.version = 11 : i64} {
  func.func @_gemm_kernel(%arg0: i32, %arg1: i32, %arg2: memref<32x1152xbf16, #tpu.memory_space<vmem>>, %arg3: memref<1152x128xbf16, #tpu.memory_space<vmem>>, %arg4: memref<1x128xf32, #tpu.memory_space<vmem>>, %arg5: memref<32x128xbf16, #tpu.memory_space<vmem>>) attributes {dimension_semantics = [#tpu.dimension_semantics<parallel>, #tpu.dimension_semantics<parallel>], iteration_bounds = array<i64: 1, 2>, scalar_prefetch = 0 : i64, scratch_operands = 0 : i64, tpu.core_type = #tpu.core_type<tc>, window_params = [{transform_indices = @transform_0, window_bounds = array<i64: 32, 1152>}, {transform_indices = @transform_1, window_bounds = array<i64: 1152, 128>}, {transform_indices = @transform_2, window_bounds = array<i64: 1, 128>}, {transform_indices = @transform_3, window_bounds = array<i64: 32, 128>}]} {
    %c0 = arith.constant 0 : index
    %c0_0 = arith.constant 0 : index
    %0 = vector.load %arg2[%c0, %c0_0] : memref<32x1152xbf16, #tpu.memory_space<vmem>>, vector<32x1152xbf16>
    %c0_1 = arith.constant 0 : index
    %c0_2 = arith.constant 0 : index
    %1 = vector.load %arg3[%c0_1, %c0_2] : memref<1152x128xbf16, #tpu.memory_space<vmem>>, vector<1152x128xbf16>
    %cst = arith.constant dense<0.000000e+00> : vector<32x128xf32>
    %2 = tpu.matmul %0, %1, %cst {dimension_numbers = #tpu.dot_dimension_numbers<[1], [0], [0], [1], [0, 0, 1, 1], [], []>} : vector<32x1152xbf16>, vector<1152x128xbf16>, vector<32x128xf32> -> vector<32x128xf32>
    %c0_3 = arith.constant 0 : index
    %c0_4 = arith.constant 0 : index
    %3 = vector.load %arg4[%c0_3, %c0_4] : memref<1x128xf32, #tpu.memory_space<vmem>>, vector<1x128xf32>
    %4 = vector.broadcast %3 : vector<1x128xf32> to vector<32x128xf32>
    %5 = arith.addf %2, %4 : vector<32x128xf32>
    %cst_5 = arith.constant 0.000000e+00 : f32
    %6 = vector.broadcast %cst_5 : f32 to vector<32x128xf32>
    %7 = arith.maximumf %5, %6 : vector<32x128xf32>
    %8 = arith.truncf %7 : vector<32x128xf32> to vector<32x128xbf16>
    %c0_6 = arith.constant 0 : index
    %c0_7 = arith.constant 0 : index
    %9 = vector.load %arg5[%c0_6, %c0_7] : memref<32x128xbf16, #tpu.memory_space<vmem>>, vector<32x128xbf16>
    tpu.vector_store %arg5[%c0_6, %c0_7], %8 {strides = array<i32>} : memref<32x128xbf16, #tpu.memory_space<vmem>>, vector<32x128xbf16>,
    return
  }
  func.func @transform_0(%arg0: i32, %arg1: i32) -> (i32, i32) {
    %c0_i32 = arith.constant 0 : i32
    %c0_i32_0 = arith.constant 0 : i32
    return %arg0, %c0_i32 : i32, i32
  }
  func.func @transform_1(%arg0: i32, %arg1: i32) -> (i32, i32) {
    %c0_i32 = arith.constant 0 : i32
    %c0_i32_0 = arith.constant 0 : i32
    return %c0_i32, %arg1 : i32, i32
  }
  func.func @transform_2(%arg0: i32, %arg1: i32) -> (i32, i32) {
    %c0_i32 = arith.constant 0 : i32
    %c0_i32_0 = arith.constant 0 : i32
    return %c0_i32, %arg1 : i32, i32
  }
  func.func @transform_3(%arg0: i32, %arg1: i32) -> (i32, i32) {
    %c0_i32 = arith.constant 0 : i32
    return %arg0, %arg1 : i32, i32
  }
}

module attributes {stable_mosaic.version = 11 : i64} {
  func.func @_gemm_kernel(%arg0: i32, %arg1: i32, %arg2: memref<64x576xbf16, #tpu.memory_space<vmem>>, %arg3: memref<576x128xbf16, #tpu.memory_space<vmem>>, %arg4: memref<1x128xf32, #tpu.memory_space<vmem>>, %arg5: memref<64x128xf32, #tpu.memory_space<vmem>>) attributes {dimension_semantics = [#tpu.dimension_semantics<parallel>, #tpu.dimension_semantics<parallel>], iteration_bounds = array<i64: 2, 1>, scalar_prefetch = 0 : i64, scratch_operands = 0 : i64, tpu.core_type = #tpu.core_type<tc>, window_params = [{transform_indices = @transform_0, window_bounds = array<i64: 64, 576>}, {transform_indices = @transform_1, window_bounds = array<i64: 576, 128>}, {transform_indices = @transform_2, window_bounds = array<i64: 1, 128>}, {transform_indices = @transform_3, window_bounds = array<i64: 64, 128>}]} {
    %c0 = arith.constant 0 : index
    %c0_0 = arith.constant 0 : index
    %0 = vector.load %arg2[%c0, %c0_0] : memref<64x576xbf16, #tpu.memory_space<vmem>>, vector<64x576xbf16>
    %c0_1 = arith.constant 0 : index
    %c0_2 = arith.constant 0 : index
    %1 = vector.load %arg3[%c0_1, %c0_2] : memref<576x128xbf16, #tpu.memory_space<vmem>>, vector<576x128xbf16>
    %cst = arith.constant dense<0.000000e+00> : vector<64x128xf32>
    %2 = tpu.matmul %0, %1, %cst {dimension_numbers = #tpu.dot_dimension_numbers<[1], [0], [0], [1], [0, 0, 1, 1], [], []>} : vector<64x576xbf16>, vector<576x128xbf16>, vector<64x128xf32> -> vector<64x128xf32>
    %c0_3 = arith.constant 0 : index
    %c0_4 = arith.constant 0 : index
    %3 = vector.load %arg4[%c0_3, %c0_4] : memref<1x128xf32, #tpu.memory_space<vmem>>, vector<1x128xf32>
    %4 = vector.broadcast %3 : vector<1x128xf32> to vector<64x128xf32>
    %5 = arith.addf %2, %4 : vector<64x128xf32>
    %6 = math.tanh %5 : vector<64x128xf32>
    %c0_5 = arith.constant 0 : index
    %c0_6 = arith.constant 0 : index
    %7 = vector.load %arg5[%c0_5, %c0_6] : memref<64x128xf32, #tpu.memory_space<vmem>>, vector<64x128xf32>
    tpu.vector_store %arg5[%c0_5, %c0_6], %6 {strides = array<i32>} : memref<64x128xf32, #tpu.memory_space<vmem>>, vector<64x128xf32>,
    return
  }
  func.func @transform_0(%arg0: i32, %arg1: i32) -> (i32, i32) {
    %c0_i32 = arith.constant 0 : i32
    %c0_i32_0 = arith.constant 0 : i32
    return %arg0, %c0_i32 : i32, i32
  }
  func.func @transform_1(%arg0: i32, %arg1: i32) -> (i32, i32) {
    %c0_i32 = arith.constant 0 : i32
    %c0_i32_0 = arith.constant 0 : i32
    return %c0_i32, %arg1 : i32, i32
  }
  func.func @transform_2(%arg0: i32, %arg1: i32) -> (i32, i32) {
    %c0_i32 = arith.constant 0 : i32
    %c0_i32_0 = arith.constant 0 : i32
    return %c0_i32, %arg1 : i32, i32
  }
  func.func @transform_3(%arg0: i32, %arg1: i32) -> (i32, i32) {
    %c0_i32 = arith.constant 0 : i32
    return %arg0, %arg1 : i32, i32
  }
}

</mosaic_0001>

<bundles_post_ra>
// kernel: generator_forward.7
= control target key start
LH: loop header
LB: loop body
LE: loop exit
PB: predicated region body
PF: predicated region fallthrough
CT: control target
= control target key end

     0   :  { %s695_s12 = smov 0   ;;  %s697_s13 = smov 0   ;;  %s749_s0 = inlined_call_operand.vmem [shape: bf16[128,48], index: 0, kind: input, shape index: {}]   ;;  %s750_s1 = inlined_call_operand.vmem [shape: bf16[48,128], index: 1, kind: input, shape index: {}]   ;;  %s751_s2 = inlined_call_operand.vmem [shape: f32[1,128], index: 2, kind: input, shape index: {}]   ;;  %s752_s3 = inlined_call_operand.vmem [shape: bf16[128,128], index: 3, kind: output, shape index: {}]  }
   0x1   :  { %s699_s14 = smov 0  }
   0x2 LB: > { %s25_s15 = sadd.s32 1, %s669_s13  ;;  %p535_p0 = scmp.ge.s32.totalorder %s673_s14, 1  ;;  %s673_s14 = sphi %s699_s14, %s13_s14   ;;  %s669_s13 = sphi %s697_s13, %s754_s13   ;;  %s665_s12 = sphi %s695_s12, %s753_s12  }
   0x3   : > { %p27_p1 = scmp.ge.s32.totalorder %s25_s15, 2  ;;  %p169_p2 = scmp.lt.s32.totalorder %s673_s14, 3 }
   0x5   : > { %s756_s15 = smov (%p27_p1, %s25_s15), 0  ;;  %p170_p3 = pnand %p535_p0, %p169_p2 }
   0x6   : > { %v644_v0 = vld [vmem:[%s750_s1] sm:$0xff] (!%p170_p3)   ;;  %s536_s18 = sshll.u32 (!%p170_p3), %s665_s12, 3  ;;  %v645_v1 = vld [vmem:[%s750_s1 + $0x8] sm:$0xff] (!%p170_p3)   ;;  %v646_v2 = vld [vmem:[%s750_s1 + $0x10] sm:$0xff] (!%p170_p3)   ;;  %vm285_vm0 = vcmask (!%p170_p3), 392192  }
   0x7   : > { %173 = sbr.rel (%p170_p3) target bundleno = 244 (0xf4), region = 32  ;;  %p204_p4 = scmp.lt.s32.totalorder (!%p170_p3), %s536_s18, 15  ;;  %600 = vmatprep.subr.bf16.mxu0 (!%p170_p3), %v644_v0  ;;  %614 = vmatprep.subr.bf16.mxu1 (!%p170_p3), %v644_v0  ;;  %v540_v7 = vld [vmem:[%s751_s2] ss:$0 sm:$0xff] (!%p170_p3) }
   0x8   : > { %601 = vmatpush3.bf16.msra.mxu0 (!%p170_p3), %v644_v0  ;;  %617 = vmatpush3.bf16.msra.mxu1 (!%p170_p3), %v644_v0 }
   0x9   : > { %602 = vmatprep.subr.bf16.mxu0 (!%p170_p3), %v645_v1  ;;  %615 = vmatprep.subr.bf16.mxu1 (!%p170_p3), %v645_v1 }
   0xc   : > { %603 = vmatpush3.bf16.msra.mxu0 (!%p170_p3), %v645_v1  ;;  %618 = vmatpush3.bf16.msra.mxu1 (!%p170_p3), %v645_v1 }
   0xd   : > { %604 = vmatprep.subr.bf16.mxu0 (!%p170_p3), %v646_v2  ;;  %616 = vmatprep.subr.bf16.mxu1 (!%p170_p3), %v646_v2 }
   0xe   : > { %s758_s18 = smov (!%p204_p4, %s536_s18), 15 }
   0xf   : > { %s537_s23 = sshll.u32 %s758_s18, 2 }
  0x10   : > { %s207_s26 = scalar_lea.vmem %s749_s0, %s537_s23  ;;  %605 = vmatpush3.bf16.msra.mxu0 %v646_v2  ;;  %619 = vmatpush3.bf16.msra.mxu1 %v646_v2  ;;  %s223_s4 = scalar_lea.vmem %s752_s3, %s537_s23 }
  0x11   : > { %v647_v3 = vld [vmem:[%s207_s26] sm:$0xff]   ;;  %v648_v4 = vld [vmem:[%s207_s26 + $0x10] sm:$0xff]   ;;  %v649_v5 = vld [vmem:[%s207_s26 + $0x8] sm:$0xff]  }
  0x12   : > { %606 = vmatprep.mubr.msk.bf16.mxu0 %vm285_vm0, %v647_v3  ;;  %610 = vmatprep.mubr.msk.bf16.mxu1 %vm285_vm0, %v648_v4  ;;  %v650_v6 = vld [vmem:[%s207_s26 + $0x18] sm:$0xff]  }
  0x13   : > { %607 = vmatmul.mubr.msk.bf16.vlgmr.msra.gmra.mrb[0].mxu0 %vm285_vm0, %v649_v5  ;;  %611 = vmatmul.mubr.msk.bf16.vlgmr.msra.gmra.mrb[0].mxu1 %vm285_vm0, %v650_v6 }
  0xe6   : > { %v608_v8 = vpop.f32.mrb[0].mxu0  ;;  %v612_v9 = vpop.f32.mrb[0].mxu1 }
  0xe7   : > { %v341_v10 = vadd.f32 %v608_v8, %v540_v7  ;;  %v357_v11 = vadd.f32 %v612_v9, %v540_v7  ;;  %v332_v12 = vpop.f32.mrb[1].mxu0  ;;  %v348_v13 = vpop.f32.mrb[1].mxu1 }
  0xe8   : > { %v333_v14 = vadd.f32 %v540_v7, %v332_v12  ;;  %v349_v15 = vadd.f32 %v540_v7, %v348_v13  ;;  %v609_v16 = vpop.f32.mrb[2].mxu0  ;;  %v613_v17 = vpop.f32.mrb[2].mxu1 }
  0xe9   : > { %vm365_vm1 = vcmp.ge.f32.partialorder %v341_v10, 0.0  ;;  %v373_v18 = vmul.f32 0.2, %v341_v10  ;;  %vm369_vm2 = vcmp.ge.f32.partialorder %v357_v11, 0.0  ;;  %v377_v19 = vmul.f32 0.2, %v357_v11 }
  0xea   : > { %vm363_vm3 = vcmp.ge.f32.partialorder %v333_v14, 0.0  ;;  %v371_v20 = vmul.f32 0.2, %v333_v14  ;;  %vm367_vm4 = vcmp.ge.f32.partialorder %v349_v15, 0.0  ;;  %v375_v21 = vmul.f32 0.2, %v349_v15 }
  0xeb   : > { %v344_v22 = vadd.f32 %v609_v16, %v540_v7  ;;  %v360_v23 = vadd.f32 %v613_v17, %v540_v7  ;;  %v335_v24 = vpop.f32.mrb[3].mxu0  ;;  %v351_v25 = vpop.f32.mrb[3].mxu1  ;;  %v381_v26 = vsel %vm365_vm1, %v341_v10, %v373_v18  ;;  %v385_v27 = vsel %vm369_vm2, %v357_v11, %v377_v19 }
  0xec   : > { %v336_v28 = vadd.f32 %v540_v7, %v335_v24  ;;  %v352_v29 = vadd.f32 %v540_v7, %v351_v25  ;;  %v379_v34 = vsel %vm363_vm3, %v333_v14, %v371_v20  ;;  %v383_v35 = vsel %vm367_vm4, %v349_v15, %v375_v21 }
  0xed   : > { %vm366_vm5 = vcmp.ge.f32.partialorder %v344_v22, 0.0  ;;  %v374_v30 = vmul.f32 0.2, %v344_v22  ;;  %vm370_vm6 = vcmp.ge.f32.partialorder %v360_v23, 0.0  ;;  %v378_v31 = vmul.f32 0.2, %v360_v23 }
  0xee   : > { %vm364_vm7 = vcmp.ge.f32.partialorder %v336_v28, 0.0  ;;  %v372_v32 = vmul.f32 0.2, %v336_v28  ;;  %vm368_vm8 = vcmp.ge.f32.partialorder %v352_v29, 0.0  ;;  %v376_v33 = vmul.f32 0.2, %v352_v29 }
  0xef   : > { %v382_v36 = vsel %vm366_vm5, %v344_v22, %v374_v30  ;;  %v386_v37 = vsel %vm370_vm6, %v360_v23, %v378_v31 }
  0xf0   : > { %v578_v38 = vpack.c.bf16 %v382_v36, %v381_v26  ;;  %v588_v39 = vpack.c.bf16 %v386_v37, %v385_v27  ;;  %v380_v40 = vsel %vm364_vm7, %v336_v28, %v372_v32  ;;  %v384_v41 = vsel %vm368_vm8, %v352_v29, %v376_v33 }
  0xf1   : > { %v573_v42 = vpack.c.bf16 %v380_v40, %v379_v34  ;;  %v583_v43 = vpack.c.bf16 %v384_v41, %v383_v35 }
  0xf2   : > { %590 = vst [vmem:[%s223_s4 + $0x8] sm:$0xff] %v578_v38   ;;  %592 = vst [vmem:[%s223_s4 + $0x18] sm:$0xff] %v588_v39  }
  0xf3   : > { %574 = vst [vmem:[%s223_s4] sm:$0xff] %v573_v42   ;;  %591 = vst [vmem:[%s223_s4 + $0x10] sm:$0xff] %v583_v43  }
  0xf4 PF: > { %s13_s14 = sadd.s32 1, %s673_s14   ;;  %s753_s12 = smov %s669_s13 }
  0xf5   : > { %p10_p5 = scmp.ge.s32.totalorder %s13_s14, 4   ;;  %s754_s13 = smov %s756_s15 }
  0xf7   :  { %12 = sbr.rel (!%p10_p5) target bundleno = 2 (0x2), region = 68 }

// kernel: generator_forward.8
= control target key start
LH: loop header
LB: loop body
LE: loop exit
PB: predicated region body
PF: predicated region fallthrough
CT: control target
= control target key end

     0   :  { %s2343_s12 = smov 0   ;;  %s2345_s13 = smov 0   ;;  %s2788_s0 = inlined_call_operand.vmem [shape: bf16[32,2048], index: 0, kind: input, shape index: {}]   ;;  %s2789_s1 = inlined_call_operand.vmem [shape: bf16[2048,128], index: 1, kind: input, shape index: {}]   ;;  %s2790_s2 = inlined_call_operand.vmem [shape: f32[1,128], index: 2, kind: input, shape index: {}]   ;;  %s2791_s3 = inlined_call_operand.vmem [shape: bf16[32,128], index: 3, kind: output, shape index: {}]  }
   0x1   :  { %s2347_s14 = smov 0  }
   0x2 LB: > { %s25_s15 = sadd.s32 1, %s2317_s13  ;;  %p1808_p0 = scmp.ge.s32.totalorder %s2321_s14, 1  ;;  %s2321_s14 = sphi %s2347_s14, %s13_s14   ;;  %s2317_s13 = sphi %s2345_s13, %s2793_s13   ;;  %s2313_s12 = sphi %s2343_s12, %s2792_s12  }
   0x3   : > { %p27_p1 = scmp.ge.s32.totalorder %s25_s15, 2  ;;  %p170_p2 = scmp.lt.s32.totalorder %s2321_s14, 3 }
   0x5   : > { %s2795_s15 = smov (%p27_p1, %s25_s15), 0  ;;  %p171_p3 = pnand %p1808_p0, %p170_p2 }
   0x6   : > { %v2171_v0 = vld [vmem:[%s2789_s1 + $0x40] sm:$0xff] (!%p171_p3)   ;;  %v2175_v4 = vld [vmem:[%s2789_s1 + $0x48] sm:$0xff] (!%p171_p3)   ;;  %v2179_v8 = vld [vmem:[%s2789_s1 + $0x50] sm:$0xff] (!%p171_p3)   ;;  %s1809_s25 = sshll.u32 (!%p171_p3), %s2313_s12, 1 }
   0x7   : > { %174 = sbr.rel (%p171_p3) target bundleno = 363 (0x16b), region = 32  ;;  %v2172_v1 = vld [vmem:[%s2789_s1 + $0xc0] sm:$0xff] (!%p171_p3)   ;;  %1971 = vmatprep.subr.bf16.mxu0 (!%p171_p3), %v2171_v0  ;;  %v2176_v5 = vld [vmem:[%s2789_s1 + $0xc8] sm:$0xff] (!%p171_p3)   ;;  %v2180_v9 = vld [vmem:[%s2789_s1 + $0xd0] sm:$0xff] (!%p171_p3)   ;;  %p206_p4 = scmp.lt.s32.totalorder (!%p171_p3), %s1809_s25, 3 }
   0x8   : > { %v2173_v2 = vld [vmem:[%s2789_s1] sm:$0xff] (!%p171_p3)   ;;  %1993 = vmatprep.subr.bf16.mxu1 (!%p171_p3), %v2172_v1  ;;  %v2177_v6 = vld [vmem:[%s2789_s1 + $0x8] sm:$0xff] (!%p171_p3)   ;;  %v2181_v10 = vld [vmem:[%s2789_s1 + $0x10] sm:$0xff] (!%p171_p3)  }
   0x9   : > { %v2174_v3 = vld [vmem:[%s2789_s1 + $0x80] sm:$0xff] (!%p171_p3)   ;;  %1972 = vmatpush3.bf16.msra.mxu0 (!%p171_p3), %v2173_v2  ;;  %v2178_v7 = vld [vmem:[%s2789_s1 + $0x88] sm:$0xff] (!%p171_p3)   ;;  %v2182_v11 = vld [vmem:[%s2789_s1 + $0x90] sm:$0xff] (!%p171_p3)  }
   0xa   : > { %1994 = vmatpush3.bf16.msra.mxu1 (!%p171_p3), %v2174_v3  ;;  %1973 = vmatprep.subr.bf16.mxu0 (!%p171_p3), %v2175_v4  ;;  %v2183_v12 = vld [vmem:[%s2789_s1 + $0x58] sm:$0xff] (!%p171_p3)   ;;  %v2187_v16 = vld [vmem:[%s2789_s1 + $0x60] sm:$0xff] (!%p171_p3)   ;;  %v2191_v20 = vld [vmem:[%s2789_s1 + $0x68] sm:$0xff] (!%p171_p3)  }
   0xb   : > { %1995 = vmatprep.subr.bf16.mxu1 (!%p171_p3), %v2176_v5  ;;  %v2184_v13 = vld [vmem:[%s2789_s1 + $0xd8] sm:$0xff] (!%p171_p3)   ;;  %v2188_v17 = vld [vmem:[%s2789_s1 + $0xe0] sm:$0xff] (!%p171_p3)   ;;  %v2192_v21 = vld [vmem:[%s2789_s1 + $0xe8] sm:$0xff] (!%p171_p3)  }
   0xc   : > { %v2185_v14 = vld [vmem:[%s2789_s1 + $0x18] sm:$0xff] (!%p171_p3)   ;;  %v2189_v18 = vld [vmem:[%s2789_s1 + $0x20] sm:$0xff] (!%p171_p3)   ;;  %v2193_v22 = vld [vmem:[%s2789_s1 + $0x28] sm:$0xff] (!%p171_p3)  }
   0xd   : > { %1974 = vmatpush3.bf16.msra.mxu0 (!%p171_p3), %v2177_v6  ;;  %v2186_v15 = vld [vmem:[%s2789_s1 + $0x98] sm:$0xff] (!%p171_p3)   ;;  %v2190_v19 = vld [vmem:[%s2789_s1 + $0xa0] sm:$0xff] (!%p171_p3)   ;;  %v2194_v23 = vld [vmem:[%s2789_s1 + $0xa8] sm:$0xff] (!%p171_p3)  }
   0xe   : > { %1996 = vmatpush3.bf16.msra.mxu1 %v2178_v7  ;;  %1975 = vmatprep.subr.bf16.mxu0 %v2179_v8  ;;  %s2797_s25 = smov (!%p206_p4, %s1809_s25), 3  ;;  %v2195_v24 = vld [vmem:[%s2789_s1 + $0x70] sm:$0xff]   ;;  %v2199_v28 = vld [vmem:[%s2789_s1 + $0x78] sm:$0xff]   ;;  %v2203_v40 = vld [vmem:[%s2789_s1 + $0x140] sm:$0xff]  }
   0xf   : > { %1997 = vmatprep.subr.bf16.mxu1 %v2180_v9  ;;  %v2196_v25 = vld [vmem:[%s2789_s1 + $0xf0] sm:$0xff]   ;;  %s1963_s24 = sshll.u32 %s2797_s25, 6  ;;  %v2200_v29 = vld [vmem:[%s2789_s1 + $0xf8] sm:$0xff]   ;;  %v2204_v41 = vld [vmem:[%s2789_s1 + $0x1c0] sm:$0xff]  }
  0x10   : > { %v2197_v26 = vld [vmem:[%s2789_s1 + $0x30] sm:$0xff]   ;;  %s2460_s12 = scalar_lea.vmem %s2788_s0, %s1963_s24  ;;  %v2201_v30 = vld [vmem:[%s2789_s1 + $0x38] sm:$0xff]   ;;  %v2205_v42 = vld [vmem:[%s2789_s1 + $0x100] sm:$0xff]  }
  0x11   : > { %1976 = vmatpush3.bf16.msra.mxu0 %v2181_v10  ;;  %v2198_v27 = vld [vmem:[%s2789_s1 + $0xb0] sm:$0xff]   ;;  %v2202_v31 = vld [vmem:[%s2789_s1 + $0xb8] sm:$0xff]   ;;  %v229_v32 = vld [vmem:[%s2460_s12] sm:$0xff] }
  0x12   : > { %1998 = vmatpush3.bf16.msra.mxu1 %v2182_v11  ;;  %1977 = vmatprep.subr.bf16.mxu0 %v2183_v12  ;;  %v237_v33 = vld [vmem:[%s2460_s12 + $0x40] sm:$0xff]  ;;  %v230_v34 = vld [vmem:[%s2460_s12 + $0x8] sm:$0xff]  ;;  %v2211_v48 = vld [vmem:[%s2789_s1 + $0x150] sm:$0xff]  }
  0x13   : > { %1999 = vmatprep.subr.bf16.mxu1 %v2184_v13  ;;  %v1815_v35 = vcombine.low %v229_v32, %v237_v33  ;;  %v1816_v36 = vcombine.high %v229_v32, %v237_v33  ;;  %v238_v37 = vld [vmem:[%s2460_s12 + $0x48] sm:$0xff]  ;;  %v2206_v43 = vld [vmem:[%s2789_s1 + $0x180] sm:$0xff]   ;;  %v2212_v49 = vld [vmem:[%s2789_s1 + $0x1d0] sm:$0xff]  }
  0x14   : > { %v1817_v38 = vcombine.low %v230_v34, %v238_v37  ;;  %v1818_v39 = vcombine.high %v230_v34, %v238_v37  ;;  %v2207_v44 = vld [vmem:[%s2789_s1 + $0x148] sm:$0xff]   ;;  %v2213_v50 = vld [vmem:[%s2789_s1 + $0x110] sm:$0xff]   ;;  %v2215_v52 = vld [vmem:[%s2789_s1 + $0x158] sm:$0xff]  }
  0x15   : > { %1978 = vmatpush3.bf16.msra.mxu0 %v2185_v14  ;;  %1388 = vmatprep.mubr.bf16.mxu0 %v1816_v36  ;;  %v2208_v45 = vld [vmem:[%s2789_s1 + $0x1c8] sm:$0xff]   ;;  %v2214_v51 = vld [vmem:[%s2789_s1 + $0x190] sm:$0xff]   ;;  %v2216_v53 = vld [vmem:[%s2789_s1 + $0x1d8] sm:$0xff]  }
  0x16   : > { %2000 = vmatpush3.bf16.msra.mxu1 %v2186_v15  ;;  %1979 = vmatprep.subr.bf16.mxu0 %v2187_v16  ;;  %v2209_v46 = vld [vmem:[%s2789_s1 + $0x108] sm:$0xff]   ;;  %v2217_v54 = vld [vmem:[%s2789_s1 + $0x118] sm:$0xff]   ;;  %v2219_v56 = vld [vmem:[%s2789_s1 + $0x160] sm:$0xff]  }
  0x17   : > { %2001 = vmatprep.subr.bf16.mxu1 %v2188_v17  ;;  %1429 = vmatprep.mubr.bf16.mxu1 %v1818_v39  ;;  %v2210_v47 = vld [vmem:[%s2789_s1 + $0x188] sm:$0xff]   ;;  %v2218_v55 = vld [vmem:[%s2789_s1 + $0x198] sm:$0xff]   ;;  %v2220_v57 = vld [vmem:[%s2789_s1 + $0x1e0] sm:$0xff]  }
  0x18   : > { %v2221_v58 = vld [vmem:[%s2789_s1 + $0x120] sm:$0xff]   ;;  %v2223_v60 = vld [vmem:[%s2789_s1 + $0x168] sm:$0xff]   ;;  %v2227_v0 = vld [vmem:[%s2789_s1 + $0x170] sm:$0xff]  }
  0x19   : > { %1980 = vmatpush3.bf16.msra.mxu0 %v2189_v18  ;;  %v2222_v59 = vld [vmem:[%s2789_s1 + $0x1a0] sm:$0xff]   ;;  %v2224_v61 = vld [vmem:[%s2789_s1 + $0x1e8] sm:$0xff]   ;;  %v2228_v1 = vld [vmem:[%s2789_s1 + $0x1f0] sm:$0xff]  }
  0x1a   : > { %2002 = vmatpush3.bf16.msra.mxu1 %v2190_v19  ;;  %1981 = vmatprep.subr.bf16.mxu0 %v2191_v20  ;;  %v2225_v62 = vld [vmem:[%s2789_s1 + $0x128] sm:$0xff]   ;;  %v2229_v2 = vld [vmem:[%s2789_s1 + $0x130] sm:$0xff]   ;;  %v2231_v4 = vld [vmem:[%s2789_s1 + $0x178] sm:$0xff]  }
  0x1b   : > { %2003 = vmatprep.subr.bf16.mxu1 %v2192_v21  ;;  %v2226_v63 = vld [vmem:[%s2789_s1 + $0x1a8] sm:$0xff]   ;;  %v2230_v3 = vld [vmem:[%s2789_s1 + $0x1b0] sm:$0xff]   ;;  %v2232_v5 = vld [vmem:[%s2789_s1 + $0x1f8] sm:$0xff]  }
  0x1c   : > { %v2233_v6 = vld [vmem:[%s2789_s1 + $0x138] sm:$0xff]   ;;  %v231_v8 = vld [vmem:[%s2460_s12 + $0x10] sm:$0xff]  ;;  %v2235_v16 = vld [vmem:[%s2789_s1 + $0x240] sm:$0xff]  }
  0x1d   : > { %1982 = vmatpush3.bf16.msra.mxu0 %v2193_v22  ;;  %v2234_v7 = vld [vmem:[%s2789_s1 + $0x1b8] sm:$0xff]   ;;  %v239_v9 = vld [vmem:[%s2460_s12 + $0x50] sm:$0xff]  ;;  %v2236_v17 = vld [vmem:[%s2789_s1 + $0x2c0] sm:$0xff]  }
  0x1e   : > { %2004 = vmatpush3.bf16.msra.mxu1 %v2194_v23  ;;  %1983 = vmatprep.subr.bf16.mxu0 %v2195_v24  ;;  %v1819_v10 = vcombine.low %v231_v8, %v239_v9  ;;  %v1820_v11 = vcombine.high %v231_v8, %v239_v9  ;;  %v232_v12 = vld [vmem:[%s2460_s12 + $0x18] sm:$0xff]  ;;  %v2237_v18 = vld [vmem:[%s2789_s1 + $0x200] sm:$0xff]   ;;  %v2239_v20 = vld [vmem:[%s2789_s1 + $0x248] sm:$0xff]  }
  0x1f   : > { %2005 = vmatprep.subr.bf16.mxu1 %v2196_v25  ;;  %v240_v13 = vld [vmem:[%s2460_s12 + $0x58] sm:$0xff]  ;;  %v2238_v19 = vld [vmem:[%s2789_s1 + $0x280] sm:$0xff]   ;;  %v2240_v21 = vld [vmem:[%s2789_s1 + $0x2c8] sm:$0xff]  }
  0x20   : > { %v1821_v14 = vcombine.low %v232_v12, %v240_v13  ;;  %v1822_v15 = vcombine.high %v232_v12, %v240_v13  ;;  %v2241_v22 = vld [vmem:[%s2789_s1 + $0x208] sm:$0xff]   ;;  %v2243_v24 = vld [vmem:[%s2789_s1 + $0x250] sm:$0xff]   ;;  %v2251_v32 = vld [vmem:[%s2789_s1 + $0x260] sm:$0xff]  }
  0x21   : > { %1984 = vmatpush3.bf16.msra.mxu0 %v2197_v26  ;;  %v2242_v23 = vld [vmem:[%s2789_s1 + $0x288] sm:$0xff]   ;;  %v2244_v25 = vld [vmem:[%s2789_s1 + $0x2d0] sm:$0xff]   ;;  %v2252_v33 = vld [vmem:[%s2789_s1 + $0x2e0] sm:$0xff]  }
  0x22   : > { %2006 = vmatpush3.bf16.msra.mxu1 %v2198_v27  ;;  %1985 = vmatprep.subr.bf16.mxu0 %v2199_v28  ;;  %v2245_v26 = vld [vmem:[%s2789_s1 + $0x210] sm:$0xff]   ;;  %v2247_v28 = vld [vmem:[%s2789_s1 + $0x258] sm:$0xff]   ;;  %v2253_v34 = vld [vmem:[%s2789_s1 + $0x220] sm:$0xff]  }
  0x23   : > { %2007 = vmatprep.subr.bf16.mxu1 %v2200_v29  ;;  %v2246_v27 = vld [vmem:[%s2789_s1 + $0x290] sm:$0xff]   ;;  %v2248_v29 = vld [vmem:[%s2789_s1 + $0x2d8] sm:$0xff]   ;;  %v2255_v36 = vld [vmem:[%s2789_s1 + $0x268] sm:$0xff]  }
  0x24   : > { %v2256_v37 = vld [vmem:[%s2789_s1 + $0x2e8] sm:$0xff]   ;;  %v2283_v8 = vld [vmem:[%s2789_s1 + $0x360] sm:$0xff]  }
  0x25   : > { %1986 = vmatpush3.bf16.msra.mxu0 %v2201_v30  ;;  %v2249_v30 = vld [vmem:[%s2789_s1 + $0x218] sm:$0xff]   ;;  %v2258_v39 = vld [vmem:[%s2789_s1 + $0x2a8] sm:$0xff]   ;;  %v2284_v9 = vld [vmem:[%s2789_s1 + $0x3e0] sm:$0xff]  }
  0x26   : > { %2008 = vmatpush3.bf16.msra.mxu1 %v2202_v31  ;;  %2015 = vmatprep.subr.bf16.mxu0 %v2203_v40  ;;  %v2250_v31 = vld [vmem:[%s2789_s1 + $0x298] sm:$0xff]   ;;  %v2259_v40 = vld [vmem:[%s2789_s1 + $0x270] sm:$0xff]   ;;  %v2287_v12 = vld [vmem:[%s2789_s1 + $0x368] sm:$0xff]  }
  0x27   : > { %2037 = vmatprep.subr.bf16.mxu1 %v2204_v41  ;;  %v2260_v41 = vld [vmem:[%s2789_s1 + $0x2f0] sm:$0xff]   ;;  %v2288_v13 = vld [vmem:[%s2789_s1 + $0x3e8] sm:$0xff]  }
  0x28   : > { %1389 = vmatmul.mubr.bf16.vlgmr.msra.gmra.mrb[0].mxu0 %v1815_v35  ;;  %v2254_v35 = vld [vmem:[%s2789_s1 + $0x2a0] sm:$0xff]  }
  0x29   : > { %1430 = vmatmul.mubr.bf16.vlgmr.msra.gmra.mrb[0].mxu1 %v1817_v38  ;;  %2016 = vmatpush3.bf16.msra.mxu0 %v2205_v42  ;;  %v2257_v38 = vld [vmem:[%s2789_s1 + $0x228] sm:$0xff]   ;;  %v2261_v42 = vld [vmem:[%s2789_s1 + $0x230] sm:$0xff]  }
  0x2a   : > { %2038 = vmatpush3.bf16.msra.mxu1 %v2206_v43  ;;  %2017 = vmatprep.subr.bf16.mxu0 %v2207_v44  ;;  %v2262_v43 = vld [vmem:[%s2789_s1 + $0x2b0] sm:$0xff]   ;;  %v2263_v44 = vld [vmem:[%s2789_s1 + $0x278] sm:$0xff]  }
  0x2b   : > { %2039 = vmatprep.subr.bf16.mxu1 %v2208_v45  ;;  %1470 = vmatprep.mubr.bf16.mxu0 %v1820_v11  ;;  %v2264_v45 = vld [vmem:[%s2789_s1 + $0x2f8] sm:$0xff]   ;;  %v2286_v11 = vld [vmem:[%s2789_s1 + $0x3a0] sm:$0xff]  }
  0x2c   : > { %1511 = vmatprep.mubr.bf16.mxu1 %v1822_v15  ;;  %v2290_v15 = vld [vmem:[%s2789_s1 + $0x3a8] sm:$0xff]  }
  0x2d   : > { %2018 = vmatpush3.bf16.msra.mxu0 %v2209_v46  ;;  %v2265_v46 = vld [vmem:[%s2789_s1 + $0x238] sm:$0xff]  }
  0x2e   : > { %2040 = vmatpush3.bf16.msra.mxu1 %v2210_v47  ;;  %2019 = vmatprep.subr.bf16.mxu0 %v2211_v48  ;;  %v2266_v47 = vld [vmem:[%s2789_s1 + $0x2b8] sm:$0xff]   ;;  %v233_v48 = vld [vmem:[%s2460_s12 + $0x20] sm:$0xff] }
  0x2f   : > { %2041 = vmatprep.subr.bf16.mxu1 %v2212_v49  ;;  %v241_v49 = vld [vmem:[%s2460_s12 + $0x60] sm:$0xff] }
  0x31   : > { %2020 = vmatpush3.bf16.msra.mxu0 %v2213_v50  ;;  %v234_v50 = vld [vmem:[%s2460_s12 + $0x28] sm:$0xff] }
  0x32   : > { %2042 = vmatpush3.bf16.msra.mxu1 %v2214_v51  ;;  %2021 = vmatprep.subr.bf16.mxu0 %v2215_v52  ;;  %v242_v51 = vld [vmem:[%s2460_s12 + $0x68] sm:$0xff]  ;;  %v1823_v52 = vcombine.low %v233_v48, %v241_v49 }
  0x33   : > { %2043 = vmatprep.subr.bf16.mxu1 %v2216_v53  ;;  %v1824_v53 = vcombine.high %v233_v48, %v241_v49 }
  0x35   : > { %2022 = vmatpush3.bf16.msra.mxu0 %v2217_v54  ;;  %v1825_v54 = vcombine.low %v234_v50, %v242_v51 }
  0x36   : > { %2044 = vmatpush3.bf16.msra.mxu1 %v2218_v55  ;;  %2023 = vmatprep.subr.bf16.mxu0 %v2219_v56  ;;  %v1826_v55 = vcombine.high %v234_v50, %v242_v51  ;;  %v2267_v56 = vld [vmem:[%s2789_s1 + $0x340] sm:$0xff]  }
  0x37   : > { %2045 = vmatprep.subr.bf16.mxu1 %v2220_v57  ;;  %v2268_v57 = vld [vmem:[%s2789_s1 + $0x3c0] sm:$0xff]  }
  0x39   : > { %2024 = vmatpush3.bf16.msra.mxu0 %v2221_v58  ;;  %v2269_v58 = vld [vmem:[%s2789_s1 + $0x300] sm:$0xff]  }
  0x3a   : > { %2046 = vmatpush3.bf16.msra.mxu1 %v2222_v59  ;;  %2025 = vmatprep.subr.bf16.mxu0 %v2223_v60  ;;  %v2270_v59 = vld [vmem:[%s2789_s1 + $0x380] sm:$0xff]   ;;  %v2271_v60 = vld [vmem:[%s2789_s1 + $0x348] sm:$0xff]  }
  0x3b   : > { %2047 = vmatprep.subr.bf16.mxu1 %v2224_v61  ;;  %v2272_v61 = vld [vmem:[%s2789_s1 + $0x3c8] sm:$0xff]  }
  0x3d   : > { %2026 = vmatpush3.bf16.msra.mxu0 %v2225_v62  ;;  %v2273_v62 = vld [vmem:[%s2789_s1 + $0x308] sm:$0xff]  }
  0x3e   : > { %2048 = vmatpush3.bf16.msra.mxu1 %v2226_v63  ;;  %2027 = vmatprep.subr.bf16.mxu0 %v2227_v0  ;;  %v2274_v63 = vld [vmem:[%s2789_s1 + $0x388] sm:$0xff]   ;;  %v2275_v0 = vld [vmem:[%s2789_s1 + $0x350] sm:$0xff]  }
  0x3f   : > { %2049 = vmatprep.subr.bf16.mxu1 %v2228_v1  ;;  %v2276_v1 = vld [vmem:[%s2789_s1 + $0x3d0] sm:$0xff]  }
  0x41   : > { %2028 = vmatpush3.bf16.msra.mxu0 %v2229_v2  ;;  %v2277_v2 = vld [vmem:[%s2789_s1 + $0x310] sm:$0xff]  }
  0x42   : > { %2050 = vmatpush3.bf16.msra.mxu1 %v2230_v3  ;;  %2029 = vmatprep.subr.bf16.mxu0 %v2231_v4  ;;  %v2278_v3 = vld [vmem:[%s2789_s1 + $0x390] sm:$0xff]   ;;  %v2279_v4 = vld [vmem:[%s2789_s1 + $0x358] sm:$0xff]  }
  0x43   : > { %2051 = vmatprep.subr.bf16.mxu1 %v2232_v5  ;;  %v2280_v5 = vld [vmem:[%s2789_s1 + $0x3d8] sm:$0xff]  }
  0x45   : > { %2030 = vmatpush3.bf16.msra.mxu0 %v2233_v6  ;;  %v2281_v6 = vld [vmem:[%s2789_s1 + $0x318] sm:$0xff]  }
  0x46   : > { %2052 = vmatpush3.bf16.msra.mxu1 %v2234_v7  ;;  %2059 = vmatprep.subr.bf16.mxu0 %v2235_v16  ;;  %v2282_v7 = vld [vmem:[%s2789_s1 + $0x398] sm:$0xff]   ;;  %v2291_v16 = vld [vmem:[%s2789_s1 + $0x370] sm:$0xff]  }
  0x47   : > { %2081 = vmatprep.subr.bf16.mxu1 %v2236_v17  ;;  %v2292_v17 = vld [vmem:[%s2789_s1 + $0x3f0] sm:$0xff]  }
  0x48   : > { %1471 = vmatmul.mubr.bf16.vlgmr.msra.gmra.mrb[4].mxu0 %v1819_v10  ;;  %v2285_v10 = vld [vmem:[%s2789_s1 + $0x320] sm:$0xff]  }
  0x49   : > { %1512 = vmatmul.mubr.bf16.vlgmr.msra.gmra.mrb[4].mxu1 %v1821_v14  ;;  %2060 = vmatpush3.bf16.msra.mxu0 %v2237_v18  ;;  %v2289_v14 = vld [vmem:[%s2789_s1 + $0x328] sm:$0xff]   ;;  %v2293_v18 = vld [vmem:[%s2789_s1 + $0x330] sm:$0xff]  }
  0x4a   : > { %2082 = vmatpush3.bf16.msra.mxu1 %v2238_v19  ;;  %2061 = vmatprep.subr.bf16.mxu0 %v2239_v20  ;;  %v2294_v19 = vld [vmem:[%s2789_s1 + $0x3b0] sm:$0xff]   ;;  %v2295_v20 = vld [vmem:[%s2789_s1 + $0x378] sm:$0xff]  }
  0x4b   : > { %2083 = vmatprep.subr.bf16.mxu1 %v2240_v21  ;;  %1552 = vmatprep.mubr.bf16.mxu0 %v1824_v53  ;;  %v2296_v21 = vld [vmem:[%s2789_s1 + $0x3f8] sm:$0xff]  }
  0x4c   : > { %1593 = vmatprep.mubr.bf16.mxu1 %v1826_v55 }
  0x4d   : > { %2062 = vmatpush3.bf16.msra.mxu0 %v2241_v22  ;;  %v2297_v22 = vld [vmem:[%s2789_s1 + $0x338] sm:$0xff]  }
  0x4e   : > { %2084 = vmatpush3.bf16.msra.mxu1 %v2242_v23  ;;  %2063 = vmatprep.subr.bf16.mxu0 %v2243_v24  ;;  %v2298_v23 = vld [vmem:[%s2789_s1 + $0x3b8] sm:$0xff]   ;;  %v235_v24 = vld [vmem:[%s2460_s12 + $0x30] sm:$0xff] }
  0x4f   : > { %2085 = vmatprep.subr.bf16.mxu1 %v2244_v25  ;;  %v243_v25 = vld [vmem:[%s2460_s12 + $0x70] sm:$0xff] }
  0x51   : > { %2064 = vmatpush3.bf16.msra.mxu0 %v2245_v26  ;;  %v236_v26 = vld [vmem:[%s2460_s12 + $0x38] sm:$0xff] }
  0x52   : > { %2086 = vmatpush3.bf16.msra.mxu1 %v2246_v27  ;;  %2065 = vmatprep.subr.bf16.mxu0 %v2247_v28  ;;  %v1827_v27 = vcombine.low %v235_v24, %v243_v25  ;;  %v1828_v28 = vcombine.high %v235_v24, %v243_v25 }
  0x53   : > { %2087 = vmatprep.subr.bf16.mxu1 %v2248_v29  ;;  %v244_v29 = vld [vmem:[%s2460_s12 + $0x78] sm:$0xff]  ;;  %s1813_s12 = sshll.u32 %s2797_s25, 2 }
  0x54   : > { %s226_s9 = scalar_lea.vmem %s2791_s3, %s1813_s12 }
  0x55   : > { %2066 = vmatpush3.bf16.msra.mxu0 %v2249_v30  ;;  %v1829_v30 = vcombine.low %v236_v26, %v244_v29 }
  0x56   : > { %2088 = vmatpush3.bf16.msra.mxu1 %v2250_v31  ;;  %2067 = vmatprep.subr.bf16.mxu0 %v2251_v32  ;;  %v1830_v31 = vcombine.high %v236_v26, %v244_v29 }
  0x57   : > { %2089 = vmatprep.subr.bf16.mxu1 %v2252_v33 }
  0x59   : > { %2068 = vmatpush3.bf16.msra.mxu0 %v2253_v34  ;;  %v1814_v34 = vld [vmem:[%s2790_s2] ss:$0 sm:$0xff] }
  0x5a   : > { %2090 = vmatpush3.bf16.msra.mxu1 %v2254_v35  ;;  %2069 = vmatprep.subr.bf16.mxu0 %v2255_v36 }
  0x5b   : > { %2091 = vmatprep.subr.bf16.mxu1 %v2256_v37 }
  0x5d   : > { %2070 = vmatpush3.bf16.msra.mxu0 %v2257_v38 }
  0x5e   : > { %2092 = vmatpush3.bf16.msra.mxu1 %v2258_v39  ;;  %2071 = vmatprep.subr.bf16.mxu0 %v2259_v40 }
  0x5f   : > { %2093 = vmatprep.subr.bf16.mxu1 %v2260_v41 }
  0x61   : > { %2072 = vmatpush3.bf16.msra.mxu0 %v2261_v42 }
  0x62   : > { %2094 = vmatpush3.bf16.msra.mxu1 %v2262_v43  ;;  %2073 = vmatprep.subr.bf16.mxu0 %v2263_v44 }
  0x63   : > { %2095 = vmatprep.subr.bf16.mxu1 %v2264_v45 }
  0x65   : > { %2074 = vmatpush3.bf16.msra.mxu0 %v2265_v46 }
  0x66   : > { %2096 = vmatpush3.bf16.msra.mxu1 %v2266_v47  ;;  %2103 = vmatprep.subr.bf16.mxu0 %v2267_v56 }
  0x67   : > { %2125 = vmatprep.subr.bf16.mxu1 %v2268_v57 }
  0x68   : > { %1553 = vmatmul.mubr.bf16.vlgmr.msra.gmra.mrb[8].mxu0 %v1823_v52 }
  0x69   : > { %1594 = vmatmul.mubr.bf16.vlgmr.msra.gmra.mrb[8].mxu1 %v1825_v54  ;;  %2104 = vmatpush3.bf16.msra.mxu0 %v2269_v58 }
  0x6a   : > { %2126 = vmatpush3.bf16.msra.mxu1 %v2270_v59  ;;  %2105 = vmatprep.subr.bf16.mxu0 %v2271_v60 }
  0x6b   : > { %2127 = vmatprep.subr.bf16.mxu1 %v2272_v61  ;;  %1634 = vmatprep.mubr.bf16.mxu0 %v1828_v28 }
  0x6c   : > { %1675 = vmatprep.mubr.bf16.mxu1 %v1830_v31 }
  0x6d   : > { %2106 = vmatpush3.bf16.msra.mxu0 %v2273_v62 }
  0x6e   : > { %2128 = vmatpush3.bf16.msra.mxu1 %v2274_v63  ;;  %2107 = vmatprep.subr.bf16.mxu0 %v2275_v0 }
  0x6f   : > { %2129 = vmatprep.subr.bf16.mxu1 %v2276_v1 }
  0x71   : > { %2108 = vmatpush3.bf16.msra.mxu0 %v2277_v2 }
  0x72   : > { %2130 = vmatpush3.bf16.msra.mxu1 %v2278_v3  ;;  %2109 = vmatprep.subr.bf16.mxu0 %v2279_v4 }
  0x73   : > { %2131 = vmatprep.subr.bf16.mxu1 %v2280_v5 }
  0x75   : > { %2110 = vmatpush3.bf16.msra.mxu0 %v2281_v6 }
  0x76   : > { %2132 = vmatpush3.bf16.msra.mxu1 %v2282_v7  ;;  %2111 = vmatprep.subr.bf16.mxu0 %v2283_v8 }
  0x77   : > { %2133 = vmatprep.subr.bf16.mxu1 %v2284_v9 }
  0x79   : > { %2112 = vmatpush3.bf16.msra.mxu0 %v2285_v10 }
  0x7a   : > { %2134 = vmatpush3.bf16.msra.mxu1 %v2286_v11  ;;  %2113 = vmatprep.subr.bf16.mxu0 %v2287_v12 }
  0x7b   : > { %2135 = vmatprep.subr.bf16.mxu1 %v2288_v13 }
  0x7d   : > { %2114 = vmatpush3.bf16.msra.mxu0 %v2289_v14 }
  0x7e   : > { %2136 = vmatpush3.bf16.msra.mxu1 %v2290_v15  ;;  %2115 = vmatprep.subr.bf16.mxu0 %v2291_v16 }
  0x7f   : > { %2137 = vmatprep.subr.bf16.mxu1 %v2292_v17 }
  0x81   : > { %2116 = vmatpush3.bf16.msra.mxu0 %v2293_v18 }
  0x82   : > { %2138 = vmatpush3.bf16.msra.mxu1 %v2294_v19  ;;  %2117 = vmatprep.subr.bf16.mxu0 %v2295_v20 }
  0x83   : > { %2139 = vmatprep.subr.bf16.mxu1 %v2296_v21 }
  0x85   : > { %2118 = vmatpush3.bf16.msra.mxu0 %v2297_v22 }
  0x86   : > { %2140 = vmatpush3.bf16.msra.mxu1 %v2298_v23 }
  0x88   : > { %1635 = vmatmul.mubr.bf16.vlgmr.msra.gmra.mrb[12].mxu0 %v1827_v27 }
  0x89   : > { %1676 = vmatmul.mubr.bf16.vlgmr.msra.gmra.mrb[12].mxu1 %v1829_v30 }
  0xfb   : > { %v1987_v32 = vpop.f32.mrb[0].mxu0 }
  0xfc   : > { %v2009_v33 = vpop.f32.mrb[0].mxu1  ;;  %v1988_v35 = vpop.f32.mrb[1].mxu0 }
  0xfd   : > { %v1989_v36 = vadd.f32 %v1988_v35, %v1987_v32  ;;  %v2010_v37 = vpop.f32.mrb[1].mxu1  ;;  %v1990_v38 = vpop.f32.mrb[2].mxu0 }
  0xfe   : > { %v2011_v39 = vadd.f32 %v2010_v37, %v2009_v33  ;;  %v2012_v40 = vpop.f32.mrb[2].mxu1  ;;  %v1991_v41 = vpop.f32.mrb[3].mxu0 }
  0xff   : > { %v1391_v42 = vadd.f32 %v1989_v36, %v1814_v34  ;;  %v1992_v43 = vadd.f32 %v1991_v41, %v1990_v38  ;;  %v2013_v44 = vpop.f32.mrb[3].mxu1 }
 0x100   : > { %v2014_v45 = vadd.f32 %v2013_v44, %v2012_v40 }
 0x101   : > { %v1432_v46 = vadd.f32 %v2011_v39, %v1391_v42  ;;  %v1394_v47 = vadd.f32 %v1992_v43, %v1814_v34 }
 0x103   : > { %v1435_v48 = vadd.f32 %v2014_v45, %v1394_v47 }
 0x11b   : > { %v2031_v49 = vpop.f32.mrb[4].mxu0 }
 0x11c   : > { %v2053_v50 = vpop.f32.mrb[4].mxu1  ;;  %v2032_v51 = vpop.f32.mrb[5].mxu0 }
 0x11d   : > { %v2033_v52 = vadd.f32 %v2032_v51, %v2031_v49  ;;  %v2054_v53 = vpop.f32.mrb[5].mxu1  ;;  %v2034_v54 = vpop.f32.mrb[6].mxu0 }
 0x11e   : > { %v2055_v55 = vadd.f32 %v2054_v53, %v2053_v50  ;;  %v2056_v56 = vpop.f32.mrb[6].mxu1  ;;  %v2035_v57 = vpop.f32.mrb[7].mxu0 }
 0x11f   : > { %v1473_v58 = vadd.f32 %v2033_v52, %v1432_v46  ;;  %v2036_v59 = vadd.f32 %v2035_v57, %v2034_v54  ;;  %v2057_v60 = vpop.f32.mrb[7].mxu1 }
 0x120   : > { %v2058_v61 = vadd.f32 %v2057_v60, %v2056_v56 }
 0x121   : > { %v1514_v62 = vadd.f32 %v2055_v55, %v1473_v58  ;;  %v1476_v63 = vadd.f32 %v2036_v59, %v1435_v48 }
 0x123   : > { %v1517_v0 = vadd.f32 %v2058_v61, %v1476_v63 }
 0x13b   : > { %v2075_v1 = vpop.f32.mrb[8].mxu0 }
 0x13c   : > { %v2097_v2 = vpop.f32.mrb[8].mxu1  ;;  %v2076_v3 = vpop.f32.mrb[9].mxu0 }
 0x13d   : > { %v2098_v4 = vpop.f32.mrb[9].mxu1  ;;  %v2077_v5 = vadd.f32 %v2076_v3, %v2075_v1  ;;  %v2078_v7 = vpop.f32.mrb[10].mxu0 }
 0x13e   : > { %v2099_v6 = vadd.f32 %v2098_v4, %v2097_v2  ;;  %v2100_v8 = vpop.f32.mrb[10].mxu1  ;;  %v2079_v9 = vpop.f32.mrb[11].mxu0 }
 0x13f   : > { %v2101_v10 = vpop.f32.mrb[11].mxu1  ;;  %v1555_v11 = vadd.f32 %v2077_v5, %v1514_v62  ;;  %v2080_v12 = vadd.f32 %v2079_v9, %v2078_v7 }
 0x140   : > { %v2102_v13 = vadd.f32 %v2101_v10, %v2100_v8 }
 0x141   : > { %v1596_v14 = vadd.f32 %v2099_v6, %v1555_v11  ;;  %v1558_v15 = vadd.f32 %v2080_v12, %v1517_v0 }
 0x143   : > { %v1599_v16 = vadd.f32 %v2102_v13, %v1558_v15 }
 0x15b   : > { %v2119_v17 = vpop.f32.mrb[12].mxu0 }
 0x15c   : > { %v2141_v18 = vpop.f32.mrb[12].mxu1  ;;  %v2120_v19 = vpop.f32.mrb[13].mxu0 }
 0x15d   : > { %v2121_v20 = vadd.f32 %v2120_v19, %v2119_v17  ;;  %v2142_v21 = vpop.f32.mrb[13].mxu1  ;;  %v2122_v22 = vpop.f32.mrb[14].mxu0 }
 0x15e   : > { %v2143_v23 = vadd.f32 %v2142_v21, %v2141_v18  ;;  %v2144_v24 = vpop.f32.mrb[14].mxu1  ;;  %v2123_v25 = vpop.f32.mrb[15].mxu0 }
 0x15f   : > { %v1637_v26 = vadd.f32 %v2121_v20, %v1596_v14  ;;  %v2124_v27 = vadd.f32 %v2123_v25, %v2122_v22  ;;  %v2145_v28 = vpop.f32.mrb[15].mxu1 }
 0x160   : > { %v2146_v29 = vadd.f32 %v2145_v28, %v2144_v24 }
 0x161   : > { %v1678_v30 = vadd.f32 %v2143_v23, %v1637_v26  ;;  %v1640_v31 = vadd.f32 %v2124_v27, %v1599_v16 }
 0x163   : > { %v1686_v32 = vmul.f32 0.2, %v1678_v30  ;;  %v1681_v33 = vadd.f32 %v2146_v29, %v1640_v31  ;;  %vm1684_vm0 = vcmp.ge.f32.partialorder %v1678_v30, 0.0 }
 0x165   : > { %vm1685_vm1 = vcmp.ge.f32.partialorder %v1681_v33, 0.0  ;;  %v1687_v34 = vmul.f32 0.2, %v1681_v33  ;;  %v1688_v35 = vsel %vm1684_vm0, %v1678_v30, %v1686_v32 }
 0x167   : > { %v1689_v36 = vsel %vm1685_vm1, %v1681_v33, %v1687_v34 }
 0x168   : > { %v1969_v37 = vpack.c.bf16 %v1689_v36, %v1688_v35 }
 0x16a   : > { %1970 = vst [vmem:[%s226_s9] sm:$0xff] %v1969_v37  }
 0x16b PF: > { %s13_s14 = sadd.s32 1, %s2321_s14   ;;  %s2792_s12 = smov %s2317_s13 }
 0x16c   : > { %p10_p5 = scmp.ge.s32.totalorder %s13_s14, 4   ;;  %s2793_s13 = smov %s2795_s15 }
 0x16e   :  { %12 = sbr.rel (!%p10_p5) target bundleno = 2 (0x2), region = 68 }

// kernel: generator_forward.9
= control target key start
LH: loop header
LB: loop body
LE: loop exit
PB: predicated region body
PF: predicated region fallthrough
CT: control target
= control target key end

     0   :  { %8 = vsyncpa [#allocation3], 0  ;;  %s2706_s0 = inlined_call_operand.vmem [shape: bf16[8,2048], index: 0, kind: input, shape index: {}]   ;;  %s2707_s1 = inlined_call_operand.hbm [shape: bf16[2048,256], index: 1, kind: input, shape index: {}]   ;;  %s2708_s2 = inlined_call_operand.vmem [shape: f32[1,256], index: 2, kind: input, shape index: {}]   ;;  %s2709_s3 = inlined_call_operand.vmem [shape: bf16[8,256], index: 3, kind: output, shape index: {}]  }
   0x1   :  { %10 = vsyncpa [#allocation3 + $0x1], 0  ;;  %s2419_s12 = smov 0   ;;  %s2421_s13 = smov 0  }
   0x2   :  { %s2423_s14 = smov 0   ;;  %s2425_s15 = smov 0  }
   0x3   :  { %s2427_s16 = smov 0   ;;  %s2429_s17 = smov 0  }
   0x4 LB: > { %s1778_s18 = sadd.s32 4294967295, %s2393_s17   ;;  %s25_s19 = sadd.s32 1, %s2389_s16  ;;  %s2393_s17 = sphi %s2429_s17, %s16_s17   ;;  %s2389_s16 = sphi %s2427_s16, %s2718_s16   ;;  %s2385_s15 = sphi %s2425_s15, %s2717_s15   ;;  %s2381_s14 = sphi %s2423_s14, %s2716_s14   ;;  %s2377_s13 = sphi %s2421_s13, %s2715_s13   ;;  %s2373_s12 = sphi %s2419_s12, %s2714_s12  }
   0x5   : > { %p26_p0 = scmp.ge.s32.totalorder %s25_s19, 2  ;;  %s61_s20 = sadd.s32 1, %s2381_s14 }
   0x6   : > { %p68_p1 = scmp.ne.s32.totalorder %s2381_s14, %s2377_s13  ;;  %p69_p2 = scmp.eq.s32.totalorder %s2393_s17, 0 }
   0x7   : > { %s2720_s19 = smov (%p26_p0, %s25_s19), 0  ;;  %p74_p4 = scmp.ne.s32.totalorder %s2377_s13, %s2373_s12 }
   0x8   : > { %p2455_p3 = por %p69_p2, %p68_p1  ;;  %s58_s22 = ssub.s32 %s2389_s16, %s2720_s19 }
   0x9   : > { %p75_p5 = scmp.eq.s32.totalorder %s1778_s18, 0  ;;  %p59_p6 = scmp.eq.s32.totalorder %s58_s22, 0 }
   0xa   : > { %p2117_p8 = scmp.lt.s32.totalorder %s2393_s17, 2  ;;  %s160_s25 = sand.u32 1, %s2381_s14  }
   0xb   : > { %p2462_p7 = por %p75_p5, %p74_p4  ;;  %s1784_s26 = sshll.u32 %s2389_s16, 6 }
   0xc   : > { %s2468_s24 = scalar_select %p59_p6, %s2381_s14, %s61_s20  }
   0xd   : > { %s1783_s27 = sshll.u32 %s160_s25, 10  ;;  %s2475_s30 = scalar_lea.hbm %s2707_s1, %s1784_s26 }
   0xe   : > { %s164_s4 = scalar_lea.vmem [#allocation2], %s1783_s27  ;;  %p2479_p9 = pnand %p2117_p8, %p2455_p3 }
   0xf   : > { %s170_s5 = sshll.u32 %s164_s4, 4  ;;  %s2486_s7 = scalar_lea.sflag [#allocation3], %s160_s25  ;;  %s2483_s5 = int_to_ptr.vmem [resolvable:$true] %s170_s5 }
  0x10   : > { %s2313_s8 = scalar_lea.hbm %s2475_s30, 16384  ;;  %p2315_p12 = pneg %p2479_p9 }
  0x11   : > { %p2314_p11 = scmp.ne.s32.totalorder %s2475_s30, %s2313_s8  ;;  %s2318_s11 = scalar_lea.hbm %s2707_s1, 32768 }
  0x12   : > { %p2319_p1 = scmp.lt.u32.totalorder %s2475_s30, %s2707_s1  ;;  %p2320_p2 = scmp.lt.u32.totalorder %s2318_s11, %s2313_s8 }
  0x13   : > { %p2316_p13 = pnand %p2315_p12, %p2314_p11  ;;  %p2322_p4 = scmp.lt.u32.totalorder %s2313_s8, %s2475_s30 }
  0x14   : > { %p2321_p3 = por %p2320_p2, %p2319_p1 }
  0x15   : > { %p2317_p0 = pneg %p2316_p13 }
  0x16   : > { %p2323_p5 = por %p2322_p4, %p2321_p3 }
  0x18   : > { %p2324_p6 = pnand %p2323_p5, %p2317_p0 }
  0x1a   : > { %2327 = shalt.err (!%p2324_p6)
}
  0x1b   : > { %s2328_s20 = scalar_lea.vmem %s2483_s5, 16384  ;;  %s2395_s21 = smov [#allocation2]  }
  0x1c   : > { %p2329_p8 = scmp.ne.s32.totalorder %s2483_s5, %s2328_s20  ;;  %s2333_s22 = sshll.u32 %s2395_s21, 4  ;;  %s2334_s22 = int_to_ptr.vmem [resolvable:$false] %s2333_s22 }
  0x1d   : > { %s2335_s25 = scalar_lea.vmem %s2334_s22, 32768  ;;  %p2336_p10 = scmp.lt.s32.totalorder %s2483_s5, %s2334_s22 }
  0x1e   : > { %p2331_p11 = pnand %p2329_p8, %p2315_p12  ;;  %p2337_p1 = scmp.lt.s32.totalorder %s2335_s25, %s2328_s20 }
  0x20   : > { %p2332_p13 = pneg %p2331_p11  ;;  %p2338_p2 = por %p2337_p1, %p2336_p10 }
  0x22   : > { %p2339_p3 = pnand %p2338_p2, %p2332_p13 }
  0x24   : > { %2342 = shalt.err (!%p2339_p3)
}
  0x25   : > { %s2396_s26 = smov 128   ;;  %s2397_s27 = smov 64  }
  0x26   : > { %s2398_s28 = smov 4   ;;  %p184_p12 = scmp.lt.s32.totalorder %s2393_s17, 3 }
  0x27   : > { %2116 = dma.hbm_to_vmem [thread:$0]  (!%p2479_p9), %s2475_s30, 16384, %s2483_s5, %s2486_s7, %s2396_s26, %s2397_s27, %s2398_s28  }
  0x28   : > { %p2713_p0 = scmp.ge.s32.totalorder %s2393_s17, 1 }
  0x2a   : > { %p185_p4 = pnand %p2713_p0, %p184_p12 }
  0x2b   : > { %s190_s29 = sand.u32 (!%p185_p4), 1, %s2377_s13  }
  0x2c   : > { %188 = sbr.rel (%p185_p4) target bundleno = 407 (0x197), region = 32  ;;  %s1786_s4 = sshll.u32 (!%p185_p4), %s190_s29, 10 }
  0x2d   : > { %s191_s8 = scalar_lea.sflag (!%p185_p4), [#allocation3], %s190_s29  ;;  %s2518_s9 = scalar_lea.vmem (!%p185_p4), [#allocation2], %s1786_s4 }
  0x33   : > { %2368 = dma.done.wait (%p2462_p7), %s191_s8, 16384  }
  0x34   : > { %2370 = vsyncadd (%p2462_p7), %s191_s8, 4294950912  ;;  %v2169_v0 = vld [vmem:[%s2518_s9 + $0x40] sm:$0xff]   ;;  %v2173_v4 = vld [vmem:[%s2518_s9 + $0x48] sm:$0xff]   ;;  %p233_p7 = scmp.lt.s32.totalorder %s2385_s15, 1 }
  0x35   : > { %v2170_v1 = vld [vmem:[%s2518_s9 + $0xc0] sm:$0xff]   ;;  %1935 = vmatprep.subr.bf16.mxu0 %v2169_v0  ;;  %v2174_v5 = vld [vmem:[%s2518_s9 + $0xc8] sm:$0xff]   ;;  %v2177_v8 = vld [vmem:[%s2518_s9 + $0x50] sm:$0xff]  }
  0x36   : > { %v2171_v2 = vld [vmem:[%s2518_s9] sm:$0xff]   ;;  %1957 = vmatprep.subr.bf16.mxu1 %v2170_v1  ;;  %v2175_v6 = vld [vmem:[%s2518_s9 + $0x8] sm:$0xff]   ;;  %v2178_v9 = vld [vmem:[%s2518_s9 + $0xd0] sm:$0xff]   ;;  %s2722_s15 = smov (!%p233_p7, %s2385_s15), 1 }
  0x37   : > { %v2172_v3 = vld [vmem:[%s2518_s9 + $0x80] sm:$0xff]   ;;  %1936 = vmatpush3.bf16.msra.mxu0 %v2171_v2  ;;  %v2176_v7 = vld [vmem:[%s2518_s9 + $0x88] sm:$0xff]   ;;  %v2179_v10 = vld [vmem:[%s2518_s9 + $0x10] sm:$0xff]   ;;  %s235_s8 = scalar_lea.vmem %s2708_s2, %s2722_s15 }
  0x38   : > { %1958 = vmatpush3.bf16.msra.mxu1 %v2172_v3  ;;  %1937 = vmatprep.subr.bf16.mxu0 %v2173_v4  ;;  %v2180_v11 = vld [vmem:[%s2518_s9 + $0x90] sm:$0xff]   ;;  %v2181_v12 = vld [vmem:[%s2518_s9 + $0x58] sm:$0xff]   ;;  %v2185_v16 = vld [vmem:[%s2518_s9 + $0x60] sm:$0xff]  }
  0x39   : > { %1959 = vmatprep.subr.bf16.mxu1 %v2174_v5  ;;  %v2182_v13 = vld [vmem:[%s2518_s9 + $0xd8] sm:$0xff]   ;;  %v2186_v17 = vld [vmem:[%s2518_s9 + $0xe0] sm:$0xff]   ;;  %v2189_v20 = vld [vmem:[%s2518_s9 + $0x68] sm:$0xff]  }
  0x3a   : > { %v2183_v14 = vld [vmem:[%s2518_s9 + $0x18] sm:$0xff]   ;;  %v2187_v18 = vld [vmem:[%s2518_s9 + $0x20] sm:$0xff]   ;;  %v2190_v21 = vld [vmem:[%s2518_s9 + $0xe8] sm:$0xff]  }
  0x3b   : > { %1938 = vmatpush3.bf16.msra.mxu0 %v2175_v6  ;;  %v2184_v15 = vld [vmem:[%s2518_s9 + $0x98] sm:$0xff]   ;;  %v2188_v19 = vld [vmem:[%s2518_s9 + $0xa0] sm:$0xff]   ;;  %v2191_v22 = vld [vmem:[%s2518_s9 + $0x28] sm:$0xff]  }
  0x3c   : > { %1960 = vmatpush3.bf16.msra.mxu1 %v2176_v7  ;;  %1939 = vmatprep.subr.bf16.mxu0 %v2177_v8  ;;  %v2192_v23 = vld [vmem:[%s2518_s9 + $0xa8] sm:$0xff]   ;;  %v2193_v24 = vld [vmem:[%s2518_s9 + $0x70] sm:$0xff]   ;;  %v2197_v28 = vld [vmem:[%s2518_s9 + $0x78] sm:$0xff]  }
  0x3d   : > { %1961 = vmatprep.subr.bf16.mxu1 %v2178_v9  ;;  %v2194_v25 = vld [vmem:[%s2518_s9 + $0xf0] sm:$0xff]   ;;  %v2198_v29 = vld [vmem:[%s2518_s9 + $0xf8] sm:$0xff]   ;;  %v245_v32 = vld [vmem:[%s2706_s0] sm:$0xff] }
  0x3e   : > { %v2195_v26 = vld [vmem:[%s2518_s9 + $0x30] sm:$0xff]   ;;  %v2199_v30 = vld [vmem:[%s2518_s9 + $0x38] sm:$0xff]   ;;  %v246_v33 = vld [vmem:[%s2706_s0 + $0x8] sm:$0xff]  ;;  %v1789_v34 = vcombine.low %v245_v32, %v245_v32  ;;  %v1790_v35 = vcombine.high %v245_v32, %v245_v32 }
  0x3f   : > { %1940 = vmatpush3.bf16.msra.mxu0 %v2179_v10  ;;  %v2196_v27 = vld [vmem:[%s2518_s9 + $0xb0] sm:$0xff]   ;;  %v2200_v31 = vld [vmem:[%s2518_s9 + $0xb8] sm:$0xff]   ;;  %v1791_v36 = vcombine.low %v246_v33, %v246_v33  ;;  %v1792_v37 = vcombine.high %v246_v33, %v246_v33  ;;  %v2205_v38 = vld [vmem:[%s2518_s9 + $0x140] sm:$0xff]  }
  0x40   : > { %1962 = vmatpush3.bf16.msra.mxu1 %v2180_v11  ;;  %1941 = vmatprep.subr.bf16.mxu0 %v2181_v12  ;;  %v2206_v39 = vld [vmem:[%s2518_s9 + $0x1c0] sm:$0xff]   ;;  %v2209_v42 = vld [vmem:[%s2518_s9 + $0x148] sm:$0xff]   ;;  %v2213_v46 = vld [vmem:[%s2518_s9 + $0x150] sm:$0xff]  }
  0x41   : > { %1963 = vmatprep.subr.bf16.mxu1 %v2182_v13  ;;  %1372 = vmatprep.mubr.bf16.mxu0 %v1790_v35  ;;  %v2207_v40 = vld [vmem:[%s2518_s9 + $0x100] sm:$0xff]   ;;  %v2210_v43 = vld [vmem:[%s2518_s9 + $0x1c8] sm:$0xff]   ;;  %v2214_v47 = vld [vmem:[%s2518_s9 + $0x1d0] sm:$0xff]  }
  0x42   : > { %1412 = vmatprep.mubr.bf16.mxu1 %v1792_v37  ;;  %v2208_v41 = vld [vmem:[%s2518_s9 + $0x180] sm:$0xff]   ;;  %v2211_v44 = vld [vmem:[%s2518_s9 + $0x108] sm:$0xff]   ;;  %v2215_v48 = vld [vmem:[%s2518_s9 + $0x110] sm:$0xff]  }
  0x43   : > { %1942 = vmatpush3.bf16.msra.mxu0 %v2183_v14  ;;  %v2212_v45 = vld [vmem:[%s2518_s9 + $0x188] sm:$0xff]   ;;  %v2216_v49 = vld [vmem:[%s2518_s9 + $0x190] sm:$0xff]   ;;  %v2217_v50 = vld [vmem:[%s2518_s9 + $0x158] sm:$0xff]  }
  0x44   : > { %1964 = vmatpush3.bf16.msra.mxu1 %v2184_v15  ;;  %1943 = vmatprep.subr.bf16.mxu0 %v2185_v16  ;;  %v2218_v51 = vld [vmem:[%s2518_s9 + $0x1d8] sm:$0xff]   ;;  %v2221_v54 = vld [vmem:[%s2518_s9 + $0x160] sm:$0xff]   ;;  %v2225_v58 = vld [vmem:[%s2518_s9 + $0x168] sm:$0xff]  }
  0x45   : > { %1965 = vmatprep.subr.bf16.mxu1 %v2186_v17  ;;  %v2219_v52 = vld [vmem:[%s2518_s9 + $0x118] sm:$0xff]   ;;  %v2222_v55 = vld [vmem:[%s2518_s9 + $0x1e0] sm:$0xff]   ;;  %v2226_v59 = vld [vmem:[%s2518_s9 + $0x1e8] sm:$0xff]  }
  0x46   : > { %v2220_v53 = vld [vmem:[%s2518_s9 + $0x198] sm:$0xff]   ;;  %v2223_v56 = vld [vmem:[%s2518_s9 + $0x120] sm:$0xff]   ;;  %v2227_v60 = vld [vmem:[%s2518_s9 + $0x128] sm:$0xff]  }
  0x47   : > { %1944 = vmatpush3.bf16.msra.mxu0 %v2187_v18  ;;  %v2224_v57 = vld [vmem:[%s2518_s9 + $0x1a0] sm:$0xff]   ;;  %v2228_v61 = vld [vmem:[%s2518_s9 + $0x1a8] sm:$0xff]   ;;  %v2229_v62 = vld [vmem:[%s2518_s9 + $0x170] sm:$0xff]  }
  0x48   : > { %1966 = vmatpush3.bf16.msra.mxu1 %v2188_v19  ;;  %1945 = vmatprep.subr.bf16.mxu0 %v2189_v20  ;;  %v2230_v63 = vld [vmem:[%s2518_s9 + $0x1f0] sm:$0xff]   ;;  %v2233_v2 = vld [vmem:[%s2518_s9 + $0x178] sm:$0xff]   ;;  %v2241_v12 = vld [vmem:[%s2518_s9 + $0x240] sm:$0xff]  }
  0x49   : > { %1967 = vmatprep.subr.bf16.mxu1 %v2190_v21  ;;  %v2231_v0 = vld [vmem:[%s2518_s9 + $0x130] sm:$0xff]   ;;  %v2234_v3 = vld [vmem:[%s2518_s9 + $0x1f8] sm:$0xff]   ;;  %v2242_v13 = vld [vmem:[%s2518_s9 + $0x2c0] sm:$0xff]  }
  0x4a   : > { %v2232_v1 = vld [vmem:[%s2518_s9 + $0x1b0] sm:$0xff]   ;;  %v2235_v4 = vld [vmem:[%s2518_s9 + $0x138] sm:$0xff]   ;;  %v2243_v14 = vld [vmem:[%s2518_s9 + $0x200] sm:$0xff]  }
  0x4b   : > { %1946 = vmatpush3.bf16.msra.mxu0 %v2191_v22  ;;  %v2236_v5 = vld [vmem:[%s2518_s9 + $0x1b8] sm:$0xff]   ;;  %v247_v6 = vld [vmem:[%s2706_s0 + $0x10] sm:$0xff]  ;;  %v2244_v15 = vld [vmem:[%s2518_s9 + $0x280] sm:$0xff]  }
  0x4c   : > { %1968 = vmatpush3.bf16.msra.mxu1 %v2192_v23  ;;  %1947 = vmatprep.subr.bf16.mxu0 %v2193_v24  ;;  %v1793_v7 = vcombine.low %v247_v6, %v247_v6  ;;  %v1794_v8 = vcombine.high %v247_v6, %v247_v6  ;;  %v248_v9 = vld [vmem:[%s2706_s0 + $0x18] sm:$0xff]  ;;  %v2245_v16 = vld [vmem:[%s2518_s9 + $0x248] sm:$0xff]   ;;  %v2249_v20 = vld [vmem:[%s2518_s9 + $0x250] sm:$0xff]  }
  0x4d   : > { %1969 = vmatprep.subr.bf16.mxu1 %v2194_v25  ;;  %v1795_v10 = vcombine.low %v248_v9, %v248_v9  ;;  %v1796_v11 = vcombine.high %v248_v9, %v248_v9  ;;  %v2246_v17 = vld [vmem:[%s2518_s9 + $0x2c8] sm:$0xff]   ;;  %v2250_v21 = vld [vmem:[%s2518_s9 + $0x2d0] sm:$0xff]   ;;  %v2253_v24 = vld [vmem:[%s2518_s9 + $0x258] sm:$0xff]  }
  0x4e   : > { %v2247_v18 = vld [vmem:[%s2518_s9 + $0x208] sm:$0xff]   ;;  %v2251_v22 = vld [vmem:[%s2518_s9 + $0x210] sm:$0xff]   ;;  %v2254_v25 = vld [vmem:[%s2518_s9 + $0x2d8] sm:$0xff]  }
  0x4f   : > { %1948 = vmatpush3.bf16.msra.mxu0 %v2195_v26  ;;  %v2248_v19 = vld [vmem:[%s2518_s9 + $0x288] sm:$0xff]   ;;  %v2252_v23 = vld [vmem:[%s2518_s9 + $0x290] sm:$0xff]   ;;  %v2255_v26 = vld [vmem:[%s2518_s9 + $0x218] sm:$0xff]  }
  0x50   : > { %1970 = vmatpush3.bf16.msra.mxu1 %v2196_v27  ;;  %1949 = vmatprep.subr.bf16.mxu0 %v2197_v28  ;;  %v2256_v27 = vld [vmem:[%s2518_s9 + $0x298] sm:$0xff]   ;;  %v2257_v28 = vld [vmem:[%s2518_s9 + $0x260] sm:$0xff]   ;;  %v2261_v32 = vld [vmem:[%s2518_s9 + $0x268] sm:$0xff]  }
  0x51   : > { %1971 = vmatprep.subr.bf16.mxu1 %v2198_v29  ;;  %v2258_v29 = vld [vmem:[%s2518_s9 + $0x2e0] sm:$0xff]   ;;  %v2262_v33 = vld [vmem:[%s2518_s9 + $0x2e8] sm:$0xff]   ;;  %v2266_v37 = vld [vmem:[%s2518_s9 + $0x2f0] sm:$0xff]  }
  0x52   : > { %v2264_v35 = vld [vmem:[%s2518_s9 + $0x2a8] sm:$0xff]  }
  0x53   : > { %1950 = vmatpush3.bf16.msra.mxu0 %v2199_v30  ;;  %v2259_v30 = vld [vmem:[%s2518_s9 + $0x220] sm:$0xff]   ;;  %v2297_v6 = vld [vmem:[%s2518_s9 + $0x368] sm:$0xff]  }
  0x54   : > { %1972 = vmatpush3.bf16.msra.mxu1 %v2200_v31  ;;  %1979 = vmatprep.subr.bf16.mxu0 %v2205_v38  ;;  %v2260_v31 = vld [vmem:[%s2518_s9 + $0x2a0] sm:$0xff]   ;;  %v2267_v38 = vld [vmem:[%s2518_s9 + $0x230] sm:$0xff]   ;;  %v2300_v9 = vld [vmem:[%s2518_s9 + $0x3a8] sm:$0xff]  }
  0x55   : > { %2001 = vmatprep.subr.bf16.mxu1 %v2206_v39  ;;  %v2268_v39 = vld [vmem:[%s2518_s9 + $0x2b0] sm:$0xff]  }
  0x56   : > { %1373 = vmatmul.mubr.bf16.vlgmr.msra.gmra.mrb[0].mxu0 %v1789_v34  ;;  %v2263_v34 = vld [vmem:[%s2518_s9 + $0x228] sm:$0xff]  }
  0x57   : > { %1413 = vmatmul.mubr.bf16.vlgmr.msra.gmra.mrb[0].mxu1 %v1791_v36  ;;  %1980 = vmatpush3.bf16.msra.mxu0 %v2207_v40  ;;  %v2265_v36 = vld [vmem:[%s2518_s9 + $0x270] sm:$0xff]   ;;  %v2269_v40 = vld [vmem:[%s2518_s9 + $0x278] sm:$0xff]  }
  0x58   : > { %2002 = vmatpush3.bf16.msra.mxu1 %v2208_v41  ;;  %1981 = vmatprep.subr.bf16.mxu0 %v2209_v42  ;;  %v2270_v41 = vld [vmem:[%s2518_s9 + $0x2f8] sm:$0xff]  }
  0x59   : > { %2003 = vmatprep.subr.bf16.mxu1 %v2210_v43  ;;  %1452 = vmatprep.mubr.bf16.mxu0 %v1794_v8  ;;  %v2271_v42 = vld [vmem:[%s2518_s9 + $0x238] sm:$0xff]   ;;  %v2299_v8 = vld [vmem:[%s2518_s9 + $0x328] sm:$0xff]  }
  0x5a   : > { %1492 = vmatprep.mubr.bf16.mxu1 %v1796_v11  ;;  %v2272_v43 = vld [vmem:[%s2518_s9 + $0x2b8] sm:$0xff]   ;;  %v2302_v11 = vld [vmem:[%s2518_s9 + $0x3f0] sm:$0xff]  }
  0x5b   : > { %1982 = vmatpush3.bf16.msra.mxu0 %v2211_v44  ;;  %v249_v44 = vld [vmem:[%s2706_s0 + $0x20] sm:$0xff] }
  0x5c   : > { %2004 = vmatpush3.bf16.msra.mxu1 %v2212_v45  ;;  %1983 = vmatprep.subr.bf16.mxu0 %v2213_v46  ;;  %v250_v45 = vld [vmem:[%s2706_s0 + $0x28] sm:$0xff]  ;;  %v1797_v46 = vcombine.low %v249_v44, %v249_v44 }
  0x5d   : > { %2005 = vmatprep.subr.bf16.mxu1 %v2214_v47  ;;  %v1798_v47 = vcombine.high %v249_v44, %v249_v44 }
  0x5f   : > { %1984 = vmatpush3.bf16.msra.mxu0 %v2215_v48  ;;  %v1799_v48 = vcombine.low %v250_v45, %v250_v45 }
  0x60   : > { %2006 = vmatpush3.bf16.msra.mxu1 %v2216_v49  ;;  %1985 = vmatprep.subr.bf16.mxu0 %v2217_v50  ;;  %v1800_v49 = vcombine.high %v250_v45, %v250_v45  ;;  %v2277_v50 = vld [vmem:[%s2518_s9 + $0x340] sm:$0xff]  }
  0x61   : > { %2007 = vmatprep.subr.bf16.mxu1 %v2218_v51  ;;  %v2278_v51 = vld [vmem:[%s2518_s9 + $0x3c0] sm:$0xff]  }
  0x63   : > { %1986 = vmatpush3.bf16.msra.mxu0 %v2219_v52  ;;  %v2279_v52 = vld [vmem:[%s2518_s9 + $0x300] sm:$0xff]  }
  0x64   : > { %2008 = vmatpush3.bf16.msra.mxu1 %v2220_v53  ;;  %1987 = vmatprep.subr.bf16.mxu0 %v2221_v54  ;;  %v2280_v53 = vld [vmem:[%s2518_s9 + $0x380] sm:$0xff]   ;;  %v2281_v54 = vld [vmem:[%s2518_s9 + $0x348] sm:$0xff]  }
  0x65   : > { %2009 = vmatprep.subr.bf16.mxu1 %v2222_v55  ;;  %v2282_v55 = vld [vmem:[%s2518_s9 + $0x3c8] sm:$0xff]  }
  0x67   : > { %1988 = vmatpush3.bf16.msra.mxu0 %v2223_v56  ;;  %v2283_v56 = vld [vmem:[%s2518_s9 + $0x308] sm:$0xff]  }
  0x68   : > { %2010 = vmatpush3.bf16.msra.mxu1 %v2224_v57  ;;  %1989 = vmatprep.subr.bf16.mxu0 %v2225_v58  ;;  %v2284_v57 = vld [vmem:[%s2518_s9 + $0x388] sm:$0xff]   ;;  %v2285_v58 = vld [vmem:[%s2518_s9 + $0x350] sm:$0xff]  }
  0x69   : > { %2011 = vmatprep.subr.bf16.mxu1 %v2226_v59  ;;  %v2286_v59 = vld [vmem:[%s2518_s9 + $0x3d0] sm:$0xff]  }
  0x6b   : > { %1990 = vmatpush3.bf16.msra.mxu0 %v2227_v60  ;;  %v2287_v60 = vld [vmem:[%s2518_s9 + $0x310] sm:$0xff]  }
  0x6c   : > { %2012 = vmatpush3.bf16.msra.mxu1 %v2228_v61  ;;  %1991 = vmatprep.subr.bf16.mxu0 %v2229_v62  ;;  %v2288_v61 = vld [vmem:[%s2518_s9 + $0x390] sm:$0xff]   ;;  %v2289_v62 = vld [vmem:[%s2518_s9 + $0x358] sm:$0xff]  }
  0x6d   : > { %2013 = vmatprep.subr.bf16.mxu1 %v2230_v63  ;;  %v2290_v63 = vld [vmem:[%s2518_s9 + $0x3d8] sm:$0xff]  }
  0x6f   : > { %1992 = vmatpush3.bf16.msra.mxu0 %v2231_v0  ;;  %v2291_v0 = vld [vmem:[%s2518_s9 + $0x318] sm:$0xff]  }
  0x70   : > { %2014 = vmatpush3.bf16.msra.mxu1 %v2232_v1  ;;  %1993 = vmatprep.subr.bf16.mxu0 %v2233_v2  ;;  %v2292_v1 = vld [vmem:[%s2518_s9 + $0x398] sm:$0xff]   ;;  %v2293_v2 = vld [vmem:[%s2518_s9 + $0x360] sm:$0xff]  }
  0x71   : > { %2015 = vmatprep.subr.bf16.mxu1 %v2234_v3  ;;  %v2294_v3 = vld [vmem:[%s2518_s9 + $0x3e0] sm:$0xff]  }
  0x73   : > { %1994 = vmatpush3.bf16.msra.mxu0 %v2235_v4  ;;  %v2295_v4 = vld [vmem:[%s2518_s9 + $0x320] sm:$0xff]  }
  0x74   : > { %2016 = vmatpush3.bf16.msra.mxu1 %v2236_v5  ;;  %2023 = vmatprep.subr.bf16.mxu0 %v2241_v12  ;;  %v2296_v5 = vld [vmem:[%s2518_s9 + $0x3a0] sm:$0xff]   ;;  %v2303_v12 = vld [vmem:[%s2518_s9 + $0x330] sm:$0xff]  }
  0x75   : > { %2045 = vmatprep.subr.bf16.mxu1 %v2242_v13  ;;  %v2304_v13 = vld [vmem:[%s2518_s9 + $0x3b0] sm:$0xff]  }
  0x76   : > { %1453 = vmatmul.mubr.bf16.vlgmr.msra.gmra.mrb[4].mxu0 %v1793_v7  ;;  %v2298_v7 = vld [vmem:[%s2518_s9 + $0x3e8] sm:$0xff]  }
  0x77   : > { %1493 = vmatmul.mubr.bf16.vlgmr.msra.gmra.mrb[4].mxu1 %v1795_v10  ;;  %2024 = vmatpush3.bf16.msra.mxu0 %v2243_v14  ;;  %v2301_v10 = vld [vmem:[%s2518_s9 + $0x370] sm:$0xff]   ;;  %v2305_v14 = vld [vmem:[%s2518_s9 + $0x378] sm:$0xff]  }
  0x78   : > { %2046 = vmatpush3.bf16.msra.mxu1 %v2244_v15  ;;  %2025 = vmatprep.subr.bf16.mxu0 %v2245_v16  ;;  %v2306_v15 = vld [vmem:[%s2518_s9 + $0x3f8] sm:$0xff]  }
  0x79   : > { %2047 = vmatprep.subr.bf16.mxu1 %v2246_v17  ;;  %1532 = vmatprep.mubr.bf16.mxu0 %v1798_v47  ;;  %v2307_v16 = vld [vmem:[%s2518_s9 + $0x338] sm:$0xff]  }
  0x7a   : > { %1572 = vmatprep.mubr.bf16.mxu1 %v1800_v49  ;;  %v2308_v17 = vld [vmem:[%s2518_s9 + $0x3b8] sm:$0xff]   ;;  %s1787_s9 = sshll.u32 %s2722_s15, 2 }
  0x7b   : > { %2026 = vmatpush3.bf16.msra.mxu0 %v2247_v18  ;;  %v251_v18 = vld [vmem:[%s2706_s0 + $0x30] sm:$0xff]  ;;  %s243_s5 = scalar_lea.vmem %s2709_s3, %s1787_s9 }
  0x7c   : > { %2048 = vmatpush3.bf16.msra.mxu1 %v2248_v19  ;;  %2027 = vmatprep.subr.bf16.mxu0 %v2249_v20  ;;  %v252_v19 = vld [vmem:[%s2706_s0 + $0x38] sm:$0xff]  ;;  %v1801_v20 = vcombine.low %v251_v18, %v251_v18 }
  0x7d   : > { %2049 = vmatprep.subr.bf16.mxu1 %v2250_v21  ;;  %v1802_v21 = vcombine.high %v251_v18, %v251_v18 }
  0x7f   : > { %2028 = vmatpush3.bf16.msra.mxu0 %v2251_v22  ;;  %v1803_v22 = vcombine.low %v252_v19, %v252_v19 }
  0x80   : > { %2050 = vmatpush3.bf16.msra.mxu1 %v2252_v23  ;;  %2029 = vmatprep.subr.bf16.mxu0 %v2253_v24  ;;  %v1804_v23 = vcombine.high %v252_v19, %v252_v19 }
  0x81   : > { %2051 = vmatprep.subr.bf16.mxu1 %v2254_v25 }
  0x83   : > { %2030 = vmatpush3.bf16.msra.mxu0 %v2255_v26  ;;  %v1788_v26 = vld [vmem:[%s235_s8] ss:$0 sm:$0xff] }
  0x84   : > { %2052 = vmatpush3.bf16.msra.mxu1 %v2256_v27  ;;  %2031 = vmatprep.subr.bf16.mxu0 %v2257_v28 }
  0x85   : > { %2053 = vmatprep.subr.bf16.mxu1 %v2258_v29 }
  0x87   : > { %2032 = vmatpush3.bf16.msra.mxu0 %v2259_v30 }
  0x88   : > { %2054 = vmatpush3.bf16.msra.mxu1 %v2260_v31  ;;  %2033 = vmatprep.subr.bf16.mxu0 %v2261_v32 }
  0x89   : > { %2055 = vmatprep.subr.bf16.mxu1 %v2262_v33 }
  0x8b   : > { %2034 = vmatpush3.bf16.msra.mxu0 %v2263_v34 }
  0x8c   : > { %2056 = vmatpush3.bf16.msra.mxu1 %v2264_v35  ;;  %2035 = vmatprep.subr.bf16.mxu0 %v2265_v36 }
  0x8d   : > { %2057 = vmatprep.subr.bf16.mxu1 %v2266_v37 }
  0x8f   : > { %2036 = vmatpush3.bf16.msra.mxu0 %v2267_v38 }
  0x90   : > { %2058 = vmatpush3.bf16.msra.mxu1 %v2268_v39  ;;  %2037 = vmatprep.subr.bf16.mxu0 %v2269_v40 }
  0x91   : > { %2059 = vmatprep.subr.bf16.mxu1 %v2270_v41 }
  0x93   : > { %2038 = vmatpush3.bf16.msra.mxu0 %v2271_v42 }
  0x94   : > { %2060 = vmatpush3.bf16.msra.mxu1 %v2272_v43  ;;  %2067 = vmatprep.subr.bf16.mxu0 %v2277_v50 }
  0x95   : > { %2089 = vmatprep.subr.bf16.mxu1 %v2278_v51 }
  0x96   : > { %1533 = vmatmul.mubr.bf16.vlgmr.msra.gmra.mrb[8].mxu0 %v1797_v46 }
  0x97   : > { %1573 = vmatmul.mubr.bf16.vlgmr.msra.gmra.mrb[8].mxu1 %v1799_v48  ;;  %2068 = vmatpush3.bf16.msra.mxu0 %v2279_v52 }
  0x98   : > { %2090 = vmatpush3.bf16.msra.mxu1 %v2280_v53  ;;  %2069 = vmatprep.subr.bf16.mxu0 %v2281_v54 }
  0x99   : > { %2091 = vmatprep.subr.bf16.mxu1 %v2282_v55  ;;  %1612 = vmatprep.mubr.bf16.mxu0 %v1802_v21 }
  0x9a   : > { %1652 = vmatprep.mubr.bf16.mxu1 %v1804_v23 }
  0x9b   : > { %2070 = vmatpush3.bf16.msra.mxu0 %v2283_v56 }
  0x9c   : > { %2092 = vmatpush3.bf16.msra.mxu1 %v2284_v57  ;;  %2071 = vmatprep.subr.bf16.mxu0 %v2285_v58 }
  0x9d   : > { %2093 = vmatprep.subr.bf16.mxu1 %v2286_v59 }
  0x9f   : > { %2072 = vmatpush3.bf16.msra.mxu0 %v2287_v60 }
  0xa0   : > { %2094 = vmatpush3.bf16.msra.mxu1 %v2288_v61  ;;  %2073 = vmatprep.subr.bf16.mxu0 %v2289_v62 }
  0xa1   : > { %2095 = vmatprep.subr.bf16.mxu1 %v2290_v63 }
  0xa3   : > { %2074 = vmatpush3.bf16.msra.mxu0 %v2291_v0 }
  0xa4   : > { %2096 = vmatpush3.bf16.msra.mxu1 %v2292_v1  ;;  %2075 = vmatprep.subr.bf16.mxu0 %v2293_v2 }
  0xa5   : > { %2097 = vmatprep.subr.bf16.mxu1 %v2294_v3 }
  0xa7   : > { %2076 = vmatpush3.bf16.msra.mxu0 %v2295_v4 }
  0xa8   : > { %2098 = vmatpush3.bf16.msra.mxu1 %v2296_v5  ;;  %2077 = vmatprep.subr.bf16.mxu0 %v2297_v6 }
  0xa9   : > { %2099 = vmatprep.subr.bf16.mxu1 %v2298_v7 }
  0xab   : > { %2078 = vmatpush3.bf16.msra.mxu0 %v2299_v8 }
  0xac   : > { %2100 = vmatpush3.bf16.msra.mxu1 %v2300_v9  ;;  %2079 = vmatprep.subr.bf16.mxu0 %v2301_v10 }
  0xad   : > { %2101 = vmatprep.subr.bf16.mxu1 %v2302_v11 }
  0xaf   : > { %2080 = vmatpush3.bf16.msra.mxu0 %v2303_v12 }
  0xb0   : > { %2102 = vmatpush3.bf16.msra.mxu1 %v2304_v13  ;;  %2081 = vmatprep.subr.bf16.mxu0 %v2305_v14 }
  0xb1   : > { %2103 = vmatprep.subr.bf16.mxu1 %v2306_v15 }
  0xb3   : > { %2082 = vmatpush3.bf16.msra.mxu0 %v2307_v16 }
  0xb4   : > { %2104 = vmatpush3.bf16.msra.mxu1 %v2308_v17 }
  0xb6   : > { %1613 = vmatmul.mubr.bf16.vlgmr.msra.gmra.mrb[12].mxu0 %v1801_v20 }
  0xb7   : > { %1653 = vmatmul.mubr.bf16.vlgmr.msra.gmra.mrb[12].mxu1 %v1803_v22 }
 0x129   : > { %v1951_v24 = vpop.f32.mrb[0].mxu0 }
 0x12a   : > { %v1973_v25 = vpop.f32.mrb[0].mxu1  ;;  %v1952_v27 = vpop.f32.mrb[1].mxu0 }
 0x12b   : > { %v1974_v28 = vpop.f32.mrb[1].mxu1  ;;  %v1953_v29 = vadd.f32 %v1952_v27, %v1951_v24  ;;  %v1954_v31 = vpop.f32.mrb[2].mxu0 }
 0x12c   : > { %v1975_v30 = vadd.f32 %v1974_v28, %v1973_v25  ;;  %v1976_v32 = vpop.f32.mrb[2].mxu1  ;;  %v1955_v33 = vpop.f32.mrb[3].mxu0 }
 0x12d   : > { %v1977_v34 = vpop.f32.mrb[3].mxu1  ;;  %v1375_v35 = vadd.f32 %v1953_v29, %v1788_v26 }
 0x12f   : > { %v1415_v36 = vadd.f32 %v1975_v30, %v1375_v35 }
 0x149   : > { %v1995_v37 = vpop.f32.mrb[4].mxu0 }
 0x14a   : > { %v2017_v38 = vpop.f32.mrb[4].mxu1  ;;  %v1996_v39 = vpop.f32.mrb[5].mxu0 }
 0x14b   : > { %v2018_v40 = vpop.f32.mrb[5].mxu1  ;;  %v1997_v41 = vadd.f32 %v1996_v39, %v1995_v37  ;;  %v1998_v43 = vpop.f32.mrb[6].mxu0 }
 0x14c   : > { %v2019_v42 = vadd.f32 %v2018_v40, %v2017_v38  ;;  %v2020_v44 = vpop.f32.mrb[6].mxu1  ;;  %v1999_v45 = vpop.f32.mrb[7].mxu0 }
 0x14d   : > { %v2021_v46 = vpop.f32.mrb[7].mxu1  ;;  %v1455_v47 = vadd.f32 %v1997_v41, %v1415_v36 }
 0x14f   : > { %v1495_v48 = vadd.f32 %v2019_v42, %v1455_v47 }
 0x169   : > { %v2039_v49 = vpop.f32.mrb[8].mxu0 }
 0x16a   : > { %v2061_v50 = vpop.f32.mrb[8].mxu1  ;;  %v2040_v51 = vpop.f32.mrb[9].mxu0 }
 0x16b   : > { %v2041_v52 = vadd.f32 %v2040_v51, %v2039_v49  ;;  %v2062_v53 = vpop.f32.mrb[9].mxu1  ;;  %v2042_v54 = vpop.f32.mrb[10].mxu0 }
 0x16c   : > { %v2063_v55 = vadd.f32 %v2062_v53, %v2061_v50  ;;  %v2064_v56 = vpop.f32.mrb[10].mxu1  ;;  %v2043_v57 = vpop.f32.mrb[11].mxu0 }
 0x16d   : > { %v1535_v58 = vadd.f32 %v2041_v52, %v1495_v48  ;;  %v2065_v59 = vpop.f32.mrb[11].mxu1 }
 0x16f   : > { %v1575_v60 = vadd.f32 %v2063_v55, %v1535_v58 }
 0x189   : > { %v2083_v61 = vpop.f32.mrb[12].mxu0 }
 0x18a   : > { %v2105_v62 = vpop.f32.mrb[12].mxu1  ;;  %v2084_v63 = vpop.f32.mrb[13].mxu0 }
 0x18b   : > { %v2085_v0 = vadd.f32 %v2084_v63, %v2083_v61  ;;  %v2106_v1 = vpop.f32.mrb[13].mxu1  ;;  %v2086_v2 = vpop.f32.mrb[14].mxu0 }
 0x18c   : > { %v2107_v3 = vadd.f32 %v2106_v1, %v2105_v62  ;;  %v2108_v4 = vpop.f32.mrb[14].mxu1  ;;  %v2087_v5 = vpop.f32.mrb[15].mxu0 }
 0x18d   : > { %v1615_v6 = vadd.f32 %v2085_v0, %v1575_v60  ;;  %v2109_v7 = vpop.f32.mrb[15].mxu1 }
 0x18f   : > { %v1655_v8 = vadd.f32 %v2107_v3, %v1615_v6 }
 0x191   : > { %vm1660_vm0 = vcmp.ge.f32.partialorder %v1655_v8, 0.0  ;;  %v1661_v9 = vmul.f32 0.2, %v1655_v8 }
 0x193   : > { %v1662_v10 = vsel %vm1660_vm0, %v1655_v8, %v1661_v9 }
 0x194   : > { %v1663_v11 = vpack.c.bf16 %v1662_v10, %v1662_v10 }
 0x196   : > { %1664 = vst [vmem:[%s243_s5] sm:$0xf] %v1663_v11 }
 0x197 PF: > { %s16_s17 = sadd.s32 1, %s2393_s17   ;;  %s2714_s12 = smov %s2377_s13 }
 0x198   : > { %p13_p9 = scmp.ge.s32.totalorder %s16_s17, 4   ;;  %s2715_s13 = smov %s2381_s14 }
 0x199   : > { %s2716_s14 = smov %s2468_s24  ;;  %s2717_s15 = smov %s2389_s16 }
 0x19a   : > { %s2718_s16 = smov %s2720_s19  ;;  %15 = sbr.rel (!%p13_p9) target bundleno = 4 (0x4), region = 78 }
 0x1a1   :  { %1692 = vsyncpa [#allocation3], 1 }
 0x1a2   :  { %1694 = vsyncpa [#allocation3 + $0x1], 1 }

// kernel: generator_forward.11
= control target key start
LH: loop header
LB: loop body
LE: loop exit
PB: predicated region body
PF: predicated region fallthrough
CT: control target
= control target key end

     0   :  { %s4626_s12 = smov 0   ;;  %s4628_s13 = smov 0   ;;  %s5645_s0 = inlined_call_operand.vmem [shape: bf16[8,2304], index: 0, kind: input, shape index: {}]   ;;  %s5646_s1 = inlined_call_operand.vmem [shape: bf16[2304,512], index: 1, kind: input, shape index: {}]   ;;  %s5647_s2 = inlined_call_operand.vmem [shape: f32[1,512], index: 2, kind: input, shape index: {}]   ;;  %s5648_s3 = inlined_call_operand.vmem [shape: bf16[8,512], index: 3, kind: output, shape index: {}]  }
   0x1   :  { %s4630_s14 = smov 0   ;;  %s4632_s15 = smov 0  }
   0x2   :  { %s4634_s16 = smov 0  }
   0x3 LB: > { %s22_s17 = sadd.s32 1, %s4600_s15  ;;  %p65_p1 = scmp.ne.s32.totalorder %s4592_s13, %s4588_s12  ;;  %s4604_s16 = sphi %s4634_s16, %s13_s16   ;;  %s4600_s15 = sphi %s4632_s15, %s5652_s15   ;;  %s4596_s14 = sphi %s4630_s14, %s5651_s14   ;;  %s4592_s13 = sphi %s4628_s13, %s5650_s13   ;;  %s4588_s12 = sphi %s4626_s12, %s5649_s12  }
   0x4   : > { %p23_p0 = scmp.ge.s32.totalorder %s22_s17, 2  ;;  %p66_p2 = scmp.eq.s32.totalorder %s4604_s16, 0 }
   0x5   : > { %s58_s19 = sadd.s32 1, %s4592_s13  ;;  %p3724_p5 = scmp.ge.s32.totalorder %s4604_s16, 2 }
   0x6   : > { %s5654_s17 = smov (%p23_p0, %s22_s17), 0  ;;  %p67_p3 = por %p66_p2, %p65_p1 }
   0x7   : > { %s55_s18 = ssub.s32 %s4600_s15, %s5654_s17  ;;  %153 = sbr.rel (%p3724_p5) target bundleno = 162 (0xa2), region = 20 }
   0x8   : > { %p56_p4 = scmp.eq.s32.totalorder %s55_s18, 0 }
   0xa   : > { %s4661_s20 = scalar_select %p56_p4, %s4592_s13, %s58_s19  }
   0xe   : > { %156 = sbr.rel (!%p67_p3) target bundleno = 162 (0xa2), region = 24  ;;  %s158_s21 = sand.u32 (%p67_p3), 1, %s4592_s13  }
   0xf   : > { %s4040_s22 = sshll.u32 (%p67_p3), %s4600_s15, 3  ;;  %s4074_s23 = smul.u32 (%p67_p3), 2304, %s158_s21 }
  0x10   : > { %s4669_s26 = scalar_lea.vmem (%p67_p3), %s5646_s1, %s4040_s22 }
  0x11   : > { %v765_v0 = vld [vmem:[%s4669_s26] sm:$0xff] (%p67_p3)  ;;  %v767_v1 = vld [vmem:[%s4669_s26 + $0x10] sm:$0xff] (%p67_p3)  ;;  %s4677_s27 = scalar_lea.vmem (%p67_p3), [#allocation2], %s4074_s23 }
  0x12   : > { %v769_v2 = vld [vmem:[%s4669_s26 + $0x20] sm:$0xff] (%p67_p3)  ;;  %v771_v3 = vld [vmem:[%s4669_s26 + $0x30] sm:$0xff] (%p67_p3)  ;;  %766 = vst [vmem:[%s4677_s27] sm:$0xff] (%p67_p3), %v765_v0  ;;  %768 = vst [vmem:[%s4677_s27 + $0x8] sm:$0xff] (%p67_p3), %v767_v1 }
  0x13   : > { %v773_v4 = vld [vmem:[%s4669_s26 + $0x40] sm:$0xff] (%p67_p3)  ;;  %v775_v5 = vld [vmem:[%s4669_s26 + $0x50] sm:$0xff] (%p67_p3)  ;;  %770 = vst [vmem:[%s4677_s27 + $0x10] sm:$0xff] (%p67_p3), %v769_v2  ;;  %772 = vst [vmem:[%s4677_s27 + $0x18] sm:$0xff] (%p67_p3), %v771_v3 }
  0x14   : > { %774 = vst [vmem:[%s4677_s27 + $0x20] sm:$0xff] (%p67_p3), %v773_v4  ;;  %776 = vst [vmem:[%s4677_s27 + $0x28] sm:$0xff] (%p67_p3), %v775_v5  ;;  %v777_v6 = vld [vmem:[%s4669_s26 + $0x60] sm:$0xff] (%p67_p3)  ;;  %v779_v7 = vld [vmem:[%s4669_s26 + $0x70] sm:$0xff] (%p67_p3) }
  0x15   : > { %v781_v8 = vld [vmem:[%s4669_s26 + $0x80] sm:$0xff]  ;;  %778 = vst [vmem:[%s4677_s27 + $0x30] sm:$0xff] %v777_v6  ;;  %780 = vst [vmem:[%s4677_s27 + $0x38] sm:$0xff] %v779_v7  ;;  %v783_v9 = vld [vmem:[%s4669_s26 + $0x90] sm:$0xff] }
  0x16   : > { %782 = vst [vmem:[%s4677_s27 + $0x40] sm:$0xff] %v781_v8  ;;  %v785_v10 = vld [vmem:[%s4669_s26 + $0xa0] sm:$0xff]  ;;  %v787_v11 = vld [vmem:[%s4669_s26 + $0xb0] sm:$0xff]  ;;  %784 = vst [vmem:[%s4677_s27 + $0x48] sm:$0xff] %v783_v9 }
  0x17   : > { %786 = vst [vmem:[%s4677_s27 + $0x50] sm:$0xff] %v785_v10  ;;  %788 = vst [vmem:[%s4677_s27 + $0x58] sm:$0xff] %v787_v11  ;;  %v789_v12 = vld [vmem:[%s4669_s26 + $0xc0] sm:$0xff]  ;;  %v791_v13 = vld [vmem:[%s4669_s26 + $0xd0] sm:$0xff] }
  0x18   : > { %v793_v14 = vld [vmem:[%s4669_s26 + $0xe0] sm:$0xff]  ;;  %790 = vst [vmem:[%s4677_s27 + $0x60] sm:$0xff] %v789_v12  ;;  %792 = vst [vmem:[%s4677_s27 + $0x68] sm:$0xff] %v791_v13  ;;  %v795_v15 = vld [vmem:[%s4669_s26 + $0xf0] sm:$0xff] }
  0x19   : > { %794 = vst [vmem:[%s4677_s27 + $0x70] sm:$0xff] %v793_v14  ;;  %v797_v16 = vld [vmem:[%s4669_s26 + $0x100] sm:$0xff]  ;;  %v799_v17 = vld [vmem:[%s4669_s26 + $0x110] sm:$0xff]  ;;  %796 = vst [vmem:[%s4677_s27 + $0x78] sm:$0xff] %v795_v15 }
  0x1a   : > { %798 = vst [vmem:[%s4677_s27 + $0x80] sm:$0xff] %v797_v16  ;;  %800 = vst [vmem:[%s4677_s27 + $0x88] sm:$0xff] %v799_v17  ;;  %v801_v18 = vld [vmem:[%s4669_s26 + $0x120] sm:$0xff]  ;;  %v803_v19 = vld [vmem:[%s4669_s26 + $0x130] sm:$0xff] }
  0x1b   : > { %v805_v20 = vld [vmem:[%s4669_s26 + $0x140] sm:$0xff]  ;;  %802 = vst [vmem:[%s4677_s27 + $0x90] sm:$0xff] %v801_v18  ;;  %804 = vst [vmem:[%s4677_s27 + $0x98] sm:$0xff] %v803_v19  ;;  %v807_v21 = vld [vmem:[%s4669_s26 + $0x150] sm:$0xff] }
  0x1c   : > { %806 = vst [vmem:[%s4677_s27 + $0xa0] sm:$0xff] %v805_v20  ;;  %v809_v22 = vld [vmem:[%s4669_s26 + $0x160] sm:$0xff]  ;;  %v811_v23 = vld [vmem:[%s4669_s26 + $0x170] sm:$0xff]  ;;  %808 = vst [vmem:[%s4677_s27 + $0xa8] sm:$0xff] %v807_v21 }
  0x1d   : > { %810 = vst [vmem:[%s4677_s27 + $0xb0] sm:$0xff] %v809_v22  ;;  %812 = vst [vmem:[%s4677_s27 + $0xb8] sm:$0xff] %v811_v23  ;;  %v813_v24 = vld [vmem:[%s4669_s26 + $0x180] sm:$0xff]  ;;  %v815_v25 = vld [vmem:[%s4669_s26 + $0x190] sm:$0xff] }
  0x1e   : > { %v817_v26 = vld [vmem:[%s4669_s26 + $0x1a0] sm:$0xff]  ;;  %814 = vst [vmem:[%s4677_s27 + $0xc0] sm:$0xff] %v813_v24  ;;  %816 = vst [vmem:[%s4677_s27 + $0xc8] sm:$0xff] %v815_v25  ;;  %v819_v27 = vld [vmem:[%s4669_s26 + $0x1b0] sm:$0xff] }
  0x1f   : > { %818 = vst [vmem:[%s4677_s27 + $0xd0] sm:$0xff] %v817_v26  ;;  %v821_v28 = vld [vmem:[%s4669_s26 + $0x1c0] sm:$0xff]  ;;  %v823_v29 = vld [vmem:[%s4669_s26 + $0x1d0] sm:$0xff]  ;;  %820 = vst [vmem:[%s4677_s27 + $0xd8] sm:$0xff] %v819_v27 }
  0x20   : > { %822 = vst [vmem:[%s4677_s27 + $0xe0] sm:$0xff] %v821_v28  ;;  %824 = vst [vmem:[%s4677_s27 + $0xe8] sm:$0xff] %v823_v29  ;;  %v825_v30 = vld [vmem:[%s4669_s26 + $0x1e0] sm:$0xff]  ;;  %v827_v31 = vld [vmem:[%s4669_s26 + $0x1f0] sm:$0xff] }
  0x21   : > { %v829_v32 = vld [vmem:[%s4669_s26 + $0x200] sm:$0xff]  ;;  %826 = vst [vmem:[%s4677_s27 + $0xf0] sm:$0xff] %v825_v30  ;;  %828 = vst [vmem:[%s4677_s27 + $0xf8] sm:$0xff] %v827_v31  ;;  %v831_v33 = vld [vmem:[%s4669_s26 + $0x210] sm:$0xff] }
  0x22   : > { %830 = vst [vmem:[%s4677_s27 + $0x100] sm:$0xff] %v829_v32  ;;  %v833_v34 = vld [vmem:[%s4669_s26 + $0x220] sm:$0xff]  ;;  %v835_v35 = vld [vmem:[%s4669_s26 + $0x230] sm:$0xff]  ;;  %832 = vst [vmem:[%s4677_s27 + $0x108] sm:$0xff] %v831_v33 }
  0x23   : > { %834 = vst [vmem:[%s4677_s27 + $0x110] sm:$0xff] %v833_v34  ;;  %836 = vst [vmem:[%s4677_s27 + $0x118] sm:$0xff] %v835_v35  ;;  %v837_v36 = vld [vmem:[%s4669_s26 + $0x240] sm:$0xff]  ;;  %v839_v37 = vld [vmem:[%s4669_s26 + $0x250] sm:$0xff] }
  0x24   : > { %v841_v38 = vld [vmem:[%s4669_s26 + $0x260] sm:$0xff]  ;;  %838 = vst [vmem:[%s4677_s27 + $0x120] sm:$0xff] %v837_v36  ;;  %840 = vst [vmem:[%s4677_s27 + $0x128] sm:$0xff] %v839_v37  ;;  %v843_v39 = vld [vmem:[%s4669_s26 + $0x270] sm:$0xff] }
  0x25   : > { %842 = vst [vmem:[%s4677_s27 + $0x130] sm:$0xff] %v841_v38  ;;  %v845_v40 = vld [vmem:[%s4669_s26 + $0x280] sm:$0xff]  ;;  %v847_v41 = vld [vmem:[%s4669_s26 + $0x290] sm:$0xff]  ;;  %844 = vst [vmem:[%s4677_s27 + $0x138] sm:$0xff] %v843_v39 }
  0x26   : > { %846 = vst [vmem:[%s4677_s27 + $0x140] sm:$0xff] %v845_v40  ;;  %848 = vst [vmem:[%s4677_s27 + $0x148] sm:$0xff] %v847_v41  ;;  %v849_v42 = vld [vmem:[%s4669_s26 + $0x2a0] sm:$0xff]  ;;  %v851_v43 = vld [vmem:[%s4669_s26 + $0x2b0] sm:$0xff] }
  0x27   : > { %v853_v44 = vld [vmem:[%s4669_s26 + $0x2c0] sm:$0xff]  ;;  %850 = vst [vmem:[%s4677_s27 + $0x150] sm:$0xff] %v849_v42  ;;  %852 = vst [vmem:[%s4677_s27 + $0x158] sm:$0xff] %v851_v43  ;;  %v855_v45 = vld [vmem:[%s4669_s26 + $0x2d0] sm:$0xff] }
  0x28   : > { %854 = vst [vmem:[%s4677_s27 + $0x160] sm:$0xff] %v853_v44  ;;  %v857_v46 = vld [vmem:[%s4669_s26 + $0x2e0] sm:$0xff]  ;;  %v859_v47 = vld [vmem:[%s4669_s26 + $0x2f0] sm:$0xff]  ;;  %856 = vst [vmem:[%s4677_s27 + $0x168] sm:$0xff] %v855_v45 }
  0x29   : > { %858 = vst [vmem:[%s4677_s27 + $0x170] sm:$0xff] %v857_v46  ;;  %860 = vst [vmem:[%s4677_s27 + $0x178] sm:$0xff] %v859_v47  ;;  %v861_v48 = vld [vmem:[%s4669_s26 + $0x300] sm:$0xff]  ;;  %v863_v49 = vld [vmem:[%s4669_s26 + $0x310] sm:$0xff] }
  0x2a   : > { %v865_v50 = vld [vmem:[%s4669_s26 + $0x320] sm:$0xff]  ;;  %862 = vst [vmem:[%s4677_s27 + $0x180] sm:$0xff] %v861_v48  ;;  %864 = vst [vmem:[%s4677_s27 + $0x188] sm:$0xff] %v863_v49  ;;  %v867_v51 = vld [vmem:[%s4669_s26 + $0x330] sm:$0xff] }
  0x2b   : > { %866 = vst [vmem:[%s4677_s27 + $0x190] sm:$0xff] %v865_v50  ;;  %v869_v52 = vld [vmem:[%s4669_s26 + $0x340] sm:$0xff]  ;;  %v871_v53 = vld [vmem:[%s4669_s26 + $0x350] sm:$0xff]  ;;  %868 = vst [vmem:[%s4677_s27 + $0x198] sm:$0xff] %v867_v51 }
  0x2c   : > { %870 = vst [vmem:[%s4677_s27 + $0x1a0] sm:$0xff] %v869_v52  ;;  %872 = vst [vmem:[%s4677_s27 + $0x1a8] sm:$0xff] %v871_v53  ;;  %v873_v54 = vld [vmem:[%s4669_s26 + $0x360] sm:$0xff]  ;;  %v875_v55 = vld [vmem:[%s4669_s26 + $0x370] sm:$0xff] }
  0x2d   : > { %v877_v56 = vld [vmem:[%s4669_s26 + $0x380] sm:$0xff]  ;;  %874 = vst [vmem:[%s4677_s27 + $0x1b0] sm:$0xff] %v873_v54  ;;  %876 = vst [vmem:[%s4677_s27 + $0x1b8] sm:$0xff] %v875_v55  ;;  %v879_v57 = vld [vmem:[%s4669_s26 + $0x390] sm:$0xff] }
  0x2e   : > { %878 = vst [vmem:[%s4677_s27 + $0x1c0] sm:$0xff] %v877_v56  ;;  %v881_v58 = vld [vmem:[%s4669_s26 + $0x3a0] sm:$0xff]  ;;  %v883_v59 = vld [vmem:[%s4669_s26 + $0x3b0] sm:$0xff]  ;;  %880 = vst [vmem:[%s4677_s27 + $0x1c8] sm:$0xff] %v879_v57 }
  0x2f   : > { %882 = vst [vmem:[%s4677_s27 + $0x1d0] sm:$0xff] %v881_v58  ;;  %884 = vst [vmem:[%s4677_s27 + $0x1d8] sm:$0xff] %v883_v59  ;;  %v885_v60 = vld [vmem:[%s4669_s26 + $0x3c0] sm:$0xff]  ;;  %v887_v61 = vld [vmem:[%s4669_s26 + $0x3d0] sm:$0xff] }
  0x30   : > { %v889_v62 = vld [vmem:[%s4669_s26 + $0x3e0] sm:$0xff]  ;;  %886 = vst [vmem:[%s4677_s27 + $0x1e0] sm:$0xff] %v885_v60  ;;  %888 = vst [vmem:[%s4677_s27 + $0x1e8] sm:$0xff] %v887_v61  ;;  %v891_v63 = vld [vmem:[%s4669_s26 + $0x3f0] sm:$0xff] }
  0x31   : > { %890 = vst [vmem:[%s4677_s27 + $0x1f0] sm:$0xff] %v889_v62  ;;  %v893_v0 = vld [vmem:[%s4669_s26 + $0x400] sm:$0xff]  ;;  %v895_v1 = vld [vmem:[%s4669_s26 + $0x410] sm:$0xff]  ;;  %892 = vst [vmem:[%s4677_s27 + $0x1f8] sm:$0xff] %v891_v63 }
  0x32   : > { %894 = vst [vmem:[%s4677_s27 + $0x200] sm:$0xff] %v893_v0  ;;  %896 = vst [vmem:[%s4677_s27 + $0x208] sm:$0xff] %v895_v1  ;;  %v897_v2 = vld [vmem:[%s4669_s26 + $0x420] sm:$0xff]  ;;  %v899_v3 = vld [vmem:[%s4669_s26 + $0x430] sm:$0xff] }
  0x33   : > { %v901_v4 = vld [vmem:[%s4669_s26 + $0x440] sm:$0xff]  ;;  %898 = vst [vmem:[%s4677_s27 + $0x210] sm:$0xff] %v897_v2  ;;  %900 = vst [vmem:[%s4677_s27 + $0x218] sm:$0xff] %v899_v3  ;;  %v903_v5 = vld [vmem:[%s4669_s26 + $0x450] sm:$0xff] }
  0x34   : > { %902 = vst [vmem:[%s4677_s27 + $0x220] sm:$0xff] %v901_v4  ;;  %v905_v6 = vld [vmem:[%s4669_s26 + $0x460] sm:$0xff]  ;;  %v907_v7 = vld [vmem:[%s4669_s26 + $0x470] sm:$0xff]  ;;  %904 = vst [vmem:[%s4677_s27 + $0x228] sm:$0xff] %v903_v5 }
  0x35   : > { %906 = vst [vmem:[%s4677_s27 + $0x230] sm:$0xff] %v905_v6  ;;  %908 = vst [vmem:[%s4677_s27 + $0x238] sm:$0xff] %v907_v7  ;;  %v909_v8 = vld [vmem:[%s4669_s26 + $0x480] sm:$0xff]  ;;  %v911_v9 = vld [vmem:[%s4669_s26 + $0x490] sm:$0xff] }
  0x36   : > { %v913_v10 = vld [vmem:[%s4669_s26 + $0x4a0] sm:$0xff]  ;;  %910 = vst [vmem:[%s4677_s27 + $0x240] sm:$0xff] %v909_v8  ;;  %912 = vst [vmem:[%s4677_s27 + $0x248] sm:$0xff] %v911_v9  ;;  %v915_v11 = vld [vmem:[%s4669_s26 + $0x4b0] sm:$0xff] }
  0x37   : > { %914 = vst [vmem:[%s4677_s27 + $0x250] sm:$0xff] %v913_v10  ;;  %v917_v12 = vld [vmem:[%s4669_s26 + $0x4c0] sm:$0xff]  ;;  %v919_v13 = vld [vmem:[%s4669_s26 + $0x4d0] sm:$0xff]  ;;  %916 = vst [vmem:[%s4677_s27 + $0x258] sm:$0xff] %v915_v11 }
  0x38   : > { %918 = vst [vmem:[%s4677_s27 + $0x260] sm:$0xff] %v917_v12  ;;  %920 = vst [vmem:[%s4677_s27 + $0x268] sm:$0xff] %v919_v13  ;;  %v921_v14 = vld [vmem:[%s4669_s26 + $0x4e0] sm:$0xff]  ;;  %v923_v15 = vld [vmem:[%s4669_s26 + $0x4f0] sm:$0xff] }
  0x39   : > { %v925_v16 = vld [vmem:[%s4669_s26 + $0x500] sm:$0xff]  ;;  %922 = vst [vmem:[%s4677_s27 + $0x270] sm:$0xff] %v921_v14  ;;  %924 = vst [vmem:[%s4677_s27 + $0x278] sm:$0xff] %v923_v15  ;;  %v927_v17 = vld [vmem:[%s4669_s26 + $0x510] sm:$0xff] }
  0x3a   : > { %926 = vst [vmem:[%s4677_s27 + $0x280] sm:$0xff] %v925_v16  ;;  %v929_v18 = vld [vmem:[%s4669_s26 + $0x520] sm:$0xff]  ;;  %v931_v19 = vld [vmem:[%s4669_s26 + $0x530] sm:$0xff]  ;;  %928 = vst [vmem:[%s4677_s27 + $0x288] sm:$0xff] %v927_v17 }
  0x3b   : > { %930 = vst [vmem:[%s4677_s27 + $0x290] sm:$0xff] %v929_v18  ;;  %932 = vst [vmem:[%s4677_s27 + $0x298] sm:$0xff] %v931_v19  ;;  %v933_v20 = vld [vmem:[%s4669_s26 + $0x540] sm:$0xff]  ;;  %v935_v21 = vld [vmem:[%s4669_s26 + $0x550] sm:$0xff] }
  0x3c   : > { %v937_v22 = vld [vmem:[%s4669_s26 + $0x560] sm:$0xff]  ;;  %934 = vst [vmem:[%s4677_s27 + $0x2a0] sm:$0xff] %v933_v20  ;;  %936 = vst [vmem:[%s4677_s27 + $0x2a8] sm:$0xff] %v935_v21  ;;  %v939_v23 = vld [vmem:[%s4669_s26 + $0x570] sm:$0xff] }
  0x3d   : > { %938 = vst [vmem:[%s4677_s27 + $0x2b0] sm:$0xff] %v937_v22  ;;  %v941_v24 = vld [vmem:[%s4669_s26 + $0x580] sm:$0xff]  ;;  %v943_v25 = vld [vmem:[%s4669_s26 + $0x590] sm:$0xff]  ;;  %940 = vst [vmem:[%s4677_s27 + $0x2b8] sm:$0xff] %v939_v23 }
  0x3e   : > { %942 = vst [vmem:[%s4677_s27 + $0x2c0] sm:$0xff] %v941_v24  ;;  %944 = vst [vmem:[%s4677_s27 + $0x2c8] sm:$0xff] %v943_v25  ;;  %v945_v26 = vld [vmem:[%s4669_s26 + $0x5a0] sm:$0xff]  ;;  %v947_v27 = vld [vmem:[%s4669_s26 + $0x5b0] sm:$0xff] }
  0x3f   : > { %v949_v28 = vld [vmem:[%s4669_s26 + $0x5c0] sm:$0xff]  ;;  %946 = vst [vmem:[%s4677_s27 + $0x2d0] sm:$0xff] %v945_v26  ;;  %948 = vst [vmem:[%s4677_s27 + $0x2d8] sm:$0xff] %v947_v27  ;;  %v951_v29 = vld [vmem:[%s4669_s26 + $0x5d0] sm:$0xff] }
  0x40   : > { %950 = vst [vmem:[%s4677_s27 + $0x2e0] sm:$0xff] %v949_v28  ;;  %v953_v30 = vld [vmem:[%s4669_s26 + $0x5e0] sm:$0xff]  ;;  %v955_v31 = vld [vmem:[%s4669_s26 + $0x5f0] sm:$0xff]  ;;  %952 = vst [vmem:[%s4677_s27 + $0x2e8] sm:$0xff] %v951_v29 }
  0x41   : > { %954 = vst [vmem:[%s4677_s27 + $0x2f0] sm:$0xff] %v953_v30  ;;  %956 = vst [vmem:[%s4677_s27 + $0x2f8] sm:$0xff] %v955_v31  ;;  %v957_v32 = vld [vmem:[%s4669_s26 + $0x600] sm:$0xff]  ;;  %v959_v33 = vld [vmem:[%s4669_s26 + $0x610] sm:$0xff] }
  0x42   : > { %v961_v34 = vld [vmem:[%s4669_s26 + $0x620] sm:$0xff]  ;;  %958 = vst [vmem:[%s4677_s27 + $0x300] sm:$0xff] %v957_v32  ;;  %960 = vst [vmem:[%s4677_s27 + $0x308] sm:$0xff] %v959_v33  ;;  %v963_v35 = vld [vmem:[%s4669_s26 + $0x630] sm:$0xff] }
  0x43   : > { %962 = vst [vmem:[%s4677_s27 + $0x310] sm:$0xff] %v961_v34  ;;  %v965_v36 = vld [vmem:[%s4669_s26 + $0x640] sm:$0xff]  ;;  %v967_v37 = vld [vmem:[%s4669_s26 + $0x650] sm:$0xff]  ;;  %964 = vst [vmem:[%s4677_s27 + $0x318] sm:$0xff] %v963_v35 }
  0x44   : > { %966 = vst [vmem:[%s4677_s27 + $0x320] sm:$0xff] %v965_v36  ;;  %968 = vst [vmem:[%s4677_s27 + $0x328] sm:$0xff] %v967_v37  ;;  %v969_v38 = vld [vmem:[%s4669_s26 + $0x660] sm:$0xff]  ;;  %v971_v39 = vld [vmem:[%s4669_s26 + $0x670] sm:$0xff] }
  0x45   : > { %v973_v40 = vld [vmem:[%s4669_s26 + $0x680] sm:$0xff]  ;;  %970 = vst [vmem:[%s4677_s27 + $0x330] sm:$0xff] %v969_v38  ;;  %972 = vst [vmem:[%s4677_s27 + $0x338] sm:$0xff] %v971_v39  ;;  %v975_v41 = vld [vmem:[%s4669_s26 + $0x690] sm:$0xff] }
  0x46   : > { %974 = vst [vmem:[%s4677_s27 + $0x340] sm:$0xff] %v973_v40  ;;  %v977_v42 = vld [vmem:[%s4669_s26 + $0x6a0] sm:$0xff]  ;;  %v979_v43 = vld [vmem:[%s4669_s26 + $0x6b0] sm:$0xff]  ;;  %976 = vst [vmem:[%s4677_s27 + $0x348] sm:$0xff] %v975_v41 }
  0x47   : > { %978 = vst [vmem:[%s4677_s27 + $0x350] sm:$0xff] %v977_v42  ;;  %980 = vst [vmem:[%s4677_s27 + $0x358] sm:$0xff] %v979_v43  ;;  %v981_v44 = vld [vmem:[%s4669_s26 + $0x6c0] sm:$0xff]  ;;  %v983_v45 = vld [vmem:[%s4669_s26 + $0x6d0] sm:$0xff] }
  0x48   : > { %v985_v46 = vld [vmem:[%s4669_s26 + $0x6e0] sm:$0xff]  ;;  %982 = vst [vmem:[%s4677_s27 + $0x360] sm:$0xff] %v981_v44  ;;  %984 = vst [vmem:[%s4677_s27 + $0x368] sm:$0xff] %v983_v45  ;;  %v987_v47 = vld [vmem:[%s4669_s26 + $0x6f0] sm:$0xff] }
  0x49   : > { %986 = vst [vmem:[%s4677_s27 + $0x370] sm:$0xff] %v985_v46  ;;  %v989_v48 = vld [vmem:[%s4669_s26 + $0x700] sm:$0xff]  ;;  %v991_v49 = vld [vmem:[%s4669_s26 + $0x710] sm:$0xff]  ;;  %988 = vst [vmem:[%s4677_s27 + $0x378] sm:$0xff] %v987_v47 }
  0x4a   : > { %990 = vst [vmem:[%s4677_s27 + $0x380] sm:$0xff] %v989_v48  ;;  %992 = vst [vmem:[%s4677_s27 + $0x388] sm:$0xff] %v991_v49  ;;  %v993_v50 = vld [vmem:[%s4669_s26 + $0x720] sm:$0xff]  ;;  %v995_v51 = vld [vmem:[%s4669_s26 + $0x730] sm:$0xff] }
  0x4b   : > { %v997_v52 = vld [vmem:[%s4669_s26 + $0x740] sm:$0xff]  ;;  %994 = vst [vmem:[%s4677_s27 + $0x390] sm:$0xff] %v993_v50  ;;  %996 = vst [vmem:[%s4677_s27 + $0x398] sm:$0xff] %v995_v51  ;;  %v999_v53 = vld [vmem:[%s4669_s26 + $0x750] sm:$0xff] }
  0x4c   : > { %998 = vst [vmem:[%s4677_s27 + $0x3a0] sm:$0xff] %v997_v52  ;;  %v1001_v54 = vld [vmem:[%s4669_s26 + $0x760] sm:$0xff]  ;;  %v1003_v55 = vld [vmem:[%s4669_s26 + $0x770] sm:$0xff]  ;;  %1000 = vst [vmem:[%s4677_s27 + $0x3a8] sm:$0xff] %v999_v53 }
  0x4d   : > { %1002 = vst [vmem:[%s4677_s27 + $0x3b0] sm:$0xff] %v1001_v54  ;;  %1004 = vst [vmem:[%s4677_s27 + $0x3b8] sm:$0xff] %v1003_v55  ;;  %v1005_v56 = vld [vmem:[%s4669_s26 + $0x780] sm:$0xff]  ;;  %v1007_v57 = vld [vmem:[%s4669_s26 + $0x790] sm:$0xff] }
  0x4e   : > { %v1009_v58 = vld [vmem:[%s4669_s26 + $0x7a0] sm:$0xff]  ;;  %1006 = vst [vmem:[%s4677_s27 + $0x3c0] sm:$0xff] %v1005_v56  ;;  %1008 = vst [vmem:[%s4677_s27 + $0x3c8] sm:$0xff] %v1007_v57  ;;  %v1011_v59 = vld [vmem:[%s4669_s26 + $0x7b0] sm:$0xff] }
  0x4f   : > { %1010 = vst [vmem:[%s4677_s27 + $0x3d0] sm:$0xff] %v1009_v58  ;;  %v1013_v60 = vld [vmem:[%s4669_s26 + $0x7c0] sm:$0xff]  ;;  %v1015_v61 = vld [vmem:[%s4669_s26 + $0x7d0] sm:$0xff]  ;;  %1012 = vst [vmem:[%s4677_s27 + $0x3d8] sm:$0xff] %v1011_v59 }
  0x50   : > { %1014 = vst [vmem:[%s4677_s27 + $0x3e0] sm:$0xff] %v1013_v60  ;;  %1016 = vst [vmem:[%s4677_s27 + $0x3e8] sm:$0xff] %v1015_v61  ;;  %v1017_v62 = vld [vmem:[%s4669_s26 + $0x7e0] sm:$0xff]  ;;  %v1019_v63 = vld [vmem:[%s4669_s26 + $0x7f0] sm:$0xff] }
  0x51   : > { %v1021_v0 = vld [vmem:[%s4669_s26 + $0x800] sm:$0xff]  ;;  %1018 = vst [vmem:[%s4677_s27 + $0x3f0] sm:$0xff] %v1017_v62  ;;  %1020 = vst [vmem:[%s4677_s27 + $0x3f8] sm:$0xff] %v1019_v63  ;;  %v1023_v1 = vld [vmem:[%s4669_s26 + $0x810] sm:$0xff] }
  0x52   : > { %1022 = vst [vmem:[%s4677_s27 + $0x400] sm:$0xff] %v1021_v0  ;;  %v1025_v2 = vld [vmem:[%s4669_s26 + $0x820] sm:$0xff]  ;;  %v1027_v3 = vld [vmem:[%s4669_s26 + $0x830] sm:$0xff]  ;;  %1024 = vst [vmem:[%s4677_s27 + $0x408] sm:$0xff] %v1023_v1 }
  0x53   : > { %1026 = vst [vmem:[%s4677_s27 + $0x410] sm:$0xff] %v1025_v2  ;;  %1028 = vst [vmem:[%s4677_s27 + $0x418] sm:$0xff] %v1027_v3  ;;  %v1029_v4 = vld [vmem:[%s4669_s26 + $0x840] sm:$0xff]  ;;  %v1031_v5 = vld [vmem:[%s4669_s26 + $0x850] sm:$0xff] }
  0x54   : > { %v1033_v6 = vld [vmem:[%s4669_s26 + $0x860] sm:$0xff]  ;;  %1030 = vst [vmem:[%s4677_s27 + $0x420] sm:$0xff] %v1029_v4  ;;  %1032 = vst [vmem:[%s4677_s27 + $0x428] sm:$0xff] %v1031_v5  ;;  %v1035_v7 = vld [vmem:[%s4669_s26 + $0x870] sm:$0xff] }
  0x55   : > { %1034 = vst [vmem:[%s4677_s27 + $0x430] sm:$0xff] %v1033_v6  ;;  %v1037_v8 = vld [vmem:[%s4669_s26 + $0x880] sm:$0xff]  ;;  %v1039_v9 = vld [vmem:[%s4669_s26 + $0x890] sm:$0xff]  ;;  %1036 = vst [vmem:[%s4677_s27 + $0x438] sm:$0xff] %v1035_v7 }
  0x56   : > { %1038 = vst [vmem:[%s4677_s27 + $0x440] sm:$0xff] %v1037_v8  ;;  %1040 = vst [vmem:[%s4677_s27 + $0x448] sm:$0xff] %v1039_v9  ;;  %v1041_v10 = vld [vmem:[%s4669_s26 + $0x8a0] sm:$0xff]  ;;  %v1043_v11 = vld [vmem:[%s4669_s26 + $0x8b0] sm:$0xff] }
  0x57   : > { %v1045_v12 = vld [vmem:[%s4669_s26 + $0x8c0] sm:$0xff]  ;;  %1042 = vst [vmem:[%s4677_s27 + $0x450] sm:$0xff] %v1041_v10  ;;  %1044 = vst [vmem:[%s4677_s27 + $0x458] sm:$0xff] %v1043_v11  ;;  %v1047_v13 = vld [vmem:[%s4669_s26 + $0x8d0] sm:$0xff] }
  0x58   : > { %1046 = vst [vmem:[%s4677_s27 + $0x460] sm:$0xff] %v1045_v12  ;;  %v1049_v14 = vld [vmem:[%s4669_s26 + $0x8e0] sm:$0xff]  ;;  %v1051_v15 = vld [vmem:[%s4669_s26 + $0x8f0] sm:$0xff]  ;;  %1048 = vst [vmem:[%s4677_s27 + $0x468] sm:$0xff] %v1047_v13 }
  0x59   : > { %1050 = vst [vmem:[%s4677_s27 + $0x470] sm:$0xff] %v1049_v14  ;;  %1052 = vst [vmem:[%s4677_s27 + $0x478] sm:$0xff] %v1051_v15  ;;  %v1053_v16 = vld [vmem:[%s4669_s26 + $0x900] sm:$0xff]  ;;  %v1055_v17 = vld [vmem:[%s4669_s26 + $0x910] sm:$0xff] }
  0x5a   : > { %v1057_v18 = vld [vmem:[%s4669_s26 + $0x920] sm:$0xff]  ;;  %1054 = vst [vmem:[%s4677_s27 + $0x480] sm:$0xff] %v1053_v16  ;;  %1056 = vst [vmem:[%s4677_s27 + $0x488] sm:$0xff] %v1055_v17  ;;  %v1059_v19 = vld [vmem:[%s4669_s26 + $0x930] sm:$0xff] }
  0x5b   : > { %1058 = vst [vmem:[%s4677_s27 + $0x490] sm:$0xff] %v1057_v18  ;;  %v1061_v20 = vld [vmem:[%s4669_s26 + $0x940] sm:$0xff]  ;;  %v1063_v21 = vld [vmem:[%s4669_s26 + $0x950] sm:$0xff]  ;;  %1060 = vst [vmem:[%s4677_s27 + $0x498] sm:$0xff] %v1059_v19 }
  0x5c   : > { %1062 = vst [vmem:[%s4677_s27 + $0x4a0] sm:$0xff] %v1061_v20  ;;  %1064 = vst [vmem:[%s4677_s27 + $0x4a8] sm:$0xff] %v1063_v21  ;;  %v1065_v22 = vld [vmem:[%s4669_s26 + $0x960] sm:$0xff]  ;;  %v1067_v23 = vld [vmem:[%s4669_s26 + $0x970] sm:$0xff] }
  0x5d   : > { %v1069_v24 = vld [vmem:[%s4669_s26 + $0x980] sm:$0xff]  ;;  %1066 = vst [vmem:[%s4677_s27 + $0x4b0] sm:$0xff] %v1065_v22  ;;  %1068 = vst [vmem:[%s4677_s27 + $0x4b8] sm:$0xff] %v1067_v23  ;;  %v1071_v25 = vld [vmem:[%s4669_s26 + $0x990] sm:$0xff] }
  0x5e   : > { %1070 = vst [vmem:[%s4677_s27 + $0x4c0] sm:$0xff] %v1069_v24  ;;  %v1073_v26 = vld [vmem:[%s4669_s26 + $0x9a0] sm:$0xff]  ;;  %v1075_v27 = vld [vmem:[%s4669_s26 + $0x9b0] sm:$0xff]  ;;  %1072 = vst [vmem:[%s4677_s27 + $0x4c8] sm:$0xff] %v1071_v25 }
  0x5f   : > { %1074 = vst [vmem:[%s4677_s27 + $0x4d0] sm:$0xff] %v1073_v26  ;;  %1076 = vst [vmem:[%s4677_s27 + $0x4d8] sm:$0xff] %v1075_v27  ;;  %v1077_v28 = vld [vmem:[%s4669_s26 + $0x9c0] sm:$0xff]  ;;  %v1079_v29 = vld [vmem:[%s4669_s26 + $0x9d0] sm:$0xff] }
  0x60   : > { %v1081_v30 = vld [vmem:[%s4669_s26 + $0x9e0] sm:$0xff]  ;;  %1078 = vst [vmem:[%s4677_s27 + $0x4e0] sm:$0xff] %v1077_v28  ;;  %1080 = vst [vmem:[%s4677_s27 + $0x4e8] sm:$0xff] %v1079_v29  ;;  %v1083_v31 = vld [vmem:[%s4669_s26 + $0x9f0] sm:$0xff] }
  0x61   : > { %1082 = vst [vmem:[%s4677_s27 + $0x4f0] sm:$0xff] %v1081_v30  ;;  %v1085_v32 = vld [vmem:[%s4669_s26 + $0xa00] sm:$0xff]  ;;  %v1087_v33 = vld [vmem:[%s4669_s26 + $0xa10] sm:$0xff]  ;;  %1084 = vst [vmem:[%s4677_s27 + $0x4f8] sm:$0xff] %v1083_v31 }
  0x62   : > { %1086 = vst [vmem:[%s4677_s27 + $0x500] sm:$0xff] %v1085_v32  ;;  %1088 = vst [vmem:[%s4677_s27 + $0x508] sm:$0xff] %v1087_v33  ;;  %v1089_v34 = vld [vmem:[%s4669_s26 + $0xa20] sm:$0xff]  ;;  %v1091_v35 = vld [vmem:[%s4669_s26 + $0xa30] sm:$0xff] }
  0x63   : > { %v1093_v36 = vld [vmem:[%s4669_s26 + $0xa40] sm:$0xff]  ;;  %1090 = vst [vmem:[%s4677_s27 + $0x510] sm:$0xff] %v1089_v34  ;;  %1092 = vst [vmem:[%s4677_s27 + $0x518] sm:$0xff] %v1091_v35  ;;  %v1095_v37 = vld [vmem:[%s4669_s26 + $0xa50] sm:$0xff] }
  0x64   : > { %1094 = vst [vmem:[%s4677_s27 + $0x520] sm:$0xff] %v1093_v36  ;;  %v1097_v38 = vld [vmem:[%s4669_s26 + $0xa60] sm:$0xff]  ;;  %v1099_v39 = vld [vmem:[%s4669_s26 + $0xa70] sm:$0xff]  ;;  %1096 = vst [vmem:[%s4677_s27 + $0x528] sm:$0xff] %v1095_v37 }
  0x65   : > { %1098 = vst [vmem:[%s4677_s27 + $0x530] sm:$0xff] %v1097_v38  ;;  %1100 = vst [vmem:[%s4677_s27 + $0x538] sm:$0xff] %v1099_v39  ;;  %v1101_v40 = vld [vmem:[%s4669_s26 + $0xa80] sm:$0xff]  ;;  %v1103_v41 = vld [vmem:[%s4669_s26 + $0xa90] sm:$0xff] }
  0x66   : > { %v1105_v42 = vld [vmem:[%s4669_s26 + $0xaa0] sm:$0xff]  ;;  %1102 = vst [vmem:[%s4677_s27 + $0x540] sm:$0xff] %v1101_v40  ;;  %1104 = vst [vmem:[%s4677_s27 + $0x548] sm:$0xff] %v1103_v41  ;;  %v1107_v43 = vld [vmem:[%s4669_s26 + $0xab0] sm:$0xff] }
  0x67   : > { %1106 = vst [vmem:[%s4677_s27 + $0x550] sm:$0xff] %v1105_v42  ;;  %v1109_v44 = vld [vmem:[%s4669_s26 + $0xac0] sm:$0xff]  ;;  %v1111_v45 = vld [vmem:[%s4669_s26 + $0xad0] sm:$0xff]  ;;  %1108 = vst [vmem:[%s4677_s27 + $0x558] sm:$0xff] %v1107_v43 }
  0x68   : > { %1110 = vst [vmem:[%s4677_s27 + $0x560] sm:$0xff] %v1109_v44  ;;  %1112 = vst [vmem:[%s4677_s27 + $0x568] sm:$0xff] %v1111_v45  ;;  %v1113_v46 = vld [vmem:[%s4669_s26 + $0xae0] sm:$0xff]  ;;  %v1115_v47 = vld [vmem:[%s4669_s26 + $0xaf0] sm:$0xff] }
  0x69   : > { %v1117_v48 = vld [vmem:[%s4669_s26 + $0xb00] sm:$0xff]  ;;  %1114 = vst [vmem:[%s4677_s27 + $0x570] sm:$0xff] %v1113_v46  ;;  %1116 = vst [vmem:[%s4677_s27 + $0x578] sm:$0xff] %v1115_v47  ;;  %v1119_v49 = vld [vmem:[%s4669_s26 + $0xb10] sm:$0xff] }
  0x6a   : > { %1118 = vst [vmem:[%s4677_s27 + $0x580] sm:$0xff] %v1117_v48  ;;  %v1121_v50 = vld [vmem:[%s4669_s26 + $0xb20] sm:$0xff]  ;;  %v1123_v51 = vld [vmem:[%s4669_s26 + $0xb30] sm:$0xff]  ;;  %1120 = vst [vmem:[%s4677_s27 + $0x588] sm:$0xff] %v1119_v49 }
  0x6b   : > { %1122 = vst [vmem:[%s4677_s27 + $0x590] sm:$0xff] %v1121_v50  ;;  %1124 = vst [vmem:[%s4677_s27 + $0x598] sm:$0xff] %v1123_v51  ;;  %v1125_v52 = vld [vmem:[%s4669_s26 + $0xb40] sm:$0xff]  ;;  %v1127_v53 = vld [vmem:[%s4669_s26 + $0xb50] sm:$0xff] }
  0x6c   : > { %v1129_v54 = vld [vmem:[%s4669_s26 + $0xb60] sm:$0xff]  ;;  %1126 = vst [vmem:[%s4677_s27 + $0x5a0] sm:$0xff] %v1125_v52  ;;  %1128 = vst [vmem:[%s4677_s27 + $0x5a8] sm:$0xff] %v1127_v53  ;;  %v1131_v55 = vld [vmem:[%s4669_s26 + $0xb70] sm:$0xff] }
  0x6d   : > { %1130 = vst [vmem:[%s4677_s27 + $0x5b0] sm:$0xff] %v1129_v54  ;;  %v1133_v56 = vld [vmem:[%s4669_s26 + $0xb80] sm:$0xff]  ;;  %v1135_v57 = vld [vmem:[%s4669_s26 + $0xb90] sm:$0xff]  ;;  %1132 = vst [vmem:[%s4677_s27 + $0x5b8] sm:$0xff] %v1131_v55 }
  0x6e   : > { %1134 = vst [vmem:[%s4677_s27 + $0x5c0] sm:$0xff] %v1133_v56  ;;  %1136 = vst [vmem:[%s4677_s27 + $0x5c8] sm:$0xff] %v1135_v57  ;;  %v1137_v58 = vld [vmem:[%s4669_s26 + $0xba0] sm:$0xff]  ;;  %v1139_v59 = vld [vmem:[%s4669_s26 + $0xbb0] sm:$0xff] }
  0x6f   : > { %v1141_v60 = vld [vmem:[%s4669_s26 + $0xbc0] sm:$0xff]  ;;  %1138 = vst [vmem:[%s4677_s27 + $0x5d0] sm:$0xff] %v1137_v58  ;;  %1140 = vst [vmem:[%s4677_s27 + $0x5d8] sm:$0xff] %v1139_v59  ;;  %v1143_v61 = vld [vmem:[%s4669_s26 + $0xbd0] sm:$0xff] }
  0x70   : > { %1142 = vst [vmem:[%s4677_s27 + $0x5e0] sm:$0xff] %v1141_v60  ;;  %v1145_v62 = vld [vmem:[%s4669_s26 + $0xbe0] sm:$0xff]  ;;  %v1147_v63 = vld [vmem:[%s4669_s26 + $0xbf0] sm:$0xff]  ;;  %1144 = vst [vmem:[%s4677_s27 + $0x5e8] sm:$0xff] %v1143_v61 }
  0x71   : > { %1146 = vst [vmem:[%s4677_s27 + $0x5f0] sm:$0xff] %v1145_v62  ;;  %1148 = vst [vmem:[%s4677_s27 + $0x5f8] sm:$0xff] %v1147_v63  ;;  %v1149_v0 = vld [vmem:[%s4669_s26 + $0xc00] sm:$0xff]  ;;  %v1151_v1 = vld [vmem:[%s4669_s26 + $0xc10] sm:$0xff] }
  0x72   : > { %v1153_v2 = vld [vmem:[%s4669_s26 + $0xc20] sm:$0xff]  ;;  %1150 = vst [vmem:[%s4677_s27 + $0x600] sm:$0xff] %v1149_v0  ;;  %1152 = vst [vmem:[%s4677_s27 + $0x608] sm:$0xff] %v1151_v1  ;;  %v1155_v3 = vld [vmem:[%s4669_s26 + $0xc30] sm:$0xff] }
  0x73   : > { %1154 = vst [vmem:[%s4677_s27 + $0x610] sm:$0xff] %v1153_v2  ;;  %v1157_v4 = vld [vmem:[%s4669_s26 + $0xc40] sm:$0xff]  ;;  %v1159_v5 = vld [vmem:[%s4669_s26 + $0xc50] sm:$0xff]  ;;  %1156 = vst [vmem:[%s4677_s27 + $0x618] sm:$0xff] %v1155_v3 }
  0x74   : > { %1158 = vst [vmem:[%s4677_s27 + $0x620] sm:$0xff] %v1157_v4  ;;  %1160 = vst [vmem:[%s4677_s27 + $0x628] sm:$0xff] %v1159_v5  ;;  %v1161_v6 = vld [vmem:[%s4669_s26 + $0xc60] sm:$0xff]  ;;  %v1163_v7 = vld [vmem:[%s4669_s26 + $0xc70] sm:$0xff] }
  0x75   : > { %v1165_v8 = vld [vmem:[%s4669_s26 + $0xc80] sm:$0xff]  ;;  %1162 = vst [vmem:[%s4677_s27 + $0x630] sm:$0xff] %v1161_v6  ;;  %1164 = vst [vmem:[%s4677_s27 + $0x638] sm:$0xff] %v1163_v7  ;;  %v1167_v9 = vld [vmem:[%s4669_s26 + $0xc90] sm:$0xff] }
  0x76   : > { %1166 = vst [vmem:[%s4677_s27 + $0x640] sm:$0xff] %v1165_v8  ;;  %v1169_v10 = vld [vmem:[%s4669_s26 + $0xca0] sm:$0xff]  ;;  %v1171_v11 = vld [vmem:[%s4669_s26 + $0xcb0] sm:$0xff]  ;;  %1168 = vst [vmem:[%s4677_s27 + $0x648] sm:$0xff] %v1167_v9 }
  0x77   : > { %1170 = vst [vmem:[%s4677_s27 + $0x650] sm:$0xff] %v1169_v10  ;;  %1172 = vst [vmem:[%s4677_s27 + $0x658] sm:$0xff] %v1171_v11  ;;  %v1173_v12 = vld [vmem:[%s4669_s26 + $0xcc0] sm:$0xff]  ;;  %v1175_v13 = vld [vmem:[%s4669_s26 + $0xcd0] sm:$0xff] }
  0x78   : > { %v1177_v14 = vld [vmem:[%s4669_s26 + $0xce0] sm:$0xff]  ;;  %1174 = vst [vmem:[%s4677_s27 + $0x660] sm:$0xff] %v1173_v12  ;;  %1176 = vst [vmem:[%s4677_s27 + $0x668] sm:$0xff] %v1175_v13  ;;  %v1179_v15 = vld [vmem:[%s4669_s26 + $0xcf0] sm:$0xff] }
  0x79   : > { %1178 = vst [vmem:[%s4677_s27 + $0x670] sm:$0xff] %v1177_v14  ;;  %v1181_v16 = vld [vmem:[%s4669_s26 + $0xd00] sm:$0xff]  ;;  %v1183_v17 = vld [vmem:[%s4669_s26 + $0xd10] sm:$0xff]  ;;  %1180 = vst [vmem:[%s4677_s27 + $0x678] sm:$0xff] %v1179_v15 }
  0x7a   : > { %1182 = vst [vmem:[%s4677_s27 + $0x680] sm:$0xff] %v1181_v16  ;;  %1184 = vst [vmem:[%s4677_s27 + $0x688] sm:$0xff] %v1183_v17  ;;  %v1185_v18 = vld [vmem:[%s4669_s26 + $0xd20] sm:$0xff]  ;;  %v1187_v19 = vld [vmem:[%s4669_s26 + $0xd30] sm:$0xff] }
  0x7b   : > { %v1189_v20 = vld [vmem:[%s4669_s26 + $0xd40] sm:$0xff]  ;;  %1186 = vst [vmem:[%s4677_s27 + $0x690] sm:$0xff] %v1185_v18  ;;  %1188 = vst [vmem:[%s4677_s27 + $0x698] sm:$0xff] %v1187_v19  ;;  %v1191_v21 = vld [vmem:[%s4669_s26 + $0xd50] sm:$0xff] }
  0x7c   : > { %1190 = vst [vmem:[%s4677_s27 + $0x6a0] sm:$0xff] %v1189_v20  ;;  %v1193_v22 = vld [vmem:[%s4669_s26 + $0xd60] sm:$0xff]  ;;  %v1195_v23 = vld [vmem:[%s4669_s26 + $0xd70] sm:$0xff]  ;;  %1192 = vst [vmem:[%s4677_s27 + $0x6a8] sm:$0xff] %v1191_v21 }
  0x7d   : > { %1194 = vst [vmem:[%s4677_s27 + $0x6b0] sm:$0xff] %v1193_v22  ;;  %1196 = vst [vmem:[%s4677_s27 + $0x6b8] sm:$0xff] %v1195_v23  ;;  %v1197_v24 = vld [vmem:[%s4669_s26 + $0xd80] sm:$0xff]  ;;  %v1199_v25 = vld [vmem:[%s4669_s26 + $0xd90] sm:$0xff] }
  0x7e   : > { %v1201_v26 = vld [vmem:[%s4669_s26 + $0xda0] sm:$0xff]  ;;  %1198 = vst [vmem:[%s4677_s27 + $0x6c0] sm:$0xff] %v1197_v24  ;;  %1200 = vst [vmem:[%s4677_s27 + $0x6c8] sm:$0xff] %v1199_v25  ;;  %v1203_v27 = vld [vmem:[%s4669_s26 + $0xdb0] sm:$0xff] }
  0x7f   : > { %1202 = vst [vmem:[%s4677_s27 + $0x6d0] sm:$0xff] %v1201_v26  ;;  %v1205_v28 = vld [vmem:[%s4669_s26 + $0xdc0] sm:$0xff]  ;;  %v1207_v29 = vld [vmem:[%s4669_s26 + $0xdd0] sm:$0xff]  ;;  %1204 = vst [vmem:[%s4677_s27 + $0x6d8] sm:$0xff] %v1203_v27 }
  0x80   : > { %1206 = vst [vmem:[%s4677_s27 + $0x6e0] sm:$0xff] %v1205_v28  ;;  %1208 = vst [vmem:[%s4677_s27 + $0x6e8] sm:$0xff] %v1207_v29  ;;  %v1209_v30 = vld [vmem:[%s4669_s26 + $0xde0] sm:$0xff]  ;;  %v1211_v31 = vld [vmem:[%s4669_s26 + $0xdf0] sm:$0xff] }
  0x81   : > { %v1213_v32 = vld [vmem:[%s4669_s26 + $0xe00] sm:$0xff]  ;;  %1210 = vst [vmem:[%s4677_s27 + $0x6f0] sm:$0xff] %v1209_v30  ;;  %1212 = vst [vmem:[%s4677_s27 + $0x6f8] sm:$0xff] %v1211_v31  ;;  %v1215_v33 = vld [vmem:[%s4669_s26 + $0xe10] sm:$0xff] }
  0x82   : > { %1214 = vst [vmem:[%s4677_s27 + $0x700] sm:$0xff] %v1213_v32  ;;  %v1217_v34 = vld [vmem:[%s4669_s26 + $0xe20] sm:$0xff]  ;;  %v1219_v35 = vld [vmem:[%s4669_s26 + $0xe30] sm:$0xff]  ;;  %1216 = vst [vmem:[%s4677_s27 + $0x708] sm:$0xff] %v1215_v33 }
  0x83   : > { %1218 = vst [vmem:[%s4677_s27 + $0x710] sm:$0xff] %v1217_v34  ;;  %1220 = vst [vmem:[%s4677_s27 + $0x718] sm:$0xff] %v1219_v35  ;;  %v1221_v36 = vld [vmem:[%s4669_s26 + $0xe40] sm:$0xff]  ;;  %v1223_v37 = vld [vmem:[%s4669_s26 + $0xe50] sm:$0xff] }
  0x84   : > { %v1225_v38 = vld [vmem:[%s4669_s26 + $0xe60] sm:$0xff]  ;;  %1222 = vst [vmem:[%s4677_s27 + $0x720] sm:$0xff] %v1221_v36  ;;  %1224 = vst [vmem:[%s4677_s27 + $0x728] sm:$0xff] %v1223_v37  ;;  %v1227_v39 = vld [vmem:[%s4669_s26 + $0xe70] sm:$0xff] }
  0x85   : > { %1226 = vst [vmem:[%s4677_s27 + $0x730] sm:$0xff] %v1225_v38  ;;  %v1229_v40 = vld [vmem:[%s4669_s26 + $0xe80] sm:$0xff]  ;;  %v1231_v41 = vld [vmem:[%s4669_s26 + $0xe90] sm:$0xff]  ;;  %1228 = vst [vmem:[%s4677_s27 + $0x738] sm:$0xff] %v1227_v39 }
  0x86   : > { %1230 = vst [vmem:[%s4677_s27 + $0x740] sm:$0xff] %v1229_v40  ;;  %1232 = vst [vmem:[%s4677_s27 + $0x748] sm:$0xff] %v1231_v41  ;;  %v1233_v42 = vld [vmem:[%s4669_s26 + $0xea0] sm:$0xff]  ;;  %v1235_v43 = vld [vmem:[%s4669_s26 + $0xeb0] sm:$0xff] }
  0x87   : > { %v1237_v44 = vld [vmem:[%s4669_s26 + $0xec0] sm:$0xff]  ;;  %1234 = vst [vmem:[%s4677_s27 + $0x750] sm:$0xff] %v1233_v42  ;;  %1236 = vst [vmem:[%s4677_s27 + $0x758] sm:$0xff] %v1235_v43  ;;  %v1239_v45 = vld [vmem:[%s4669_s26 + $0xed0] sm:$0xff] }
  0x88   : > { %1238 = vst [vmem:[%s4677_s27 + $0x760] sm:$0xff] %v1237_v44  ;;  %v1241_v46 = vld [vmem:[%s4669_s26 + $0xee0] sm:$0xff]  ;;  %v1243_v47 = vld [vmem:[%s4669_s26 + $0xef0] sm:$0xff]  ;;  %1240 = vst [vmem:[%s4677_s27 + $0x768] sm:$0xff] %v1239_v45 }
  0x89   : > { %1242 = vst [vmem:[%s4677_s27 + $0x770] sm:$0xff] %v1241_v46  ;;  %1244 = vst [vmem:[%s4677_s27 + $0x778] sm:$0xff] %v1243_v47  ;;  %v1245_v48 = vld [vmem:[%s4669_s26 + $0xf00] sm:$0xff]  ;;  %v1247_v49 = vld [vmem:[%s4669_s26 + $0xf10] sm:$0xff] }
  0x8a   : > { %v1249_v50 = vld [vmem:[%s4669_s26 + $0xf20] sm:$0xff]  ;;  %1246 = vst [vmem:[%s4677_s27 + $0x780] sm:$0xff] %v1245_v48  ;;  %1248 = vst [vmem:[%s4677_s27 + $0x788] sm:$0xff] %v1247_v49  ;;  %v1251_v51 = vld [vmem:[%s4669_s26 + $0xf30] sm:$0xff] }
  0x8b   : > { %1250 = vst [vmem:[%s4677_s27 + $0x790] sm:$0xff] %v1249_v50  ;;  %v1253_v52 = vld [vmem:[%s4669_s26 + $0xf40] sm:$0xff]  ;;  %v1255_v53 = vld [vmem:[%s4669_s26 + $0xf50] sm:$0xff]  ;;  %1252 = vst [vmem:[%s4677_s27 + $0x798] sm:$0xff] %v1251_v51 }
  0x8c   : > { %1254 = vst [vmem:[%s4677_s27 + $0x7a0] sm:$0xff] %v1253_v52  ;;  %1256 = vst [vmem:[%s4677_s27 + $0x7a8] sm:$0xff] %v1255_v53  ;;  %v1257_v54 = vld [vmem:[%s4669_s26 + $0xf60] sm:$0xff]  ;;  %v1259_v55 = vld [vmem:[%s4669_s26 + $0xf70] sm:$0xff] }
  0x8d   : > { %v1261_v56 = vld [vmem:[%s4669_s26 + $0xf80] sm:$0xff]  ;;  %1258 = vst [vmem:[%s4677_s27 + $0x7b0] sm:$0xff] %v1257_v54  ;;  %1260 = vst [vmem:[%s4677_s27 + $0x7b8] sm:$0xff] %v1259_v55  ;;  %v1263_v57 = vld [vmem:[%s4669_s26 + $0xf90] sm:$0xff] }
  0x8e   : > { %1262 = vst [vmem:[%s4677_s27 + $0x7c0] sm:$0xff] %v1261_v56  ;;  %v1265_v58 = vld [vmem:[%s4669_s26 + $0xfa0] sm:$0xff]  ;;  %v1267_v59 = vld [vmem:[%s4669_s26 + $0xfb0] sm:$0xff]  ;;  %1264 = vst [vmem:[%s4677_s27 + $0x7c8] sm:$0xff] %v1263_v57 }
  0x8f   : > { %1266 = vst [vmem:[%s4677_s27 + $0x7d0] sm:$0xff] %v1265_v58  ;;  %1268 = vst [vmem:[%s4677_s27 + $0x7d8] sm:$0xff] %v1267_v59  ;;  %v1269_v60 = vld [vmem:[%s4669_s26 + $0xfc0] sm:$0xff]  ;;  %v1271_v61 = vld [vmem:[%s4669_s26 + $0xfd0] sm:$0xff] }
  0x90   : > { %v1273_v62 = vld [vmem:[%s4669_s26 + $0xfe0] sm:$0xff]  ;;  %1270 = vst [vmem:[%s4677_s27 + $0x7e0] sm:$0xff] %v1269_v60  ;;  %1272 = vst [vmem:[%s4677_s27 + $0x7e8] sm:$0xff] %v1271_v61  ;;  %v1275_v63 = vld [vmem:[%s4669_s26 + $0xff0] sm:$0xff] }
  0x91   : > { %1274 = vst [vmem:[%s4677_s27 + $0x7f0] sm:$0xff] %v1273_v62  ;;  %v1277_v0 = vld [vmem:[%s4669_s26 + $0x1000] sm:$0xff]  ;;  %v1279_v1 = vld [vmem:[%s4669_s26 + $0x1010] sm:$0xff]  ;;  %1276 = vst [vmem:[%s4677_s27 + $0x7f8] sm:$0xff] %v1275_v63 }
  0x92   : > { %1278 = vst [vmem:[%s4677_s27 + $0x800] sm:$0xff] %v1277_v0  ;;  %1280 = vst [vmem:[%s4677_s27 + $0x808] sm:$0xff] %v1279_v1  ;;  %v1281_v2 = vld [vmem:[%s4669_s26 + $0x1020] sm:$0xff]  ;;  %v1283_v3 = vld [vmem:[%s4669_s26 + $0x1030] sm:$0xff] }
  0x93   : > { %v1285_v4 = vld [vmem:[%s4669_s26 + $0x1040] sm:$0xff]  ;;  %1282 = vst [vmem:[%s4677_s27 + $0x810] sm:$0xff] %v1281_v2  ;;  %1284 = vst [vmem:[%s4677_s27 + $0x818] sm:$0xff] %v1283_v3  ;;  %v1287_v5 = vld [vmem:[%s4669_s26 + $0x1050] sm:$0xff] }
  0x94   : > { %1286 = vst [vmem:[%s4677_s27 + $0x820] sm:$0xff] %v1285_v4  ;;  %v1289_v6 = vld [vmem:[%s4669_s26 + $0x1060] sm:$0xff]  ;;  %v1291_v7 = vld [vmem:[%s4669_s26 + $0x1070] sm:$0xff]  ;;  %1288 = vst [vmem:[%s4677_s27 + $0x828] sm:$0xff] %v1287_v5 }
  0x95   : > { %1290 = vst [vmem:[%s4677_s27 + $0x830] sm:$0xff] %v1289_v6  ;;  %1292 = vst [vmem:[%s4677_s27 + $0x838] sm:$0xff] %v1291_v7  ;;  %v1293_v8 = vld [vmem:[%s4669_s26 + $0x1080] sm:$0xff]  ;;  %v1295_v9 = vld [vmem:[%s4669_s26 + $0x1090] sm:$0xff] }
  0x96   : > { %v1297_v10 = vld [vmem:[%s4669_s26 + $0x10a0] sm:$0xff]  ;;  %1294 = vst [vmem:[%s4677_s27 + $0x840] sm:$0xff] %v1293_v8  ;;  %1296 = vst [vmem:[%s4677_s27 + $0x848] sm:$0xff] %v1295_v9  ;;  %v1299_v11 = vld [vmem:[%s4669_s26 + $0x10b0] sm:$0xff] }
  0x97   : > { %1298 = vst [vmem:[%s4677_s27 + $0x850] sm:$0xff] %v1297_v10  ;;  %v1301_v12 = vld [vmem:[%s4669_s26 + $0x10c0] sm:$0xff]  ;;  %v1303_v13 = vld [vmem:[%s4669_s26 + $0x10d0] sm:$0xff]  ;;  %1300 = vst [vmem:[%s4677_s27 + $0x858] sm:$0xff] %v1299_v11 }
  0x98   : > { %1302 = vst [vmem:[%s4677_s27 + $0x860] sm:$0xff] %v1301_v12  ;;  %1304 = vst [vmem:[%s4677_s27 + $0x868] sm:$0xff] %v1303_v13  ;;  %v1305_v14 = vld [vmem:[%s4669_s26 + $0x10e0] sm:$0xff]  ;;  %v1307_v15 = vld [vmem:[%s4669_s26 + $0x10f0] sm:$0xff] }
  0x99   : > { %v1309_v16 = vld [vmem:[%s4669_s26 + $0x1100] sm:$0xff]  ;;  %1306 = vst [vmem:[%s4677_s27 + $0x870] sm:$0xff] %v1305_v14  ;;  %1308 = vst [vmem:[%s4677_s27 + $0x878] sm:$0xff] %v1307_v15  ;;  %v1311_v17 = vld [vmem:[%s4669_s26 + $0x1110] sm:$0xff] }
  0x9a   : > { %1310 = vst [vmem:[%s4677_s27 + $0x880] sm:$0xff] %v1309_v16  ;;  %v1313_v18 = vld [vmem:[%s4669_s26 + $0x1120] sm:$0xff]  ;;  %v1315_v19 = vld [vmem:[%s4669_s26 + $0x1130] sm:$0xff]  ;;  %1312 = vst [vmem:[%s4677_s27 + $0x888] sm:$0xff] %v1311_v17 }
  0x9b   : > { %1314 = vst [vmem:[%s4677_s27 + $0x890] sm:$0xff] %v1313_v18  ;;  %1316 = vst [vmem:[%s4677_s27 + $0x898] sm:$0xff] %v1315_v19  ;;  %v1317_v20 = vld [vmem:[%s4669_s26 + $0x1140] sm:$0xff]  ;;  %v1319_v21 = vld [vmem:[%s4669_s26 + $0x1150] sm:$0xff] }
  0x9c   : > { %v1321_v22 = vld [vmem:[%s4669_s26 + $0x1160] sm:$0xff]  ;;  %1318 = vst [vmem:[%s4677_s27 + $0x8a0] sm:$0xff] %v1317_v20  ;;  %1320 = vst [vmem:[%s4677_s27 + $0x8a8] sm:$0xff] %v1319_v21  ;;  %v1323_v23 = vld [vmem:[%s4669_s26 + $0x1170] sm:$0xff] }
  0x9d   : > { %1322 = vst [vmem:[%s4677_s27 + $0x8b0] sm:$0xff] %v1321_v22  ;;  %v1325_v24 = vld [vmem:[%s4669_s26 + $0x1180] sm:$0xff]  ;;  %v1327_v25 = vld [vmem:[%s4669_s26 + $0x1190] sm:$0xff]  ;;  %1324 = vst [vmem:[%s4677_s27 + $0x8b8] sm:$0xff] %v1323_v23 }
  0x9e   : > { %1326 = vst [vmem:[%s4677_s27 + $0x8c0] sm:$0xff] %v1325_v24  ;;  %1328 = vst [vmem:[%s4677_s27 + $0x8c8] sm:$0xff] %v1327_v25  ;;  %v1329_v26 = vld [vmem:[%s4669_s26 + $0x11a0] sm:$0xff]  ;;  %v1331_v27 = vld [vmem:[%s4669_s26 + $0x11b0] sm:$0xff] }
  0x9f   : > { %v1333_v28 = vld [vmem:[%s4669_s26 + $0x11c0] sm:$0xff]  ;;  %1330 = vst [vmem:[%s4677_s27 + $0x8d0] sm:$0xff] %v1329_v26  ;;  %1332 = vst [vmem:[%s4677_s27 + $0x8d8] sm:$0xff] %v1331_v27  ;;  %v1335_v29 = vld [vmem:[%s4669_s26 + $0x11d0] sm:$0xff] }
  0xa0   : > { %1334 = vst [vmem:[%s4677_s27 + $0x8e0] sm:$0xff] %v1333_v28  ;;  %v1337_v30 = vld [vmem:[%s4669_s26 + $0x11e0] sm:$0xff]  ;;  %v1339_v31 = vld [vmem:[%s4669_s26 + $0x11f0] sm:$0xff]  ;;  %1336 = vst [vmem:[%s4677_s27 + $0x8e8] sm:$0xff] %v1335_v29 }
  0xa1   : > { %1338 = vst [vmem:[%s4677_s27 + $0x8f0] sm:$0xff] %v1337_v30  ;;  %1340 = vst [vmem:[%s4677_s27 + $0x8f8] sm:$0xff] %v1339_v31 }
  0xa2 PF: > { %p3727_p6 = scmp.ge.s32.totalorder %s4604_s16, 1  ;;  %p1353_p7 = scmp.lt.s32.totalorder %s4604_s16, 3 }
  0xa4   : > { %p1354_p8 = pnand %p3727_p6, %p1353_p7 }
  0xa5   : > { %s1360_s28 = sand.u32 (!%p1354_p8), 1, %s4588_s12   ;;  %v5255_v32 = vld [vmem:[%s5645_s0] sm:$0xff] (!%p1354_p8) }
  0xa6   : > { %1357 = sbr.rel (%p1354_p8) target bundleno = 712 (0x2c8), region = 66  ;;  %v5260_v33 = vld [vmem:[%s5645_s0 + $0x20] sm:$0xff] (!%p1354_p8)  ;;  %v3732_v34 = vcombine.high (!%p1354_p8), %v5255_v32, %v5255_v32 }
  0xa7   : > { %s4075_s6 = smul.u32 (!%p1354_p8), 2304, %s1360_s28  ;;  %v3740_v35 = vcombine.high (!%p1354_p8), %v5260_v33, %v5260_v33  ;;  %s3728_s28 = sshll.u32 (!%p1354_p8), %s4596_s14, 1 }
  0xa8   : > { %3261 = vmatprep.mubr.bf16.mxu1 (!%p1354_p8), %v3732_v34  ;;  %p1403_p9 = scmp.lt.s32.totalorder (!%p1354_p8), %s3728_s28, 3 }
  0xa9   : > { %3425 = vmatprep.mubr.bf16.mxu0 (!%p1354_p8), %v3740_v35  ;;  %s5266_s7 = scalar_lea.vmem (!%p1354_p8), [#allocation2], %s4075_s6 }
  0xaa   : > { %v4116_v36 = vld [vmem:[%s5266_s7 + $0x4] ss:$8 sps:$4 sm:$0xff] (!%p1354_p8)   ;;  %v4120_v38 = vld [vmem:[%s5266_s7] ss:$8 sps:$4 sm:$0xff] (!%p1354_p8)   ;;  %v4122_v40 = vld [vmem:[%s5266_s7 + $0x14] ss:$8 sps:$4 sm:$0xff] (!%p1354_p8)  }
  0xab   : > { %v4118_v37 = vld [vmem:[%s5266_s7 + $0x404] ss:$8 sps:$4 sm:$0xff] (!%p1354_p8)   ;;  %3229 = vmatprep.subr.bf16.mxu1 (!%p1354_p8), %v4116_v36  ;;  %v4121_v39 = vld [vmem:[%s5266_s7 + $0x400] ss:$8 sps:$4 sm:$0xff] (!%p1354_p8)   ;;  %v4124_v41 = vld [vmem:[%s5266_s7 + $0x414] ss:$8 sps:$4 sm:$0xff] (!%p1354_p8)  }
  0xac   : > { %3393 = vmatprep.subr.bf16.mxu0 (!%p1354_p8), %v4118_v37  ;;  %3230 = vmatpush1.bf16.msra.mxu1 (!%p1354_p8), %v4120_v38  ;;  %v4126_v42 = vld [vmem:[%s5266_s7 + $0x10] ss:$8 sps:$4 sm:$0xff] (!%p1354_p8)   ;;  %v4128_v44 = vld [vmem:[%s5266_s7 + $0x24] ss:$8 sps:$4 sm:$0xff] (!%p1354_p8)   ;;  %v4132_v46 = vld [vmem:[%s5266_s7 + $0x20] ss:$8 sps:$4 sm:$0xff] (!%p1354_p8)  }
  0xad   : > { %3394 = vmatpush1.bf16.msra.mxu0 %v4121_v39  ;;  %3231 = vmatprep.subr.bf16.mxu1 %v4122_v40  ;;  %v4127_v43 = vld [vmem:[%s5266_s7 + $0x410] ss:$8 sps:$4 sm:$0xff]   ;;  %v4130_v45 = vld [vmem:[%s5266_s7 + $0x424] ss:$8 sps:$4 sm:$0xff]   ;;  %v4133_v47 = vld [vmem:[%s5266_s7 + $0x420] ss:$8 sps:$4 sm:$0xff]   ;;  %v3731_v40 = vcombine.low %v5255_v32, %v5255_v32 }
  0xae   : > { %3395 = vmatprep.subr.bf16.mxu0 %v4124_v41  ;;  %v4134_v48 = vld [vmem:[%s5266_s7 + $0x34] ss:$8 sps:$4 sm:$0xff]   ;;  %v4138_v50 = vld [vmem:[%s5266_s7 + $0x30] ss:$8 sps:$4 sm:$0xff]   ;;  %v4140_v52 = vld [vmem:[%s5266_s7 + $0x44] ss:$8 sps:$4 sm:$0xff]  }
  0xaf   : > { %v4136_v49 = vld [vmem:[%s5266_s7 + $0x434] ss:$8 sps:$4 sm:$0xff]   ;;  %v4139_v51 = vld [vmem:[%s5266_s7 + $0x430] ss:$8 sps:$4 sm:$0xff]   ;;  %v4142_v53 = vld [vmem:[%s5266_s7 + $0x444] ss:$8 sps:$4 sm:$0xff]  }
  0xb0   : > { %3232 = vmatpush1.bf16.msra.mxu1 %v4126_v42  ;;  %v4144_v54 = vld [vmem:[%s5266_s7 + $0x40] ss:$8 sps:$4 sm:$0xff]   ;;  %v4146_v56 = vld [vmem:[%s5266_s7 + $0x54] ss:$8 sps:$4 sm:$0xff]   ;;  %v4150_v58 = vld [vmem:[%s5266_s7 + $0x50] ss:$8 sps:$4 sm:$0xff]   ;;  %v3739_v42 = vcombine.low %v5260_v33, %v5260_v33 }
  0xb1   : > { %3396 = vmatpush1.bf16.msra.mxu0 %v4127_v43  ;;  %3233 = vmatprep.subr.bf16.mxu1 %v4128_v44  ;;  %v4145_v55 = vld [vmem:[%s5266_s7 + $0x440] ss:$8 sps:$4 sm:$0xff]   ;;  %v4148_v57 = vld [vmem:[%s5266_s7 + $0x454] ss:$8 sps:$4 sm:$0xff]   ;;  %v4151_v59 = vld [vmem:[%s5266_s7 + $0x450] ss:$8 sps:$4 sm:$0xff]  }
  0xb2   : > { %3397 = vmatprep.subr.bf16.mxu0 %v4130_v45  ;;  %v4152_v60 = vld [vmem:[%s5266_s7 + $0x64] ss:$8 sps:$4 sm:$0xff]   ;;  %v4156_v62 = vld [vmem:[%s5266_s7 + $0x60] ss:$8 sps:$4 sm:$0xff]   ;;  %v4158_v0 = vld [vmem:[%s5266_s7 + $0x74] ss:$8 sps:$4 sm:$0xff]  }
  0xb3   : > { %v4154_v61 = vld [vmem:[%s5266_s7 + $0x464] ss:$8 sps:$4 sm:$0xff]   ;;  %v4157_v63 = vld [vmem:[%s5266_s7 + $0x460] ss:$8 sps:$4 sm:$0xff]   ;;  %v4160_v1 = vld [vmem:[%s5266_s7 + $0x474] ss:$8 sps:$4 sm:$0xff]  }
  0xb4   : > { %3234 = vmatpush1.bf16.msra.mxu1 %v4132_v46  ;;  %v4162_v2 = vld [vmem:[%s5266_s7 + $0x70] ss:$8 sps:$4 sm:$0xff]   ;;  %v4164_v4 = vld [vmem:[%s5266_s7 + $0x84] ss:$8 sps:$4 sm:$0xff]   ;;  %v4168_v6 = vld [vmem:[%s5266_s7 + $0x80] ss:$8 sps:$4 sm:$0xff]  }
  0xb5   : > { %3398 = vmatpush1.bf16.msra.mxu0 %v4133_v47  ;;  %3235 = vmatprep.subr.bf16.mxu1 %v4134_v48  ;;  %v4163_v3 = vld [vmem:[%s5266_s7 + $0x470] ss:$8 sps:$4 sm:$0xff]   ;;  %v4166_v5 = vld [vmem:[%s5266_s7 + $0x484] ss:$8 sps:$4 sm:$0xff]   ;;  %v4169_v7 = vld [vmem:[%s5266_s7 + $0x480] ss:$8 sps:$4 sm:$0xff]  }
  0xb6   : > { %3399 = vmatprep.subr.bf16.mxu0 %v4136_v49  ;;  %v4170_v8 = vld [vmem:[%s5266_s7 + $0x94] ss:$8 sps:$4 sm:$0xff]   ;;  %v4174_v10 = vld [vmem:[%s5266_s7 + $0x90] ss:$8 sps:$4 sm:$0xff]   ;;  %v4176_v12 = vld [vmem:[%s5266_s7 + $0xa4] ss:$8 sps:$4 sm:$0xff]  }
  0xb7   : > { %v4172_v9 = vld [vmem:[%s5266_s7 + $0x494] ss:$8 sps:$4 sm:$0xff]   ;;  %v4175_v11 = vld [vmem:[%s5266_s7 + $0x490] ss:$8 sps:$4 sm:$0xff]   ;;  %v4178_v13 = vld [vmem:[%s5266_s7 + $0x4a4] ss:$8 sps:$4 sm:$0xff]  }
  0xb8   : > { %3236 = vmatpush1.bf16.msra.mxu1 %v4138_v50  ;;  %v4180_v14 = vld [vmem:[%s5266_s7 + $0xa0] ss:$8 sps:$4 sm:$0xff]   ;;  %v4182_v16 = vld [vmem:[%s5266_s7 + $0xb4] ss:$8 sps:$4 sm:$0xff]   ;;  %v4186_v18 = vld [vmem:[%s5266_s7 + $0xb0] ss:$8 sps:$4 sm:$0xff]  }
  0xb9   : > { %3400 = vmatpush1.bf16.msra.mxu0 %v4139_v51  ;;  %3237 = vmatprep.subr.bf16.mxu1 %v4140_v52  ;;  %v4181_v15 = vld [vmem:[%s5266_s7 + $0x4a0] ss:$8 sps:$4 sm:$0xff]   ;;  %v4184_v17 = vld [vmem:[%s5266_s7 + $0x4b4] ss:$8 sps:$4 sm:$0xff]   ;;  %v4187_v19 = vld [vmem:[%s5266_s7 + $0x4b0] ss:$8 sps:$4 sm:$0xff]  }
  0xba   : > { %3401 = vmatprep.subr.bf16.mxu0 %v4142_v53  ;;  %v4188_v20 = vld [vmem:[%s5266_s7 + $0xc4] ss:$8 sps:$4 sm:$0xff]   ;;  %v4192_v22 = vld [vmem:[%s5266_s7 + $0xc0] ss:$8 sps:$4 sm:$0xff]   ;;  %v4194_v24 = vld [vmem:[%s5266_s7 + $0xd4] ss:$8 sps:$4 sm:$0xff]  }
  0xbb   : > { %v4190_v21 = vld [vmem:[%s5266_s7 + $0x4c4] ss:$8 sps:$4 sm:$0xff]   ;;  %v4193_v23 = vld [vmem:[%s5266_s7 + $0x4c0] ss:$8 sps:$4 sm:$0xff]   ;;  %v4196_v25 = vld [vmem:[%s5266_s7 + $0x4d4] ss:$8 sps:$4 sm:$0xff]  }
  0xbc   : > { %3238 = vmatpush1.bf16.msra.mxu1 %v4144_v54  ;;  %v4198_v26 = vld [vmem:[%s5266_s7 + $0xd0] ss:$8 sps:$4 sm:$0xff]   ;;  %v4200_v28 = vld [vmem:[%s5266_s7 + $0xe4] ss:$8 sps:$4 sm:$0xff]   ;;  %v4204_v30 = vld [vmem:[%s5266_s7 + $0xe0] ss:$8 sps:$4 sm:$0xff]  }
  0xbd   : > { %3402 = vmatpush1.bf16.msra.mxu0 %v4145_v55  ;;  %3239 = vmatprep.subr.bf16.mxu1 %v4146_v56  ;;  %v4199_v27 = vld [vmem:[%s5266_s7 + $0x4d0] ss:$8 sps:$4 sm:$0xff]   ;;  %v4202_v29 = vld [vmem:[%s5266_s7 + $0x4e4] ss:$8 sps:$4 sm:$0xff]   ;;  %v4205_v31 = vld [vmem:[%s5266_s7 + $0x4e0] ss:$8 sps:$4 sm:$0xff]  }
  0xbe   : > { %3403 = vmatprep.subr.bf16.mxu0 %v4148_v57  ;;  %v4206_v34 = vld [vmem:[%s5266_s7 + $0xf4] ss:$8 sps:$4 sm:$0xff]   ;;  %v4210_v36 = vld [vmem:[%s5266_s7 + $0xf0] ss:$8 sps:$4 sm:$0xff]   ;;  %v4216_v38 = vld [vmem:[%s5266_s7 + $0x104] ss:$8 sps:$4 sm:$0xff]  }
  0xbf   : > { %v4208_v35 = vld [vmem:[%s5266_s7 + $0x4f4] ss:$8 sps:$4 sm:$0xff]   ;;  %v4211_v37 = vld [vmem:[%s5266_s7 + $0x4f0] ss:$8 sps:$4 sm:$0xff]   ;;  %v4221_v39 = vld [vmem:[%s5266_s7 + $0x504] ss:$8 sps:$4 sm:$0xff]  }
  0xc0   : > { %3240 = vmatpush1.bf16.msra.mxu1 %v4150_v58  ;;  %v4214_v41 = vld [vmem:[%s5266_s7 + $0x100] ss:$8 sps:$4 sm:$0xff]   ;;  %v4224_v44 = vld [vmem:[%s5266_s7 + $0x114] ss:$8 sps:$4 sm:$0xff]   ;;  %v4222_v32 = vld [vmem:[%s5266_s7 + $0x110] ss:$8 sps:$4 sm:$0xff]  }
  0xc1   : > { %3404 = vmatpush1.bf16.msra.mxu0 %v4151_v59  ;;  %3241 = vmatprep.subr.bf16.mxu1 %v4152_v60  ;;  %v4219_v43 = vld [vmem:[%s5266_s7 + $0x500] ss:$8 sps:$4 sm:$0xff]   ;;  %v4227_v45 = vld [vmem:[%s5266_s7 + $0x514] ss:$8 sps:$4 sm:$0xff]   ;;  %v4225_v46 = vld [vmem:[%s5266_s7 + $0x510] ss:$8 sps:$4 sm:$0xff]  }
  0xc2   : > { %3405 = vmatprep.subr.bf16.mxu0 %v4154_v61  ;;  %v4230_v33 = vld [vmem:[%s5266_s7 + $0x124] ss:$8 sps:$4 sm:$0xff]   ;;  %v4228_v48 = vld [vmem:[%s5266_s7 + $0x120] ss:$8 sps:$4 sm:$0xff]   ;;  %v4236_v50 = vld [vmem:[%s5266_s7 + $0x134] ss:$8 sps:$4 sm:$0xff]  }
  0xc3   : > { %v4233_v47 = vld [vmem:[%s5266_s7 + $0x524] ss:$8 sps:$4 sm:$0xff]   ;;  %v4231_v49 = vld [vmem:[%s5266_s7 + $0x520] ss:$8 sps:$4 sm:$0xff]   ;;  %v4239_v51 = vld [vmem:[%s5266_s7 + $0x534] ss:$8 sps:$4 sm:$0xff]  }
  0xc4   : > { %3242 = vmatpush1.bf16.msra.mxu1 %v4156_v62  ;;  %v4234_v52 = vld [vmem:[%s5266_s7 + $0x130] ss:$8 sps:$4 sm:$0xff]   ;;  %v4242_v54 = vld [vmem:[%s5266_s7 + $0x144] ss:$8 sps:$4 sm:$0xff]   ;;  %v4240_v56 = vld [vmem:[%s5266_s7 + $0x140] ss:$8 sps:$4 sm:$0xff]  }
  0xc5   : > { %3406 = vmatpush1.bf16.msra.mxu0 %v4157_v63  ;;  %3243 = vmatprep.subr.bf16.mxu1 %v4158_v0  ;;  %v4237_v53 = vld [vmem:[%s5266_s7 + $0x530] ss:$8 sps:$4 sm:$0xff]   ;;  %v4245_v55 = vld [vmem:[%s5266_s7 + $0x544] ss:$8 sps:$4 sm:$0xff]   ;;  %v4243_v57 = vld [vmem:[%s5266_s7 + $0x540] ss:$8 sps:$4 sm:$0xff]  }
  0xc6   : > { %3407 = vmatprep.subr.bf16.mxu0 %v4160_v1  ;;  %v4248_v58 = vld [vmem:[%s5266_s7 + $0x154] ss:$8 sps:$4 sm:$0xff]   ;;  %v4246_v60 = vld [vmem:[%s5266_s7 + $0x150] ss:$8 sps:$4 sm:$0xff]   ;;  %v4254_v62 = vld [vmem:[%s5266_s7 + $0x164] ss:$8 sps:$4 sm:$0xff]  }
  0xc7   : > { %v4251_v59 = vld [vmem:[%s5266_s7 + $0x554] ss:$8 sps:$4 sm:$0xff]   ;;  %v4249_v61 = vld [vmem:[%s5266_s7 + $0x550] ss:$8 sps:$4 sm:$0xff]   ;;  %v4257_v63 = vld [vmem:[%s5266_s7 + $0x564] ss:$8 sps:$4 sm:$0xff]  }
  0xc8   : > { %3244 = vmatpush1.bf16.msra.mxu1 %v4162_v2  ;;  %v5365_v0 = vld [vmem:[%s5645_s0 + $0x8] sm:$0xff]  ;;  %s5656_s28 = smov (!%p1403_p9, %s3728_s28), 3 }
  0xc9   : > { %3408 = vmatpush1.bf16.msra.mxu0 %v4163_v3  ;;  %3245 = vmatprep.subr.bf16.mxu1 %v4164_v4  ;;  %v3734_v1 = vcombine.high %v5365_v0, %v5365_v0  ;;  %v5372_v2 = vld [vmem:[%s5645_s0 + $0x28] sm:$0xff]  ;;  %s1405_s4 = scalar_lea.vmem %s5647_s2, %s5656_s28  ;;  %s3730_s5 = sshll.u32 %s5656_s28, 2 }
  0xca   : > { %3409 = vmatprep.subr.bf16.mxu0 %v4166_v5  ;;  %v4252_v3 = vld [vmem:[%s5266_s7 + $0x160] ss:$8 sps:$4 sm:$0xff]   ;;  %v3742_v5 = vcombine.high %v5372_v2, %v5372_v2 }
  0xcb   : > { %v4255_v4 = vld [vmem:[%s5266_s7 + $0x560] ss:$8 sps:$4 sm:$0xff]  }
  0xcc   : > { %3246 = vmatpush1.bf16.msra.mxu1 %v4168_v6  ;;  %v4260_v6 = vld [vmem:[%s5266_s7 + $0x174] ss:$8 sps:$4 sm:$0xff]  }
  0xcd   : > { %3410 = vmatpush1.bf16.msra.mxu0 %v4169_v7  ;;  %3247 = vmatprep.subr.bf16.mxu1 %v4170_v8  ;;  %v4263_v7 = vld [vmem:[%s5266_s7 + $0x574] ss:$8 sps:$4 sm:$0xff]   ;;  %v4258_v8 = vld [vmem:[%s5266_s7 + $0x170] ss:$8 sps:$4 sm:$0xff]  }
  0xce   : > { %3411 = vmatprep.subr.bf16.mxu0 %v4172_v9  ;;  %v4261_v9 = vld [vmem:[%s5266_s7 + $0x570] ss:$8 sps:$4 sm:$0xff]  }
  0xd0   : > { %3248 = vmatpush1.bf16.msra.mxu1 %v4174_v10  ;;  %v4266_v10 = vld [vmem:[%s5266_s7 + $0x184] ss:$8 sps:$4 sm:$0xff]  }
  0xd1   : > { %3412 = vmatpush1.bf16.msra.mxu0 %v4175_v11  ;;  %3249 = vmatprep.subr.bf16.mxu1 %v4176_v12  ;;  %v4269_v11 = vld [vmem:[%s5266_s7 + $0x584] ss:$8 sps:$4 sm:$0xff]   ;;  %v4264_v12 = vld [vmem:[%s5266_s7 + $0x180] ss:$8 sps:$4 sm:$0xff]  }
  0xd2   : > { %3413 = vmatprep.subr.bf16.mxu0 %v4178_v13  ;;  %v4267_v13 = vld [vmem:[%s5266_s7 + $0x580] ss:$8 sps:$4 sm:$0xff]  }
  0xd4   : > { %3250 = vmatpush1.bf16.msra.mxu1 %v4180_v14  ;;  %v4272_v14 = vld [vmem:[%s5266_s7 + $0x194] ss:$8 sps:$4 sm:$0xff]  }
  0xd5   : > { %3414 = vmatpush1.bf16.msra.mxu0 %v4181_v15  ;;  %3251 = vmatprep.subr.bf16.mxu1 %v4182_v16  ;;  %v4275_v15 = vld [vmem:[%s5266_s7 + $0x594] ss:$8 sps:$4 sm:$0xff]   ;;  %v4270_v16 = vld [vmem:[%s5266_s7 + $0x190] ss:$8 sps:$4 sm:$0xff]  }
  0xd6   : > { %3415 = vmatprep.subr.bf16.mxu0 %v4184_v17  ;;  %v4273_v17 = vld [vmem:[%s5266_s7 + $0x590] ss:$8 sps:$4 sm:$0xff]  }
  0xd8   : > { %3252 = vmatpush1.bf16.msra.mxu1 %v4186_v18  ;;  %v4278_v18 = vld [vmem:[%s5266_s7 + $0x1a4] ss:$8 sps:$4 sm:$0xff]  }
  0xd9   : > { %3416 = vmatpush1.bf16.msra.mxu0 %v4187_v19  ;;  %3253 = vmatprep.subr.bf16.mxu1 %v4188_v20  ;;  %v4281_v19 = vld [vmem:[%s5266_s7 + $0x5a4] ss:$8 sps:$4 sm:$0xff]   ;;  %v4276_v20 = vld [vmem:[%s5266_s7 + $0x1a0] ss:$8 sps:$4 sm:$0xff]  }
  0xda   : > { %3417 = vmatprep.subr.bf16.mxu0 %v4190_v21  ;;  %v4279_v21 = vld [vmem:[%s5266_s7 + $0x5a0] ss:$8 sps:$4 sm:$0xff]  }
  0xdc   : > { %3254 = vmatpush1.bf16.msra.mxu1 %v4192_v22  ;;  %v4284_v22 = vld [vmem:[%s5266_s7 + $0x1b4] ss:$8 sps:$4 sm:$0xff]  }
  0xdd   : > { %3418 = vmatpush1.bf16.msra.mxu0 %v4193_v23  ;;  %3255 = vmatprep.subr.bf16.mxu1 %v4194_v24  ;;  %v4287_v23 = vld [vmem:[%s5266_s7 + $0x5b4] ss:$8 sps:$4 sm:$0xff]   ;;  %v4282_v24 = vld [vmem:[%s5266_s7 + $0x1b0] ss:$8 sps:$4 sm:$0xff]  }
  0xde   : > { %3419 = vmatprep.subr.bf16.mxu0 %v4196_v25  ;;  %v4285_v25 = vld [vmem:[%s5266_s7 + $0x5b0] ss:$8 sps:$4 sm:$0xff]  }
  0xe0   : > { %3256 = vmatpush1.bf16.msra.mxu1 %v4198_v26  ;;  %v4290_v26 = vld [vmem:[%s5266_s7 + $0x1c4] ss:$8 sps:$4 sm:$0xff]  }
  0xe1   : > { %3420 = vmatpush1.bf16.msra.mxu0 %v4199_v27  ;;  %3257 = vmatprep.subr.bf16.mxu1 %v4200_v28  ;;  %v4293_v27 = vld [vmem:[%s5266_s7 + $0x5c4] ss:$8 sps:$4 sm:$0xff]   ;;  %v4288_v28 = vld [vmem:[%s5266_s7 + $0x1c0] ss:$8 sps:$4 sm:$0xff]  }
  0xe2   : > { %3421 = vmatprep.subr.bf16.mxu0 %v4202_v29  ;;  %v4291_v29 = vld [vmem:[%s5266_s7 + $0x5c0] ss:$8 sps:$4 sm:$0xff]  }
  0xe4   : > { %3258 = vmatpush1.bf16.msra.mxu1 %v4204_v30  ;;  %v4296_v30 = vld [vmem:[%s5266_s7 + $0x1d4] ss:$8 sps:$4 sm:$0xff]  }
  0xe5   : > { %3422 = vmatpush1.bf16.msra.mxu0 %v4205_v31  ;;  %3259 = vmatprep.subr.bf16.mxu1 %v4206_v34  ;;  %v4299_v31 = vld [vmem:[%s5266_s7 + $0x5d4] ss:$8 sps:$4 sm:$0xff]   ;;  %v4294_v34 = vld [vmem:[%s5266_s7 + $0x1d0] ss:$8 sps:$4 sm:$0xff]  }
  0xe6   : > { %3423 = vmatprep.subr.bf16.mxu0 %v4208_v35  ;;  %v4297_v35 = vld [vmem:[%s5266_s7 + $0x5d0] ss:$8 sps:$4 sm:$0xff]  }
  0xe8   : > { %3260 = vmatpush1.bf16.msra.mxu1 %v4210_v36  ;;  %v4302_v36 = vld [vmem:[%s5266_s7 + $0x1e4] ss:$8 sps:$4 sm:$0xff]  }
  0xe9   : > { %3424 = vmatpush1.bf16.msra.mxu0 %v4211_v37  ;;  %3270 = vmatprep.subr.bf16.mxu1 %v4216_v38  ;;  %v4305_v37 = vld [vmem:[%s5266_s7 + $0x5e4] ss:$8 sps:$4 sm:$0xff]   ;;  %v4300_v38 = vld [vmem:[%s5266_s7 + $0x1e0] ss:$8 sps:$4 sm:$0xff]  }
  0xea   : > { %3434 = vmatprep.subr.bf16.mxu0 %v4221_v39  ;;  %v4303_v39 = vld [vmem:[%s5266_s7 + $0x5e0] ss:$8 sps:$4 sm:$0xff]  }
  0xeb   : > { %3262 = vmatmul.mubr.bf16.vlgmr.msra.gmra.mrb[0].mxu1 %v3731_v40  ;;  %v4308_v40 = vld [vmem:[%s5266_s7 + $0x1f4] ss:$8 sps:$4 sm:$0xff]  }
  0xec   : > { %3426 = vmatmul.mubr.bf16.vlgmr.msra.gmra.mrb[0].mxu0 %v3739_v42  ;;  %3271 = vmatpush1.bf16.msra.mxu1 %v4214_v41  ;;  %v4311_v41 = vld [vmem:[%s5266_s7 + $0x5f4] ss:$8 sps:$4 sm:$0xff]   ;;  %v4306_v42 = vld [vmem:[%s5266_s7 + $0x1f0] ss:$8 sps:$4 sm:$0xff]  }
  0xed   : > { %3435 = vmatpush1.bf16.msra.mxu0 %v4219_v43  ;;  %3272 = vmatprep.subr.bf16.mxu1 %v4224_v44  ;;  %v4309_v43 = vld [vmem:[%s5266_s7 + $0x5f0] ss:$8 sps:$4 sm:$0xff]   ;;  %v4316_v44 = vld [vmem:[%s5266_s7 + $0x204] ss:$8 sps:$4 sm:$0xff]  }
  0xee   : > { %3436 = vmatprep.subr.bf16.mxu0 %v4227_v45  ;;  %3302 = vmatprep.mubr.bf16.mxu1 %v3734_v1  ;;  %v4321_v45 = vld [vmem:[%s5266_s7 + $0x604] ss:$8 sps:$4 sm:$0xff]  }
  0xef   : > { %3466 = vmatprep.mubr.bf16.mxu0 %v3742_v5  ;;  %v4345_v1 = vld [vmem:[%s5266_s7 + $0x644] ss:$8 sps:$4 sm:$0xff]   ;;  %v4351_v5 = vld [vmem:[%s5266_s7 + $0x654] ss:$8 sps:$4 sm:$0xff]  }
  0xf0   : > { %3273 = vmatpush1.bf16.msra.mxu1 %v4222_v32  ;;  %v3733_v32 = vcombine.low %v5365_v0, %v5365_v0  ;;  %v4342_v0 = vld [vmem:[%s5266_s7 + $0x244] ss:$8 sps:$4 sm:$0xff]  }
  0xf1   : > { %3437 = vmatpush1.bf16.msra.mxu0 %v4225_v46  ;;  %3274 = vmatprep.subr.bf16.mxu1 %v4230_v33  ;;  %v4314_v46 = vld [vmem:[%s5266_s7 + $0x200] ss:$8 sps:$4 sm:$0xff]   ;;  %v3741_v33 = vcombine.low %v5372_v2, %v5372_v2 }
  0xf2   : > { %3438 = vmatprep.subr.bf16.mxu0 %v4233_v47  ;;  %v4319_v47 = vld [vmem:[%s5266_s7 + $0x600] ss:$8 sps:$4 sm:$0xff]  }
  0xf3   : > { %v4340_v2 = vld [vmem:[%s5266_s7 + $0x240] ss:$8 sps:$4 sm:$0xff]  }
  0xf4   : > { %3275 = vmatpush1.bf16.msra.mxu1 %v4228_v48  ;;  %v4324_v48 = vld [vmem:[%s5266_s7 + $0x214] ss:$8 sps:$4 sm:$0xff]  }
  0xf5   : > { %3439 = vmatpush1.bf16.msra.mxu0 %v4231_v49  ;;  %3276 = vmatprep.subr.bf16.mxu1 %v4236_v50  ;;  %v5426_v49 = vld [vmem:[%s5645_s0 + $0x10] sm:$0xff] }
  0xf6   : > { %3440 = vmatprep.subr.bf16.mxu0 %v4239_v51  ;;  %v4327_v50 = vld [vmem:[%s5266_s7 + $0x614] ss:$8 sps:$4 sm:$0xff]   ;;  %v3736_v51 = vcombine.high %v5426_v49, %v5426_v49 }
  0xf8   : > { %3277 = vmatpush1.bf16.msra.mxu1 %v4234_v52  ;;  %v5434_v52 = vld [vmem:[%s5645_s0 + $0x30] sm:$0xff] }
  0xf9   : > { %3441 = vmatpush1.bf16.msra.mxu0 %v4237_v53  ;;  %3278 = vmatprep.subr.bf16.mxu1 %v4242_v54  ;;  %v4322_v53 = vld [vmem:[%s5266_s7 + $0x210] ss:$8 sps:$4 sm:$0xff]  }
  0xfa   : > { %3442 = vmatprep.subr.bf16.mxu0 %v4245_v55  ;;  %v4325_v54 = vld [vmem:[%s5266_s7 + $0x610] ss:$8 sps:$4 sm:$0xff]   ;;  %v3744_v55 = vcombine.high %v5434_v52, %v5434_v52 }
  0xfc   : > { %3279 = vmatpush1.bf16.msra.mxu1 %v4240_v56  ;;  %v4330_v56 = vld [vmem:[%s5266_s7 + $0x224] ss:$8 sps:$4 sm:$0xff]  }
  0xfd   : > { %3443 = vmatpush1.bf16.msra.mxu0 %v4243_v57  ;;  %3280 = vmatprep.subr.bf16.mxu1 %v4248_v58  ;;  %v4333_v57 = vld [vmem:[%s5266_s7 + $0x624] ss:$8 sps:$4 sm:$0xff]   ;;  %v4328_v58 = vld [vmem:[%s5266_s7 + $0x220] ss:$8 sps:$4 sm:$0xff]  }
  0xfe   : > { %3444 = vmatprep.subr.bf16.mxu0 %v4251_v59  ;;  %v4331_v59 = vld [vmem:[%s5266_s7 + $0x620] ss:$8 sps:$4 sm:$0xff]  }
 0x100   : > { %3281 = vmatpush1.bf16.msra.mxu1 %v4246_v60  ;;  %v4336_v60 = vld [vmem:[%s5266_s7 + $0x234] ss:$8 sps:$4 sm:$0xff]  }
 0x101   : > { %3445 = vmatpush1.bf16.msra.mxu0 %v4249_v61  ;;  %3282 = vmatprep.subr.bf16.mxu1 %v4254_v62  ;;  %v4339_v61 = vld [vmem:[%s5266_s7 + $0x634] ss:$8 sps:$4 sm:$0xff]   ;;  %v4334_v62 = vld [vmem:[%s5266_s7 + $0x230] ss:$8 sps:$4 sm:$0xff]  }
 0x102   : > { %3446 = vmatprep.subr.bf16.mxu0 %v4257_v63  ;;  %v4337_v63 = vld [vmem:[%s5266_s7 + $0x630] ss:$8 sps:$4 sm:$0xff]  }
 0x104   : > { %3283 = vmatpush1.bf16.msra.mxu1 %v4252_v3  ;;  %v4343_v3 = vld [vmem:[%s5266_s7 + $0x640] ss:$8 sps:$4 sm:$0xff]  }
 0x105   : > { %3447 = vmatpush1.bf16.msra.mxu0 %v4255_v4  ;;  %3284 = vmatprep.subr.bf16.mxu1 %v4260_v6  ;;  %v4348_v4 = vld [vmem:[%s5266_s7 + $0x254] ss:$8 sps:$4 sm:$0xff]   ;;  %v4346_v6 = vld [vmem:[%s5266_s7 + $0x250] ss:$8 sps:$4 sm:$0xff]  }
 0x106   : > { %3448 = vmatprep.subr.bf16.mxu0 %v4263_v7  ;;  %v4349_v7 = vld [vmem:[%s5266_s7 + $0x650] ss:$8 sps:$4 sm:$0xff]  }
 0x108   : > { %3285 = vmatpush1.bf16.msra.mxu1 %v4258_v8  ;;  %v4354_v8 = vld [vmem:[%s5266_s7 + $0x264] ss:$8 sps:$4 sm:$0xff]  }
 0x109   : > { %3449 = vmatpush1.bf16.msra.mxu0 %v4261_v9  ;;  %3286 = vmatprep.subr.bf16.mxu1 %v4266_v10  ;;  %v4357_v9 = vld [vmem:[%s5266_s7 + $0x664] ss:$8 sps:$4 sm:$0xff]   ;;  %v4352_v10 = vld [vmem:[%s5266_s7 + $0x260] ss:$8 sps:$4 sm:$0xff]  }
 0x10a   : > { %3450 = vmatprep.subr.bf16.mxu0 %v4269_v11  ;;  %v4355_v11 = vld [vmem:[%s5266_s7 + $0x660] ss:$8 sps:$4 sm:$0xff]  }
 0x10c   : > { %3287 = vmatpush1.bf16.msra.mxu1 %v4264_v12  ;;  %v4360_v12 = vld [vmem:[%s5266_s7 + $0x274] ss:$8 sps:$4 sm:$0xff]  }
 0x10d   : > { %3451 = vmatpush1.bf16.msra.mxu0 %v4267_v13  ;;  %3288 = vmatprep.subr.bf16.mxu1 %v4272_v14  ;;  %v4363_v13 = vld [vmem:[%s5266_s7 + $0x674] ss:$8 sps:$4 sm:$0xff]   ;;  %v4358_v14 = vld [vmem:[%s5266_s7 + $0x270] ss:$8 sps:$4 sm:$0xff]  }
 0x10e   : > { %3452 = vmatprep.subr.bf16.mxu0 %v4275_v15  ;;  %v4361_v15 = vld [vmem:[%s5266_s7 + $0x670] ss:$8 sps:$4 sm:$0xff]  }
 0x110   : > { %3289 = vmatpush1.bf16.msra.mxu1 %v4270_v16  ;;  %v4366_v16 = vld [vmem:[%s5266_s7 + $0x284] ss:$8 sps:$4 sm:$0xff]  }
 0x111   : > { %3453 = vmatpush1.bf16.msra.mxu0 %v4273_v17  ;;  %3290 = vmatprep.subr.bf16.mxu1 %v4278_v18  ;;  %v4369_v17 = vld [vmem:[%s5266_s7 + $0x684] ss:$8 sps:$4 sm:$0xff]   ;;  %v4364_v18 = vld [vmem:[%s5266_s7 + $0x280] ss:$8 sps:$4 sm:$0xff]  }
 0x112   : > { %3454 = vmatprep.subr.bf16.mxu0 %v4281_v19  ;;  %v4367_v19 = vld [vmem:[%s5266_s7 + $0x680] ss:$8 sps:$4 sm:$0xff]  }
 0x114   : > { %3291 = vmatpush1.bf16.msra.mxu1 %v4276_v20  ;;  %v4372_v20 = vld [vmem:[%s5266_s7 + $0x294] ss:$8 sps:$4 sm:$0xff]  }
 0x115   : > { %3455 = vmatpush1.bf16.msra.mxu0 %v4279_v21  ;;  %3292 = vmatprep.subr.bf16.mxu1 %v4284_v22  ;;  %v4375_v21 = vld [vmem:[%s5266_s7 + $0x694] ss:$8 sps:$4 sm:$0xff]   ;;  %v4370_v22 = vld [vmem:[%s5266_s7 + $0x290] ss:$8 sps:$4 sm:$0xff]  }
 0x116   : > { %3456 = vmatprep.subr.bf16.mxu0 %v4287_v23  ;;  %v4373_v23 = vld [vmem:[%s5266_s7 + $0x690] ss:$8 sps:$4 sm:$0xff]  }
 0x118   : > { %3293 = vmatpush1.bf16.msra.mxu1 %v4282_v24  ;;  %v4378_v24 = vld [vmem:[%s5266_s7 + $0x2a4] ss:$8 sps:$4 sm:$0xff]  }
 0x119   : > { %3457 = vmatpush1.bf16.msra.mxu0 %v4285_v25  ;;  %3294 = vmatprep.subr.bf16.mxu1 %v4290_v26  ;;  %v4381_v25 = vld [vmem:[%s5266_s7 + $0x6a4] ss:$8 sps:$4 sm:$0xff]   ;;  %v4376_v26 = vld [vmem:[%s5266_s7 + $0x2a0] ss:$8 sps:$4 sm:$0xff]  }
 0x11a   : > { %3458 = vmatprep.subr.bf16.mxu0 %v4293_v27  ;;  %v4379_v27 = vld [vmem:[%s5266_s7 + $0x6a0] ss:$8 sps:$4 sm:$0xff]  }
 0x11c   : > { %3295 = vmatpush1.bf16.msra.mxu1 %v4288_v28  ;;  %v4384_v28 = vld [vmem:[%s5266_s7 + $0x2b4] ss:$8 sps:$4 sm:$0xff]  }
 0x11d   : > { %3459 = vmatpush1.bf16.msra.mxu0 %v4291_v29  ;;  %3296 = vmatprep.subr.bf16.mxu1 %v4296_v30  ;;  %v4387_v29 = vld [vmem:[%s5266_s7 + $0x6b4] ss:$8 sps:$4 sm:$0xff]   ;;  %v4382_v30 = vld [vmem:[%s5266_s7 + $0x2b0] ss:$8 sps:$4 sm:$0xff]  }
 0x11e   : > { %3460 = vmatprep.subr.bf16.mxu0 %v4299_v31  ;;  %v4385_v31 = vld [vmem:[%s5266_s7 + $0x6b0] ss:$8 sps:$4 sm:$0xff]  }
 0x120   : > { %3297 = vmatpush1.bf16.msra.mxu1 %v4294_v34  ;;  %v4390_v34 = vld [vmem:[%s5266_s7 + $0x2c4] ss:$8 sps:$4 sm:$0xff]  }
 0x121   : > { %3461 = vmatpush1.bf16.msra.mxu0 %v4297_v35  ;;  %3298 = vmatprep.subr.bf16.mxu1 %v4302_v36  ;;  %v4393_v35 = vld [vmem:[%s5266_s7 + $0x6c4] ss:$8 sps:$4 sm:$0xff]   ;;  %v4388_v36 = vld [vmem:[%s5266_s7 + $0x2c0] ss:$8 sps:$4 sm:$0xff]  }
 0x122   : > { %3462 = vmatprep.subr.bf16.mxu0 %v4305_v37  ;;  %v4391_v37 = vld [vmem:[%s5266_s7 + $0x6c0] ss:$8 sps:$4 sm:$0xff]  }
 0x124   : > { %3299 = vmatpush1.bf16.msra.mxu1 %v4300_v38  ;;  %v4396_v38 = vld [vmem:[%s5266_s7 + $0x2d4] ss:$8 sps:$4 sm:$0xff]  }
 0x125   : > { %3463 = vmatpush1.bf16.msra.mxu0 %v4303_v39  ;;  %3300 = vmatprep.subr.bf16.mxu1 %v4308_v40  ;;  %v4399_v39 = vld [vmem:[%s5266_s7 + $0x6d4] ss:$8 sps:$4 sm:$0xff]   ;;  %v4394_v40 = vld [vmem:[%s5266_s7 + $0x2d0] ss:$8 sps:$4 sm:$0xff]  }
 0x126   : > { %3464 = vmatprep.subr.bf16.mxu0 %v4311_v41  ;;  %v4397_v41 = vld [vmem:[%s5266_s7 + $0x6d0] ss:$8 sps:$4 sm:$0xff]  }
 0x128   : > { %3301 = vmatpush1.bf16.msra.mxu1 %v4306_v42  ;;  %v4402_v42 = vld [vmem:[%s5266_s7 + $0x2e4] ss:$8 sps:$4 sm:$0xff]  }
 0x129   : > { %3465 = vmatpush1.bf16.msra.mxu0 %v4309_v43  ;;  %3311 = vmatprep.subr.bf16.mxu1 %v4316_v44  ;;  %v4405_v43 = vld [vmem:[%s5266_s7 + $0x6e4] ss:$8 sps:$4 sm:$0xff]   ;;  %v4400_v44 = vld [vmem:[%s5266_s7 + $0x2e0] ss:$8 sps:$4 sm:$0xff]  }
 0x12a   : > { %3475 = vmatprep.subr.bf16.mxu0 %v4321_v45  ;;  %v4403_v45 = vld [vmem:[%s5266_s7 + $0x6e0] ss:$8 sps:$4 sm:$0xff]  }
 0x12b   : > { %3303 = vmatmul.mubr.bf16.vlgmr.msra.gmra.mrb[0].mxu1 %v3733_v32  ;;  %v4408_v32 = vld [vmem:[%s5266_s7 + $0x2f4] ss:$8 sps:$4 sm:$0xff]  }
 0x12c   : > { %3467 = vmatmul.mubr.bf16.vlgmr.msra.gmra.mrb[0].mxu0 %v3741_v33  ;;  %3312 = vmatpush1.bf16.msra.mxu1 %v4314_v46  ;;  %v4411_v46 = vld [vmem:[%s5266_s7 + $0x6f4] ss:$8 sps:$4 sm:$0xff]   ;;  %v4406_v33 = vld [vmem:[%s5266_s7 + $0x2f0] ss:$8 sps:$4 sm:$0xff]  }
 0x12d   : > { %3476 = vmatpush1.bf16.msra.mxu0 %v4319_v47  ;;  %3313 = vmatprep.subr.bf16.mxu1 %v4324_v48  ;;  %v4409_v47 = vld [vmem:[%s5266_s7 + $0x6f0] ss:$8 sps:$4 sm:$0xff]   ;;  %v4416_v48 = vld [vmem:[%s5266_s7 + $0x304] ss:$8 sps:$4 sm:$0xff]  }
 0x12e   : > { %3477 = vmatprep.subr.bf16.mxu0 %v4327_v50  ;;  %3343 = vmatprep.mubr.bf16.mxu1 %v3736_v51  ;;  %v4421_v50 = vld [vmem:[%s5266_s7 + $0x704] ss:$8 sps:$4 sm:$0xff]   ;;  %v5501_v51 = vld [vmem:[%s5645_s0 + $0x18] sm:$0xff] }
 0x12f   : > { %3507 = vmatprep.mubr.bf16.mxu0 %v3744_v55  ;;  %v5510_v55 = vld [vmem:[%s5645_s0 + $0x38] sm:$0xff] }
 0x130   : > { %3314 = vmatpush1.bf16.msra.mxu1 %v4322_v53  ;;  %v3735_v53 = vcombine.low %v5426_v49, %v5426_v49  ;;  %v4427_v49 = vld [vmem:[%s5266_s7 + $0x714] ss:$8 sps:$4 sm:$0xff]  }
 0x131   : > { %3478 = vmatpush1.bf16.msra.mxu0 %v4325_v54  ;;  %3315 = vmatprep.subr.bf16.mxu1 %v4330_v56  ;;  %v3743_v54 = vcombine.low %v5434_v52, %v5434_v52  ;;  %v4414_v56 = vld [vmem:[%s5266_s7 + $0x300] ss:$8 sps:$4 sm:$0xff]   ;;  %v3738_v52 = vcombine.high %v5501_v51, %v5501_v51 }
 0x132   : > { %3479 = vmatprep.subr.bf16.mxu0 %v4333_v57  ;;  %v4419_v57 = vld [vmem:[%s5266_s7 + $0x700] ss:$8 sps:$4 sm:$0xff]  }
 0x134   : > { %3316 = vmatpush1.bf16.msra.mxu1 %v4328_v58  ;;  %v4424_v58 = vld [vmem:[%s5266_s7 + $0x314] ss:$8 sps:$4 sm:$0xff]  }
 0x135   : > { %3480 = vmatpush1.bf16.msra.mxu0 %v4331_v59  ;;  %3317 = vmatprep.subr.bf16.mxu1 %v4336_v60  ;;  %v3746_v59 = vcombine.high %v5510_v55, %v5510_v55  ;;  %v4422_v60 = vld [vmem:[%s5266_s7 + $0x310] ss:$8 sps:$4 sm:$0xff]  }
 0x136   : > { %3481 = vmatprep.subr.bf16.mxu0 %v4339_v61  ;;  %v4425_v61 = vld [vmem:[%s5266_s7 + $0x710] ss:$8 sps:$4 sm:$0xff]  }
 0x138   : > { %3318 = vmatpush1.bf16.msra.mxu1 %v4334_v62  ;;  %v4430_v62 = vld [vmem:[%s5266_s7 + $0x324] ss:$8 sps:$4 sm:$0xff]  }
 0x139   : > { %3482 = vmatpush1.bf16.msra.mxu0 %v4337_v63  ;;  %3319 = vmatprep.subr.bf16.mxu1 %v4342_v0  ;;  %v4433_v63 = vld [vmem:[%s5266_s7 + $0x724] ss:$8 sps:$4 sm:$0xff]   ;;  %v4428_v0 = vld [vmem:[%s5266_s7 + $0x320] ss:$8 sps:$4 sm:$0xff]  }
 0x13a   : > { %3483 = vmatprep.subr.bf16.mxu0 %v4345_v1  ;;  %v4431_v1 = vld [vmem:[%s5266_s7 + $0x720] ss:$8 sps:$4 sm:$0xff]  }
 0x13c   : > { %3320 = vmatpush1.bf16.msra.mxu1 %v4340_v2  ;;  %v4436_v2 = vld [vmem:[%s5266_s7 + $0x334] ss:$8 sps:$4 sm:$0xff]  }
 0x13d   : > { %3484 = vmatpush1.bf16.msra.mxu0 %v4343_v3  ;;  %3321 = vmatprep.subr.bf16.mxu1 %v4348_v4  ;;  %v4439_v3 = vld [vmem:[%s5266_s7 + $0x734] ss:$8 sps:$4 sm:$0xff]   ;;  %v4434_v4 = vld [vmem:[%s5266_s7 + $0x330] ss:$8 sps:$4 sm:$0xff]  }
 0x13e   : > { %3485 = vmatprep.subr.bf16.mxu0 %v4351_v5  ;;  %v4437_v5 = vld [vmem:[%s5266_s7 + $0x730] ss:$8 sps:$4 sm:$0xff]  }
 0x140   : > { %3322 = vmatpush1.bf16.msra.mxu1 %v4346_v6  ;;  %v4442_v6 = vld [vmem:[%s5266_s7 + $0x344] ss:$8 sps:$4 sm:$0xff]  }
 0x141   : > { %3486 = vmatpush1.bf16.msra.mxu0 %v4349_v7  ;;  %3323 = vmatprep.subr.bf16.mxu1 %v4354_v8  ;;  %v4445_v7 = vld [vmem:[%s5266_s7 + $0x744] ss:$8 sps:$4 sm:$0xff]   ;;  %v4440_v8 = vld [vmem:[%s5266_s7 + $0x340] ss:$8 sps:$4 sm:$0xff]  }
 0x142   : > { %3487 = vmatprep.subr.bf16.mxu0 %v4357_v9  ;;  %v4443_v9 = vld [vmem:[%s5266_s7 + $0x740] ss:$8 sps:$4 sm:$0xff]  }
 0x144   : > { %3324 = vmatpush1.bf16.msra.mxu1 %v4352_v10  ;;  %v4448_v10 = vld [vmem:[%s5266_s7 + $0x354] ss:$8 sps:$4 sm:$0xff]  }
 0x145   : > { %3488 = vmatpush1.bf16.msra.mxu0 %v4355_v11  ;;  %3325 = vmatprep.subr.bf16.mxu1 %v4360_v12  ;;  %v4451_v11 = vld [vmem:[%s5266_s7 + $0x754] ss:$8 sps:$4 sm:$0xff]   ;;  %v4446_v12 = vld [vmem:[%s5266_s7 + $0x350] ss:$8 sps:$4 sm:$0xff]  }
 0x146   : > { %3489 = vmatprep.subr.bf16.mxu0 %v4363_v13  ;;  %v4449_v13 = vld [vmem:[%s5266_s7 + $0x750] ss:$8 sps:$4 sm:$0xff]  }
 0x148   : > { %3326 = vmatpush1.bf16.msra.mxu1 %v4358_v14  ;;  %v4454_v14 = vld [vmem:[%s5266_s7 + $0x364] ss:$8 sps:$4 sm:$0xff]  }
 0x149   : > { %3490 = vmatpush1.bf16.msra.mxu0 %v4361_v15  ;;  %3327 = vmatprep.subr.bf16.mxu1 %v4366_v16  ;;  %v4457_v15 = vld [vmem:[%s5266_s7 + $0x764] ss:$8 sps:$4 sm:$0xff]   ;;  %v4452_v16 = vld [vmem:[%s5266_s7 + $0x360] ss:$8 sps:$4 sm:$0xff]  }
 0x14a   : > { %3491 = vmatprep.subr.bf16.mxu0 %v4369_v17  ;;  %v4455_v17 = vld [vmem:[%s5266_s7 + $0x760] ss:$8 sps:$4 sm:$0xff]  }
 0x14c   : > { %3328 = vmatpush1.bf16.msra.mxu1 %v4364_v18  ;;  %v4460_v18 = vld [vmem:[%s5266_s7 + $0x374] ss:$8 sps:$4 sm:$0xff]  }
 0x14d   : > { %3492 = vmatpush1.bf16.msra.mxu0 %v4367_v19  ;;  %3329 = vmatprep.subr.bf16.mxu1 %v4372_v20  ;;  %v4463_v19 = vld [vmem:[%s5266_s7 + $0x774] ss:$8 sps:$4 sm:$0xff]   ;;  %v4458_v20 = vld [vmem:[%s5266_s7 + $0x370] ss:$8 sps:$4 sm:$0xff]  }
 0x14e   : > { %3493 = vmatprep.subr.bf16.mxu0 %v4375_v21  ;;  %v4461_v21 = vld [vmem:[%s5266_s7 + $0x770] ss:$8 sps:$4 sm:$0xff]  }
 0x150   : > { %3330 = vmatpush1.bf16.msra.mxu1 %v4370_v22  ;;  %v4466_v22 = vld [vmem:[%s5266_s7 + $0x384] ss:$8 sps:$4 sm:$0xff]  }
 0x151   : > { %3494 = vmatpush1.bf16.msra.mxu0 %v4373_v23  ;;  %3331 = vmatprep.subr.bf16.mxu1 %v4378_v24  ;;  %v4469_v23 = vld [vmem:[%s5266_s7 + $0x784] ss:$8 sps:$4 sm:$0xff]   ;;  %v4464_v24 = vld [vmem:[%s5266_s7 + $0x380] ss:$8 sps:$4 sm:$0xff]  }
 0x152   : > { %3495 = vmatprep.subr.bf16.mxu0 %v4381_v25  ;;  %v4467_v25 = vld [vmem:[%s5266_s7 + $0x780] ss:$8 sps:$4 sm:$0xff]  }
 0x154   : > { %3332 = vmatpush1.bf16.msra.mxu1 %v4376_v26  ;;  %v4472_v26 = vld [vmem:[%s5266_s7 + $0x394] ss:$8 sps:$4 sm:$0xff]  }
 0x155   : > { %3496 = vmatpush1.bf16.msra.mxu0 %v4379_v27  ;;  %3333 = vmatprep.subr.bf16.mxu1 %v4384_v28  ;;  %v4475_v27 = vld [vmem:[%s5266_s7 + $0x794] ss:$8 sps:$4 sm:$0xff]   ;;  %v4470_v28 = vld [vmem:[%s5266_s7 + $0x390] ss:$8 sps:$4 sm:$0xff]  }
 0x156   : > { %3497 = vmatprep.subr.bf16.mxu0 %v4387_v29  ;;  %v4473_v29 = vld [vmem:[%s5266_s7 + $0x790] ss:$8 sps:$4 sm:$0xff]  }
 0x158   : > { %3334 = vmatpush1.bf16.msra.mxu1 %v4382_v30  ;;  %v4478_v30 = vld [vmem:[%s5266_s7 + $0x3a4] ss:$8 sps:$4 sm:$0xff]  }
 0x159   : > { %3498 = vmatpush1.bf16.msra.mxu0 %v4385_v31  ;;  %3335 = vmatprep.subr.bf16.mxu1 %v4390_v34  ;;  %v4481_v31 = vld [vmem:[%s5266_s7 + $0x7a4] ss:$8 sps:$4 sm:$0xff]   ;;  %v4476_v34 = vld [vmem:[%s5266_s7 + $0x3a0] ss:$8 sps:$4 sm:$0xff]  }
 0x15a   : > { %3499 = vmatprep.subr.bf16.mxu0 %v4393_v35  ;;  %v4479_v35 = vld [vmem:[%s5266_s7 + $0x7a0] ss:$8 sps:$4 sm:$0xff]  }
 0x15c   : > { %3336 = vmatpush1.bf16.msra.mxu1 %v4388_v36  ;;  %v4484_v36 = vld [vmem:[%s5266_s7 + $0x3b4] ss:$8 sps:$4 sm:$0xff]  }
 0x15d   : > { %3500 = vmatpush1.bf16.msra.mxu0 %v4391_v37  ;;  %3337 = vmatprep.subr.bf16.mxu1 %v4396_v38  ;;  %v4487_v37 = vld [vmem:[%s5266_s7 + $0x7b4] ss:$8 sps:$4 sm:$0xff]   ;;  %v4482_v38 = vld [vmem:[%s5266_s7 + $0x3b0] ss:$8 sps:$4 sm:$0xff]  }
 0x15e   : > { %3501 = vmatprep.subr.bf16.mxu0 %v4399_v39  ;;  %v4485_v39 = vld [vmem:[%s5266_s7 + $0x7b0] ss:$8 sps:$4 sm:$0xff]  }
 0x160   : > { %3338 = vmatpush1.bf16.msra.mxu1 %v4394_v40  ;;  %v4490_v40 = vld [vmem:[%s5266_s7 + $0x3c4] ss:$8 sps:$4 sm:$0xff]  }
 0x161   : > { %3502 = vmatpush1.bf16.msra.mxu0 %v4397_v41  ;;  %3339 = vmatprep.subr.bf16.mxu1 %v4402_v42  ;;  %v4493_v41 = vld [vmem:[%s5266_s7 + $0x7c4] ss:$8 sps:$4 sm:$0xff]   ;;  %v4488_v42 = vld [vmem:[%s5266_s7 + $0x3c0] ss:$8 sps:$4 sm:$0xff]  }
 0x162   : > { %3503 = vmatprep.subr.bf16.mxu0 %v4405_v43  ;;  %v4491_v43 = vld [vmem:[%s5266_s7 + $0x7c0] ss:$8 sps:$4 sm:$0xff]  }
 0x164   : > { %3340 = vmatpush1.bf16.msra.mxu1 %v4400_v44  ;;  %v4496_v44 = vld [vmem:[%s5266_s7 + $0x3d4] ss:$8 sps:$4 sm:$0xff]  }
 0x165   : > { %3504 = vmatpush1.bf16.msra.mxu0 %v4403_v45  ;;  %3341 = vmatprep.subr.bf16.mxu1 %v4408_v32  ;;  %v4499_v45 = vld [vmem:[%s5266_s7 + $0x7d4] ss:$8 sps:$4 sm:$0xff]   ;;  %v4494_v32 = vld [vmem:[%s5266_s7 + $0x3d0] ss:$8 sps:$4 sm:$0xff]  }
 0x166   : > { %3505 = vmatprep.subr.bf16.mxu0 %v4411_v46  ;;  %v4497_v46 = vld [vmem:[%s5266_s7 + $0x7d0] ss:$8 sps:$4 sm:$0xff]  }
 0x168   : > { %3342 = vmatpush1.bf16.msra.mxu1 %v4406_v33  ;;  %v4502_v33 = vld [vmem:[%s5266_s7 + $0x3e4] ss:$8 sps:$4 sm:$0xff]  }
 0x169   : > { %3506 = vmatpush1.bf16.msra.mxu0 %v4409_v47  ;;  %3352 = vmatprep.subr.bf16.mxu1 %v4416_v48  ;;  %v4505_v47 = vld [vmem:[%s5266_s7 + $0x7e4] ss:$8 sps:$4 sm:$0xff]   ;;  %v4500_v48 = vld [vmem:[%s5266_s7 + $0x3e0] ss:$8 sps:$4 sm:$0xff]  }
 0x16a   : > { %3516 = vmatprep.subr.bf16.mxu0 %v4421_v50  ;;  %v4503_v50 = vld [vmem:[%s5266_s7 + $0x7e0] ss:$8 sps:$4 sm:$0xff]  }
 0x16b   : > { %3344 = vmatmul.mubr.bf16.vlgmr.msra.gmra.mrb[0].mxu1 %v3735_v53  ;;  %v4508_v53 = vld [vmem:[%s5266_s7 + $0x3f4] ss:$8 sps:$4 sm:$0xff]  }
 0x16c   : > { %3508 = vmatmul.mubr.bf16.vlgmr.msra.gmra.mrb[0].mxu0 %v3743_v54  ;;  %3353 = vmatpush1.bf16.msra.mxu1 %v4414_v56  ;;  %v4511_v54 = vld [vmem:[%s5266_s7 + $0x7f4] ss:$8 sps:$4 sm:$0xff]   ;;  %v4506_v56 = vld [vmem:[%s5266_s7 + $0x3f0] ss:$8 sps:$4 sm:$0xff]  }
 0x16d   : > { %3517 = vmatpush1.bf16.msra.mxu0 %v4419_v57  ;;  %3354 = vmatprep.subr.bf16.mxu1 %v4424_v58  ;;  %v4509_v57 = vld [vmem:[%s5266_s7 + $0x7f0] ss:$8 sps:$4 sm:$0xff]   ;;  %v4518_v58 = vld [vmem:[%s5266_s7 + $0x804] ss:$8 sps:$4 sm:$0xff]  }
 0x16e   : > { %3518 = vmatprep.subr.bf16.mxu0 %v4427_v49  ;;  %3384 = vmatprep.mubr.bf16.mxu1 %v3738_v52  ;;  %v5582_v49 = vld [vmem:[%s5645_s0 + $0x40] sm:$0xff]  ;;  %v3737_v52 = vcombine.low %v5501_v51, %v5501_v51  ;;  %v4519_v51 = vld [vmem:[%s5266_s7 + $0x810] ss:$8 sps:$4 sm:$0xff]  }
 0x16f   : > { %3548 = vmatprep.mubr.bf16.mxu0 %v3746_v59  ;;  %v3745_v59 = vcombine.low %v5510_v55, %v5510_v55  ;;  %v4524_v55 = vld [vmem:[%s5266_s7 + $0x824] ss:$8 sps:$4 sm:$0xff]  }
 0x170   : > { %3355 = vmatpush1.bf16.msra.mxu1 %v4422_v60  ;;  %v4516_v60 = vld [vmem:[%s5266_s7 + $0x800] ss:$8 sps:$4 sm:$0xff]  }
 0x171   : > { %3519 = vmatpush1.bf16.msra.mxu0 %v4425_v61  ;;  %3356 = vmatprep.subr.bf16.mxu1 %v4430_v62  ;;  %v3748_v61 = vcombine.high %v5582_v49, %v5582_v49  ;;  %v4521_v62 = vld [vmem:[%s5266_s7 + $0x814] ss:$8 sps:$4 sm:$0xff]  }
 0x172   : > { %3520 = vmatprep.subr.bf16.mxu0 %v4433_v63  ;;  %v4522_v63 = vld [vmem:[%s5266_s7 + $0x820] ss:$8 sps:$4 sm:$0xff]  }
 0x174   : > { %3357 = vmatpush1.bf16.msra.mxu1 %v4428_v0  ;;  %v4527_v0 = vld [vmem:[%s5266_s7 + $0x834] ss:$8 sps:$4 sm:$0xff]  }
 0x175   : > { %3521 = vmatpush1.bf16.msra.mxu0 %v4431_v1  ;;  %3358 = vmatprep.subr.bf16.mxu1 %v4436_v2  ;;  %v4525_v1 = vld [vmem:[%s5266_s7 + $0x830] ss:$8 sps:$4 sm:$0xff]   ;;  %v4530_v2 = vld [vmem:[%s5266_s7 + $0x844] ss:$8 sps:$4 sm:$0xff]  }
 0x176   : > { %3522 = vmatprep.subr.bf16.mxu0 %v4439_v3  ;;  %v4528_v3 = vld [vmem:[%s5266_s7 + $0x840] ss:$8 sps:$4 sm:$0xff]  }
 0x178   : > { %3359 = vmatpush1.bf16.msra.mxu1 %v4434_v4  ;;  %v4533_v4 = vld [vmem:[%s5266_s7 + $0x854] ss:$8 sps:$4 sm:$0xff]  }
 0x179   : > { %3523 = vmatpush1.bf16.msra.mxu0 %v4437_v5  ;;  %3360 = vmatprep.subr.bf16.mxu1 %v4442_v6  ;;  %v4531_v5 = vld [vmem:[%s5266_s7 + $0x850] ss:$8 sps:$4 sm:$0xff]   ;;  %v4536_v6 = vld [vmem:[%s5266_s7 + $0x864] ss:$8 sps:$4 sm:$0xff]  }
 0x17a   : > { %3524 = vmatprep.subr.bf16.mxu0 %v4445_v7  ;;  %v4534_v7 = vld [vmem:[%s5266_s7 + $0x860] ss:$8 sps:$4 sm:$0xff]  }
 0x17c   : > { %3361 = vmatpush1.bf16.msra.mxu1 %v4440_v8  ;;  %v4539_v8 = vld [vmem:[%s5266_s7 + $0x874] ss:$8 sps:$4 sm:$0xff]  }
 0x17d   : > { %3525 = vmatpush1.bf16.msra.mxu0 %v4443_v9  ;;  %3362 = vmatprep.subr.bf16.mxu1 %v4448_v10  ;;  %v4537_v9 = vld [vmem:[%s5266_s7 + $0x870] ss:$8 sps:$4 sm:$0xff]   ;;  %v4542_v10 = vld [vmem:[%s5266_s7 + $0x884] ss:$8 sps:$4 sm:$0xff]  }
 0x17e   : > { %3526 = vmatprep.subr.bf16.mxu0 %v4451_v11  ;;  %v4540_v11 = vld [vmem:[%s5266_s7 + $0x880] ss:$8 sps:$4 sm:$0xff]  }
 0x180   : > { %3363 = vmatpush1.bf16.msra.mxu1 %v4446_v12  ;;  %v4545_v12 = vld [vmem:[%s5266_s7 + $0x894] ss:$8 sps:$4 sm:$0xff]  }
 0x181   : > { %3527 = vmatpush1.bf16.msra.mxu0 %v4449_v13  ;;  %3364 = vmatprep.subr.bf16.mxu1 %v4454_v14  ;;  %v4543_v13 = vld [vmem:[%s5266_s7 + $0x890] ss:$8 sps:$4 sm:$0xff]   ;;  %v4548_v14 = vld [vmem:[%s5266_s7 + $0x8a4] ss:$8 sps:$4 sm:$0xff]  }
 0x182   : > { %3528 = vmatprep.subr.bf16.mxu0 %v4457_v15  ;;  %v4546_v15 = vld [vmem:[%s5266_s7 + $0x8a0] ss:$8 sps:$4 sm:$0xff]  }
 0x184   : > { %3365 = vmatpush1.bf16.msra.mxu1 %v4452_v16  ;;  %v4551_v16 = vld [vmem:[%s5266_s7 + $0x8b4] ss:$8 sps:$4 sm:$0xff]  }
 0x185   : > { %3529 = vmatpush1.bf16.msra.mxu0 %v4455_v17  ;;  %3366 = vmatprep.subr.bf16.mxu1 %v4460_v18  ;;  %v4549_v17 = vld [vmem:[%s5266_s7 + $0x8b0] ss:$8 sps:$4 sm:$0xff]   ;;  %v4554_v18 = vld [vmem:[%s5266_s7 + $0x8c4] ss:$8 sps:$4 sm:$0xff]  }
 0x186   : > { %3530 = vmatprep.subr.bf16.mxu0 %v4463_v19  ;;  %v4552_v19 = vld [vmem:[%s5266_s7 + $0x8c0] ss:$8 sps:$4 sm:$0xff]  }
 0x188   : > { %3367 = vmatpush1.bf16.msra.mxu1 %v4458_v20  ;;  %v4557_v20 = vld [vmem:[%s5266_s7 + $0x8d4] ss:$8 sps:$4 sm:$0xff]  }
 0x189   : > { %3531 = vmatpush1.bf16.msra.mxu0 %v4461_v21  ;;  %3368 = vmatprep.subr.bf16.mxu1 %v4466_v22  ;;  %v4555_v21 = vld [vmem:[%s5266_s7 + $0x8d0] ss:$8 sps:$4 sm:$0xff]   ;;  %v4560_v22 = vld [vmem:[%s5266_s7 + $0x8e4] ss:$8 sps:$4 sm:$0xff]  }
 0x18a   : > { %3532 = vmatprep.subr.bf16.mxu0 %v4469_v23  ;;  %v4558_v23 = vld [vmem:[%s5266_s7 + $0x8e0] ss:$8 sps:$4 sm:$0xff]  }
 0x18c   : > { %3369 = vmatpush1.bf16.msra.mxu1 %v4464_v24  ;;  %v4563_v24 = vld [vmem:[%s5266_s7 + $0x8f4] ss:$8 sps:$4 sm:$0xff]  }
 0x18d   : > { %3533 = vmatpush1.bf16.msra.mxu0 %v4467_v25  ;;  %3370 = vmatprep.subr.bf16.mxu1 %v4472_v26  ;;  %v4561_v25 = vld [vmem:[%s5266_s7 + $0x8f0] ss:$8 sps:$4 sm:$0xff]   ;;  %v3747_v26 = vcombine.low %v5582_v49, %v5582_v49  ;;  %s1415_s7 = scalar_lea.vmem %s5648_s3, %s3730_s5 }
 0x18e   : > { %3534 = vmatprep.subr.bf16.mxu0 %v4475_v27 }
 0x190   : > { %3371 = vmatpush1.bf16.msra.mxu1 %v4470_v28 }
 0x191   : > { %3535 = vmatpush1.bf16.msra.mxu0 %v4473_v29  ;;  %3372 = vmatprep.subr.bf16.mxu1 %v4478_v30 }
 0x192   : > { %3536 = vmatprep.subr.bf16.mxu0 %v4481_v31  ;;  %v1716_v31 = vlaneseq }
 0x194   : > { %3373 = vmatpush1.bf16.msra.mxu1 %v4476_v34  ;;  %v1717_v34 = vshrl.u32 %v1716_v31, 7 }
 0x195   : > { %3537 = vmatpush1.bf16.msra.mxu0 %v4479_v35  ;;  %3374 = vmatprep.subr.bf16.mxu1 %v4484_v36  ;;  %v1714_v36 = vld [vmem:[%s1405_s4] sm:$0x3] }
 0x196   : > { %3538 = vmatprep.subr.bf16.mxu0 %v4487_v37  ;;  %v1718_v35 = vsub.s32 0, %v1717_v34  ;;  %v1722_v37 = vsub.s32 1, %v1717_v34 }
 0x198   : > { %3375 = vmatpush1.bf16.msra.mxu1 %v4482_v38  ;;  %v1719_v38 = vrot.slane %v1714_v36, %v1718_v35 }
 0x199   : > { %3539 = vmatpush1.bf16.msra.mxu0 %v4485_v39  ;;  %3376 = vmatprep.subr.bf16.mxu1 %v4490_v40  ;;  %v1723_v39 = vrot.slane %v1714_v36, %v1722_v37 }
 0x19a   : > { %3540 = vmatprep.subr.bf16.mxu0 %v4493_v41 }
 0x19c   : > { %3377 = vmatpush1.bf16.msra.mxu1 %v4488_v42 }
 0x19d   : > { %3541 = vmatpush1.bf16.msra.mxu0 %v4491_v43  ;;  %3378 = vmatprep.subr.bf16.mxu1 %v4496_v44 }
 0x19e   : > { %3542 = vmatprep.subr.bf16.mxu0 %v4499_v45 }
 0x1a0   : > { %3379 = vmatpush1.bf16.msra.mxu1 %v4494_v32 }
 0x1a1   : > { %3543 = vmatpush1.bf16.msra.mxu0 %v4497_v46  ;;  %3380 = vmatprep.subr.bf16.mxu1 %v4502_v33 }
 0x1a2   : > { %3544 = vmatprep.subr.bf16.mxu0 %v4505_v47 }
 0x1a4   : > { %3381 = vmatpush1.bf16.msra.mxu1 %v4500_v48 }
 0x1a5   : > { %3545 = vmatpush1.bf16.msra.mxu0 %v4503_v50  ;;  %3382 = vmatprep.subr.bf16.mxu1 %v4508_v53 }
 0x1a6   : > { %3546 = vmatprep.subr.bf16.mxu0 %v4511_v54 }
 0x1a8   : > { %3383 = vmatpush1.bf16.msra.mxu1 %v4506_v56 }
 0x1a9   : > { %3547 = vmatpush1.bf16.msra.mxu0 %v4509_v57 }
 0x1aa   : > { %3557 = vmatprep.subr.bf16.mxu0 %v4518_v58 }
 0x1ab   : > { %3385 = vmatmul.mubr.bf16.vlgmr.msra.gmra.mrb[0].mxu1 %v3737_v52 }
 0x1ac   : > { %3549 = vmatmul.mubr.bf16.vlgmr.msra.gmra.mrb[0].mxu0 %v3745_v59 }
 0x1ad   : > { %3558 = vmatpush1.bf16.msra.mxu0 %v4516_v60  ;;  %3589 = vmatprep.mubr.bf16.mxu0 %v3748_v61 }
 0x1ae   : > { %3559 = vmatprep.subr.bf16.mxu0 %v4521_v62 }
 0x1b1   : > { %3560 = vmatpush1.bf16.msra.mxu0 %v4519_v51 }
 0x1b2   : > { %3561 = vmatprep.subr.bf16.mxu0 %v4524_v55 }
 0x1b5   : > { %3562 = vmatpush1.bf16.msra.mxu0 %v4522_v63 }
 0x1b6   : > { %3563 = vmatprep.subr.bf16.mxu0 %v4527_v0 }
 0x1b9   : > { %3564 = vmatpush1.bf16.msra.mxu0 %v4525_v1 }
 0x1ba   : > { %3565 = vmatprep.subr.bf16.mxu0 %v4530_v2 }
 0x1bd   : > { %3566 = vmatpush1.bf16.msra.mxu0 %v4528_v3 }
 0x1be   : > { %3567 = vmatprep.subr.bf16.mxu0 %v4533_v4 }
 0x1c1   : > { %3568 = vmatpush1.bf16.msra.mxu0 %v4531_v5 }
 0x1c2   : > { %3569 = vmatprep.subr.bf16.mxu0 %v4536_v6 }
 0x1c5   : > { %3570 = vmatpush1.bf16.msra.mxu0 %v4534_v7 }
 0x1c6   : > { %3571 = vmatprep.subr.bf16.mxu0 %v4539_v8 }
 0x1c9   : > { %3572 = vmatpush1.bf16.msra.mxu0 %v4537_v9 }
 0x1ca   : > { %3573 = vmatprep.subr.bf16.mxu0 %v4542_v10 }
 0x1cd   : > { %3574 = vmatpush1.bf16.msra.mxu0 %v4540_v11 }
 0x1ce   : > { %3575 = vmatprep.subr.bf16.mxu0 %v4545_v12 }
 0x1d1   : > { %3576 = vmatpush1.bf16.msra.mxu0 %v4543_v13 }
 0x1d2   : > { %3577 = vmatprep.subr.bf16.mxu0 %v4548_v14 }
 0x1d5   : > { %3578 = vmatpush1.bf16.msra.mxu0 %v4546_v15 }
 0x1d6   : > { %3579 = vmatprep.subr.bf16.mxu0 %v4551_v16 }
 0x1d9   : > { %3580 = vmatpush1.bf16.msra.mxu0 %v4549_v17 }
 0x1da   : > { %3581 = vmatprep.subr.bf16.mxu0 %v4554_v18 }
 0x1dd   : > { %3582 = vmatpush1.bf16.msra.mxu0 %v4552_v19 }
 0x1de   : > { %3583 = vmatprep.subr.bf16.mxu0 %v4557_v20 }
 0x1e1   : > { %3584 = vmatpush1.bf16.msra.mxu0 %v4555_v21 }
 0x1e2   : > { %3585 = vmatprep.subr.bf16.mxu0 %v4560_v22 }
 0x1e5   : > { %3586 = vmatpush1.bf16.msra.mxu0 %v4558_v23 }
 0x1e6   : > { %3587 = vmatprep.subr.bf16.mxu0 %v4563_v24 }
 0x1e9   : > { %3588 = vmatpush1.bf16.msra.mxu0 %v4561_v25 }
 0x1ec   : > { %3590 = vmatmul.mubr.bf16.vlgmr.msra.gmra.mrb[0].mxu0 %v3747_v26 }
 0x27e   : > { %v3386_v27 = vpop.f32.mrb[0].mxu1 }
 0x27f   : > { %v3388_v28 = vpop.f32.mrb[1].mxu1  ;;  %v4042_v40 = vadd.f32 %v3386_v27, %v1719_v38 }
 0x280   : > { %v3390_v29 = vpop.f32.mrb[2].mxu1  ;;  %v4044_v41 = vadd.f32 %v3388_v28, %v1723_v39 }
 0x281   : > { %v3391_v30 = vpop.f32.mrb[3].mxu1 }
 0x2bf   : > { %v3591_v42 = vpop.f32.mrb[0].mxu0 }
 0x2c0   : > { %v4043_v43 = vadd.f32 %v4042_v40, %v3591_v42  ;;  %v3593_v44 = vpop.f32.mrb[1].mxu0 }
 0x2c1   : > { %v4045_v45 = vadd.f32 %v4044_v41, %v3593_v44  ;;  %v3595_v32 = vpop.f32.mrb[2].mxu0 }
 0x2c2   : > { %v3598_v46 = vmax.f32 %v4043_v43, 0.0  ;;  %v3596_v33 = vpop.f32.mrb[3].mxu0 }
 0x2c3   : > { %v3599_v47 = vmax.f32 %v4045_v45, 0.0 }
 0x2c5   : > { %v4041_v48 = vpack.c.bf16 %v3599_v47, %v3598_v46 }
 0x2c7   : > { %3608 = vst [vmem:[%s1415_s7] sm:$0xff] %v4041_v48 }
 0x2c8 PF: > { %s13_s16 = sadd.s32 1, %s4604_s16   ;;  %s5649_s12 = smov %s4592_s13 }
 0x2c9   : > { %p10_p10 = scmp.ge.s32.totalorder %s13_s16, 4   ;;  %s5650_s13 = smov %s4661_s20 }
 0x2ca   : > { %s5651_s14 = smov %s4600_s15  ;;  %s5652_s15 = smov %s5654_s17 }
 0x2cb   :  { %12 = sbr.rel (!%p10_p10) target bundleno = 3 (0x3), region = 111 }

// kernel: generator_forward.12
= control target key start
LH: loop header
LB: loop body
LE: loop exit
PB: predicated region body
PF: predicated region fallthrough
CT: control target
= control target key end

     0   :  { %s2415_s12 = smov 0   ;;  %s2417_s13 = smov 0   ;;  %s2916_s0 = inlined_call_operand.vmem [shape: bf16[32,1152], index: 0, kind: input, shape index: {}]   ;;  %s2917_s1 = inlined_call_operand.vmem [shape: bf16[1152,256], index: 1, kind: input, shape index: {}]   ;;  %s2918_s2 = inlined_call_operand.vmem [shape: f32[1,256], index: 2, kind: input, shape index: {}]   ;;  %s2919_s3 = inlined_call_operand.vmem [shape: bf16[32,256], index: 3, kind: output, shape index: {}]  }
   0x1   :  { %s2419_s14 = smov 0   ;;  %s2421_s15 = smov 0  }
   0x2   :  { %s2423_s16 = smov 0  }
   0x3 LB: > { %s22_s17 = sadd.s32 1, %s2389_s15  ;;  %s1951_s18 = sadd.s32 4294967295, %s2393_s16   ;;  %s2393_s16 = sphi %s2423_s16, %s13_s16   ;;  %s2389_s15 = sphi %s2421_s15, %s2924_s15   ;;  %s2385_s14 = sphi %s2419_s14, %s2923_s14   ;;  %s2381_s13 = sphi %s2417_s13, %s2922_s13   ;;  %s2377_s12 = sphi %s2415_s12, %s2921_s12  }
   0x4   : > { %p23_p0 = scmp.ge.s32.totalorder %s22_s17, 2  ;;  %p65_p1 = scmp.ne.s32.totalorder %s2381_s13, %s2377_s12 }
   0x5   : > { %p66_p2 = scmp.eq.s32.totalorder %s2393_s16, 0  ;;  %p123_p4 = scmp.eq.s32.totalorder %s1951_s18, 1 }
   0x6   : > { %s2926_s17 = smov (%p23_p0, %s22_s17), 0  ;;  %s58_s20 = sadd.s32 1, %s2381_s13 }
   0x7   : > { %p67_p3 = por %p66_p2, %p65_p1  ;;  %s55_s19 = ssub.s32 %s2389_s15, %s2926_s17 }
   0x8   : > { %p56_p5 = scmp.eq.s32.totalorder %s55_s19, 0  ;;  %p2450_p6 = por %p123_p4, %p65_p1 }
   0x9   : > { %p1955_p7 = scmp.ge.s32.totalorder %s2393_s16, 2 }
   0xa   : > { %s2455_s22 = scalar_select %p56_p5, %s2381_s13, %s58_s20  }
   0xb   : > { %155 = sbr.rel (%p1955_p7) target bundleno = 118 (0x76), region = 20 }
  0x12   : > { %158 = sbr.rel (!%p67_p3) target bundleno = 118 (0x76), region = 24  ;;  %s160_s23 = sand.u32 (%p67_p3), 1, %s2381_s13  }
  0x13   : > { %s1956_s24 = sshll.u32 (%p67_p3), %s2389_s15, 2  ;;  %s2215_s25 = smul.u32 (%p67_p3), 576, %s160_s23 }
  0x14   : > { %s2463_s28 = scalar_lea.vmem (%p67_p3), %s2917_s1, %s1956_s24 }
  0x15   : > { %v180_v0 = vld [vmem:[%s2463_s28] sm:$0xf] (%p67_p3)  ;;  %v182_v1 = vld [vmem:[%s2463_s28 + $0x8] sm:$0xf] (%p67_p3)  ;;  %v184_v2 = vld [vmem:[%s2463_s28 + $0x10] sm:$0xf] (%p67_p3) }
  0x16   : > { %v186_v3 = vld [vmem:[%s2463_s28 + $0x18] sm:$0xf] (%p67_p3)  ;;  %v188_v4 = vld [vmem:[%s2463_s28 + $0x20] sm:$0xf] (%p67_p3)  ;;  %s2470_s29 = scalar_lea.vmem (%p67_p3), [#allocation2], %s2215_s25 }
  0x17   : > { %181 = vst [vmem:[%s2470_s29] sm:$0xf] (%p67_p3), %v180_v0  ;;  %183 = vst [vmem:[%s2470_s29 + $0x4] sm:$0xf] (%p67_p3), %v182_v1  ;;  %v190_v5 = vld [vmem:[%s2463_s28 + $0x28] sm:$0xf] (%p67_p3) }
  0x18   : > { %185 = vst [vmem:[%s2470_s29 + $0x8] sm:$0xf] (%p67_p3), %v184_v2  ;;  %187 = vst [vmem:[%s2470_s29 + $0xc] sm:$0xf] (%p67_p3), %v186_v3  ;;  %v192_v6 = vld [vmem:[%s2463_s28 + $0x30] sm:$0xf] (%p67_p3) }
  0x19   : > { %189 = vst [vmem:[%s2470_s29 + $0x10] sm:$0xf] %v188_v4  ;;  %v194_v7 = vld [vmem:[%s2463_s28 + $0x38] sm:$0xf]  ;;  %191 = vst [vmem:[%s2470_s29 + $0x14] sm:$0xf] %v190_v5 }
  0x1a   : > { %193 = vst [vmem:[%s2470_s29 + $0x18] sm:$0xf] %v192_v6  ;;  %195 = vst [vmem:[%s2470_s29 + $0x1c] sm:$0xf] %v194_v7  ;;  %v196_v8 = vld [vmem:[%s2463_s28 + $0x40] sm:$0xf] }
  0x1b   : > { %v198_v9 = vld [vmem:[%s2463_s28 + $0x48] sm:$0xf]  ;;  %v200_v10 = vld [vmem:[%s2463_s28 + $0x50] sm:$0xf]  ;;  %197 = vst [vmem:[%s2470_s29 + $0x20] sm:$0xf] %v196_v8 }
  0x1c   : > { %199 = vst [vmem:[%s2470_s29 + $0x24] sm:$0xf] %v198_v9  ;;  %201 = vst [vmem:[%s2470_s29 + $0x28] sm:$0xf] %v200_v10  ;;  %v202_v11 = vld [vmem:[%s2463_s28 + $0x58] sm:$0xf] }
  0x1d   : > { %v204_v12 = vld [vmem:[%s2463_s28 + $0x60] sm:$0xf]  ;;  %v206_v13 = vld [vmem:[%s2463_s28 + $0x68] sm:$0xf]  ;;  %203 = vst [vmem:[%s2470_s29 + $0x2c] sm:$0xf] %v202_v11 }
  0x1e   : > { %205 = vst [vmem:[%s2470_s29 + $0x30] sm:$0xf] %v204_v12  ;;  %207 = vst [vmem:[%s2470_s29 + $0x34] sm:$0xf] %v206_v13  ;;  %v208_v14 = vld [vmem:[%s2463_s28 + $0x70] sm:$0xf] }
  0x1f   : > { %v210_v15 = vld [vmem:[%s2463_s28 + $0x78] sm:$0xf]  ;;  %v212_v16 = vld [vmem:[%s2463_s28 + $0x80] sm:$0xf]  ;;  %209 = vst [vmem:[%s2470_s29 + $0x38] sm:$0xf] %v208_v14 }
  0x20   : > { %211 = vst [vmem:[%s2470_s29 + $0x3c] sm:$0xf] %v210_v15  ;;  %213 = vst [vmem:[%s2470_s29 + $0x40] sm:$0xf] %v212_v16  ;;  %v214_v17 = vld [vmem:[%s2463_s28 + $0x88] sm:$0xf] }
  0x21   : > { %v216_v18 = vld [vmem:[%s2463_s28 + $0x90] sm:$0xf]  ;;  %v218_v19 = vld [vmem:[%s2463_s28 + $0x98] sm:$0xf]  ;;  %215 = vst [vmem:[%s2470_s29 + $0x44] sm:$0xf] %v214_v17 }
  0x22   : > { %217 = vst [vmem:[%s2470_s29 + $0x48] sm:$0xf] %v216_v18  ;;  %219 = vst [vmem:[%s2470_s29 + $0x4c] sm:$0xf] %v218_v19  ;;  %v220_v20 = vld [vmem:[%s2463_s28 + $0xa0] sm:$0xf] }
  0x23   : > { %v222_v21 = vld [vmem:[%s2463_s28 + $0xa8] sm:$0xf]  ;;  %v224_v22 = vld [vmem:[%s2463_s28 + $0xb0] sm:$0xf]  ;;  %221 = vst [vmem:[%s2470_s29 + $0x50] sm:$0xf] %v220_v20 }
  0x24   : > { %223 = vst [vmem:[%s2470_s29 + $0x54] sm:$0xf] %v222_v21  ;;  %225 = vst [vmem:[%s2470_s29 + $0x58] sm:$0xf] %v224_v22  ;;  %v226_v23 = vld [vmem:[%s2463_s28 + $0xb8] sm:$0xf] }
  0x25   : > { %v228_v24 = vld [vmem:[%s2463_s28 + $0xc0] sm:$0xf]  ;;  %v230_v25 = vld [vmem:[%s2463_s28 + $0xc8] sm:$0xf]  ;;  %227 = vst [vmem:[%s2470_s29 + $0x5c] sm:$0xf] %v226_v23 }
  0x26   : > { %229 = vst [vmem:[%s2470_s29 + $0x60] sm:$0xf] %v228_v24  ;;  %231 = vst [vmem:[%s2470_s29 + $0x64] sm:$0xf] %v230_v25  ;;  %v232_v26 = vld [vmem:[%s2463_s28 + $0xd0] sm:$0xf] }
  0x27   : > { %v234_v27 = vld [vmem:[%s2463_s28 + $0xd8] sm:$0xf]  ;;  %v236_v28 = vld [vmem:[%s2463_s28 + $0xe0] sm:$0xf]  ;;  %233 = vst [vmem:[%s2470_s29 + $0x68] sm:$0xf] %v232_v26 }
  0x28   : > { %235 = vst [vmem:[%s2470_s29 + $0x6c] sm:$0xf] %v234_v27  ;;  %237 = vst [vmem:[%s2470_s29 + $0x70] sm:$0xf] %v236_v28  ;;  %v238_v29 = vld [vmem:[%s2463_s28 + $0xe8] sm:$0xf] }
  0x29   : > { %v240_v30 = vld [vmem:[%s2463_s28 + $0xf0] sm:$0xf]  ;;  %v242_v31 = vld [vmem:[%s2463_s28 + $0xf8] sm:$0xf]  ;;  %239 = vst [vmem:[%s2470_s29 + $0x74] sm:$0xf] %v238_v29 }
  0x2a   : > { %241 = vst [vmem:[%s2470_s29 + $0x78] sm:$0xf] %v240_v30  ;;  %243 = vst [vmem:[%s2470_s29 + $0x7c] sm:$0xf] %v242_v31  ;;  %v244_v32 = vld [vmem:[%s2463_s28 + $0x100] sm:$0xf] }
  0x2b   : > { %v246_v33 = vld [vmem:[%s2463_s28 + $0x108] sm:$0xf]  ;;  %v248_v34 = vld [vmem:[%s2463_s28 + $0x110] sm:$0xf]  ;;  %245 = vst [vmem:[%s2470_s29 + $0x80] sm:$0xf] %v244_v32 }
  0x2c   : > { %247 = vst [vmem:[%s2470_s29 + $0x84] sm:$0xf] %v246_v33  ;;  %249 = vst [vmem:[%s2470_s29 + $0x88] sm:$0xf] %v248_v34  ;;  %v250_v35 = vld [vmem:[%s2463_s28 + $0x118] sm:$0xf] }
  0x2d   : > { %v252_v36 = vld [vmem:[%s2463_s28 + $0x120] sm:$0xf]  ;;  %v254_v37 = vld [vmem:[%s2463_s28 + $0x128] sm:$0xf]  ;;  %251 = vst [vmem:[%s2470_s29 + $0x8c] sm:$0xf] %v250_v35 }
  0x2e   : > { %253 = vst [vmem:[%s2470_s29 + $0x90] sm:$0xf] %v252_v36  ;;  %255 = vst [vmem:[%s2470_s29 + $0x94] sm:$0xf] %v254_v37  ;;  %v256_v38 = vld [vmem:[%s2463_s28 + $0x130] sm:$0xf] }
  0x2f   : > { %v258_v39 = vld [vmem:[%s2463_s28 + $0x138] sm:$0xf]  ;;  %v260_v40 = vld [vmem:[%s2463_s28 + $0x140] sm:$0xf]  ;;  %257 = vst [vmem:[%s2470_s29 + $0x98] sm:$0xf] %v256_v38 }
  0x30   : > { %259 = vst [vmem:[%s2470_s29 + $0x9c] sm:$0xf] %v258_v39  ;;  %261 = vst [vmem:[%s2470_s29 + $0xa0] sm:$0xf] %v260_v40  ;;  %v262_v41 = vld [vmem:[%s2463_s28 + $0x148] sm:$0xf] }
  0x31   : > { %v264_v42 = vld [vmem:[%s2463_s28 + $0x150] sm:$0xf]  ;;  %v266_v43 = vld [vmem:[%s2463_s28 + $0x158] sm:$0xf]  ;;  %263 = vst [vmem:[%s2470_s29 + $0xa4] sm:$0xf] %v262_v41 }
  0x32   : > { %265 = vst [vmem:[%s2470_s29 + $0xa8] sm:$0xf] %v264_v42  ;;  %267 = vst [vmem:[%s2470_s29 + $0xac] sm:$0xf] %v266_v43  ;;  %v268_v44 = vld [vmem:[%s2463_s28 + $0x160] sm:$0xf] }
  0x33   : > { %v270_v45 = vld [vmem:[%s2463_s28 + $0x168] sm:$0xf]  ;;  %v272_v46 = vld [vmem:[%s2463_s28 + $0x170] sm:$0xf]  ;;  %269 = vst [vmem:[%s2470_s29 + $0xb0] sm:$0xf] %v268_v44 }
  0x34   : > { %271 = vst [vmem:[%s2470_s29 + $0xb4] sm:$0xf] %v270_v45  ;;  %273 = vst [vmem:[%s2470_s29 + $0xb8] sm:$0xf] %v272_v46  ;;  %v274_v47 = vld [vmem:[%s2463_s28 + $0x178] sm:$0xf] }
  0x35   : > { %v276_v48 = vld [vmem:[%s2463_s28 + $0x180] sm:$0xf]  ;;  %v278_v49 = vld [vmem:[%s2463_s28 + $0x188] sm:$0xf]  ;;  %275 = vst [vmem:[%s2470_s29 + $0xbc] sm:$0xf] %v274_v47 }
  0x36   : > { %277 = vst [vmem:[%s2470_s29 + $0xc0] sm:$0xf] %v276_v48  ;;  %279 = vst [vmem:[%s2470_s29 + $0xc4] sm:$0xf] %v278_v49  ;;  %v280_v50 = vld [vmem:[%s2463_s28 + $0x190] sm:$0xf] }
  0x37   : > { %v282_v51 = vld [vmem:[%s2463_s28 + $0x198] sm:$0xf]  ;;  %v284_v52 = vld [vmem:[%s2463_s28 + $0x1a0] sm:$0xf]  ;;  %281 = vst [vmem:[%s2470_s29 + $0xc8] sm:$0xf] %v280_v50 }
  0x38   : > { %283 = vst [vmem:[%s2470_s29 + $0xcc] sm:$0xf] %v282_v51  ;;  %285 = vst [vmem:[%s2470_s29 + $0xd0] sm:$0xf] %v284_v52  ;;  %v286_v53 = vld [vmem:[%s2463_s28 + $0x1a8] sm:$0xf] }
  0x39   : > { %v288_v54 = vld [vmem:[%s2463_s28 + $0x1b0] sm:$0xf]  ;;  %v290_v55 = vld [vmem:[%s2463_s28 + $0x1b8] sm:$0xf]  ;;  %287 = vst [vmem:[%s2470_s29 + $0xd4] sm:$0xf] %v286_v53 }
  0x3a   : > { %289 = vst [vmem:[%s2470_s29 + $0xd8] sm:$0xf] %v288_v54  ;;  %291 = vst [vmem:[%s2470_s29 + $0xdc] sm:$0xf] %v290_v55  ;;  %v292_v56 = vld [vmem:[%s2463_s28 + $0x1c0] sm:$0xf] }
  0x3b   : > { %v294_v57 = vld [vmem:[%s2463_s28 + $0x1c8] sm:$0xf]  ;;  %v296_v58 = vld [vmem:[%s2463_s28 + $0x1d0] sm:$0xf]  ;;  %293 = vst [vmem:[%s2470_s29 + $0xe0] sm:$0xf] %v292_v56 }
  0x3c   : > { %295 = vst [vmem:[%s2470_s29 + $0xe4] sm:$0xf] %v294_v57  ;;  %297 = vst [vmem:[%s2470_s29 + $0xe8] sm:$0xf] %v296_v58  ;;  %v298_v59 = vld [vmem:[%s2463_s28 + $0x1d8] sm:$0xf] }
  0x3d   : > { %v300_v60 = vld [vmem:[%s2463_s28 + $0x1e0] sm:$0xf]  ;;  %v302_v61 = vld [vmem:[%s2463_s28 + $0x1e8] sm:$0xf]  ;;  %299 = vst [vmem:[%s2470_s29 + $0xec] sm:$0xf] %v298_v59 }
  0x3e   : > { %301 = vst [vmem:[%s2470_s29 + $0xf0] sm:$0xf] %v300_v60  ;;  %303 = vst [vmem:[%s2470_s29 + $0xf4] sm:$0xf] %v302_v61  ;;  %v304_v62 = vld [vmem:[%s2463_s28 + $0x1f0] sm:$0xf] }
  0x3f   : > { %v306_v63 = vld [vmem:[%s2463_s28 + $0x1f8] sm:$0xf]  ;;  %v308_v0 = vld [vmem:[%s2463_s28 + $0x200] sm:$0xf]  ;;  %305 = vst [vmem:[%s2470_s29 + $0xf8] sm:$0xf] %v304_v62 }
  0x40   : > { %307 = vst [vmem:[%s2470_s29 + $0xfc] sm:$0xf] %v306_v63  ;;  %309 = vst [vmem:[%s2470_s29 + $0x100] sm:$0xf] %v308_v0  ;;  %v310_v1 = vld [vmem:[%s2463_s28 + $0x208] sm:$0xf] }
  0x41   : > { %v312_v2 = vld [vmem:[%s2463_s28 + $0x210] sm:$0xf]  ;;  %v314_v3 = vld [vmem:[%s2463_s28 + $0x218] sm:$0xf]  ;;  %311 = vst [vmem:[%s2470_s29 + $0x104] sm:$0xf] %v310_v1 }
  0x42   : > { %313 = vst [vmem:[%s2470_s29 + $0x108] sm:$0xf] %v312_v2  ;;  %315 = vst [vmem:[%s2470_s29 + $0x10c] sm:$0xf] %v314_v3  ;;  %v316_v4 = vld [vmem:[%s2463_s28 + $0x220] sm:$0xf] }
  0x43   : > { %v318_v5 = vld [vmem:[%s2463_s28 + $0x228] sm:$0xf]  ;;  %v320_v6 = vld [vmem:[%s2463_s28 + $0x230] sm:$0xf]  ;;  %317 = vst [vmem:[%s2470_s29 + $0x110] sm:$0xf] %v316_v4 }
  0x44   : > { %319 = vst [vmem:[%s2470_s29 + $0x114] sm:$0xf] %v318_v5  ;;  %321 = vst [vmem:[%s2470_s29 + $0x118] sm:$0xf] %v320_v6  ;;  %v322_v7 = vld [vmem:[%s2463_s28 + $0x238] sm:$0xf] }
  0x45   : > { %v324_v8 = vld [vmem:[%s2463_s28 + $0x240] sm:$0xf]  ;;  %v326_v9 = vld [vmem:[%s2463_s28 + $0x248] sm:$0xf]  ;;  %323 = vst [vmem:[%s2470_s29 + $0x11c] sm:$0xf] %v322_v7 }
  0x46   : > { %325 = vst [vmem:[%s2470_s29 + $0x120] sm:$0xf] %v324_v8  ;;  %327 = vst [vmem:[%s2470_s29 + $0x124] sm:$0xf] %v326_v9  ;;  %v328_v10 = vld [vmem:[%s2463_s28 + $0x250] sm:$0xf] }
  0x47   : > { %v330_v11 = vld [vmem:[%s2463_s28 + $0x258] sm:$0xf]  ;;  %v332_v12 = vld [vmem:[%s2463_s28 + $0x260] sm:$0xf]  ;;  %329 = vst [vmem:[%s2470_s29 + $0x128] sm:$0xf] %v328_v10 }
  0x48   : > { %331 = vst [vmem:[%s2470_s29 + $0x12c] sm:$0xf] %v330_v11  ;;  %333 = vst [vmem:[%s2470_s29 + $0x130] sm:$0xf] %v332_v12  ;;  %v334_v13 = vld [vmem:[%s2463_s28 + $0x268] sm:$0xf] }
  0x49   : > { %v336_v14 = vld [vmem:[%s2463_s28 + $0x270] sm:$0xf]  ;;  %v338_v15 = vld [vmem:[%s2463_s28 + $0x278] sm:$0xf]  ;;  %335 = vst [vmem:[%s2470_s29 + $0x134] sm:$0xf] %v334_v13 }
  0x4a   : > { %337 = vst [vmem:[%s2470_s29 + $0x138] sm:$0xf] %v336_v14  ;;  %339 = vst [vmem:[%s2470_s29 + $0x13c] sm:$0xf] %v338_v15  ;;  %v340_v16 = vld [vmem:[%s2463_s28 + $0x280] sm:$0xf] }
  0x4b   : > { %v342_v17 = vld [vmem:[%s2463_s28 + $0x288] sm:$0xf]  ;;  %v344_v18 = vld [vmem:[%s2463_s28 + $0x290] sm:$0xf]  ;;  %341 = vst [vmem:[%s2470_s29 + $0x140] sm:$0xf] %v340_v16 }
  0x4c   : > { %343 = vst [vmem:[%s2470_s29 + $0x144] sm:$0xf] %v342_v17  ;;  %345 = vst [vmem:[%s2470_s29 + $0x148] sm:$0xf] %v344_v18  ;;  %v346_v19 = vld [vmem:[%s2463_s28 + $0x298] sm:$0xf] }
  0x4d   : > { %v348_v20 = vld [vmem:[%s2463_s28 + $0x2a0] sm:$0xf]  ;;  %v350_v21 = vld [vmem:[%s2463_s28 + $0x2a8] sm:$0xf]  ;;  %347 = vst [vmem:[%s2470_s29 + $0x14c] sm:$0xf] %v346_v19 }
  0x4e   : > { %349 = vst [vmem:[%s2470_s29 + $0x150] sm:$0xf] %v348_v20  ;;  %351 = vst [vmem:[%s2470_s29 + $0x154] sm:$0xf] %v350_v21  ;;  %v352_v22 = vld [vmem:[%s2463_s28 + $0x2b0] sm:$0xf] }
  0x4f   : > { %v354_v23 = vld [vmem:[%s2463_s28 + $0x2b8] sm:$0xf]  ;;  %v356_v24 = vld [vmem:[%s2463_s28 + $0x2c0] sm:$0xf]  ;;  %353 = vst [vmem:[%s2470_s29 + $0x158] sm:$0xf] %v352_v22 }
  0x50   : > { %355 = vst [vmem:[%s2470_s29 + $0x15c] sm:$0xf] %v354_v23  ;;  %357 = vst [vmem:[%s2470_s29 + $0x160] sm:$0xf] %v356_v24  ;;  %v358_v25 = vld [vmem:[%s2463_s28 + $0x2c8] sm:$0xf] }
  0x51   : > { %v360_v26 = vld [vmem:[%s2463_s28 + $0x2d0] sm:$0xf]  ;;  %v362_v27 = vld [vmem:[%s2463_s28 + $0x2d8] sm:$0xf]  ;;  %359 = vst [vmem:[%s2470_s29 + $0x164] sm:$0xf] %v358_v25 }
  0x52   : > { %361 = vst [vmem:[%s2470_s29 + $0x168] sm:$0xf] %v360_v26  ;;  %363 = vst [vmem:[%s2470_s29 + $0x16c] sm:$0xf] %v362_v27  ;;  %v364_v28 = vld [vmem:[%s2463_s28 + $0x2e0] sm:$0xf] }
  0x53   : > { %v366_v29 = vld [vmem:[%s2463_s28 + $0x2e8] sm:$0xf]  ;;  %v368_v30 = vld [vmem:[%s2463_s28 + $0x2f0] sm:$0xf]  ;;  %365 = vst [vmem:[%s2470_s29 + $0x170] sm:$0xf] %v364_v28 }
  0x54   : > { %367 = vst [vmem:[%s2470_s29 + $0x174] sm:$0xf] %v366_v29  ;;  %369 = vst [vmem:[%s2470_s29 + $0x178] sm:$0xf] %v368_v30  ;;  %v370_v31 = vld [vmem:[%s2463_s28 + $0x2f8] sm:$0xf] }
  0x55   : > { %v372_v32 = vld [vmem:[%s2463_s28 + $0x300] sm:$0xf]  ;;  %v374_v33 = vld [vmem:[%s2463_s28 + $0x308] sm:$0xf]  ;;  %371 = vst [vmem:[%s2470_s29 + $0x17c] sm:$0xf] %v370_v31 }
  0x56   : > { %373 = vst [vmem:[%s2470_s29 + $0x180] sm:$0xf] %v372_v32  ;;  %375 = vst [vmem:[%s2470_s29 + $0x184] sm:$0xf] %v374_v33  ;;  %v376_v34 = vld [vmem:[%s2463_s28 + $0x310] sm:$0xf] }
  0x57   : > { %v378_v35 = vld [vmem:[%s2463_s28 + $0x318] sm:$0xf]  ;;  %v380_v36 = vld [vmem:[%s2463_s28 + $0x320] sm:$0xf]  ;;  %377 = vst [vmem:[%s2470_s29 + $0x188] sm:$0xf] %v376_v34 }
  0x58   : > { %379 = vst [vmem:[%s2470_s29 + $0x18c] sm:$0xf] %v378_v35  ;;  %381 = vst [vmem:[%s2470_s29 + $0x190] sm:$0xf] %v380_v36  ;;  %v382_v37 = vld [vmem:[%s2463_s28 + $0x328] sm:$0xf] }
  0x59   : > { %v384_v38 = vld [vmem:[%s2463_s28 + $0x330] sm:$0xf]  ;;  %v386_v39 = vld [vmem:[%s2463_s28 + $0x338] sm:$0xf]  ;;  %383 = vst [vmem:[%s2470_s29 + $0x194] sm:$0xf] %v382_v37 }
  0x5a   : > { %385 = vst [vmem:[%s2470_s29 + $0x198] sm:$0xf] %v384_v38  ;;  %387 = vst [vmem:[%s2470_s29 + $0x19c] sm:$0xf] %v386_v39  ;;  %v388_v40 = vld [vmem:[%s2463_s28 + $0x340] sm:$0xf] }
  0x5b   : > { %v390_v41 = vld [vmem:[%s2463_s28 + $0x348] sm:$0xf]  ;;  %v392_v42 = vld [vmem:[%s2463_s28 + $0x350] sm:$0xf]  ;;  %389 = vst [vmem:[%s2470_s29 + $0x1a0] sm:$0xf] %v388_v40 }
  0x5c   : > { %391 = vst [vmem:[%s2470_s29 + $0x1a4] sm:$0xf] %v390_v41  ;;  %393 = vst [vmem:[%s2470_s29 + $0x1a8] sm:$0xf] %v392_v42  ;;  %v394_v43 = vld [vmem:[%s2463_s28 + $0x358] sm:$0xf] }
  0x5d   : > { %v396_v44 = vld [vmem:[%s2463_s28 + $0x360] sm:$0xf]  ;;  %v398_v45 = vld [vmem:[%s2463_s28 + $0x368] sm:$0xf]  ;;  %395 = vst [vmem:[%s2470_s29 + $0x1ac] sm:$0xf] %v394_v43 }
  0x5e   : > { %397 = vst [vmem:[%s2470_s29 + $0x1b0] sm:$0xf] %v396_v44  ;;  %399 = vst [vmem:[%s2470_s29 + $0x1b4] sm:$0xf] %v398_v45  ;;  %v400_v46 = vld [vmem:[%s2463_s28 + $0x370] sm:$0xf] }
  0x5f   : > { %v402_v47 = vld [vmem:[%s2463_s28 + $0x378] sm:$0xf]  ;;  %v404_v48 = vld [vmem:[%s2463_s28 + $0x380] sm:$0xf]  ;;  %401 = vst [vmem:[%s2470_s29 + $0x1b8] sm:$0xf] %v400_v46 }
  0x60   : > { %403 = vst [vmem:[%s2470_s29 + $0x1bc] sm:$0xf] %v402_v47  ;;  %405 = vst [vmem:[%s2470_s29 + $0x1c0] sm:$0xf] %v404_v48  ;;  %v406_v49 = vld [vmem:[%s2463_s28 + $0x388] sm:$0xf] }
  0x61   : > { %v408_v50 = vld [vmem:[%s2463_s28 + $0x390] sm:$0xf]  ;;  %v410_v51 = vld [vmem:[%s2463_s28 + $0x398] sm:$0xf]  ;;  %407 = vst [vmem:[%s2470_s29 + $0x1c4] sm:$0xf] %v406_v49 }
  0x62   : > { %409 = vst [vmem:[%s2470_s29 + $0x1c8] sm:$0xf] %v408_v50  ;;  %411 = vst [vmem:[%s2470_s29 + $0x1cc] sm:$0xf] %v410_v51  ;;  %v412_v52 = vld [vmem:[%s2463_s28 + $0x3a0] sm:$0xf] }
  0x63   : > { %v414_v53 = vld [vmem:[%s2463_s28 + $0x3a8] sm:$0xf]  ;;  %v416_v54 = vld [vmem:[%s2463_s28 + $0x3b0] sm:$0xf]  ;;  %413 = vst [vmem:[%s2470_s29 + $0x1d0] sm:$0xf] %v412_v52 }
  0x64   : > { %415 = vst [vmem:[%s2470_s29 + $0x1d4] sm:$0xf] %v414_v53  ;;  %417 = vst [vmem:[%s2470_s29 + $0x1d8] sm:$0xf] %v416_v54  ;;  %v418_v55 = vld [vmem:[%s2463_s28 + $0x3b8] sm:$0xf] }
  0x65   : > { %v420_v56 = vld [vmem:[%s2463_s28 + $0x3c0] sm:$0xf]  ;;  %v422_v57 = vld [vmem:[%s2463_s28 + $0x3c8] sm:$0xf]  ;;  %419 = vst [vmem:[%s2470_s29 + $0x1dc] sm:$0xf] %v418_v55 }
  0x66   : > { %421 = vst [vmem:[%s2470_s29 + $0x1e0] sm:$0xf] %v420_v56  ;;  %423 = vst [vmem:[%s2470_s29 + $0x1e4] sm:$0xf] %v422_v57  ;;  %v424_v58 = vld [vmem:[%s2463_s28 + $0x3d0] sm:$0xf] }
  0x67   : > { %v426_v59 = vld [vmem:[%s2463_s28 + $0x3d8] sm:$0xf]  ;;  %v428_v60 = vld [vmem:[%s2463_s28 + $0x3e0] sm:$0xf]  ;;  %425 = vst [vmem:[%s2470_s29 + $0x1e8] sm:$0xf] %v424_v58 }
  0x68   : > { %427 = vst [vmem:[%s2470_s29 + $0x1ec] sm:$0xf] %v426_v59  ;;  %429 = vst [vmem:[%s2470_s29 + $0x1f0] sm:$0xf] %v428_v60  ;;  %v430_v61 = vld [vmem:[%s2463_s28 + $0x3e8] sm:$0xf] }
  0x69   : > { %v432_v62 = vld [vmem:[%s2463_s28 + $0x3f0] sm:$0xf]  ;;  %v434_v63 = vld [vmem:[%s2463_s28 + $0x3f8] sm:$0xf]  ;;  %431 = vst [vmem:[%s2470_s29 + $0x1f4] sm:$0xf] %v430_v61 }
  0x6a   : > { %433 = vst [vmem:[%s2470_s29 + $0x1f8] sm:$0xf] %v432_v62  ;;  %435 = vst [vmem:[%s2470_s29 + $0x1fc] sm:$0xf] %v434_v63  ;;  %v436_v0 = vld [vmem:[%s2463_s28 + $0x400] sm:$0xf] }
  0x6b   : > { %v438_v1 = vld [vmem:[%s2463_s28 + $0x408] sm:$0xf]  ;;  %v440_v2 = vld [vmem:[%s2463_s28 + $0x410] sm:$0xf]  ;;  %437 = vst [vmem:[%s2470_s29 + $0x200] sm:$0xf] %v436_v0 }
  0x6c   : > { %439 = vst [vmem:[%s2470_s29 + $0x204] sm:$0xf] %v438_v1  ;;  %441 = vst [vmem:[%s2470_s29 + $0x208] sm:$0xf] %v440_v2  ;;  %v442_v3 = vld [vmem:[%s2463_s28 + $0x418] sm:$0xf] }
  0x6d   : > { %v444_v4 = vld [vmem:[%s2463_s28 + $0x420] sm:$0xf]  ;;  %v446_v5 = vld [vmem:[%s2463_s28 + $0x428] sm:$0xf]  ;;  %443 = vst [vmem:[%s2470_s29 + $0x20c] sm:$0xf] %v442_v3 }
  0x6e   : > { %445 = vst [vmem:[%s2470_s29 + $0x210] sm:$0xf] %v444_v4  ;;  %447 = vst [vmem:[%s2470_s29 + $0x214] sm:$0xf] %v446_v5  ;;  %v448_v6 = vld [vmem:[%s2463_s28 + $0x430] sm:$0xf] }
  0x6f   : > { %v450_v7 = vld [vmem:[%s2463_s28 + $0x438] sm:$0xf]  ;;  %v452_v8 = vld [vmem:[%s2463_s28 + $0x440] sm:$0xf]  ;;  %449 = vst [vmem:[%s2470_s29 + $0x218] sm:$0xf] %v448_v6 }
  0x70   : > { %451 = vst [vmem:[%s2470_s29 + $0x21c] sm:$0xf] %v450_v7  ;;  %453 = vst [vmem:[%s2470_s29 + $0x220] sm:$0xf] %v452_v8  ;;  %v454_v9 = vld [vmem:[%s2463_s28 + $0x448] sm:$0xf] }
  0x71   : > { %v456_v10 = vld [vmem:[%s2463_s28 + $0x450] sm:$0xf]  ;;  %v458_v11 = vld [vmem:[%s2463_s28 + $0x458] sm:$0xf]  ;;  %455 = vst [vmem:[%s2470_s29 + $0x224] sm:$0xf] %v454_v9 }
  0x72   : > { %457 = vst [vmem:[%s2470_s29 + $0x228] sm:$0xf] %v456_v10  ;;  %459 = vst [vmem:[%s2470_s29 + $0x22c] sm:$0xf] %v458_v11  ;;  %v460_v12 = vld [vmem:[%s2463_s28 + $0x460] sm:$0xf] }
  0x73   : > { %v462_v13 = vld [vmem:[%s2463_s28 + $0x468] sm:$0xf]  ;;  %v464_v14 = vld [vmem:[%s2463_s28 + $0x470] sm:$0xf]  ;;  %461 = vst [vmem:[%s2470_s29 + $0x230] sm:$0xf] %v460_v12 }
  0x74   : > { %463 = vst [vmem:[%s2470_s29 + $0x234] sm:$0xf] %v462_v13  ;;  %465 = vst [vmem:[%s2470_s29 + $0x238] sm:$0xf] %v464_v14  ;;  %v466_v15 = vld [vmem:[%s2463_s28 + $0x478] sm:$0xf] }
  0x75   : > { %467 = vst [vmem:[%s2470_s29 + $0x23c] sm:$0xf] %v466_v15 }
  0x76 PF: > { %p1957_p8 = scmp.ge.s32.totalorder %s2393_s16, 1  ;;  %p783_p9 = scmp.lt.s32.totalorder %s2393_s16, 3 }
  0x78   : > { %p784_p10 = pnand %p1957_p8, %p783_p9 }
  0x79   : > { %s790_s30 = sand.u32 (!%p784_p10), 1, %s2377_s12   ;;  %v2290_v16 = vld [vmem:[%s2916_s0 + $0x4] ss:$36 sps:$4 sm:$0xff] (!%p784_p10)   ;;  %v2295_v17 = vld [vmem:[%s2916_s0 + $0xc] ss:$36 sps:$4 sm:$0xff] (!%p784_p10)   ;;  %p828_p11 = scmp.lt.s32.totalorder (!%p784_p10), %s2385_s14, 1 }
  0x7a   : > { %787 = sbr.rel (%p784_p10) target bundleno = 454 (0x1c6), region = 69  ;;  %1560 = vmatprep.mubr.bf16.mxu0 (!%p784_p10), %v2290_v16  ;;  %1609 = vmatprep.mubr.bf16.mxu1 (!%p784_p10), %v2295_v17  ;;  %v2288_v47 = vld [vmem:[%s2916_s0] ss:$36 sps:$4 sm:$0xff] (!%p784_p10)   ;;  %v2316_v49 = vld [vmem:[%s2916_s0 + $0x4c] ss:$36 sps:$4 sm:$0xff] (!%p784_p10)  }
  0x7b   : > { %s2216_s4 = smul.u32 (!%p784_p10), 576, %s790_s30  ;;  %v2293_v51 = vld [vmem:[%s2916_s0 + $0x8] ss:$36 sps:$4 sm:$0xff] (!%p784_p10)   ;;  %v2321_v13 = vld [vmem:[%s2916_s0 + $0x54] ss:$36 sps:$4 sm:$0xff] (!%p784_p10)  }
  0x7c   : > { %v2319_v58 = vld [vmem:[%s2916_s0 + $0x48] ss:$36 sps:$4 sm:$0xff] (!%p784_p10)   ;;  %v2324_v15 = vld [vmem:[%s2916_s0 + $0x50] ss:$36 sps:$4 sm:$0xff] (!%p784_p10)  }
  0x7d   : > { %s2766_s9 = scalar_lea.vmem (!%p784_p10), [#allocation2], %s2216_s4 }
  0x7e   : > { %v2257_v18 = vld [vmem:[%s2766_s9 + $0x40] sm:$0xff] (!%p784_p10)   ;;  %v2261_v22 = vld [vmem:[%s2766_s9 + $0x48] sm:$0xff] (!%p784_p10)   ;;  %v2265_v26 = vld [vmem:[%s2766_s9 + $0x50] sm:$0xff] (!%p784_p10)  }
  0x7f   : > { %v2258_v19 = vld [vmem:[%s2766_s9] sm:$0xff] (!%p784_p10)   ;;  %2073 = vmatprep.subr.bf16.mxu0 (!%p784_p10), %v2257_v18  ;;  %v2262_v23 = vld [vmem:[%s2766_s9 + $0x8] sm:$0xff] (!%p784_p10)   ;;  %v2266_v27 = vld [vmem:[%s2766_s9 + $0x10] sm:$0xff] (!%p784_p10)  }
  0x80   : > { %v2259_v20 = vld [vmem:[%s2766_s9 + $0xc0] sm:$0xff] (!%p784_p10)   ;;  %2074 = vmatpush3.bf16.msra.mxu0 (!%p784_p10), %v2258_v19  ;;  %v2263_v24 = vld [vmem:[%s2766_s9 + $0xc8] sm:$0xff] (!%p784_p10)   ;;  %v2267_v28 = vld [vmem:[%s2766_s9 + $0xd0] sm:$0xff] (!%p784_p10)  }
  0x81   : > { %v2260_v21 = vld [vmem:[%s2766_s9 + $0x80] sm:$0xff]   ;;  %2101 = vmatprep.subr.bf16.mxu1 %v2259_v20  ;;  %2075 = vmatprep.subr.bf16.mxu0 %v2261_v22  ;;  %v2264_v25 = vld [vmem:[%s2766_s9 + $0x88] sm:$0xff]   ;;  %v2268_v29 = vld [vmem:[%s2766_s9 + $0x90] sm:$0xff]   ;;  %s829_s7 = scalar_select %p828_p11, %s2385_s14, 1 }
  0x82   : > { %2102 = vmatpush3.bf16.msra.mxu1 %v2260_v21  ;;  %v2269_v30 = vld [vmem:[%s2766_s9 + $0x58] sm:$0xff]   ;;  %v2273_v34 = vld [vmem:[%s2766_s9 + $0x60] sm:$0xff]   ;;  %v2277_v38 = vld [vmem:[%s2766_s9 + $0x68] sm:$0xff]   ;;  %s2055_s19 = sshll.u32 (%p2450_p6), %s2385_s14, 2 }
  0x83   : > { %2103 = vmatprep.subr.bf16.mxu1 %v2263_v24  ;;  %v2270_v31 = vld [vmem:[%s2766_s9 + $0x18] sm:$0xff]   ;;  %v2274_v35 = vld [vmem:[%s2766_s9 + $0x20] sm:$0xff]   ;;  %v2278_v39 = vld [vmem:[%s2766_s9 + $0x28] sm:$0xff]   ;;  %s830_s11 = scalar_lea.vmem %s2918_s2, %s829_s7  ;;  %s1808_s20 = scalar_lea.vmem (%p2450_p6), %s2919_s3, %s2055_s19 }
  0x84   : > { %2076 = vmatpush3.bf16.msra.mxu0 %v2262_v23  ;;  %v2271_v32 = vld [vmem:[%s2766_s9 + $0xd8] sm:$0xff]   ;;  %v2275_v36 = vld [vmem:[%s2766_s9 + $0xe0] sm:$0xff]   ;;  %v2279_v40 = vld [vmem:[%s2766_s9 + $0xe8] sm:$0xff]  }
  0x85   : > { %2077 = vmatprep.subr.bf16.mxu0 %v2265_v26  ;;  %v2272_v33 = vld [vmem:[%s2766_s9 + $0x98] sm:$0xff]   ;;  %v2276_v37 = vld [vmem:[%s2766_s9 + $0xa0] sm:$0xff]   ;;  %v2280_v41 = vld [vmem:[%s2766_s9 + $0xa8] sm:$0xff]  }
  0x86   : > { %2104 = vmatpush3.bf16.msra.mxu1 %v2264_v25  ;;  %v2281_v42 = vld [vmem:[%s2766_s9 + $0x70] sm:$0xff]   ;;  %v2285_v46 = vld [vmem:[%s2766_s9 + $0x78] sm:$0xff]   ;;  %v2292_v53 = vld [vmem:[%s2766_s9 + $0x140] sm:$0xff]  }
  0x87   : > { %2105 = vmatprep.subr.bf16.mxu1 %v2267_v28  ;;  %v2282_v43 = vld [vmem:[%s2766_s9 + $0x30] sm:$0xff]   ;;  %v2286_v48 = vld [vmem:[%s2766_s9 + $0x38] sm:$0xff]   ;;  %v2296_v54 = vld [vmem:[%s2766_s9 + $0x100] sm:$0xff]  }
  0x88   : > { %2078 = vmatpush3.bf16.msra.mxu0 %v2266_v27  ;;  %v2283_v44 = vld [vmem:[%s2766_s9 + $0xf0] sm:$0xff]   ;;  %v2287_v50 = vld [vmem:[%s2766_s9 + $0xf8] sm:$0xff]   ;;  %v2297_v55 = vld [vmem:[%s2766_s9 + $0x1c0] sm:$0xff]  }
  0x89   : > { %2079 = vmatprep.subr.bf16.mxu0 %v2269_v30  ;;  %v2284_v45 = vld [vmem:[%s2766_s9 + $0xb0] sm:$0xff]   ;;  %v2291_v52 = vld [vmem:[%s2766_s9 + $0xb8] sm:$0xff]   ;;  %v2298_v56 = vld [vmem:[%s2766_s9 + $0x180] sm:$0xff]  }
  0x8a   : > { %2106 = vmatpush3.bf16.msra.mxu1 %v2268_v29  ;;  %v2299_v57 = vld [vmem:[%s2766_s9 + $0x148] sm:$0xff]   ;;  %v2303_v62 = vld [vmem:[%s2766_s9 + $0x150] sm:$0xff]   ;;  %v2307_v2 = vld [vmem:[%s2766_s9 + $0x158] sm:$0xff]  }
  0x8b   : > { %2107 = vmatprep.subr.bf16.mxu1 %v2271_v32  ;;  %v2300_v59 = vld [vmem:[%s2766_s9 + $0x108] sm:$0xff]   ;;  %v2304_v63 = vld [vmem:[%s2766_s9 + $0x110] sm:$0xff]   ;;  %v2308_v3 = vld [vmem:[%s2766_s9 + $0x118] sm:$0xff]  }
  0x8c   : > { %2080 = vmatpush3.bf16.msra.mxu0 %v2270_v31  ;;  %v2301_v60 = vld [vmem:[%s2766_s9 + $0x1c8] sm:$0xff]   ;;  %v2305_v0 = vld [vmem:[%s2766_s9 + $0x1d0] sm:$0xff]   ;;  %v2309_v4 = vld [vmem:[%s2766_s9 + $0x1d8] sm:$0xff]  }
  0x8d   : > { %2081 = vmatprep.subr.bf16.mxu0 %v2273_v34  ;;  %v2302_v61 = vld [vmem:[%s2766_s9 + $0x188] sm:$0xff]   ;;  %v2306_v1 = vld [vmem:[%s2766_s9 + $0x190] sm:$0xff]   ;;  %v2310_v5 = vld [vmem:[%s2766_s9 + $0x198] sm:$0xff]  }
  0x8e   : > { %2108 = vmatpush3.bf16.msra.mxu1 %v2272_v33  ;;  %v2311_v6 = vld [vmem:[%s2766_s9 + $0x160] sm:$0xff]   ;;  %v2315_v10 = vld [vmem:[%s2766_s9 + $0x168] sm:$0xff]   ;;  %v2325_v16 = vld [vmem:[%s2766_s9 + $0x170] sm:$0xff]  }
  0x8f   : > { %2109 = vmatprep.subr.bf16.mxu1 %v2275_v36  ;;  %v2312_v7 = vld [vmem:[%s2766_s9 + $0x120] sm:$0xff]   ;;  %v2318_v11 = vld [vmem:[%s2766_s9 + $0x128] sm:$0xff]   ;;  %v2326_v17 = vld [vmem:[%s2766_s9 + $0x130] sm:$0xff]  }
  0x90   : > { %2082 = vmatpush3.bf16.msra.mxu0 %v2274_v35  ;;  %v2313_v8 = vld [vmem:[%s2766_s9 + $0x1e0] sm:$0xff]   ;;  %v2320_v12 = vld [vmem:[%s2766_s9 + $0x1e8] sm:$0xff]   ;;  %v2327_v18 = vld [vmem:[%s2766_s9 + $0x1f0] sm:$0xff]  }
  0x91   : > { %2083 = vmatprep.subr.bf16.mxu0 %v2277_v38  ;;  %v2314_v9 = vld [vmem:[%s2766_s9 + $0x1a0] sm:$0xff]   ;;  %v2323_v14 = vld [vmem:[%s2766_s9 + $0x1a8] sm:$0xff]   ;;  %v2328_v19 = vld [vmem:[%s2766_s9 + $0x1b0] sm:$0xff]  }
  0x92   : > { %2110 = vmatpush3.bf16.msra.mxu1 %v2276_v37  ;;  %v2329_v20 = vld [vmem:[%s2766_s9 + $0x178] sm:$0xff]   ;;  %v2332_v23 = vld [vmem:[%s2916_s0 + $0x10] ss:$36 sps:$4 sm:$0xff]   ;;  %v2336_v26 = vld [vmem:[%s2766_s9 + $0x200] sm:$0xff]  }
  0x93   : > { %2111 = vmatprep.subr.bf16.mxu1 %v2279_v40  ;;  %v2330_v21 = vld [vmem:[%s2766_s9 + $0x138] sm:$0xff]   ;;  %v2340_v29 = vld [vmem:[%s2766_s9 + $0x208] sm:$0xff]   ;;  %v2344_v32 = vld [vmem:[%s2766_s9 + $0x210] sm:$0xff]  }
  0x94   : > { %2084 = vmatpush3.bf16.msra.mxu0 %v2278_v39  ;;  %v2331_v22 = vld [vmem:[%s2766_s9 + $0x1f8] sm:$0xff]   ;;  %v2345_v33 = vld [vmem:[%s2916_s0 + $0x64] ss:$36 sps:$4 sm:$0xff]   ;;  %v2351_v39 = vld [vmem:[%s2766_s9 + $0x230] sm:$0xff]  }
  0x95   : > { %2085 = vmatprep.subr.bf16.mxu0 %v2281_v42  ;;  %v2334_v24 = vld [vmem:[%s2916_s0 + $0x14] ss:$36 sps:$4 sm:$0xff]   ;;  %v2339_v28 = vld [vmem:[%s2916_s0 + $0x1c] ss:$36 sps:$4 sm:$0xff]   ;;  %v2350_v38 = vld [vmem:[%s2766_s9 + $0x228] sm:$0xff]  }
  0x96   : > { %2112 = vmatpush3.bf16.msra.mxu1 %v2280_v41  ;;  %v2335_v25 = vld [vmem:[%s2766_s9 + $0x1b8] sm:$0xff]   ;;  %v2347_v34 = vld [vmem:[%s2916_s0 + $0x60] ss:$36 sps:$4 sm:$0xff]   ;;  %v2354_v41 = vld [vmem:[%s2916_s0 + $0x68] ss:$36 sps:$4 sm:$0xff]  }
  0x97   : > { %2113 = vmatprep.subr.bf16.mxu1 %v2283_v44  ;;  %v2337_v27 = vld [vmem:[%s2916_s0 + $0x18] ss:$36 sps:$4 sm:$0xff]   ;;  %v2349_v36 = vld [vmem:[%s2766_s9 + $0x220] sm:$0xff]  }
  0x98   : > { %2086 = vmatpush3.bf16.msra.mxu0 %v2282_v43  ;;  %v2341_v30 = vld [vmem:[%s2916_s0 + $0x5c] ss:$36 sps:$4 sm:$0xff]  }
  0x99   : > { %2087 = vmatprep.subr.bf16.mxu0 %v2285_v46  ;;  %v2343_v31 = vld [vmem:[%s2916_s0 + $0x58] ss:$36 sps:$4 sm:$0xff]   ;;  %v2353_v37 = vld [vmem:[%s2916_s0 + $0x20] ss:$36 sps:$4 sm:$0xff]  }
  0x9a   : > { %2114 = vmatpush3.bf16.msra.mxu1 %v2284_v45  ;;  %v2348_v35 = vld [vmem:[%s2766_s9 + $0x218] sm:$0xff]   ;;  %v1959_v43 = vld [vmem:[%s830_s11] ss:$0 sm:$0xff] }
  0x9b   : > { %2115 = vmatprep.subr.bf16.mxu1 %v2287_v50  ;;  %v2352_v40 = vld [vmem:[%s2766_s9 + $0x238] sm:$0xff]   ;;  %s1958_s9 = sshll.u32 %s790_s30, 4 }
  0x9c   : > { %2088 = vmatpush3.bf16.msra.mxu0 %v2286_v48  ;;  %s820_s18 = scalar_lea.vmem [#allocation3], %s1958_s9 }
  0x9d   : > { %2129 = vmatprep.subr.bf16.mxu0 %v2292_v53 }
  0x9e   : > { %2116 = vmatpush3.bf16.msra.mxu1 %v2291_v52 }
  0x9f   : > { %1561 = vmatmul.mubr.bf16.vlgmr.msra.gmra.mrb[0].mxu0 %v2288_v47  ;;  %2157 = vmatprep.subr.bf16.mxu1 %v2297_v55 }
  0xa0   : > { %2130 = vmatpush3.bf16.msra.mxu0 %v2296_v54  ;;  %1568 = vmatprep.mubr.bf16.mxu0 %v2316_v49 }
  0xa1   : > { %1610 = vmatmul.mubr.bf16.vlgmr.msra.gmra.mrb[0].mxu1 %v2293_v51  ;;  %2131 = vmatprep.subr.bf16.mxu0 %v2299_v57 }
  0xa2   : > { %2158 = vmatpush3.bf16.msra.mxu1 %v2298_v56  ;;  %1617 = vmatprep.mubr.bf16.mxu1 %v2321_v13 }
  0xa3   : > { %2159 = vmatprep.subr.bf16.mxu1 %v2301_v60 }
  0xa4   : > { %2132 = vmatpush3.bf16.msra.mxu0 %v2300_v59 }
  0xa5   : > { %2133 = vmatprep.subr.bf16.mxu0 %v2303_v62 }
  0xa6   : > { %2160 = vmatpush3.bf16.msra.mxu1 %v2302_v61 }
  0xa7   : > { %1569 = vmatmul.mubr.bf16.gmra.mrb[4].mxu0 %v2319_v58  ;;  %2161 = vmatprep.subr.bf16.mxu1 %v2305_v0 }
  0xa8   : > { %2134 = vmatpush3.bf16.msra.mxu0 %v2304_v63  ;;  %1658 = vmatprep.mubr.bf16.mxu0 %v2334_v24 }
  0xa9   : > { %2135 = vmatprep.subr.bf16.mxu0 %v2307_v2  ;;  %1618 = vmatmul.mubr.bf16.gmra.mrb[4].mxu1 %v2324_v15 }
  0xaa   : > { %2162 = vmatpush3.bf16.msra.mxu1 %v2306_v1  ;;  %1707 = vmatprep.mubr.bf16.mxu1 %v2339_v28 }
  0xab   : > { %2163 = vmatprep.subr.bf16.mxu1 %v2309_v4 }
  0xac   : > { %2136 = vmatpush3.bf16.msra.mxu0 %v2308_v3 }
  0xad   : > { %2137 = vmatprep.subr.bf16.mxu0 %v2311_v6 }
  0xae   : > { %2164 = vmatpush3.bf16.msra.mxu1 %v2310_v5 }
  0xaf   : > { %2165 = vmatprep.subr.bf16.mxu1 %v2313_v8 }
  0xb0   : > { %2138 = vmatpush3.bf16.msra.mxu0 %v2312_v7 }
  0xb1   : > { %2139 = vmatprep.subr.bf16.mxu0 %v2315_v10 }
  0xb2   : > { %2166 = vmatpush3.bf16.msra.mxu1 %v2314_v9 }
  0xb3   : > { %2167 = vmatprep.subr.bf16.mxu1 %v2320_v12 }
  0xb4   : > { %2140 = vmatpush3.bf16.msra.mxu0 %v2318_v11 }
  0xb5   : > { %2141 = vmatprep.subr.bf16.mxu0 %v2325_v16 }
  0xb6   : > { %2168 = vmatpush3.bf16.msra.mxu1 %v2323_v14 }
  0xb7   : > { %2169 = vmatprep.subr.bf16.mxu1 %v2327_v18 }
  0xb8   : > { %2142 = vmatpush3.bf16.msra.mxu0 %v2326_v17 }
  0xb9   : > { %2143 = vmatprep.subr.bf16.mxu0 %v2329_v20 }
  0xba   : > { %2170 = vmatpush3.bf16.msra.mxu1 %v2328_v19 }
  0xbb   : > { %2171 = vmatprep.subr.bf16.mxu1 %v2331_v22 }
  0xbc   : > { %2144 = vmatpush3.bf16.msra.mxu0 %v2330_v21 }
  0xbd   : > { %2195 = vmatprep.subr.bf16.mxu0 %v2336_v26 }
  0xbe   : > { %2172 = vmatpush3.bf16.msra.mxu1 %v2335_v25 }
  0xbf   : > { %1659 = vmatmul.mubr.bf16.vlgmr.msra.gmra.mrb[8].mxu0 %v2332_v23 }
  0xc0   : > { %2196 = vmatpush3.bf16.msra.mxu0 %v2336_v26  ;;  %1666 = vmatprep.mubr.bf16.mxu0 %v2341_v30 }
  0xc1   : > { %1708 = vmatmul.mubr.bf16.vlgmr.msra.gmra.mrb[8].mxu1 %v2337_v27  ;;  %2197 = vmatprep.subr.bf16.mxu0 %v2340_v29 }
  0xc2   : > { %1715 = vmatprep.mubr.bf16.mxu1 %v2345_v33 }
  0xc4   : > { %2198 = vmatpush3.bf16.msra.mxu0 %v2340_v29 }
  0xc5   : > { %2199 = vmatprep.subr.bf16.mxu0 %v2344_v32 }
  0xc7   : > { %1667 = vmatmul.mubr.bf16.gmra.mrb[12].mxu0 %v2343_v31 }
  0xc8   : > { %2200 = vmatpush3.bf16.msra.mxu0 %v2344_v32  ;;  %2211 = vmatprep.mubr.bf16.mxu0 %v2353_v37 }
  0xc9   : > { %1716 = vmatmul.mubr.bf16.gmra.mrb[12].mxu1 %v2347_v34  ;;  %2201 = vmatprep.subr.bf16.mxu0 %v2348_v35 }
  0xcc   : > { %2202 = vmatpush3.bf16.msra.mxu0 %v2348_v35 }
  0xcd   : > { %2203 = vmatprep.subr.bf16.mxu0 %v2349_v36 }
  0xd0   : > { %2204 = vmatpush3.bf16.msra.mxu0 %v2349_v36 }
  0xd1   : > { %2205 = vmatprep.subr.bf16.mxu0 %v2350_v38 }
  0xd4   : > { %2206 = vmatpush3.bf16.msra.mxu0 %v2350_v38 }
  0xd5   : > { %2207 = vmatprep.subr.bf16.mxu0 %v2351_v39 }
  0xd8   : > { %2208 = vmatpush3.bf16.msra.mxu0 %v2351_v39 }
  0xd9   : > { %2209 = vmatprep.subr.bf16.mxu0 %v2352_v40 }
  0xdc   : > { %2210 = vmatpush3.bf16.msra.mxu0 %v2352_v40 }
  0xdf   : > { %2212 = vmatmul.mubr.bf16.vlgmr.msra.gmra.mrb[16].mxu0 %v2354_v41 }
 0x172   : > { %v2089_v42 = vpop.f32.mrb[0].mxu0 }
 0x173   : > { %v2090_v44 = vpop.f32.mrb[1].mxu0 }
 0x174   : > { %v2091_v45 = vadd.f32 %v2090_v44, %v2089_v42  ;;  %v2092_v46 = vpop.f32.mrb[2].mxu0  ;;  %v2117_v47 = vpop.f32.mrb[0].mxu1 }
 0x175   : > { %v2093_v48 = vpop.f32.mrb[3].mxu0  ;;  %v2118_v49 = vpop.f32.mrb[1].mxu1 }
 0x176   : > { %v1563_v50 = vadd.f32 %v2091_v45, %v1959_v43  ;;  %v2094_v51 = vadd.f32 %v2093_v48, %v2092_v46  ;;  %v2119_v52 = vadd.f32 %v2118_v49, %v2117_v47  ;;  %v2120_v53 = vpop.f32.mrb[2].mxu1 }
 0x177   : > { %v2121_v54 = vpop.f32.mrb[3].mxu1 }
 0x178   : > { %v1566_v55 = vadd.f32 %v2094_v51, %v1959_v43  ;;  %v1612_v56 = vadd.f32 %v2119_v52, %v1563_v50  ;;  %v2122_v57 = vadd.f32 %v2121_v54, %v2120_v53 }
 0x17a   : > { %v1615_v58 = vadd.f32 %v2122_v57, %v1566_v55  ;;  %v2095_v59 = vpop.f32.mrb[4].mxu0 }
 0x17b   : > { %v2096_v60 = vpop.f32.mrb[5].mxu0 }
 0x17c   : > { %v2097_v61 = vadd.f32 %v2096_v60, %v2095_v59  ;;  %v2098_v62 = vpop.f32.mrb[6].mxu0  ;;  %v2123_v2 = vpop.f32.mrb[4].mxu1 }
 0x17d   : > { %v2099_v63 = vpop.f32.mrb[7].mxu0  ;;  %v2124_v3 = vpop.f32.mrb[5].mxu1 }
 0x17e   : > { %v2100_v0 = vadd.f32 %v2099_v63, %v2098_v62  ;;  %v1571_v1 = vadd.f32 %v2097_v61, %v1959_v43  ;;  %v2125_v5 = vadd.f32 %v2124_v3, %v2123_v2  ;;  %v2126_v6 = vpop.f32.mrb[6].mxu1 }
 0x17f   : > { %v2127_v7 = vpop.f32.mrb[7].mxu1 }
 0x180   : > { %v1574_v4 = vadd.f32 %v2100_v0, %v1959_v43  ;;  %v1620_v8 = vadd.f32 %v2125_v5, %v1571_v1  ;;  %v2128_v9 = vadd.f32 %v2127_v7, %v2126_v6 }
 0x182   : > { %v1623_v10 = vadd.f32 %v2128_v9, %v1574_v4 }
 0x192   : > { %v2145_v11 = vpop.f32.mrb[8].mxu0 }
 0x193   : > { %v2146_v12 = vpop.f32.mrb[9].mxu0 }
 0x194   : > { %v2147_v13 = vadd.f32 %v2146_v12, %v2145_v11  ;;  %v2148_v14 = vpop.f32.mrb[10].mxu0  ;;  %v2173_v15 = vpop.f32.mrb[8].mxu1 }
 0x195   : > { %v2149_v16 = vpop.f32.mrb[11].mxu0  ;;  %v2174_v19 = vpop.f32.mrb[9].mxu1 }
 0x196   : > { %v1661_v17 = vadd.f32 %v2147_v13, %v1612_v56  ;;  %v2150_v18 = vadd.f32 %v2149_v16, %v2148_v14  ;;  %v2175_v20 = vadd.f32 %v2174_v19, %v2173_v15  ;;  %v2176_v21 = vpop.f32.mrb[10].mxu1 }
 0x197   : > { %v2177_v23 = vpop.f32.mrb[11].mxu1 }
 0x198   : > { %v1664_v22 = vadd.f32 %v2150_v18, %v1615_v58  ;;  %v2178_v24 = vadd.f32 %v2177_v23, %v2176_v21  ;;  %v1710_v25 = vadd.f32 %v2175_v20, %v1661_v17 }
 0x19a   : > { %v2151_v26 = vpop.f32.mrb[12].mxu0  ;;  %v1713_v28 = vadd.f32 %v2178_v24, %v1664_v22 }
 0x19b   : > { %v2152_v27 = vpop.f32.mrb[13].mxu0 }
 0x19c   : > { %v2153_v29 = vadd.f32 %v2152_v27, %v2151_v26  ;;  %v2154_v30 = vpop.f32.mrb[14].mxu0  ;;  %v2179_v31 = vpop.f32.mrb[12].mxu1 }
 0x19d   : > { %v2155_v32 = vpop.f32.mrb[15].mxu0  ;;  %v2180_v35 = vpop.f32.mrb[13].mxu1 }
 0x19e   : > { %v1669_v33 = vadd.f32 %v2153_v29, %v1620_v8  ;;  %v2156_v34 = vadd.f32 %v2155_v32, %v2154_v30  ;;  %v2181_v36 = vadd.f32 %v2180_v35, %v2179_v31  ;;  %v2182_v37 = vpop.f32.mrb[14].mxu1 }
 0x19f   : > { %v2183_v39 = vpop.f32.mrb[15].mxu1 }
 0x1a0   : > { %v1672_v38 = vadd.f32 %v2156_v34, %v1623_v10  ;;  %v2184_v40 = vadd.f32 %v2183_v39, %v2182_v37  ;;  %v1718_v41 = vadd.f32 %v2181_v36, %v1669_v33 }
 0x1a2   : > { %v1721_v42 = vadd.f32 %v2184_v40, %v1672_v38 }
 0x1b2   : > { %v2213_v43 = vpop.f32.mrb[16].mxu0 }
 0x1b3   : > { %v1767_v44 = vadd.f32 %v2213_v43, %v1718_v41  ;;  %v1758_v45 = vpop.f32.mrb[17].mxu0 }
 0x1b4   : > { %v1759_v46 = vadd.f32 %v1758_v45, %v1710_v25  ;;  %v2214_v47 = vpop.f32.mrb[18].mxu0 }
 0x1b5   : > { %v1770_v48 = vadd.f32 %v2214_v47, %v1721_v42  ;;  %v1761_v49 = vpop.f32.mrb[19].mxu0  ;;  %v1775_v51 = vmax.f32 %v1767_v44, 0.0 }
 0x1b6   : > { %v1762_v50 = vadd.f32 %v1761_v49, %v1713_v28  ;;  %v1773_v53 = vmax.f32 %v1759_v46, 0.0  ;;  %1803 = sbr.rel (!%p2450_p6) target bundleno = 454 (0x1c6), region = 77 }
 0x1b7   : > { %v1776_v52 = vmax.f32 %v1770_v48, 0.0 }
 0x1b8   : > { %v1774_v54 = vmax.f32 %v1762_v50, 0.0 }
 0x1b9   : > { %v2070_v55 = vpack.c.bf16 %v1776_v52, %v1775_v51 }
 0x1ba   : > { %v2065_v56 = vpack.c.bf16 %v1774_v54, %v1773_v53 }
 0x1bb   : > { %2072 = vst [vmem:[%s820_s18 + $0x8] sm:$0xff] %v2070_v55  }
 0x1bc   : > { %2066 = vst [vmem:[%s820_s18] sm:$0xff] %v2065_v56  }
 0x1c2   : > { %v1828_v59 = vld [vmem:[%s820_s18 + $0x8] sm:$0xf]  ;;  %v1830_v60 = vld [vmem:[%s820_s18 + $0xc] sm:$0xf] }
 0x1c3   : > { %v1824_v57 = vld [vmem:[%s820_s18] sm:$0xf]  ;;  %v1826_v58 = vld [vmem:[%s820_s18 + $0x4] sm:$0xf]  ;;  %1829 = vst [vmem:[%s1808_s20 + $0x10] sm:$0xf] %v1828_v59 }
 0x1c4   : > { %1825 = vst [vmem:[%s1808_s20] sm:$0xf] %v1824_v57  ;;  %1827 = vst [vmem:[%s1808_s20 + $0x8] sm:$0xf] %v1826_v58 }
 0x1c5   : > { %1831 = vst [vmem:[%s1808_s20 + $0x18] sm:$0xf] %v1830_v60 }
 0x1c6 PF: > { %s13_s16 = sadd.s32 1, %s2393_s16   ;;  %s2921_s12 = smov %s2381_s13 }
 0x1c7   : > { %p10_p12 = scmp.ge.s32.totalorder %s13_s16, 4   ;;  %s2922_s13 = smov %s2455_s22 }
 0x1c8   : > { %s2923_s14 = smov %s2389_s15  ;;  %s2924_s15 = smov %s2926_s17 }
 0x1c9   :  { %12 = sbr.rel (!%p10_p12) target bundleno = 3 (0x3), region = 155 }

// kernel: generator_forward.13
= control target key start
LH: loop header
LB: loop body
LE: loop exit
PB: predicated region body
PF: predicated region fallthrough
CT: control target
= control target key end

     0   :  { %s1309_s12 = smov 0   ;;  %s1311_s13 = smov 0   ;;  %s1485_s0 = inlined_call_operand.vmem [shape: bf16[128,576], index: 0, kind: input, shape index: {}]   ;;  %s1486_s1 = inlined_call_operand.vmem [shape: bf16[576,128], index: 1, kind: input, shape index: {}]   ;;  %s1487_s2 = inlined_call_operand.vmem [shape: f32[1,128], index: 2, kind: input, shape index: {}]   ;;  %s1488_s3 = inlined_call_operand.vmem [shape: f32[128,128], index: 3, kind: output, shape index: {}]  }
   0x1   :  { %s1313_s14 = smov 0  }
   0x2 LB: > { %s25_s15 = sadd.s32 1, %s1283_s13  ;;  %p980_p0 = scmp.ge.s32.totalorder %s1287_s14, 1  ;;  %s1287_s14 = sphi %s1313_s14, %s13_s14   ;;  %s1283_s13 = sphi %s1311_s13, %s1490_s13   ;;  %s1279_s12 = sphi %s1309_s12, %s1489_s12  }
   0x3   : > { %p27_p1 = scmp.ge.s32.totalorder %s25_s15, 2  ;;  %p170_p2 = scmp.lt.s32.totalorder %s1287_s14, 3 }
   0x5   : > { %s1492_s15 = smov (%p27_p1, %s25_s15), 0  ;;  %p171_p3 = pnand %p980_p0, %p170_p2 }
   0x6   : > { %v1185_v0 = vld [vmem:[%s1486_s1 + $0x40] sm:$0xff] (!%p171_p3)   ;;  %v1189_v4 = vld [vmem:[%s1486_s1 + $0x48] sm:$0xff] (!%p171_p3)   ;;  %v1193_v8 = vld [vmem:[%s1486_s1 + $0x50] sm:$0xff] (!%p171_p3)   ;;  %s981_s23 = sshll.u32 (!%p171_p3), %s1279_s12, 3  ;;  %vm648_vm0 = vcmask (!%p171_p3), 523264  }
   0x7   : > { %174 = sbr.rel (%p171_p3) target bundleno = 305 (0x131), region = 32  ;;  %v1186_v1 = vld [vmem:[%s1486_s1 + $0xc0] sm:$0xff] (!%p171_p3)   ;;  %1048 = vmatprep.subr.bf16.mxu0 (!%p171_p3), %v1185_v0  ;;  %v1190_v5 = vld [vmem:[%s1486_s1 + $0xc8] sm:$0xff] (!%p171_p3)   ;;  %v1194_v9 = vld [vmem:[%s1486_s1 + $0xd0] sm:$0xff] (!%p171_p3)   ;;  %p206_p4 = scmp.lt.s32.totalorder (!%p171_p3), %s981_s23, 15 }
   0x8   : > { %v1187_v2 = vld [vmem:[%s1486_s1] sm:$0xff] (!%p171_p3)   ;;  %1088 = vmatprep.subr.bf16.mxu1 (!%p171_p3), %v1186_v1  ;;  %v1191_v6 = vld [vmem:[%s1486_s1 + $0x8] sm:$0xff] (!%p171_p3)   ;;  %v1195_v10 = vld [vmem:[%s1486_s1 + $0x10] sm:$0xff] (!%p171_p3)  }
   0x9   : > { %v1188_v3 = vld [vmem:[%s1486_s1 + $0x80] sm:$0xff] (!%p171_p3)   ;;  %1049 = vmatpush3.bf16.msra.mxu0 (!%p171_p3), %v1187_v2  ;;  %v1192_v7 = vld [vmem:[%s1486_s1 + $0x88] sm:$0xff] (!%p171_p3)   ;;  %v1196_v11 = vld [vmem:[%s1486_s1 + $0x90] sm:$0xff] (!%p171_p3)  }
   0xa   : > { %1089 = vmatpush3.bf16.msra.mxu1 (!%p171_p3), %v1188_v3  ;;  %1050 = vmatprep.subr.bf16.mxu0 (!%p171_p3), %v1189_v4  ;;  %v1197_v12 = vld [vmem:[%s1486_s1 + $0x58] sm:$0xff] (!%p171_p3)   ;;  %v1201_v16 = vld [vmem:[%s1486_s1 + $0x60] sm:$0xff] (!%p171_p3)   ;;  %v1205_v20 = vld [vmem:[%s1486_s1 + $0x68] sm:$0xff] (!%p171_p3)  }
   0xb   : > { %1090 = vmatprep.subr.bf16.mxu1 (!%p171_p3), %v1190_v5  ;;  %v1198_v13 = vld [vmem:[%s1486_s1 + $0xd8] sm:$0xff] (!%p171_p3)   ;;  %v1202_v17 = vld [vmem:[%s1486_s1 + $0xe0] sm:$0xff] (!%p171_p3)   ;;  %v1206_v21 = vld [vmem:[%s1486_s1 + $0xe8] sm:$0xff] (!%p171_p3)  }
   0xc   : > { %v1199_v14 = vld [vmem:[%s1486_s1 + $0x18] sm:$0xff] (!%p171_p3)   ;;  %v1203_v18 = vld [vmem:[%s1486_s1 + $0x20] sm:$0xff] (!%p171_p3)   ;;  %v1207_v22 = vld [vmem:[%s1486_s1 + $0x28] sm:$0xff] (!%p171_p3)  }
   0xd   : > { %1051 = vmatpush3.bf16.msra.mxu0 (!%p171_p3), %v1191_v6  ;;  %v1200_v15 = vld [vmem:[%s1486_s1 + $0x98] sm:$0xff] (!%p171_p3)   ;;  %v1204_v19 = vld [vmem:[%s1486_s1 + $0xa0] sm:$0xff] (!%p171_p3)   ;;  %v1208_v23 = vld [vmem:[%s1486_s1 + $0xa8] sm:$0xff] (!%p171_p3)  }
   0xe   : > { %1091 = vmatpush3.bf16.msra.mxu1 %v1192_v7  ;;  %1052 = vmatprep.subr.bf16.mxu0 %v1193_v8  ;;  %s1494_s23 = smov (!%p206_p4, %s981_s23), 15  ;;  %v1209_v24 = vld [vmem:[%s1486_s1 + $0x70] sm:$0xff]   ;;  %v1213_v28 = vld [vmem:[%s1486_s1 + $0x78] sm:$0xff]   ;;  %v1223_v36 = vld [vmem:[%s1486_s1 + $0x100] sm:$0xff]  }
   0xf   : > { %1092 = vmatprep.subr.bf16.mxu1 %v1194_v9  ;;  %v1210_v25 = vld [vmem:[%s1486_s1 + $0xf0] sm:$0xff]   ;;  %s1160_s22 = smul.u32 20, %s1494_s23  ;;  %v1214_v29 = vld [vmem:[%s1486_s1 + $0xf8] sm:$0xff]   ;;  %v1230_v39 = vld [vmem:[%s1486_s1 + $0x108] sm:$0xff]   ;;  %s984_s26 = sshll.u32 %s1494_s23, 3 }
  0x10   : > { %v1211_v26 = vld [vmem:[%s1486_s1 + $0x30] sm:$0xff]   ;;  %v1215_v30 = vld [vmem:[%s1486_s1 + $0x38] sm:$0xff]   ;;  %v985_v58 = vld [vmem:[%s1487_s2] ss:$0 sm:$0xff]  ;;  %s226_s29 = scalar_lea.vmem %s1488_s3, %s984_s26 }
  0x11   : > { %1053 = vmatpush3.bf16.msra.mxu0 %v1195_v10  ;;  %v1212_v27 = vld [vmem:[%s1486_s1 + $0xb0] sm:$0xff]   ;;  %s1426_s6 = scalar_lea.vmem %s1485_s0, %s1160_s22  ;;  %v1216_v31 = vld [vmem:[%s1486_s1 + $0xb8] sm:$0xff]  }
  0x12   : > { %1093 = vmatpush3.bf16.msra.mxu1 %v1196_v11  ;;  %1054 = vmatprep.subr.bf16.mxu0 %v1197_v12  ;;  %v1217_v32 = vld [vmem:[%s1426_s6] ss:$20 sps:$4 sm:$0xff]   ;;  %v1219_v33 = vld [vmem:[%s1426_s6 + $0x4] ss:$20 sps:$4 sm:$0xff]   ;;  %v1220_v34 = vld [vmem:[%s1426_s6 + $0x8] ss:$20 sps:$4 sm:$0xff]  }
  0x13   : > { %1094 = vmatprep.subr.bf16.mxu1 %v1198_v13  ;;  %v1222_v35 = vld [vmem:[%s1426_s6 + $0xc] ss:$20 sps:$4 sm:$0xff]   ;;  %693 = vmatprep.mubr.bf16.mxu0 %v1219_v33  ;;  %v1226_v38 = vld [vmem:[%s1426_s6 + $0x34] ss:$20 sps:$4 sm:$0xff]   ;;  %v1229_v41 = vld [vmem:[%s1426_s6 + $0x30] ss:$20 sps:$4 sm:$0xff]  }
  0x14   : > { %758 = vmatprep.mubr.bf16.mxu1 %v1222_v35  ;;  %v1224_v37 = vld [vmem:[%s1426_s6 + $0x2c] ss:$20 sps:$4 sm:$0xff]   ;;  %v1228_v40 = vld [vmem:[%s1426_s6 + $0x28] ss:$20 sps:$4 sm:$0xff]   ;;  %v1237_v44 = vld [vmem:[%s1486_s1 + $0x110] sm:$0xff]  }
  0x15   : > { %1055 = vmatpush3.bf16.msra.mxu0 %v1199_v14  ;;  %v1231_v42 = vld [vmem:[%s1426_s6 + $0x54] ss:$20 sps:$4 sm:$0xff]   ;;  %v1233_v43 = vld [vmem:[%s1426_s6 + $0x5c] ss:$20 sps:$4 sm:$0xff]   ;;  %v1236_v47 = vld [vmem:[%s1426_s6 + $0x58] ss:$20 sps:$4 sm:$0xff]  }
  0x16   : > { %1095 = vmatpush3.bf16.msra.mxu1 %v1200_v15  ;;  %1056 = vmatprep.subr.bf16.mxu0 %v1201_v16  ;;  %v1244_v45 = vld [vmem:[%s1486_s1 + $0x118] sm:$0xff]   ;;  %v1235_v46 = vld [vmem:[%s1426_s6 + $0x50] ss:$20 sps:$4 sm:$0xff]   ;;  %v1243_v51 = vld [vmem:[%s1426_s6 + $0x80] ss:$20 sps:$4 sm:$0xff]  }
  0x17   : > { %1096 = vmatprep.subr.bf16.mxu1 %v1202_v17  ;;  %v1238_v48 = vld [vmem:[%s1426_s6 + $0x7c] ss:$20 sps:$4 sm:$0xff]   ;;  %v1240_v49 = vld [vmem:[%s1426_s6 + $0x84] ss:$20 sps:$4 sm:$0xff]   ;;  %v1246_v53 = vld [vmem:[%s1426_s6 + $0x60] ss:$20 sps:$4 sm:$0xff]  }
  0x18   : > { %v1242_v50 = vld [vmem:[%s1426_s6 + $0x78] ss:$20 sps:$4 sm:$0xff]   ;;  %v1245_v52 = vld [vmem:[%s1426_s6 + $0x10] ss:$20 sps:$4 sm:$0xff]   ;;  %v1248_v55 = vld [vmem:[%s1426_s6 + $0x88] ss:$20 sps:$4 sm:$0xff]  }
  0x19   : > { %1057 = vmatpush3.bf16.msra.mxu0 %v1203_v18  ;;  %v1247_v54 = vld [vmem:[%s1426_s6 + $0x38] ss:$20 sps:$4 sm:$0xff]  }
  0x1a   : > { %1097 = vmatpush3.bf16.msra.mxu1 %v1204_v19  ;;  %1058 = vmatprep.subr.bf16.mxu0 %v1205_v20 }
  0x1b   : > { %1098 = vmatprep.subr.bf16.mxu1 %v1206_v21 }
  0x1d   : > { %1059 = vmatpush3.bf16.msra.mxu0 %v1207_v22 }
  0x1e   : > { %1099 = vmatpush3.bf16.msra.mxu1 %v1208_v23  ;;  %1060 = vmatprep.subr.bf16.mxu0 %v1209_v24 }
  0x1f   : > { %1100 = vmatprep.subr.bf16.mxu1 %v1210_v25 }
  0x21   : > { %1061 = vmatpush3.bf16.msra.mxu0 %v1211_v26 }
  0x22   : > { %1101 = vmatpush3.bf16.msra.mxu1 %v1212_v27  ;;  %1062 = vmatprep.subr.bf16.mxu0 %v1213_v28 }
  0x23   : > { %1102 = vmatprep.subr.bf16.mxu1 %v1214_v29 }
  0x25   : > { %1063 = vmatpush3.bf16.msra.mxu0 %v1215_v30 }
  0x26   : > { %1103 = vmatpush3.bf16.msra.mxu1 %v1216_v31  ;;  %1136 = vmatprep.subr.bf16.mxu0 %v1223_v36 }
  0x27   : > { %1152 = vmatprep.subr.bf16.mxu1 %v1223_v36 }
  0x28   : > { %694 = vmatmul.mubr.bf16.vlgmr.msra.gmra.mrb[0].mxu0 %v1217_v32 }
  0x29   : > { %759 = vmatmul.mubr.bf16.vlgmr.msra.gmra.mrb[0].mxu1 %v1220_v34  ;;  %1137 = vmatpush3.bf16.msra.mxu0 %v1223_v36 }
  0x2a   : > { %1156 = vmatpush3.bf16.msra.mxu1 %v1223_v36  ;;  %701 = vmatprep.mubr.bf16.mxu0 %v1224_v37 }
  0x2b   : > { %766 = vmatprep.mubr.bf16.mxu1 %v1226_v38  ;;  %1138 = vmatprep.subr.bf16.mxu0 %v1230_v39 }
  0x2c   : > { %1153 = vmatprep.subr.bf16.mxu1 %v1230_v39 }
  0x2d   : > { %1139 = vmatpush3.bf16.msra.mxu0 %v1230_v39 }
  0x2e   : > { %1157 = vmatpush3.bf16.msra.mxu1 %v1230_v39  ;;  %1140 = vmatprep.subr.bf16.mxu0 %v1237_v44 }
  0x2f   : > { %1154 = vmatprep.subr.bf16.mxu1 %v1237_v44 }
  0x30   : > { %702 = vmatmul.mubr.bf16.gmra.mrb[4].mxu0 %v1228_v40 }
  0x31   : > { %767 = vmatmul.mubr.bf16.gmra.mrb[4].mxu1 %v1229_v41  ;;  %709 = vmatprep.mubr.bf16.mxu0 %v1231_v42 }
  0x32   : > { %774 = vmatprep.mubr.bf16.mxu1 %v1233_v43  ;;  %1141 = vmatpush3.bf16.msra.mxu0 %v1237_v44 }
  0x33   : > { %1158 = vmatpush3.bf16.msra.mxu1 %v1237_v44  ;;  %1142 = vmatprep.subr.bf16.mxu0 %v1244_v45 }
  0x34   : > { %1155 = vmatprep.subr.bf16.mxu1 %v1244_v45 }
  0x36   : > { %1143 = vmatpush3.bf16.msra.mxu0 %v1244_v45 }
  0x37   : > { %1159 = vmatpush3.bf16.msra.mxu1 %v1244_v45 }
  0x38   : > { %710 = vmatmul.mubr.bf16.gmra.mrb[8].mxu0 %v1235_v46 }
  0x39   : > { %775 = vmatmul.mubr.bf16.gmra.mrb[8].mxu1 %v1236_v47  ;;  %717 = vmatprep.mubr.bf16.mxu0 %v1238_v48 }
  0x3a   : > { %782 = vmatprep.mubr.bf16.mxu1 %v1240_v49 }
  0x40   : > { %718 = vmatmul.mubr.bf16.gmra.mrb[12].mxu0 %v1242_v50 }
  0x41   : > { %783 = vmatmul.mubr.bf16.gmra.mrb[12].mxu1 %v1243_v51  ;;  %1144 = vmatprep.mubr.msk.bf16.mxu0 %vm648_vm0, %v1245_v52 }
  0x42   : > { %1148 = vmatprep.mubr.msk.bf16.mxu1 %vm648_vm0, %v1246_v53 }
  0x48   : > { %1145 = vmatmul.mubr.msk.bf16.vlgmr.msra.gmra.mrb[16].mxu0 %vm648_vm0, %v1247_v54 }
  0x49   : > { %1149 = vmatmul.mubr.msk.bf16.vlgmr.msra.gmra.mrb[16].mxu1 %vm648_vm0, %v1248_v55 }
  0xfb   : > { %v1064_v56 = vpop.f32.mrb[0].mxu0 }
  0xfc   : > { %v1104_v57 = vpop.f32.mrb[0].mxu1  ;;  %v1065_v59 = vpop.f32.mrb[1].mxu0 }
  0xfd   : > { %v1066_v60 = vadd.f32 %v1065_v59, %v1064_v56  ;;  %v1105_v61 = vpop.f32.mrb[1].mxu1  ;;  %v1067_v62 = vpop.f32.mrb[2].mxu0 }
  0xfe   : > { %v1106_v63 = vadd.f32 %v1105_v61, %v1104_v57  ;;  %v1107_v0 = vpop.f32.mrb[2].mxu1  ;;  %v1068_v1 = vpop.f32.mrb[3].mxu0 }
  0xff   : > { %v696_v2 = vadd.f32 %v1066_v60, %v985_v58  ;;  %v1069_v3 = vadd.f32 %v1068_v1, %v1067_v62  ;;  %v1108_v4 = vpop.f32.mrb[3].mxu1 }
 0x100   : > { %v1109_v5 = vadd.f32 %v1108_v4, %v1107_v0 }
 0x101   : > { %v699_v6 = vadd.f32 %v1069_v3, %v985_v58  ;;  %v761_v7 = vadd.f32 %v1106_v63, %v696_v2 }
 0x103   : > { %v1070_v8 = vpop.f32.mrb[4].mxu0  ;;  %v1469_v9 = vadd.f32 %v1109_v5, %v699_v6 }
 0x104   : > { %v1110_v10 = vpop.f32.mrb[4].mxu1  ;;  %v1071_v11 = vpop.f32.mrb[5].mxu0 }
 0x105   : > { %v1072_v12 = vadd.f32 %v1071_v11, %v1070_v8  ;;  %v1111_v13 = vpop.f32.mrb[5].mxu1  ;;  %v1073_v14 = vpop.f32.mrb[6].mxu0 }
 0x106   : > { %v1112_v15 = vadd.f32 %v1111_v13, %v1110_v10  ;;  %v1113_v16 = vpop.f32.mrb[6].mxu1  ;;  %v1074_v17 = vpop.f32.mrb[7].mxu0 }
 0x107   : > { %v704_v18 = vadd.f32 %v1072_v12, %v985_v58  ;;  %v1075_v19 = vadd.f32 %v1074_v17, %v1073_v14  ;;  %v1114_v20 = vpop.f32.mrb[7].mxu1 }
 0x108   : > { %v1115_v21 = vadd.f32 %v1114_v20, %v1113_v16 }
 0x109   : > { %v707_v22 = vadd.f32 %v1075_v19, %v985_v58  ;;  %v769_v23 = vadd.f32 %v1112_v15, %v704_v18 }
 0x10b   : > { %v1076_v24 = vpop.f32.mrb[8].mxu0  ;;  %v772_v25 = vadd.f32 %v1115_v21, %v707_v22 }
 0x10c   : > { %v1116_v26 = vpop.f32.mrb[8].mxu1  ;;  %v1077_v27 = vpop.f32.mrb[9].mxu0 }
 0x10d   : > { %v1078_v28 = vadd.f32 %v1077_v27, %v1076_v24  ;;  %v1117_v29 = vpop.f32.mrb[9].mxu1  ;;  %v1079_v30 = vpop.f32.mrb[10].mxu0 }
 0x10e   : > { %v1118_v31 = vadd.f32 %v1117_v29, %v1116_v26  ;;  %v1119_v32 = vpop.f32.mrb[10].mxu1  ;;  %v1080_v33 = vpop.f32.mrb[11].mxu0 }
 0x10f   : > { %v712_v34 = vadd.f32 %v1078_v28, %v985_v58  ;;  %v1081_v35 = vadd.f32 %v1080_v33, %v1079_v30  ;;  %v1120_v36 = vpop.f32.mrb[11].mxu1 }
 0x110   : > { %v1121_v37 = vadd.f32 %v1120_v36, %v1119_v32 }
 0x111   : > { %v715_v38 = vadd.f32 %v1081_v35, %v985_v58  ;;  %v777_v39 = vadd.f32 %v1118_v31, %v712_v34 }
 0x113   : > { %v1082_v40 = vpop.f32.mrb[12].mxu0  ;;  %v780_v41 = vadd.f32 %v1121_v37, %v715_v38 }
 0x114   : > { %v1122_v42 = vpop.f32.mrb[12].mxu1  ;;  %v1083_v43 = vpop.f32.mrb[13].mxu0 }
 0x115   : > { %v1084_v44 = vadd.f32 %v1083_v43, %v1082_v40  ;;  %v1123_v45 = vpop.f32.mrb[13].mxu1  ;;  %v1085_v46 = vpop.f32.mrb[14].mxu0 }
 0x116   : > { %v1124_v47 = vadd.f32 %v1123_v45, %v1122_v42  ;;  %v1125_v48 = vpop.f32.mrb[14].mxu1  ;;  %v1086_v49 = vpop.f32.mrb[15].mxu0 }
 0x117   : > { %v720_v50 = vadd.f32 %v1084_v44, %v985_v58  ;;  %v1087_v51 = vadd.f32 %v1086_v49, %v1085_v46  ;;  %v1126_v52 = vpop.f32.mrb[15].mxu1 }
 0x118   : > { %v1127_v53 = vadd.f32 %v1126_v52, %v1125_v48 }
 0x119   : > { %v723_v54 = vadd.f32 %v1087_v51, %v985_v58  ;;  %v785_v55 = vadd.f32 %v1124_v47, %v720_v50 }
 0x11b   : > { %v1146_v56 = vpop.f32.mrb[16].mxu0  ;;  %v788_v57 = vadd.f32 %v1127_v53, %v723_v54 }
 0x11c   : > { %v834_v59 = vadd.f32 %v1146_v56, %v769_v23  ;;  %v1150_v60 = vpop.f32.mrb[16].mxu1  ;;  %v825_v61 = vpop.f32.mrb[17].mxu0 }
 0x11d   : > { %v850_v62 = vadd.f32 %v1150_v60, %v785_v55  ;;  %v826_v63 = vadd.f32 %v825_v61, %v761_v7  ;;  %v841_v0 = vpop.f32.mrb[17].mxu1  ;;  %v1147_v1 = vpop.f32.mrb[18].mxu0 }
 0x11e   : > { %1249 = vtanh.f32 %v834_v59  ;;  %v842_v2 = vadd.f32 %v841_v0, %v777_v39  ;;  %v837_v3 = vadd.f32 %v1147_v1, %v772_v25  ;;  %v1151_v4 = vpop.f32.mrb[18].mxu1  ;;  %v828_v5 = vpop.f32.mrb[19].mxu0 }
 0x11f   : > { %1251 = vtanh.f32 %v850_v62  ;;  %v853_v6 = vadd.f32 %v1151_v4, %v788_v57  ;;  %v829_v58 = vadd.f32 %v828_v5, %v1469_v9  ;;  %v844_v8 = vpop.f32.mrb[19].mxu1 }
 0x120   : > { %1253 = vtanh.f32 %v826_v63  ;;  %v845_v10 = vadd.f32 %v844_v8, %v780_v41 }
 0x121   : > { %1255 = vtanh.f32 %v842_v2 }
 0x122   : > { %1257 = vtanh.f32 %v837_v3 }
 0x123   : > { %1259 = vtanh.f32 %v853_v6 }
 0x124   : > { %1261 = vtanh.f32 %v829_v58 }
 0x125   : > { %1263 = vtanh.f32 %v845_v10 }
 0x128   : > { %v1250_v7 = vpop.eup %1249 }
 0x129   : > { %v1252_v11 = vpop.eup %1251  ;;  %866 = vst [vmem:[%s226_s29 + $0x10] sm:$0xff] %v1250_v7 }
 0x12a   : > { %v1254_v12 = vpop.eup %1253  ;;  %870 = vst [vmem:[%s226_s29 + $0x30] sm:$0xff] %v1252_v11 }
 0x12b   : > { %v1256_v13 = vpop.eup %1255  ;;  %864 = vst [vmem:[%s226_s29] sm:$0xff] %v1254_v12 }
 0x12c   : > { %v1258_v9 = vpop.eup %1257  ;;  %868 = vst [vmem:[%s226_s29 + $0x20] sm:$0xff] %v1256_v13 }
 0x12d   : > { %v1260_v14 = vpop.eup %1259  ;;  %867 = vst [vmem:[%s226_s29 + $0x18] sm:$0xff] %v1258_v9 }
 0x12e   : > { %v1262_v15 = vpop.eup %1261  ;;  %871 = vst [vmem:[%s226_s29 + $0x38] sm:$0xff] %v1260_v14 }
 0x12f   : > { %v1264_v16 = vpop.eup %1263  ;;  %865 = vst [vmem:[%s226_s29 + $0x8] sm:$0xff] %v1262_v15 }
 0x130   : > { %869 = vst [vmem:[%s226_s29 + $0x28] sm:$0xff] %v1264_v16 }
 0x131 PF: > { %s13_s14 = sadd.s32 1, %s1287_s14   ;;  %s1489_s12 = smov %s1283_s13 }
 0x132   : > { %p10_p5 = scmp.ge.s32.totalorder %s13_s14, 4   ;;  %s1490_s13 = smov %s1492_s15 }
 0x134   :  { %12 = sbr.rel (!%p10_p5) target bundleno = 2 (0x2), region = 68 }

// kernel: generator_forward.10
= control target key start
LH: loop header
LB: loop body
LE: loop exit
PB: predicated region body
PF: predicated region fallthrough
CT: control target
= control target key end

     0   :  { %14 = vsyncpa [#allocation3], 0  ;;  %s13238_s30 = smov [#allocation2]   ;;  %s16656_s0 = inlined_call_operand.vmem [shape: bf16[2,1024], index: 0, kind: input, shape index: {}]   ;;  %s16657_s1 = inlined_call_operand.vmem [shape: bf16[1024,512], index: 1, kind: input, shape index: {}]   ;;  %s16658_s2 = inlined_call_operand.vmem [shape: f32[1,512], index: 2, kind: input, shape index: {}]   ;;  %s16659_s3 = inlined_call_operand.vmem [shape: bf16[3,512,512], index: 3, kind: input, shape index: {}]   ;;  %s16660_s4 = inlined_call_operand.vmem [shape: f32[3,1,512], index: 4, kind: input, shape index: {}]   ;;  %s16661_s5 = inlined_call_operand.vmem [shape: bf16[3,512,512], index: 5, kind: input, shape index: {}]   ;;  %s16662_s6 = inlined_call_operand.vmem [shape: f32[3,1,512], index: 6, kind: input, shape index: {}]   ;;  %s16663_s7 = inlined_call_operand.hbm [shape: bf16[512,1024], index: 7, kind: input, shape index: {}]   ;;  %s16664_s8 = inlined_call_operand.vmem [shape: f32[1,1024], index: 8, kind: input, shape index: {}]   ;;  %s16665_s9 = inlined_call_operand.vmem [shape: bf16[2,1024], index: 9, kind: output, shape index: {}]  }
   0x1   :  { %s34_s10 = sshll.u32 %s13238_s30, 4  ;;  %s13214_s13 = scalar_lea.hbm %s16663_s7, 32768  ;;  %s35_s10 = int_to_ptr.vmem [resolvable:$true] %s34_s10 }
   0x2   :  { %p13215_p0 = scmp.ne.s32.totalorder %s16663_s7, %s13214_s13  ;;  %p13218_p1 = scmp.lt.u32.totalorder %s13214_s13, %s16663_s7 }
   0x4   :  { %p13220_p2 = pnand %p13218_p1, %p13215_p0 }
   0x6   :  { %13223 = shalt.err (!%p13220_p2)
}
   0x7   :  { %s13224_s18 = scalar_lea.vmem %s35_s10, 32768  ;;  %p13229_p4 = scmp.lt.s32.totalorder %s35_s10, %s35_s10 }
   0x8   :  { %p13225_p3 = scmp.ne.s32.totalorder %s35_s10, %s13224_s18  ;;  %p13230_p5 = scmp.lt.s32.totalorder %s13224_s18, %s13224_s18 }
   0xa   :  { %p13231_p6 = por %p13230_p5, %p13229_p4 }
   0xc   :  { %p13232_p7 = pnand %p13231_p6, %p13225_p3 }
   0xe   :  { %13235 = shalt.err (!%p13232_p7)
}
   0xf   :  { %s13239_s19 = smov 512   ;;  %s13240_s20 = smov 32  }
  0x10   :  { %40 = dma.hbm_to_vmem [thread:$0]  %s16663_s7, 32768, %s35_s10, [#allocation3], %s13239_s19, %s13239_s19, %s13240_s20  }
  0x11   :  { %13236 = dma.done.wait [#allocation3], 32768  }
  0x12   :  { %13237 = vsyncadd [#allocation3], 4294934528  ;;  %v11677_v0 = vld [vmem:[%s16657_s1 + $0x4] ss:$16 sps:$4 sm:$0xff]   ;;  %v11679_v1 = vld [vmem:[%s16657_s1 + $0xc] ss:$16 sps:$4 sm:$0xff]   ;;  %v305_v36 = vlaneseq }
  0x13   :  { %1663 = vmatprep.subr.bf16.mxu0 %v11677_v0  ;;  %v11681_v2 = vld [vmem:[%s16657_s1] ss:$16 sps:$4 sm:$0xff]   ;;  %v11682_v3 = vld [vmem:[%s16657_s1 + $0x8] ss:$16 sps:$4 sm:$0xff]   ;;  %1827 = vmatprep.subr.bf16.mxu1 %v11679_v1  ;;  %v11683_v4 = vld [vmem:[%s16657_s1 + $0x24] ss:$16 sps:$4 sm:$0xff]  }
  0x14   :  { %1664 = vmatpush1.bf16.msra.mxu0 %v11681_v2  ;;  %1828 = vmatpush1.bf16.msra.mxu1 %v11682_v3  ;;  %v11685_v5 = vld [vmem:[%s16657_s1 + $0x2c] ss:$16 sps:$4 sm:$0xff]   ;;  %v11687_v6 = vld [vmem:[%s16657_s1 + $0x20] ss:$16 sps:$4 sm:$0xff]   ;;  %v11688_v7 = vld [vmem:[%s16657_s1 + $0x28] ss:$16 sps:$4 sm:$0xff]  }
  0x15   :  { %1665 = vmatprep.subr.bf16.mxu0 %v11683_v4  ;;  %1829 = vmatprep.subr.bf16.mxu1 %v11685_v5  ;;  %v11689_v8 = vld [vmem:[%s16657_s1 + $0x44] ss:$16 sps:$4 sm:$0xff]   ;;  %v11691_v9 = vld [vmem:[%s16657_s1 + $0x4c] ss:$16 sps:$4 sm:$0xff]   ;;  %v11693_v10 = vld [vmem:[%s16657_s1 + $0x40] ss:$16 sps:$4 sm:$0xff]  }
  0x16   :  { %v11694_v11 = vld [vmem:[%s16657_s1 + $0x48] ss:$16 sps:$4 sm:$0xff]   ;;  %v11695_v12 = vld [vmem:[%s16657_s1 + $0x64] ss:$16 sps:$4 sm:$0xff]   ;;  %v11697_v13 = vld [vmem:[%s16657_s1 + $0x6c] ss:$16 sps:$4 sm:$0xff]  }
  0x17   :  { %v11699_v14 = vld [vmem:[%s16657_s1 + $0x60] ss:$16 sps:$4 sm:$0xff]   ;;  %v11700_v15 = vld [vmem:[%s16657_s1 + $0x68] ss:$16 sps:$4 sm:$0xff]   ;;  %v11701_v16 = vld [vmem:[%s16657_s1 + $0x84] ss:$16 sps:$4 sm:$0xff]  }
  0x18   :  { %1666 = vmatpush1.bf16.msra.mxu0 %v11687_v6  ;;  %1830 = vmatpush1.bf16.msra.mxu1 %v11688_v7  ;;  %v11703_v17 = vld [vmem:[%s16657_s1 + $0x8c] ss:$16 sps:$4 sm:$0xff]   ;;  %v11705_v18 = vld [vmem:[%s16657_s1 + $0x80] ss:$16 sps:$4 sm:$0xff]   ;;  %v11706_v19 = vld [vmem:[%s16657_s1 + $0x88] ss:$16 sps:$4 sm:$0xff]  }
  0x19   :  { %1667 = vmatprep.subr.bf16.mxu0 %v11689_v8  ;;  %1831 = vmatprep.subr.bf16.mxu1 %v11691_v9  ;;  %v11707_v20 = vld [vmem:[%s16657_s1 + $0xa4] ss:$16 sps:$4 sm:$0xff]   ;;  %v11709_v21 = vld [vmem:[%s16657_s1 + $0xac] ss:$16 sps:$4 sm:$0xff]   ;;  %v11711_v22 = vld [vmem:[%s16657_s1 + $0xa0] ss:$16 sps:$4 sm:$0xff]  }
  0x1a   :  { %v11712_v23 = vld [vmem:[%s16657_s1 + $0xa8] ss:$16 sps:$4 sm:$0xff]   ;;  %v11713_v24 = vld [vmem:[%s16657_s1 + $0xc4] ss:$16 sps:$4 sm:$0xff]   ;;  %v11715_v25 = vld [vmem:[%s16657_s1 + $0xcc] ss:$16 sps:$4 sm:$0xff]  }
  0x1b   :  { %v11717_v26 = vld [vmem:[%s16657_s1 + $0xc0] ss:$16 sps:$4 sm:$0xff]   ;;  %v11718_v27 = vld [vmem:[%s16657_s1 + $0xc8] ss:$16 sps:$4 sm:$0xff]   ;;  %v11719_v28 = vld [vmem:[%s16657_s1 + $0xe4] ss:$16 sps:$4 sm:$0xff]  }
  0x1c   :  { %1668 = vmatpush1.bf16.msra.mxu0 %v11693_v10  ;;  %1832 = vmatpush1.bf16.msra.mxu1 %v11694_v11  ;;  %v11721_v29 = vld [vmem:[%s16657_s1 + $0xec] ss:$16 sps:$4 sm:$0xff]   ;;  %v11723_v30 = vld [vmem:[%s16657_s1 + $0xe0] ss:$16 sps:$4 sm:$0xff]   ;;  %v11724_v31 = vld [vmem:[%s16657_s1 + $0xe8] ss:$16 sps:$4 sm:$0xff]  }
  0x1d   :  { %1669 = vmatprep.subr.bf16.mxu0 %v11695_v12  ;;  %1833 = vmatprep.subr.bf16.mxu1 %v11697_v13  ;;  %v11725_v32 = vld [vmem:[%s16657_s1 + $0x104] ss:$16 sps:$4 sm:$0xff]   ;;  %v11727_v33 = vld [vmem:[%s16657_s1 + $0x10c] ss:$16 sps:$4 sm:$0xff]   ;;  %v11729_v34 = vld [vmem:[%s16657_s1 + $0x100] ss:$16 sps:$4 sm:$0xff]  }
  0x1e   :  { %v11730_v35 = vld [vmem:[%s16657_s1 + $0x108] ss:$16 sps:$4 sm:$0xff]   ;;  %v13241_v37 = vmov 1966171168   ;;  %v11731_v39 = vld [vmem:[%s16657_s1 + $0x124] ss:$16 sps:$4 sm:$0xff]  }
  0x1f   :  { %v328_v38 = vunpack.c.l.s4 %v13241_v37  ;;  %v11733_v40 = vld [vmem:[%s16657_s1 + $0x12c] ss:$16 sps:$4 sm:$0xff]   ;;  %v11735_v41 = vld [vmem:[%s16657_s1 + $0x120] ss:$16 sps:$4 sm:$0xff]   ;;  %v13421_v42 = vshrl.u32 %v305_v36, 7 }
  0x20   :  { %1670 = vmatpush1.bf16.msra.mxu0 %v11699_v14  ;;  %1834 = vmatpush1.bf16.msra.mxu1 %v11700_v15  ;;  %v11736_v44 = vld [vmem:[%s16657_s1 + $0x128] ss:$16 sps:$4 sm:$0xff]   ;;  %v11737_v45 = vld [vmem:[%s16657_s1 + $0x144] ss:$16 sps:$4 sm:$0xff]   ;;  %v11739_v46 = vld [vmem:[%s16657_s1 + $0x14c] ss:$16 sps:$4 sm:$0xff]  }
  0x21   :  { %1671 = vmatprep.subr.bf16.mxu0 %v11701_v16  ;;  %1835 = vmatprep.subr.bf16.mxu1 %v11703_v17  ;;  %v329_v43 = vunpack.c.0.s8 %v328_v38  ;;  %v11741_v47 = vld [vmem:[%s16657_s1 + $0x140] ss:$16 sps:$4 sm:$0xff]   ;;  %v11742_v48 = vld [vmem:[%s16657_s1 + $0x148] ss:$16 sps:$4 sm:$0xff]   ;;  %v11743_v50 = vld [vmem:[%s16657_s1 + $0x164] ss:$16 sps:$4 sm:$0xff]  }
  0x22   :  { %v11745_v51 = vld [vmem:[%s16657_s1 + $0x16c] ss:$16 sps:$4 sm:$0xff]   ;;  %v13450_v52 = vld [vmem:[%s16656_s0] sm:$0xff]  ;;  %v11748_v55 = vld [vmem:[%s16657_s1 + $0x168] ss:$16 sps:$4 sm:$0xff]  }
  0x23   :  { %v13439_v49 = vsub.s32 %v329_v43, %v13421_v42  ;;  %v11747_v53 = vld [vmem:[%s16657_s1 + $0x160] ss:$16 sps:$4 sm:$0xff]   ;;  %v11749_v56 = vld [vmem:[%s16657_s1 + $0x184] ss:$16 sps:$4 sm:$0xff]   ;;  %v11751_v57 = vld [vmem:[%s16657_s1 + $0x18c] ss:$16 sps:$4 sm:$0xff]  }
  0x24   :  { %1672 = vmatpush1.bf16.msra.mxu0 %v11705_v18  ;;  %1836 = vmatpush1.bf16.msra.mxu1 %v11706_v19  ;;  %v11753_v59 = vld [vmem:[%s16657_s1 + $0x180] ss:$16 sps:$4 sm:$0xff]   ;;  %v11754_v61 = vld [vmem:[%s16657_s1 + $0x188] ss:$16 sps:$4 sm:$0xff]   ;;  %v11755_v62 = vld [vmem:[%s16657_s1 + $0x1a4] ss:$16 sps:$4 sm:$0xff]  }
  0x25   :  { %1673 = vmatprep.subr.bf16.mxu0 %v11707_v20  ;;  %1837 = vmatprep.subr.bf16.mxu1 %v11709_v21  ;;  %v333_v54 = vrot.slane %v13450_v52, %v13439_v49  ;;  %v11757_v63 = vld [vmem:[%s16657_s1 + $0x1ac] ss:$16 sps:$4 sm:$0xff]   ;;  %v11759_v0 = vld [vmem:[%s16657_s1 + $0x1a0] ss:$16 sps:$4 sm:$0xff]   ;;  %v11760_v1 = vld [vmem:[%s16657_s1 + $0x1a8] ss:$16 sps:$4 sm:$0xff]  }
  0x26   :  { %v11761_v2 = vld [vmem:[%s16657_s1 + $0x1c4] ss:$16 sps:$4 sm:$0xff]   ;;  %v11763_v3 = vld [vmem:[%s16657_s1 + $0x1cc] ss:$16 sps:$4 sm:$0xff]   ;;  %v11765_v4 = vld [vmem:[%s16657_s1 + $0x1c0] ss:$16 sps:$4 sm:$0xff]  }
  0x27   :  { %v341_v58 = vcombine.high %v333_v54, %v333_v54  ;;  %v11766_v5 = vld [vmem:[%s16657_s1 + $0x1c8] ss:$16 sps:$4 sm:$0xff]   ;;  %v11767_v6 = vld [vmem:[%s16657_s1 + $0x1e4] ss:$16 sps:$4 sm:$0xff]   ;;  %v11769_v7 = vld [vmem:[%s16657_s1 + $0x1ec] ss:$16 sps:$4 sm:$0xff]   ;;  %v13519_v13 = vrot.slane %v333_v54, %v13439_v49 }
  0x28   :  { %1674 = vmatpush1.bf16.msra.mxu0 %v11711_v22  ;;  %1838 = vmatpush1.bf16.msra.mxu1 %v11712_v23  ;;  %v11771_v8 = vld [vmem:[%s16657_s1 + $0x1e0] ss:$16 sps:$4 sm:$0xff]   ;;  %v11772_v9 = vld [vmem:[%s16657_s1 + $0x1e8] ss:$16 sps:$4 sm:$0xff]   ;;  %v11775_v10 = vld [vmem:[%s16657_s1 + $0x204] ss:$16 sps:$4 sm:$0xff]  }
  0x29   :  { %1675 = vmatprep.subr.bf16.mxu0 %v11713_v24  ;;  %1839 = vmatprep.subr.bf16.mxu1 %v11715_v25  ;;  %v363_v60 = vrot.slane %v341_v58, %v13439_v49  ;;  %v11778_v11 = vld [vmem:[%s16657_s1 + $0x20c] ss:$16 sps:$4 sm:$0xff]   ;;  %v11773_v12 = vld [vmem:[%s16657_s1 + $0x200] ss:$16 sps:$4 sm:$0xff]   ;;  %v11776_v14 = vld [vmem:[%s16657_s1 + $0x208] ss:$16 sps:$4 sm:$0xff]  }
  0x2a   :  { %v11781_v15 = vld [vmem:[%s16657_s1 + $0x224] ss:$16 sps:$4 sm:$0xff]   ;;  %v11784_v16 = vld [vmem:[%s16657_s1 + $0x22c] ss:$16 sps:$4 sm:$0xff]   ;;  %v11779_v18 = vld [vmem:[%s16657_s1 + $0x220] ss:$16 sps:$4 sm:$0xff]  }
  0x2b   :  { %1695 = vmatprep.mubr.bf16.mxu0 %v363_v60  ;;  %1859 = vmatprep.mubr.bf16.mxu1 %v363_v60  ;;  %v373_v17 = vcombine.high %v363_v60, %v363_v60  ;;  %v11782_v19 = vld [vmem:[%s16657_s1 + $0x228] ss:$16 sps:$4 sm:$0xff]   ;;  %v11787_v20 = vld [vmem:[%s16657_s1 + $0x244] ss:$16 sps:$4 sm:$0xff]   ;;  %v11790_v21 = vld [vmem:[%s16657_s1 + $0x24c] ss:$16 sps:$4 sm:$0xff]  }
  0x2c   :  { %1676 = vmatpush1.bf16.msra.mxu0 %v11717_v26  ;;  %1840 = vmatpush1.bf16.msra.mxu1 %v11718_v27  ;;  %v11785_v22 = vld [vmem:[%s16657_s1 + $0x240] ss:$16 sps:$4 sm:$0xff]   ;;  %v11788_v23 = vld [vmem:[%s16657_s1 + $0x248] ss:$16 sps:$4 sm:$0xff]   ;;  %v11793_v24 = vld [vmem:[%s16657_s1 + $0x264] ss:$16 sps:$4 sm:$0xff]  }
  0x2d   :  { %1677 = vmatprep.subr.bf16.mxu0 %v11719_v28  ;;  %1841 = vmatprep.subr.bf16.mxu1 %v11721_v29  ;;  %v11796_v25 = vld [vmem:[%s16657_s1 + $0x26c] ss:$16 sps:$4 sm:$0xff]   ;;  %v11791_v26 = vld [vmem:[%s16657_s1 + $0x260] ss:$16 sps:$4 sm:$0xff]   ;;  %v11794_v27 = vld [vmem:[%s16657_s1 + $0x268] ss:$16 sps:$4 sm:$0xff]  }
  0x2e   :  { %v11799_v28 = vld [vmem:[%s16657_s1 + $0x284] ss:$16 sps:$4 sm:$0xff]   ;;  %v11802_v29 = vld [vmem:[%s16657_s1 + $0x28c] ss:$16 sps:$4 sm:$0xff]   ;;  %v11809_v38 = vld [vmem:[%s16657_s1 + $0x2c0] ss:$16 sps:$4 sm:$0xff]  }
  0x2f   :  { %v11811_v36 = vld [vmem:[%s16657_s1 + $0x2c4] ss:$16 sps:$4 sm:$0xff]   ;;  %v11814_v37 = vld [vmem:[%s16657_s1 + $0x2cc] ss:$16 sps:$4 sm:$0xff]   ;;  %v11815_v43 = vld [vmem:[%s16657_s1 + $0x2e0] ss:$16 sps:$4 sm:$0xff]  }
  0x30   :  { %1678 = vmatpush1.bf16.msra.mxu0 %v11723_v30  ;;  %1842 = vmatpush1.bf16.msra.mxu1 %v11724_v31  ;;  %v11797_v30 = vld [vmem:[%s16657_s1 + $0x280] ss:$16 sps:$4 sm:$0xff]   ;;  %v11800_v31 = vld [vmem:[%s16657_s1 + $0x288] ss:$16 sps:$4 sm:$0xff]   ;;  %v11844_v60 = vld [vmem:[%s16657_s1 + $0x36c] ss:$16 sps:$4 sm:$0xff]  }
  0x31   :  { %1679 = vmatprep.subr.bf16.mxu0 %v11725_v32  ;;  %1843 = vmatprep.subr.bf16.mxu1 %v11727_v33  ;;  %v11805_v32 = vld [vmem:[%s16657_s1 + $0x2a4] ss:$16 sps:$4 sm:$0xff]   ;;  %v11808_v33 = vld [vmem:[%s16657_s1 + $0x2ac] ss:$16 sps:$4 sm:$0xff]   ;;  %v11830_v54 = vld [vmem:[%s16657_s1 + $0x328] ss:$16 sps:$4 sm:$0xff]  }
  0x32   :  { %v11836_v58 = vld [vmem:[%s16657_s1 + $0x348] ss:$16 sps:$4 sm:$0xff]  }
  0x34   :  { %1680 = vmatpush1.bf16.msra.mxu0 %v11729_v34  ;;  %1844 = vmatpush1.bf16.msra.mxu1 %v11730_v35  ;;  %v11803_v34 = vld [vmem:[%s16657_s1 + $0x2a0] ss:$16 sps:$4 sm:$0xff]   ;;  %v11806_v35 = vld [vmem:[%s16657_s1 + $0x2a8] ss:$16 sps:$4 sm:$0xff]  }
  0x35   :  { %1681 = vmatprep.subr.bf16.mxu0 %v11731_v39  ;;  %1845 = vmatprep.subr.bf16.mxu1 %v11733_v40  ;;  %v11812_v39 = vld [vmem:[%s16657_s1 + $0x2c8] ss:$16 sps:$4 sm:$0xff]   ;;  %v11817_v40 = vld [vmem:[%s16657_s1 + $0x2e4] ss:$16 sps:$4 sm:$0xff]  }
  0x38   :  { %1682 = vmatpush1.bf16.msra.mxu0 %v11735_v41  ;;  %1846 = vmatpush1.bf16.msra.mxu1 %v11736_v44  ;;  %v11820_v41 = vld [vmem:[%s16657_s1 + $0x2ec] ss:$16 sps:$4 sm:$0xff]   ;;  %v11818_v44 = vld [vmem:[%s16657_s1 + $0x2e8] ss:$16 sps:$4 sm:$0xff]  }
  0x39   :  { %1683 = vmatprep.subr.bf16.mxu0 %v11737_v45  ;;  %1847 = vmatprep.subr.bf16.mxu1 %v11739_v46  ;;  %v11823_v45 = vld [vmem:[%s16657_s1 + $0x304] ss:$16 sps:$4 sm:$0xff]   ;;  %v11826_v46 = vld [vmem:[%s16657_s1 + $0x30c] ss:$16 sps:$4 sm:$0xff]  }
  0x3c   :  { %1684 = vmatpush1.bf16.msra.mxu0 %v11741_v47  ;;  %1848 = vmatpush1.bf16.msra.mxu1 %v11742_v48  ;;  %v11821_v47 = vld [vmem:[%s16657_s1 + $0x300] ss:$16 sps:$4 sm:$0xff]   ;;  %v11824_v48 = vld [vmem:[%s16657_s1 + $0x308] ss:$16 sps:$4 sm:$0xff]  }
  0x3d   :  { %1685 = vmatprep.subr.bf16.mxu0 %v11743_v50  ;;  %1849 = vmatprep.subr.bf16.mxu1 %v11745_v51  ;;  %v11829_v50 = vld [vmem:[%s16657_s1 + $0x324] ss:$16 sps:$4 sm:$0xff]   ;;  %v11832_v51 = vld [vmem:[%s16657_s1 + $0x32c] ss:$16 sps:$4 sm:$0xff]  }
  0x40   :  { %1686 = vmatpush1.bf16.msra.mxu0 %v11747_v53  ;;  %1850 = vmatpush1.bf16.msra.mxu1 %v11748_v55  ;;  %v11827_v53 = vld [vmem:[%s16657_s1 + $0x320] ss:$16 sps:$4 sm:$0xff]   ;;  %v11835_v55 = vld [vmem:[%s16657_s1 + $0x344] ss:$16 sps:$4 sm:$0xff]  }
  0x41   :  { %1687 = vmatprep.subr.bf16.mxu0 %v11749_v56  ;;  %1851 = vmatprep.subr.bf16.mxu1 %v11751_v57  ;;  %v11838_v56 = vld [vmem:[%s16657_s1 + $0x34c] ss:$16 sps:$4 sm:$0xff]   ;;  %v11833_v57 = vld [vmem:[%s16657_s1 + $0x340] ss:$16 sps:$4 sm:$0xff]  }
  0x44   :  { %1688 = vmatpush1.bf16.msra.mxu0 %v11753_v59  ;;  %1852 = vmatpush1.bf16.msra.mxu1 %v11754_v61  ;;  %v11841_v59 = vld [vmem:[%s16657_s1 + $0x364] ss:$16 sps:$4 sm:$0xff]   ;;  %v11839_v61 = vld [vmem:[%s16657_s1 + $0x360] ss:$16 sps:$4 sm:$0xff]  }
  0x45   :  { %1689 = vmatprep.subr.bf16.mxu0 %v11755_v62  ;;  %1853 = vmatprep.subr.bf16.mxu1 %v11757_v63  ;;  %v11842_v62 = vld [vmem:[%s16657_s1 + $0x368] ss:$16 sps:$4 sm:$0xff]   ;;  %v11847_v63 = vld [vmem:[%s16657_s1 + $0x384] ss:$16 sps:$4 sm:$0xff]  }
  0x48   :  { %1690 = vmatpush1.bf16.msra.mxu0 %v11759_v0  ;;  %1854 = vmatpush1.bf16.msra.mxu1 %v11760_v1  ;;  %v11850_v0 = vld [vmem:[%s16657_s1 + $0x38c] ss:$16 sps:$4 sm:$0xff]   ;;  %v11845_v1 = vld [vmem:[%s16657_s1 + $0x380] ss:$16 sps:$4 sm:$0xff]  }
  0x49   :  { %1691 = vmatprep.subr.bf16.mxu0 %v11761_v2  ;;  %1855 = vmatprep.subr.bf16.mxu1 %v11763_v3  ;;  %v11848_v2 = vld [vmem:[%s16657_s1 + $0x388] ss:$16 sps:$4 sm:$0xff]   ;;  %v11853_v3 = vld [vmem:[%s16657_s1 + $0x3a4] ss:$16 sps:$4 sm:$0xff]  }
  0x4c   :  { %1692 = vmatpush1.bf16.msra.mxu0 %v11765_v4  ;;  %1856 = vmatpush1.bf16.msra.mxu1 %v11766_v5  ;;  %v11856_v4 = vld [vmem:[%s16657_s1 + $0x3ac] ss:$16 sps:$4 sm:$0xff]   ;;  %v11851_v5 = vld [vmem:[%s16657_s1 + $0x3a0] ss:$16 sps:$4 sm:$0xff]  }
  0x4d   :  { %1693 = vmatprep.subr.bf16.mxu0 %v11767_v6  ;;  %1857 = vmatprep.subr.bf16.mxu1 %v11769_v7  ;;  %v11854_v6 = vld [vmem:[%s16657_s1 + $0x3a8] ss:$16 sps:$4 sm:$0xff]   ;;  %v11859_v7 = vld [vmem:[%s16657_s1 + $0x3c4] ss:$16 sps:$4 sm:$0xff]  }
  0x50   :  { %1694 = vmatpush1.bf16.msra.mxu0 %v11771_v8  ;;  %1858 = vmatpush1.bf16.msra.mxu1 %v11772_v9  ;;  %v11862_v8 = vld [vmem:[%s16657_s1 + $0x3cc] ss:$16 sps:$4 sm:$0xff]   ;;  %v326_v9 = vcombine.high %v13450_v52, %v13450_v52 }
  0x51   :  { %1704 = vmatprep.subr.bf16.mxu0 %v11775_v10  ;;  %1868 = vmatprep.subr.bf16.mxu1 %v11778_v11  ;;  %v11857_v10 = vld [vmem:[%s16657_s1 + $0x3c0] ss:$16 sps:$4 sm:$0xff]   ;;  %v11860_v11 = vld [vmem:[%s16657_s1 + $0x3c8] ss:$16 sps:$4 sm:$0xff]   ;;  %v11868_v52 = vld [vmem:[%s16657_s1 + $0x3ec] ss:$16 sps:$4 sm:$0xff]  }
  0x53   :  { %1696 = vmatmul.mubr.bf16.vlgmr.msra.gmra.mrb[0].mxu0 %v13519_v13  ;;  %1860 = vmatmul.mubr.bf16.vlgmr.msra.gmra.mrb[0].mxu1 %v13519_v13 }
  0x54   :  { %1705 = vmatpush1.bf16.msra.mxu0 %v11773_v12  ;;  %1869 = vmatpush1.bf16.msra.mxu1 %v11776_v14  ;;  %v11865_v12 = vld [vmem:[%s16657_s1 + $0x3e4] ss:$16 sps:$4 sm:$0xff]   ;;  %v13703_v14 = vrot.slane %v326_v9, %v13439_v49  ;;  %v11944_v9 = vld [vmem:[%s16657_s1 + $0x588] ss:$16 sps:$4 sm:$0xff]  }
  0x55   :  { %1706 = vmatprep.subr.bf16.mxu0 %v11781_v15  ;;  %1870 = vmatprep.subr.bf16.mxu1 %v11784_v16  ;;  %v11863_v15 = vld [vmem:[%s16657_s1 + $0x3e0] ss:$16 sps:$4 sm:$0xff]   ;;  %v11866_v16 = vld [vmem:[%s16657_s1 + $0x3e8] ss:$16 sps:$4 sm:$0xff]  }
  0x56   :  { %1736 = vmatprep.mubr.bf16.mxu0 %v373_v17  ;;  %1900 = vmatprep.mubr.bf16.mxu1 %v373_v17  ;;  %v11871_v17 = vld [vmem:[%s16657_s1 + $0x404] ss:$16 sps:$4 sm:$0xff]  }
  0x58   :  { %1707 = vmatpush1.bf16.msra.mxu0 %v11779_v18  ;;  %1871 = vmatpush1.bf16.msra.mxu1 %v11782_v19  ;;  %v11874_v18 = vld [vmem:[%s16657_s1 + $0x40c] ss:$16 sps:$4 sm:$0xff]   ;;  %v342_v19 = vcombine.high %v13703_v14, %v13703_v14 }
  0x59   :  { %1708 = vmatprep.subr.bf16.mxu0 %v11787_v20  ;;  %1872 = vmatprep.subr.bf16.mxu1 %v11790_v21  ;;  %v11869_v20 = vld [vmem:[%s16657_s1 + $0x400] ss:$16 sps:$4 sm:$0xff]   ;;  %v371_v21 = vcombine.high %v13519_v13, %v13519_v13 }
  0x5a   :  { %v11875_v13 = vld [vmem:[%s16657_s1 + $0x420] ss:$16 sps:$4 sm:$0xff]  }
  0x5c   :  { %1709 = vmatpush1.bf16.msra.mxu0 %v11785_v22  ;;  %1873 = vmatpush1.bf16.msra.mxu1 %v11788_v23  ;;  %v11872_v22 = vld [vmem:[%s16657_s1 + $0x408] ss:$16 sps:$4 sm:$0xff]   ;;  %v11877_v23 = vld [vmem:[%s16657_s1 + $0x424] ss:$16 sps:$4 sm:$0xff]  }
  0x5d   :  { %1710 = vmatprep.subr.bf16.mxu0 %v11793_v24  ;;  %1874 = vmatprep.subr.bf16.mxu1 %v11796_v25  ;;  %v11880_v24 = vld [vmem:[%s16657_s1 + $0x42c] ss:$16 sps:$4 sm:$0xff]   ;;  %v13734_v25 = vrot.slane %v342_v19, %v13439_v49  ;;  %v11961_v19 = vld [vmem:[%s16657_s1 + $0x5e4] ss:$16 sps:$4 sm:$0xff]  }
  0x60   :  { %1711 = vmatpush1.bf16.msra.mxu0 %v11791_v26  ;;  %1875 = vmatpush1.bf16.msra.mxu1 %v11794_v27  ;;  %v11878_v26 = vld [vmem:[%s16657_s1 + $0x428] ss:$16 sps:$4 sm:$0xff]   ;;  %v11883_v27 = vld [vmem:[%s16657_s1 + $0x444] ss:$16 sps:$4 sm:$0xff]  }
  0x61   :  { %1712 = vmatprep.subr.bf16.mxu0 %v11799_v28  ;;  %1876 = vmatprep.subr.bf16.mxu1 %v11802_v29  ;;  %v11886_v28 = vld [vmem:[%s16657_s1 + $0x44c] ss:$16 sps:$4 sm:$0xff]   ;;  %v11881_v29 = vld [vmem:[%s16657_s1 + $0x440] ss:$16 sps:$4 sm:$0xff]  }
  0x64   :  { %1713 = vmatpush1.bf16.msra.mxu0 %v11797_v30  ;;  %1877 = vmatpush1.bf16.msra.mxu1 %v11800_v31  ;;  %v11884_v30 = vld [vmem:[%s16657_s1 + $0x448] ss:$16 sps:$4 sm:$0xff]   ;;  %v11889_v31 = vld [vmem:[%s16657_s1 + $0x464] ss:$16 sps:$4 sm:$0xff]  }
  0x65   :  { %1714 = vmatprep.subr.bf16.mxu0 %v11805_v32  ;;  %1878 = vmatprep.subr.bf16.mxu1 %v11808_v33  ;;  %v11892_v32 = vld [vmem:[%s16657_s1 + $0x46c] ss:$16 sps:$4 sm:$0xff]   ;;  %v11887_v33 = vld [vmem:[%s16657_s1 + $0x460] ss:$16 sps:$4 sm:$0xff]  }
  0x68   :  { %1715 = vmatpush1.bf16.msra.mxu0 %v11803_v34  ;;  %1879 = vmatpush1.bf16.msra.mxu1 %v11806_v35  ;;  %v11890_v34 = vld [vmem:[%s16657_s1 + $0x468] ss:$16 sps:$4 sm:$0xff]   ;;  %v11895_v35 = vld [vmem:[%s16657_s1 + $0x484] ss:$16 sps:$4 sm:$0xff]  }
  0x69   :  { %1716 = vmatprep.subr.bf16.mxu0 %v11811_v36  ;;  %1880 = vmatprep.subr.bf16.mxu1 %v11814_v37  ;;  %v11898_v36 = vld [vmem:[%s16657_s1 + $0x48c] ss:$16 sps:$4 sm:$0xff]   ;;  %v11893_v37 = vld [vmem:[%s16657_s1 + $0x480] ss:$16 sps:$4 sm:$0xff]  }
  0x6c   :  { %1717 = vmatpush1.bf16.msra.mxu0 %v11809_v38  ;;  %1881 = vmatpush1.bf16.msra.mxu1 %v11812_v39  ;;  %v11896_v38 = vld [vmem:[%s16657_s1 + $0x488] ss:$16 sps:$4 sm:$0xff]   ;;  %v11901_v39 = vld [vmem:[%s16657_s1 + $0x4a4] ss:$16 sps:$4 sm:$0xff]  }
  0x6d   :  { %1718 = vmatprep.subr.bf16.mxu0 %v11817_v40  ;;  %1882 = vmatprep.subr.bf16.mxu1 %v11820_v41  ;;  %v11904_v40 = vld [vmem:[%s16657_s1 + $0x4ac] ss:$16 sps:$4 sm:$0xff]   ;;  %v11899_v41 = vld [vmem:[%s16657_s1 + $0x4a0] ss:$16 sps:$4 sm:$0xff]  }
  0x70   :  { %1719 = vmatpush1.bf16.msra.mxu0 %v11815_v43  ;;  %1883 = vmatpush1.bf16.msra.mxu1 %v11818_v44  ;;  %v11902_v43 = vld [vmem:[%s16657_s1 + $0x4a8] ss:$16 sps:$4 sm:$0xff]   ;;  %v11907_v44 = vld [vmem:[%s16657_s1 + $0x4c4] ss:$16 sps:$4 sm:$0xff]  }
  0x71   :  { %1720 = vmatprep.subr.bf16.mxu0 %v11823_v45  ;;  %1884 = vmatprep.subr.bf16.mxu1 %v11826_v46  ;;  %v11910_v45 = vld [vmem:[%s16657_s1 + $0x4cc] ss:$16 sps:$4 sm:$0xff]   ;;  %v11905_v46 = vld [vmem:[%s16657_s1 + $0x4c0] ss:$16 sps:$4 sm:$0xff]  }
  0x74   :  { %1721 = vmatpush1.bf16.msra.mxu0 %v11821_v47  ;;  %1885 = vmatpush1.bf16.msra.mxu1 %v11824_v48  ;;  %v11908_v47 = vld [vmem:[%s16657_s1 + $0x4c8] ss:$16 sps:$4 sm:$0xff]   ;;  %v11913_v48 = vld [vmem:[%s16657_s1 + $0x4e4] ss:$16 sps:$4 sm:$0xff]  }
  0x75   :  { %1722 = vmatprep.subr.bf16.mxu0 %v11829_v50  ;;  %1886 = vmatprep.subr.bf16.mxu1 %v11832_v51  ;;  %v11916_v50 = vld [vmem:[%s16657_s1 + $0x4ec] ss:$16 sps:$4 sm:$0xff]   ;;  %v11911_v51 = vld [vmem:[%s16657_s1 + $0x4e0] ss:$16 sps:$4 sm:$0xff]  }
  0x78   :  { %1723 = vmatpush1.bf16.msra.mxu0 %v11827_v53  ;;  %1887 = vmatpush1.bf16.msra.mxu1 %v11830_v54  ;;  %v11914_v53 = vld [vmem:[%s16657_s1 + $0x4e8] ss:$16 sps:$4 sm:$0xff]   ;;  %v11919_v54 = vld [vmem:[%s16657_s1 + $0x504] ss:$16 sps:$4 sm:$0xff]  }
  0x79   :  { %1724 = vmatprep.subr.bf16.mxu0 %v11835_v55  ;;  %1888 = vmatprep.subr.bf16.mxu1 %v11838_v56  ;;  %v11922_v55 = vld [vmem:[%s16657_s1 + $0x50c] ss:$16 sps:$4 sm:$0xff]   ;;  %v11917_v56 = vld [vmem:[%s16657_s1 + $0x500] ss:$16 sps:$4 sm:$0xff]  }
  0x7c   :  { %1725 = vmatpush1.bf16.msra.mxu0 %v11833_v57  ;;  %1889 = vmatpush1.bf16.msra.mxu1 %v11836_v58  ;;  %v11920_v57 = vld [vmem:[%s16657_s1 + $0x508] ss:$16 sps:$4 sm:$0xff]   ;;  %v11925_v58 = vld [vmem:[%s16657_s1 + $0x524] ss:$16 sps:$4 sm:$0xff]  }
  0x7d   :  { %1726 = vmatprep.subr.bf16.mxu0 %v11841_v59  ;;  %1890 = vmatprep.subr.bf16.mxu1 %v11844_v60  ;;  %v11928_v59 = vld [vmem:[%s16657_s1 + $0x52c] ss:$16 sps:$4 sm:$0xff]   ;;  %v11923_v60 = vld [vmem:[%s16657_s1 + $0x520] ss:$16 sps:$4 sm:$0xff]  }
  0x80   :  { %1727 = vmatpush1.bf16.msra.mxu0 %v11839_v61  ;;  %1891 = vmatpush1.bf16.msra.mxu1 %v11842_v62  ;;  %v11926_v61 = vld [vmem:[%s16657_s1 + $0x528] ss:$16 sps:$4 sm:$0xff]   ;;  %v11931_v62 = vld [vmem:[%s16657_s1 + $0x544] ss:$16 sps:$4 sm:$0xff]  }
  0x81   :  { %1728 = vmatprep.subr.bf16.mxu0 %v11847_v63  ;;  %1892 = vmatprep.subr.bf16.mxu1 %v11850_v0  ;;  %v11934_v63 = vld [vmem:[%s16657_s1 + $0x54c] ss:$16 sps:$4 sm:$0xff]   ;;  %v11929_v0 = vld [vmem:[%s16657_s1 + $0x540] ss:$16 sps:$4 sm:$0xff]  }
  0x84   :  { %1729 = vmatpush1.bf16.msra.mxu0 %v11845_v1  ;;  %1893 = vmatpush1.bf16.msra.mxu1 %v11848_v2  ;;  %v11932_v1 = vld [vmem:[%s16657_s1 + $0x548] ss:$16 sps:$4 sm:$0xff]   ;;  %v11937_v2 = vld [vmem:[%s16657_s1 + $0x564] ss:$16 sps:$4 sm:$0xff]  }
  0x85   :  { %1730 = vmatprep.subr.bf16.mxu0 %v11853_v3  ;;  %1894 = vmatprep.subr.bf16.mxu1 %v11856_v4  ;;  %v11940_v3 = vld [vmem:[%s16657_s1 + $0x56c] ss:$16 sps:$4 sm:$0xff]   ;;  %v11935_v4 = vld [vmem:[%s16657_s1 + $0x560] ss:$16 sps:$4 sm:$0xff]  }
  0x88   :  { %1731 = vmatpush1.bf16.msra.mxu0 %v11851_v5  ;;  %1895 = vmatpush1.bf16.msra.mxu1 %v11854_v6  ;;  %v11938_v5 = vld [vmem:[%s16657_s1 + $0x568] ss:$16 sps:$4 sm:$0xff]   ;;  %v11943_v6 = vld [vmem:[%s16657_s1 + $0x584] ss:$16 sps:$4 sm:$0xff]  }
  0x89   :  { %1732 = vmatprep.subr.bf16.mxu0 %v11859_v7  ;;  %1896 = vmatprep.subr.bf16.mxu1 %v11862_v8  ;;  %v11946_v7 = vld [vmem:[%s16657_s1 + $0x58c] ss:$16 sps:$4 sm:$0xff]   ;;  %v11941_v8 = vld [vmem:[%s16657_s1 + $0x580] ss:$16 sps:$4 sm:$0xff]  }
  0x8c   :  { %1733 = vmatpush1.bf16.msra.mxu0 %v11857_v10  ;;  %1897 = vmatpush1.bf16.msra.mxu1 %v11860_v11  ;;  %v11949_v10 = vld [vmem:[%s16657_s1 + $0x5a4] ss:$16 sps:$4 sm:$0xff]   ;;  %v11952_v11 = vld [vmem:[%s16657_s1 + $0x5ac] ss:$16 sps:$4 sm:$0xff]  }
  0x8d   :  { %1734 = vmatprep.subr.bf16.mxu0 %v11865_v12  ;;  %1898 = vmatprep.subr.bf16.mxu1 %v11868_v52  ;;  %v11947_v12 = vld [vmem:[%s16657_s1 + $0x5a0] ss:$16 sps:$4 sm:$0xff]   ;;  %v11950_v52 = vld [vmem:[%s16657_s1 + $0x5a8] ss:$16 sps:$4 sm:$0xff]  }
  0x90   :  { %1735 = vmatpush1.bf16.msra.mxu0 %v11863_v15  ;;  %1899 = vmatpush1.bf16.msra.mxu1 %v11866_v16  ;;  %v11955_v15 = vld [vmem:[%s16657_s1 + $0x5c4] ss:$16 sps:$4 sm:$0xff]   ;;  %v11958_v16 = vld [vmem:[%s16657_s1 + $0x5cc] ss:$16 sps:$4 sm:$0xff]  }
  0x91   :  { %1745 = vmatprep.subr.bf16.mxu0 %v11871_v17  ;;  %1909 = vmatprep.subr.bf16.mxu1 %v11874_v18  ;;  %v11953_v17 = vld [vmem:[%s16657_s1 + $0x5c0] ss:$16 sps:$4 sm:$0xff]   ;;  %v11956_v18 = vld [vmem:[%s16657_s1 + $0x5c8] ss:$16 sps:$4 sm:$0xff]  }
  0x93   :  { %1737 = vmatmul.mubr.bf16.vlgmr.msra.gmra.mrb[0].mxu0 %v371_v21  ;;  %1901 = vmatmul.mubr.bf16.vlgmr.msra.gmra.mrb[0].mxu1 %v371_v21  ;;  %v11959_v21 = vld [vmem:[%s16657_s1 + $0x5e0] ss:$16 sps:$4 sm:$0xff]  }
  0x94   :  { %1746 = vmatpush1.bf16.msra.mxu0 %v11869_v20  ;;  %1910 = vmatpush1.bf16.msra.mxu1 %v11872_v22  ;;  %v11964_v20 = vld [vmem:[%s16657_s1 + $0x5ec] ss:$16 sps:$4 sm:$0xff]   ;;  %v11962_v22 = vld [vmem:[%s16657_s1 + $0x5e8] ss:$16 sps:$4 sm:$0xff]  }
  0x95   :  { %1747 = vmatprep.subr.bf16.mxu0 %v11877_v23  ;;  %1911 = vmatprep.subr.bf16.mxu1 %v11880_v24  ;;  %v11968_v23 = vld [vmem:[%s16657_s1 + $0x604] ss:$16 sps:$4 sm:$0xff]   ;;  %v11971_v24 = vld [vmem:[%s16657_s1 + $0x60c] ss:$16 sps:$4 sm:$0xff]  }
  0x96   :  { %1777 = vmatprep.mubr.bf16.mxu0 %v13734_v25  ;;  %1941 = vmatprep.mubr.bf16.mxu1 %v13734_v25 }
  0x98   :  { %1748 = vmatpush1.bf16.msra.mxu0 %v11875_v13  ;;  %1912 = vmatpush1.bf16.msra.mxu1 %v11878_v26  ;;  %v11966_v13 = vld [vmem:[%s16657_s1 + $0x600] ss:$16 sps:$4 sm:$0xff]   ;;  %v13923_v26 = vrot.slane %v13703_v14, %v13439_v49  ;;  %v374_v14 = vcombine.high %v13734_v25, %v13734_v25  ;;  %v11980_v25 = vld [vmem:[%s16657_s1 + $0x644] ss:$16 sps:$4 sm:$0xff]  }
  0x99   :  { %1749 = vmatprep.subr.bf16.mxu0 %v11883_v27  ;;  %1913 = vmatprep.subr.bf16.mxu1 %v11886_v28  ;;  %v11969_v27 = vld [vmem:[%s16657_s1 + $0x608] ss:$16 sps:$4 sm:$0xff]   ;;  %v11974_v28 = vld [vmem:[%s16657_s1 + $0x624] ss:$16 sps:$4 sm:$0xff]  }
  0x9c   :  { %1750 = vmatpush1.bf16.msra.mxu0 %v11881_v29  ;;  %1914 = vmatpush1.bf16.msra.mxu1 %v11884_v30  ;;  %v11977_v29 = vld [vmem:[%s16657_s1 + $0x62c] ss:$16 sps:$4 sm:$0xff]   ;;  %v11972_v30 = vld [vmem:[%s16657_s1 + $0x620] ss:$16 sps:$4 sm:$0xff]  }
  0x9d   :  { %1751 = vmatprep.subr.bf16.mxu0 %v11889_v31  ;;  %1915 = vmatprep.subr.bf16.mxu1 %v11892_v32  ;;  %v11975_v31 = vld [vmem:[%s16657_s1 + $0x628] ss:$16 sps:$4 sm:$0xff]   ;;  %v11983_v32 = vld [vmem:[%s16657_s1 + $0x64c] ss:$16 sps:$4 sm:$0xff]  }
  0xa0   :  { %1752 = vmatpush1.bf16.msra.mxu0 %v11887_v33  ;;  %1916 = vmatpush1.bf16.msra.mxu1 %v11890_v34  ;;  %v11978_v33 = vld [vmem:[%s16657_s1 + $0x640] ss:$16 sps:$4 sm:$0xff]   ;;  %v11981_v34 = vld [vmem:[%s16657_s1 + $0x648] ss:$16 sps:$4 sm:$0xff]  }
  0xa1   :  { %1753 = vmatprep.subr.bf16.mxu0 %v11895_v35  ;;  %1917 = vmatprep.subr.bf16.mxu1 %v11898_v36  ;;  %v11986_v35 = vld [vmem:[%s16657_s1 + $0x664] ss:$16 sps:$4 sm:$0xff]   ;;  %v11989_v36 = vld [vmem:[%s16657_s1 + $0x66c] ss:$16 sps:$4 sm:$0xff]  }
  0xa4   :  { %1754 = vmatpush1.bf16.msra.mxu0 %v11893_v37  ;;  %1918 = vmatpush1.bf16.msra.mxu1 %v11896_v38  ;;  %v11984_v37 = vld [vmem:[%s16657_s1 + $0x660] ss:$16 sps:$4 sm:$0xff]   ;;  %v11987_v38 = vld [vmem:[%s16657_s1 + $0x668] ss:$16 sps:$4 sm:$0xff]  }
  0xa5   :  { %1755 = vmatprep.subr.bf16.mxu0 %v11901_v39  ;;  %1919 = vmatprep.subr.bf16.mxu1 %v11904_v40  ;;  %v11992_v39 = vld [vmem:[%s16657_s1 + $0x684] ss:$16 sps:$4 sm:$0xff]   ;;  %v11995_v40 = vld [vmem:[%s16657_s1 + $0x68c] ss:$16 sps:$4 sm:$0xff]  }
  0xa8   :  { %1756 = vmatpush1.bf16.msra.mxu0 %v11899_v41  ;;  %1920 = vmatpush1.bf16.msra.mxu1 %v11902_v43  ;;  %v11990_v41 = vld [vmem:[%s16657_s1 + $0x680] ss:$16 sps:$4 sm:$0xff]   ;;  %v11993_v43 = vld [vmem:[%s16657_s1 + $0x688] ss:$16 sps:$4 sm:$0xff]  }
  0xa9   :  { %1757 = vmatprep.subr.bf16.mxu0 %v11907_v44  ;;  %1921 = vmatprep.subr.bf16.mxu1 %v11910_v45  ;;  %v11998_v44 = vld [vmem:[%s16657_s1 + $0x6a4] ss:$16 sps:$4 sm:$0xff]   ;;  %v12001_v45 = vld [vmem:[%s16657_s1 + $0x6ac] ss:$16 sps:$4 sm:$0xff]  }
  0xac   :  { %1758 = vmatpush1.bf16.msra.mxu0 %v11905_v46  ;;  %1922 = vmatpush1.bf16.msra.mxu1 %v11908_v47  ;;  %v11996_v46 = vld [vmem:[%s16657_s1 + $0x6a0] ss:$16 sps:$4 sm:$0xff]   ;;  %v11999_v47 = vld [vmem:[%s16657_s1 + $0x6a8] ss:$16 sps:$4 sm:$0xff]  }
  0xad   :  { %1759 = vmatprep.subr.bf16.mxu0 %v11913_v48  ;;  %1923 = vmatprep.subr.bf16.mxu1 %v11916_v50  ;;  %v12004_v48 = vld [vmem:[%s16657_s1 + $0x6c4] ss:$16 sps:$4 sm:$0xff]   ;;  %v12007_v50 = vld [vmem:[%s16657_s1 + $0x6cc] ss:$16 sps:$4 sm:$0xff]  }
  0xb0   :  { %1760 = vmatpush1.bf16.msra.mxu0 %v11911_v51  ;;  %1924 = vmatpush1.bf16.msra.mxu1 %v11914_v53  ;;  %v12002_v51 = vld [vmem:[%s16657_s1 + $0x6c0] ss:$16 sps:$4 sm:$0xff]   ;;  %v12005_v53 = vld [vmem:[%s16657_s1 + $0x6c8] ss:$16 sps:$4 sm:$0xff]  }
  0xb1   :  { %1761 = vmatprep.subr.bf16.mxu0 %v11919_v54  ;;  %1925 = vmatprep.subr.bf16.mxu1 %v11922_v55  ;;  %v12010_v54 = vld [vmem:[%s16657_s1 + $0x6e4] ss:$16 sps:$4 sm:$0xff]   ;;  %v12013_v55 = vld [vmem:[%s16657_s1 + $0x6ec] ss:$16 sps:$4 sm:$0xff]  }
  0xb4   :  { %1762 = vmatpush1.bf16.msra.mxu0 %v11917_v56  ;;  %1926 = vmatpush1.bf16.msra.mxu1 %v11920_v57  ;;  %v12008_v56 = vld [vmem:[%s16657_s1 + $0x6e0] ss:$16 sps:$4 sm:$0xff]   ;;  %v12011_v57 = vld [vmem:[%s16657_s1 + $0x6e8] ss:$16 sps:$4 sm:$0xff]  }
  0xb5   :  { %1763 = vmatprep.subr.bf16.mxu0 %v11925_v58  ;;  %1927 = vmatprep.subr.bf16.mxu1 %v11928_v59  ;;  %v12016_v58 = vld [vmem:[%s16657_s1 + $0x704] ss:$16 sps:$4 sm:$0xff]   ;;  %v12019_v59 = vld [vmem:[%s16657_s1 + $0x70c] ss:$16 sps:$4 sm:$0xff]  }
  0xb8   :  { %1764 = vmatpush1.bf16.msra.mxu0 %v11923_v60  ;;  %1928 = vmatpush1.bf16.msra.mxu1 %v11926_v61  ;;  %v12014_v60 = vld [vmem:[%s16657_s1 + $0x700] ss:$16 sps:$4 sm:$0xff]   ;;  %v12017_v61 = vld [vmem:[%s16657_s1 + $0x708] ss:$16 sps:$4 sm:$0xff]  }
  0xb9   :  { %1765 = vmatprep.subr.bf16.mxu0 %v11931_v62  ;;  %1929 = vmatprep.subr.bf16.mxu1 %v11934_v63  ;;  %v12022_v62 = vld [vmem:[%s16657_s1 + $0x724] ss:$16 sps:$4 sm:$0xff]   ;;  %v12025_v63 = vld [vmem:[%s16657_s1 + $0x72c] ss:$16 sps:$4 sm:$0xff]  }
  0xbc   :  { %1766 = vmatpush1.bf16.msra.mxu0 %v11929_v0  ;;  %1930 = vmatpush1.bf16.msra.mxu1 %v11932_v1  ;;  %v12020_v0 = vld [vmem:[%s16657_s1 + $0x720] ss:$16 sps:$4 sm:$0xff]   ;;  %v12023_v1 = vld [vmem:[%s16657_s1 + $0x728] ss:$16 sps:$4 sm:$0xff]  }
  0xbd   :  { %1767 = vmatprep.subr.bf16.mxu0 %v11937_v2  ;;  %1931 = vmatprep.subr.bf16.mxu1 %v11940_v3  ;;  %v12028_v2 = vld [vmem:[%s16657_s1 + $0x744] ss:$16 sps:$4 sm:$0xff]   ;;  %v12031_v3 = vld [vmem:[%s16657_s1 + $0x74c] ss:$16 sps:$4 sm:$0xff]  }
  0xc0   :  { %1768 = vmatpush1.bf16.msra.mxu0 %v11935_v4  ;;  %1932 = vmatpush1.bf16.msra.mxu1 %v11938_v5  ;;  %v12026_v4 = vld [vmem:[%s16657_s1 + $0x740] ss:$16 sps:$4 sm:$0xff]   ;;  %v12029_v5 = vld [vmem:[%s16657_s1 + $0x748] ss:$16 sps:$4 sm:$0xff]  }
  0xc1   :  { %1769 = vmatprep.subr.bf16.mxu0 %v11943_v6  ;;  %1933 = vmatprep.subr.bf16.mxu1 %v11946_v7  ;;  %v12034_v6 = vld [vmem:[%s16657_s1 + $0x764] ss:$16 sps:$4 sm:$0xff]   ;;  %v12037_v7 = vld [vmem:[%s16657_s1 + $0x76c] ss:$16 sps:$4 sm:$0xff]  }
  0xc4   :  { %1770 = vmatpush1.bf16.msra.mxu0 %v11941_v8  ;;  %1934 = vmatpush1.bf16.msra.mxu1 %v11944_v9  ;;  %v12032_v8 = vld [vmem:[%s16657_s1 + $0x760] ss:$16 sps:$4 sm:$0xff]   ;;  %v12035_v9 = vld [vmem:[%s16657_s1 + $0x768] ss:$16 sps:$4 sm:$0xff]  }
  0xc5   :  { %1771 = vmatprep.subr.bf16.mxu0 %v11949_v10  ;;  %1935 = vmatprep.subr.bf16.mxu1 %v11952_v11  ;;  %v12040_v10 = vld [vmem:[%s16657_s1 + $0x784] ss:$16 sps:$4 sm:$0xff]   ;;  %v12043_v11 = vld [vmem:[%s16657_s1 + $0x78c] ss:$16 sps:$4 sm:$0xff]  }
  0xc8   :  { %1772 = vmatpush1.bf16.msra.mxu0 %v11947_v12  ;;  %1936 = vmatpush1.bf16.msra.mxu1 %v11950_v52  ;;  %v12038_v12 = vld [vmem:[%s16657_s1 + $0x780] ss:$16 sps:$4 sm:$0xff]   ;;  %v12041_v52 = vld [vmem:[%s16657_s1 + $0x788] ss:$16 sps:$4 sm:$0xff]  }
  0xc9   :  { %1773 = vmatprep.subr.bf16.mxu0 %v11955_v15  ;;  %1937 = vmatprep.subr.bf16.mxu1 %v11958_v16  ;;  %v12046_v15 = vld [vmem:[%s16657_s1 + $0x7a4] ss:$16 sps:$4 sm:$0xff]   ;;  %v12049_v16 = vld [vmem:[%s16657_s1 + $0x7ac] ss:$16 sps:$4 sm:$0xff]  }
  0xcc   :  { %1774 = vmatpush1.bf16.msra.mxu0 %v11953_v17  ;;  %1938 = vmatpush1.bf16.msra.mxu1 %v11956_v18  ;;  %v12044_v17 = vld [vmem:[%s16657_s1 + $0x7a0] ss:$16 sps:$4 sm:$0xff]   ;;  %v12047_v18 = vld [vmem:[%s16657_s1 + $0x7a8] ss:$16 sps:$4 sm:$0xff]  }
  0xcd   :  { %1775 = vmatprep.subr.bf16.mxu0 %v11961_v19  ;;  %1939 = vmatprep.subr.bf16.mxu1 %v11964_v20  ;;  %v12052_v19 = vld [vmem:[%s16657_s1 + $0x7c4] ss:$16 sps:$4 sm:$0xff]   ;;  %v12055_v20 = vld [vmem:[%s16657_s1 + $0x7cc] ss:$16 sps:$4 sm:$0xff]  }
  0xd0   :  { %1776 = vmatpush1.bf16.msra.mxu0 %v11959_v21  ;;  %1940 = vmatpush1.bf16.msra.mxu1 %v11962_v22  ;;  %v12050_v21 = vld [vmem:[%s16657_s1 + $0x7c0] ss:$16 sps:$4 sm:$0xff]   ;;  %v12053_v22 = vld [vmem:[%s16657_s1 + $0x7c8] ss:$16 sps:$4 sm:$0xff]  }
  0xd1   :  { %1786 = vmatprep.subr.bf16.mxu0 %v11968_v23  ;;  %1950 = vmatprep.subr.bf16.mxu1 %v11971_v24  ;;  %v12058_v23 = vld [vmem:[%s16657_s1 + $0x7e4] ss:$16 sps:$4 sm:$0xff]   ;;  %v12061_v24 = vld [vmem:[%s16657_s1 + $0x7ec] ss:$16 sps:$4 sm:$0xff]  }
  0xd3   :  { %1778 = vmatmul.mubr.bf16.vlgmr.msra.gmra.mrb[0].mxu0 %v13923_v26  ;;  %1942 = vmatmul.mubr.bf16.vlgmr.msra.gmra.mrb[0].mxu1 %v13923_v26 }
  0xd4   :  { %1787 = vmatpush1.bf16.msra.mxu0 %v11966_v13  ;;  %1951 = vmatpush1.bf16.msra.mxu1 %v11969_v27  ;;  %v12056_v13 = vld [vmem:[%s16657_s1 + $0x7e0] ss:$16 sps:$4 sm:$0xff]   ;;  %v12059_v27 = vld [vmem:[%s16657_s1 + $0x7e8] ss:$16 sps:$4 sm:$0xff]  }
  0xd5   :  { %1788 = vmatprep.subr.bf16.mxu0 %v11974_v28  ;;  %1952 = vmatprep.subr.bf16.mxu1 %v11977_v29  ;;  %v12064_v28 = vld [vmem:[%s16659_s3 + $0x4] ss:$16 sps:$4 sm:$0xff]   ;;  %v12067_v29 = vld [vmem:[%s16659_s3 + $0xc] ss:$16 sps:$4 sm:$0xff]  }
  0xd6   :  { %1818 = vmatprep.mubr.bf16.mxu0 %v374_v14  ;;  %1982 = vmatprep.mubr.bf16.mxu1 %v374_v14  ;;  %v12062_v14 = vld [vmem:[%s16659_s3] ss:$16 sps:$4 sm:$0xff]  }
  0xd8   :  { %1789 = vmatpush1.bf16.msra.mxu0 %v11972_v30  ;;  %1953 = vmatpush1.bf16.msra.mxu1 %v11975_v31  ;;  %v12065_v30 = vld [vmem:[%s16659_s3 + $0x8] ss:$16 sps:$4 sm:$0xff]   ;;  %v372_v31 = vcombine.high %v13923_v26, %v13923_v26 }
  0xd9   :  { %1790 = vmatprep.subr.bf16.mxu0 %v11980_v25  ;;  %1954 = vmatprep.subr.bf16.mxu1 %v11983_v32  ;;  %v12070_v25 = vld [vmem:[%s16659_s3 + $0x24] ss:$16 sps:$4 sm:$0xff]   ;;  %v12073_v32 = vld [vmem:[%s16659_s3 + $0x2c] ss:$16 sps:$4 sm:$0xff]   ;;  %v12071_v26 = vld [vmem:[%s16659_s3 + $0x28] ss:$16 sps:$4 sm:$0xff]  }
  0xdc   :  { %1791 = vmatpush1.bf16.msra.mxu0 %v11978_v33  ;;  %1955 = vmatpush1.bf16.msra.mxu1 %v11981_v34  ;;  %v12068_v33 = vld [vmem:[%s16659_s3 + $0x20] ss:$16 sps:$4 sm:$0xff]   ;;  %v12076_v34 = vld [vmem:[%s16659_s3 + $0x44] ss:$16 sps:$4 sm:$0xff]  }
  0xdd   :  { %1792 = vmatprep.subr.bf16.mxu0 %v11986_v35  ;;  %1956 = vmatprep.subr.bf16.mxu1 %v11989_v36  ;;  %v12079_v35 = vld [vmem:[%s16659_s3 + $0x4c] ss:$16 sps:$4 sm:$0xff]   ;;  %v12074_v36 = vld [vmem:[%s16659_s3 + $0x40] ss:$16 sps:$4 sm:$0xff]  }
  0xe0   :  { %1793 = vmatpush1.bf16.msra.mxu0 %v11984_v37  ;;  %1957 = vmatpush1.bf16.msra.mxu1 %v11987_v38  ;;  %v12077_v37 = vld [vmem:[%s16659_s3 + $0x48] ss:$16 sps:$4 sm:$0xff]   ;;  %v12082_v38 = vld [vmem:[%s16659_s3 + $0x64] ss:$16 sps:$4 sm:$0xff]  }
  0xe1   :  { %1794 = vmatprep.subr.bf16.mxu0 %v11992_v39  ;;  %1958 = vmatprep.subr.bf16.mxu1 %v11995_v40  ;;  %v12085_v39 = vld [vmem:[%s16659_s3 + $0x6c] ss:$16 sps:$4 sm:$0xff]   ;;  %v12080_v40 = vld [vmem:[%s16659_s3 + $0x60] ss:$16 sps:$4 sm:$0xff]  }
  0xe4   :  { %1795 = vmatpush1.bf16.msra.mxu0 %v11990_v41  ;;  %1959 = vmatpush1.bf16.msra.mxu1 %v11993_v43  ;;  %v12083_v41 = vld [vmem:[%s16659_s3 + $0x68] ss:$16 sps:$4 sm:$0xff]   ;;  %v12088_v43 = vld [vmem:[%s16659_s3 + $0x84] ss:$16 sps:$4 sm:$0xff]  }
  0xe5   :  { %1796 = vmatprep.subr.bf16.mxu0 %v11998_v44  ;;  %1960 = vmatprep.subr.bf16.mxu1 %v12001_v45  ;;  %v12091_v44 = vld [vmem:[%s16659_s3 + $0x8c] ss:$16 sps:$4 sm:$0xff]   ;;  %v12086_v45 = vld [vmem:[%s16659_s3 + $0x80] ss:$16 sps:$4 sm:$0xff]  }
  0xe8   :  { %1797 = vmatpush1.bf16.msra.mxu0 %v11996_v46  ;;  %1961 = vmatpush1.bf16.msra.mxu1 %v11999_v47  ;;  %v12089_v46 = vld [vmem:[%s16659_s3 + $0x88] ss:$16 sps:$4 sm:$0xff]   ;;  %v12094_v47 = vld [vmem:[%s16659_s3 + $0xa4] ss:$16 sps:$4 sm:$0xff]  }
  0xe9   :  { %1798 = vmatprep.subr.bf16.mxu0 %v12004_v48  ;;  %1962 = vmatprep.subr.bf16.mxu1 %v12007_v50  ;;  %v12097_v48 = vld [vmem:[%s16659_s3 + $0xac] ss:$16 sps:$4 sm:$0xff]   ;;  %v12092_v50 = vld [vmem:[%s16659_s3 + $0xa0] ss:$16 sps:$4 sm:$0xff]  }
  0xec   :  { %1799 = vmatpush1.bf16.msra.mxu0 %v12002_v51  ;;  %1963 = vmatpush1.bf16.msra.mxu1 %v12005_v53  ;;  %v12095_v51 = vld [vmem:[%s16659_s3 + $0xa8] ss:$16 sps:$4 sm:$0xff]   ;;  %v12100_v53 = vld [vmem:[%s16659_s3 + $0xc4] ss:$16 sps:$4 sm:$0xff]  }
  0xed   :  { %1800 = vmatprep.subr.bf16.mxu0 %v12010_v54  ;;  %1964 = vmatprep.subr.bf16.mxu1 %v12013_v55  ;;  %v12103_v54 = vld [vmem:[%s16659_s3 + $0xcc] ss:$16 sps:$4 sm:$0xff]   ;;  %v12098_v55 = vld [vmem:[%s16659_s3 + $0xc0] ss:$16 sps:$4 sm:$0xff]  }
  0xf0   :  { %1801 = vmatpush1.bf16.msra.mxu0 %v12008_v56  ;;  %1965 = vmatpush1.bf16.msra.mxu1 %v12011_v57  ;;  %v12101_v56 = vld [vmem:[%s16659_s3 + $0xc8] ss:$16 sps:$4 sm:$0xff]   ;;  %v12106_v57 = vld [vmem:[%s16659_s3 + $0xe4] ss:$16 sps:$4 sm:$0xff]  }
  0xf1   :  { %1802 = vmatprep.subr.bf16.mxu0 %v12016_v58  ;;  %1966 = vmatprep.subr.bf16.mxu1 %v12019_v59  ;;  %v12109_v58 = vld [vmem:[%s16659_s3 + $0xec] ss:$16 sps:$4 sm:$0xff]   ;;  %v12104_v59 = vld [vmem:[%s16659_s3 + $0xe0] ss:$16 sps:$4 sm:$0xff]  }
  0xf4   :  { %1803 = vmatpush1.bf16.msra.mxu0 %v12014_v60  ;;  %1967 = vmatpush1.bf16.msra.mxu1 %v12017_v61  ;;  %v12107_v60 = vld [vmem:[%s16659_s3 + $0xe8] ss:$16 sps:$4 sm:$0xff]   ;;  %v12112_v61 = vld [vmem:[%s16659_s3 + $0x104] ss:$16 sps:$4 sm:$0xff]  }
  0xf5   :  { %1804 = vmatprep.subr.bf16.mxu0 %v12022_v62  ;;  %1968 = vmatprep.subr.bf16.mxu1 %v12025_v63  ;;  %v12115_v62 = vld [vmem:[%s16659_s3 + $0x10c] ss:$16 sps:$4 sm:$0xff]   ;;  %v12110_v63 = vld [vmem:[%s16659_s3 + $0x100] ss:$16 sps:$4 sm:$0xff]  }
  0xf8   :  { %1805 = vmatpush1.bf16.msra.mxu0 %v12020_v0  ;;  %1969 = vmatpush1.bf16.msra.mxu1 %v12023_v1  ;;  %v12113_v0 = vld [vmem:[%s16659_s3 + $0x108] ss:$16 sps:$4 sm:$0xff]   ;;  %v12118_v1 = vld [vmem:[%s16659_s3 + $0x124] ss:$16 sps:$4 sm:$0xff]  }
  0xf9   :  { %1806 = vmatprep.subr.bf16.mxu0 %v12028_v2  ;;  %1970 = vmatprep.subr.bf16.mxu1 %v12031_v3  ;;  %v12121_v2 = vld [vmem:[%s16659_s3 + $0x12c] ss:$16 sps:$4 sm:$0xff]   ;;  %v12116_v3 = vld [vmem:[%s16659_s3 + $0x120] ss:$16 sps:$4 sm:$0xff]  }
  0xfc   :  { %1807 = vmatpush1.bf16.msra.mxu0 %v12026_v4  ;;  %1971 = vmatpush1.bf16.msra.mxu1 %v12029_v5  ;;  %v12119_v4 = vld [vmem:[%s16659_s3 + $0x128] ss:$16 sps:$4 sm:$0xff]   ;;  %v12124_v5 = vld [vmem:[%s16659_s3 + $0x144] ss:$16 sps:$4 sm:$0xff]  }
  0xfd   :  { %1808 = vmatprep.subr.bf16.mxu0 %v12034_v6  ;;  %1972 = vmatprep.subr.bf16.mxu1 %v12037_v7  ;;  %v12127_v6 = vld [vmem:[%s16659_s3 + $0x14c] ss:$16 sps:$4 sm:$0xff]   ;;  %v12122_v7 = vld [vmem:[%s16659_s3 + $0x140] ss:$16 sps:$4 sm:$0xff]  }
 0x100   :  { %1809 = vmatpush1.bf16.msra.mxu0 %v12032_v8  ;;  %1973 = vmatpush1.bf16.msra.mxu1 %v12035_v9  ;;  %v12125_v8 = vld [vmem:[%s16659_s3 + $0x148] ss:$16 sps:$4 sm:$0xff]   ;;  %v12130_v9 = vld [vmem:[%s16659_s3 + $0x164] ss:$16 sps:$4 sm:$0xff]  }
 0x101   :  { %1810 = vmatprep.subr.bf16.mxu0 %v12040_v10  ;;  %1974 = vmatprep.subr.bf16.mxu1 %v12043_v11  ;;  %v12133_v10 = vld [vmem:[%s16659_s3 + $0x16c] ss:$16 sps:$4 sm:$0xff]   ;;  %v12128_v11 = vld [vmem:[%s16659_s3 + $0x160] ss:$16 sps:$4 sm:$0xff]  }
 0x104   :  { %1811 = vmatpush1.bf16.msra.mxu0 %v12038_v12  ;;  %1975 = vmatpush1.bf16.msra.mxu1 %v12041_v52  ;;  %v12131_v12 = vld [vmem:[%s16659_s3 + $0x168] ss:$16 sps:$4 sm:$0xff]   ;;  %v12136_v52 = vld [vmem:[%s16659_s3 + $0x184] ss:$16 sps:$4 sm:$0xff]  }
 0x105   :  { %1812 = vmatprep.subr.bf16.mxu0 %v12046_v15  ;;  %1976 = vmatprep.subr.bf16.mxu1 %v12049_v16  ;;  %v12139_v15 = vld [vmem:[%s16659_s3 + $0x18c] ss:$16 sps:$4 sm:$0xff]   ;;  %v12134_v16 = vld [vmem:[%s16659_s3 + $0x180] ss:$16 sps:$4 sm:$0xff]  }
 0x108   :  { %1813 = vmatpush1.bf16.msra.mxu0 %v12044_v17  ;;  %1977 = vmatpush1.bf16.msra.mxu1 %v12047_v18  ;;  %v12137_v17 = vld [vmem:[%s16659_s3 + $0x188] ss:$16 sps:$4 sm:$0xff]   ;;  %v12142_v18 = vld [vmem:[%s16659_s3 + $0x1a4] ss:$16 sps:$4 sm:$0xff]  }
 0x109   :  { %1814 = vmatprep.subr.bf16.mxu0 %v12052_v19  ;;  %1978 = vmatprep.subr.bf16.mxu1 %v12055_v20  ;;  %v12145_v19 = vld [vmem:[%s16659_s3 + $0x1ac] ss:$16 sps:$4 sm:$0xff]   ;;  %v12140_v20 = vld [vmem:[%s16659_s3 + $0x1a0] ss:$16 sps:$4 sm:$0xff]  }
 0x10c   :  { %1815 = vmatpush1.bf16.msra.mxu0 %v12050_v21  ;;  %1979 = vmatpush1.bf16.msra.mxu1 %v12053_v22  ;;  %v12143_v21 = vld [vmem:[%s16659_s3 + $0x1a8] ss:$16 sps:$4 sm:$0xff]   ;;  %v12148_v22 = vld [vmem:[%s16659_s3 + $0x1c4] ss:$16 sps:$4 sm:$0xff]  }
 0x10d   :  { %1816 = vmatprep.subr.bf16.mxu0 %v12058_v23  ;;  %1980 = vmatprep.subr.bf16.mxu1 %v12061_v24  ;;  %v12151_v23 = vld [vmem:[%s16659_s3 + $0x1cc] ss:$16 sps:$4 sm:$0xff]   ;;  %v12146_v24 = vld [vmem:[%s16659_s3 + $0x1c0] ss:$16 sps:$4 sm:$0xff]  }
 0x110   :  { %1817 = vmatpush1.bf16.msra.mxu0 %v12056_v13  ;;  %1981 = vmatpush1.bf16.msra.mxu1 %v12059_v27  ;;  %v12149_v13 = vld [vmem:[%s16659_s3 + $0x1c8] ss:$16 sps:$4 sm:$0xff]   ;;  %v12154_v27 = vld [vmem:[%s16659_s3 + $0x1e4] ss:$16 sps:$4 sm:$0xff]  }
 0x111   :  { %2797 = vmatprep.subr.bf16.mxu0 %v12064_v28  ;;  %2879 = vmatprep.subr.bf16.mxu1 %v12067_v29  ;;  %v12157_v28 = vld [vmem:[%s16659_s3 + $0x1ec] ss:$16 sps:$4 sm:$0xff]   ;;  %v12152_v29 = vld [vmem:[%s16659_s3 + $0x1e0] ss:$16 sps:$4 sm:$0xff]  }
 0x113   :  { %1819 = vmatmul.mubr.bf16.vlgmr.msra.gmra.mrb[0].mxu0 %v372_v31  ;;  %1983 = vmatmul.mubr.bf16.vlgmr.msra.gmra.mrb[0].mxu1 %v372_v31  ;;  %v12163_v31 = vld [vmem:[%s16659_s3 + $0x20c] ss:$16 sps:$4 sm:$0xff]  }
 0x114   :  { %2798 = vmatpush1.bf16.msra.mxu0 %v12062_v14  ;;  %2880 = vmatpush1.bf16.msra.mxu1 %v12065_v30  ;;  %v12155_v14 = vld [vmem:[%s16659_s3 + $0x1e8] ss:$16 sps:$4 sm:$0xff]   ;;  %v12160_v30 = vld [vmem:[%s16659_s3 + $0x204] ss:$16 sps:$4 sm:$0xff]  }
 0x115   :  { %2799 = vmatprep.subr.bf16.mxu0 %v12070_v25  ;;  %2881 = vmatprep.subr.bf16.mxu1 %v12073_v32  ;;  %v14315_v25 = vld [vmem:[%s16658_s2] sm:$0xf]  ;;  %v14318_v32 = vsub.s32 0, %v13421_v42 }
 0x118   :  { %2800 = vmatpush1.bf16.msra.mxu0 %v12068_v33  ;;  %2882 = vmatpush1.bf16.msra.mxu1 %v12071_v26  ;;  %v14321_v33 = vsub.s32 1, %v13421_v42  ;;  %v14324_v26 = vsub.s32 3, %v13421_v42 }
 0x119   :  { %2801 = vmatprep.subr.bf16.mxu0 %v12076_v34  ;;  %2883 = vmatprep.subr.bf16.mxu1 %v12079_v35  ;;  %v308_v34 = vrot.slane %v14315_v25, %v14318_v32 }
 0x11a   :  { %v312_v35 = vrot.slane %v14315_v25, %v14321_v33 }
 0x11c   :  { %2802 = vmatpush1.bf16.msra.mxu0 %v12074_v36  ;;  %2884 = vmatpush1.bf16.msra.mxu1 %v12077_v37  ;;  %v320_v36 = vrot.slane %v14315_v25, %v14324_v26 }
 0x11d   :  { %2803 = vmatprep.subr.bf16.mxu0 %v12082_v38  ;;  %2885 = vmatprep.subr.bf16.mxu1 %v12085_v39 }
 0x120   :  { %2804 = vmatpush1.bf16.msra.mxu0 %v12080_v40  ;;  %2886 = vmatpush1.bf16.msra.mxu1 %v12083_v41 }
 0x121   :  { %2805 = vmatprep.subr.bf16.mxu0 %v12088_v43  ;;  %2887 = vmatprep.subr.bf16.mxu1 %v12091_v44 }
 0x124   :  { %2806 = vmatpush1.bf16.msra.mxu0 %v12086_v45  ;;  %2888 = vmatpush1.bf16.msra.mxu1 %v12089_v46 }
 0x125   :  { %2807 = vmatprep.subr.bf16.mxu0 %v12094_v47  ;;  %2889 = vmatprep.subr.bf16.mxu1 %v12097_v48 }
 0x128   :  { %2808 = vmatpush1.bf16.msra.mxu0 %v12092_v50  ;;  %2890 = vmatpush1.bf16.msra.mxu1 %v12095_v51 }
 0x129   :  { %2809 = vmatprep.subr.bf16.mxu0 %v12100_v53  ;;  %2891 = vmatprep.subr.bf16.mxu1 %v12103_v54 }
 0x12c   :  { %2810 = vmatpush1.bf16.msra.mxu0 %v12098_v55  ;;  %2892 = vmatpush1.bf16.msra.mxu1 %v12101_v56  ;;  %v12158_v55 = vld [vmem:[%s16659_s3 + $0x200] ss:$16 sps:$4 sm:$0xff]   ;;  %v12161_v56 = vld [vmem:[%s16659_s3 + $0x208] ss:$16 sps:$4 sm:$0xff]  }
 0x12d   :  { %2811 = vmatprep.subr.bf16.mxu0 %v12106_v57  ;;  %2893 = vmatprep.subr.bf16.mxu1 %v12109_v58 }
 0x130   :  { %2812 = vmatpush1.bf16.msra.mxu0 %v12104_v59  ;;  %2894 = vmatpush1.bf16.msra.mxu1 %v12107_v60  ;;  %v12166_v60 = vld [vmem:[%s16659_s3 + $0x224] ss:$16 sps:$4 sm:$0xff]  }
 0x131   :  { %2813 = vmatprep.subr.bf16.mxu0 %v12112_v61  ;;  %2895 = vmatprep.subr.bf16.mxu1 %v12115_v62  ;;  %v12169_v61 = vld [vmem:[%s16659_s3 + $0x22c] ss:$16 sps:$4 sm:$0xff]  }
 0x134   :  { %2814 = vmatpush1.bf16.msra.mxu0 %v12110_v63  ;;  %2896 = vmatpush1.bf16.msra.mxu1 %v12113_v0  ;;  %v12164_v63 = vld [vmem:[%s16659_s3 + $0x220] ss:$16 sps:$4 sm:$0xff]   ;;  %v12167_v0 = vld [vmem:[%s16659_s3 + $0x228] ss:$16 sps:$4 sm:$0xff]  }
 0x135   :  { %2815 = vmatprep.subr.bf16.mxu0 %v12118_v1  ;;  %2897 = vmatprep.subr.bf16.mxu1 %v12121_v2  ;;  %v12172_v2 = vld [vmem:[%s16659_s3 + $0x244] ss:$16 sps:$4 sm:$0xff]  }
 0x138   :  { %2816 = vmatpush1.bf16.msra.mxu0 %v12116_v3  ;;  %2898 = vmatpush1.bf16.msra.mxu1 %v12119_v4  ;;  %v12175_v3 = vld [vmem:[%s16659_s3 + $0x24c] ss:$16 sps:$4 sm:$0xff]   ;;  %v12170_v4 = vld [vmem:[%s16659_s3 + $0x240] ss:$16 sps:$4 sm:$0xff]  }
 0x139   :  { %2817 = vmatprep.subr.bf16.mxu0 %v12124_v5  ;;  %2899 = vmatprep.subr.bf16.mxu1 %v12127_v6  ;;  %v12173_v5 = vld [vmem:[%s16659_s3 + $0x248] ss:$16 sps:$4 sm:$0xff]   ;;  %v12178_v6 = vld [vmem:[%s16659_s3 + $0x264] ss:$16 sps:$4 sm:$0xff]  }
 0x13c   :  { %2818 = vmatpush1.bf16.msra.mxu0 %v12122_v7  ;;  %2900 = vmatpush1.bf16.msra.mxu1 %v12125_v8  ;;  %v12181_v7 = vld [vmem:[%s16659_s3 + $0x26c] ss:$16 sps:$4 sm:$0xff]   ;;  %v12176_v8 = vld [vmem:[%s16659_s3 + $0x260] ss:$16 sps:$4 sm:$0xff]  }
 0x13d   :  { %2819 = vmatprep.subr.bf16.mxu0 %v12130_v9  ;;  %2901 = vmatprep.subr.bf16.mxu1 %v12133_v10  ;;  %v12179_v9 = vld [vmem:[%s16659_s3 + $0x268] ss:$16 sps:$4 sm:$0xff]   ;;  %v12184_v10 = vld [vmem:[%s16659_s3 + $0x284] ss:$16 sps:$4 sm:$0xff]  }
 0x140   :  { %2820 = vmatpush1.bf16.msra.mxu0 %v12128_v11  ;;  %2902 = vmatpush1.bf16.msra.mxu1 %v12131_v12  ;;  %v12187_v11 = vld [vmem:[%s16659_s3 + $0x28c] ss:$16 sps:$4 sm:$0xff]   ;;  %v12182_v12 = vld [vmem:[%s16659_s3 + $0x280] ss:$16 sps:$4 sm:$0xff]  }
 0x141   :  { %2821 = vmatprep.subr.bf16.mxu0 %v12136_v52  ;;  %2903 = vmatprep.subr.bf16.mxu1 %v12139_v15  ;;  %v12185_v52 = vld [vmem:[%s16659_s3 + $0x288] ss:$16 sps:$4 sm:$0xff]   ;;  %v12190_v15 = vld [vmem:[%s16659_s3 + $0x2a4] ss:$16 sps:$4 sm:$0xff]  }
 0x144   :  { %2822 = vmatpush1.bf16.msra.mxu0 %v12134_v16  ;;  %2904 = vmatpush1.bf16.msra.mxu1 %v12137_v17  ;;  %v12193_v16 = vld [vmem:[%s16659_s3 + $0x2ac] ss:$16 sps:$4 sm:$0xff]   ;;  %v12188_v17 = vld [vmem:[%s16659_s3 + $0x2a0] ss:$16 sps:$4 sm:$0xff]  }
 0x145   :  { %2823 = vmatprep.subr.bf16.mxu0 %v12142_v18  ;;  %2905 = vmatprep.subr.bf16.mxu1 %v12145_v19  ;;  %v12191_v18 = vld [vmem:[%s16659_s3 + $0x2a8] ss:$16 sps:$4 sm:$0xff]   ;;  %v12196_v19 = vld [vmem:[%s16659_s3 + $0x2c4] ss:$16 sps:$4 sm:$0xff]  }
 0x148   :  { %2824 = vmatpush1.bf16.msra.mxu0 %v12140_v20  ;;  %2906 = vmatpush1.bf16.msra.mxu1 %v12143_v21  ;;  %v12199_v20 = vld [vmem:[%s16659_s3 + $0x2cc] ss:$16 sps:$4 sm:$0xff]   ;;  %v12194_v21 = vld [vmem:[%s16659_s3 + $0x2c0] ss:$16 sps:$4 sm:$0xff]  }
 0x149   :  { %2825 = vmatprep.subr.bf16.mxu0 %v12148_v22  ;;  %2907 = vmatprep.subr.bf16.mxu1 %v12151_v23  ;;  %v12197_v22 = vld [vmem:[%s16659_s3 + $0x2c8] ss:$16 sps:$4 sm:$0xff]   ;;  %v12202_v23 = vld [vmem:[%s16659_s3 + $0x2e4] ss:$16 sps:$4 sm:$0xff]  }
 0x14c   :  { %2826 = vmatpush1.bf16.msra.mxu0 %v12146_v24  ;;  %2908 = vmatpush1.bf16.msra.mxu1 %v12149_v13  ;;  %v12205_v24 = vld [vmem:[%s16659_s3 + $0x2ec] ss:$16 sps:$4 sm:$0xff]   ;;  %v12200_v13 = vld [vmem:[%s16659_s3 + $0x2e0] ss:$16 sps:$4 sm:$0xff]  }
 0x14d   :  { %2827 = vmatprep.subr.bf16.mxu0 %v12154_v27  ;;  %2909 = vmatprep.subr.bf16.mxu1 %v12157_v28  ;;  %v12203_v27 = vld [vmem:[%s16659_s3 + $0x2e8] ss:$16 sps:$4 sm:$0xff]   ;;  %v12208_v28 = vld [vmem:[%s16659_s3 + $0x304] ss:$16 sps:$4 sm:$0xff]  }
 0x150   :  { %2828 = vmatpush1.bf16.msra.mxu0 %v12152_v29  ;;  %2910 = vmatpush1.bf16.msra.mxu1 %v12155_v14  ;;  %v12211_v29 = vld [vmem:[%s16659_s3 + $0x30c] ss:$16 sps:$4 sm:$0xff]   ;;  %v12206_v14 = vld [vmem:[%s16659_s3 + $0x300] ss:$16 sps:$4 sm:$0xff]  }
 0x151   :  { %2838 = vmatprep.subr.bf16.mxu0 %v12160_v30  ;;  %2920 = vmatprep.subr.bf16.mxu1 %v12163_v31  ;;  %v12209_v30 = vld [vmem:[%s16659_s3 + $0x308] ss:$16 sps:$4 sm:$0xff]   ;;  %v12214_v31 = vld [vmem:[%s16659_s3 + $0x324] ss:$16 sps:$4 sm:$0xff]  }
 0x1e6   :  { %v1820_v37 = vpop.f32.mrb[0].mxu0  ;;  %v14332_v38 = vpop.f32.mrb[0].mxu1 }
 0x1e7   :  { %v11585_v39 = vadd.f32 %v1820_v37, %v308_v34  ;;  %v1822_v40 = vpop.f32.mrb[1].mxu0  ;;  %v1986_v41 = vpop.f32.mrb[1].mxu1  ;;  %v12217_v34 = vld [vmem:[%s16659_s3 + $0x32c] ss:$16 sps:$4 sm:$0xff]   ;;  %v12220_v37 = vld [vmem:[%s16659_s3 + $0x344] ss:$16 sps:$4 sm:$0xff]  }
 0x1e8   :  { %v11586_v43 = vadd.f32 %v1822_v40, %v312_v35  ;;  %v11588_v44 = vadd.f32 %v1986_v41, %v320_v36  ;;  %v1824_v45 = vpop.f32.mrb[2].mxu0  ;;  %v1988_v46 = vpop.f32.mrb[2].mxu1  ;;  %v12212_v35 = vld [vmem:[%s16659_s3 + $0x320] ss:$16 sps:$4 sm:$0xff]   ;;  %v12215_v36 = vld [vmem:[%s16659_s3 + $0x328] ss:$16 sps:$4 sm:$0xff]  }
 0x1e9   :  { %vm1991_vm0 = vcmp.ge.f32.partialorder %v11585_v39, 0.0  ;;  %v1995_v47 = vmul.f32 0.2, %v11585_v39  ;;  %v1825_v53 = vpop.f32.mrb[3].mxu0  ;;  %v1989_v54 = vpop.f32.mrb[3].mxu1 }
 0x1ea   :  { %vm1992_vm1 = vcmp.ge.f32.partialorder %v11586_v43, 0.0  ;;  %v1996_v48 = vmul.f32 0.2, %v11586_v43  ;;  %vm1994_vm2 = vcmp.ge.f32.partialorder %v11588_v44, 0.0  ;;  %v1998_v50 = vmul.f32 0.2, %v11588_v44 }
 0x1eb   :  { %v14334_v51 = vsel %vm1991_vm0, %v11585_v39, %v1995_v47  ;;  %v12223_v39 = vld [vmem:[%s16659_s3 + $0x34c] ss:$16 sps:$4 sm:$0xff]   ;;  %v12218_v40 = vld [vmem:[%s16659_s3 + $0x340] ss:$16 sps:$4 sm:$0xff]   ;;  %v12221_v41 = vld [vmem:[%s16659_s3 + $0x348] ss:$16 sps:$4 sm:$0xff]  }
 0x1ec   :  { %v14342_v57 = vsel %vm1992_vm1, %v11586_v43, %v1996_v48  ;;  %v14346_v59 = vsel %vm1994_vm2, %v11588_v44, %v1998_v50  ;;  %v2003_v62 = vpack.c.bf16 %v14334_v51, %v14334_v51  ;;  %v12226_v43 = vld [vmem:[%s16659_s3 + $0x364] ss:$16 sps:$4 sm:$0xff]   ;;  %v12229_v44 = vld [vmem:[%s16659_s3 + $0x36c] ss:$16 sps:$4 sm:$0xff]   ;;  %v12224_v45 = vld [vmem:[%s16659_s3 + $0x360] ss:$16 sps:$4 sm:$0xff]  }
 0x1ed   :  { %v2004_v58 = vpack.c.bf16 %v14342_v57, %v14342_v57  ;;  %v2006_v1 = vpack.c.bf16 %v14346_v59, %v14346_v59  ;;  %v12227_v46 = vld [vmem:[%s16659_s3 + $0x368] ss:$16 sps:$4 sm:$0xff]   ;;  %v12232_v47 = vld [vmem:[%s16659_s3 + $0x384] ss:$16 sps:$4 sm:$0xff]   ;;  %v12235_v48 = vld [vmem:[%s16659_s3 + $0x38c] ss:$16 sps:$4 sm:$0xff]  }
 0x1ee   :  { %v14491_v50 = vsub.s32 2, %v13421_v42  ;;  %v12230_v53 = vld [vmem:[%s16659_s3 + $0x380] ss:$16 sps:$4 sm:$0xff]   ;;  %v12233_v54 = vld [vmem:[%s16659_s3 + $0x388] ss:$16 sps:$4 sm:$0xff]  }
 0x1ef   :  { %2829 = vmatprep.mubr.bf16.mxu0 %v2004_v58  ;;  %2911 = vmatprep.mubr.bf16.mxu1 %v2004_v58 }
 0x1f0   :  { %2830 = vmatmul.mubr.bf16.vlgmr.msra.gmra.mrb[4].mxu0 %v2003_v62  ;;  %2912 = vmatmul.mubr.bf16.vlgmr.msra.gmra.mrb[4].mxu1 %v2003_v62  ;;  %v316_v58 = vrot.slane %v14315_v25, %v14491_v50  ;;  %v12244_v62 = vld [vmem:[%s16659_s3 + $0x3c4] ss:$16 sps:$4 sm:$0xff]   ;;  %v12247_v25 = vld [vmem:[%s16659_s3 + $0x3cc] ss:$16 sps:$4 sm:$0xff]  }
 0x1f1   :  { %2839 = vmatpush1.bf16.msra.mxu0 %v12158_v55  ;;  %2921 = vmatpush1.bf16.msra.mxu1 %v12161_v56  ;;  %v12238_v55 = vld [vmem:[%s16659_s3 + $0x3a4] ss:$16 sps:$4 sm:$0xff]   ;;  %v12241_v56 = vld [vmem:[%s16659_s3 + $0x3ac] ss:$16 sps:$4 sm:$0xff]  }
 0x1f2   :  { %2870 = vmatprep.mubr.bf16.mxu0 %v2006_v1  ;;  %2952 = vmatprep.mubr.bf16.mxu1 %v2006_v1  ;;  %v12245_v1 = vld [vmem:[%s16659_s3 + $0x3c8] ss:$16 sps:$4 sm:$0xff]  }
 0x1f3   :  { %2840 = vmatprep.subr.bf16.mxu0 %v12166_v60  ;;  %2922 = vmatprep.subr.bf16.mxu1 %v12169_v61  ;;  %v12236_v60 = vld [vmem:[%s16659_s3 + $0x3a0] ss:$16 sps:$4 sm:$0xff]   ;;  %v12239_v61 = vld [vmem:[%s16659_s3 + $0x3a8] ss:$16 sps:$4 sm:$0xff]  }
 0x1f5   :  { %2841 = vmatpush1.bf16.msra.mxu0 %v12164_v63  ;;  %2923 = vmatpush1.bf16.msra.mxu1 %v12167_v0  ;;  %v11587_v63 = vadd.f32 %v14332_v38, %v316_v58  ;;  %v12242_v0 = vld [vmem:[%s16659_s3 + $0x3c0] ss:$16 sps:$4 sm:$0xff]   ;;  %v12253_v38 = vld [vmem:[%s16659_s3 + $0x3ec] ss:$16 sps:$4 sm:$0xff]   ;;  %v12316_v58 = vld [vmem:[%s16661_s5 + $0x144] ss:$16 sps:$4 sm:$0xff]  }
 0x1f6   :  { %2842 = vmatprep.subr.bf16.mxu0 %v12172_v2  ;;  %2924 = vmatprep.subr.bf16.mxu1 %v12175_v3  ;;  %v12250_v2 = vld [vmem:[%s16659_s3 + $0x3e4] ss:$16 sps:$4 sm:$0xff]  }
 0x1f7   :  { %v1997_v3 = vmul.f32 0.2, %v11587_v63  ;;  %vm1993_vm3 = vcmp.ge.f32.partialorder %v11587_v63, 0.0 }
 0x1f9   :  { %2843 = vmatpush1.bf16.msra.mxu0 %v12170_v4  ;;  %2925 = vmatpush1.bf16.msra.mxu1 %v12173_v5  ;;  %v12248_v4 = vld [vmem:[%s16659_s3 + $0x3e0] ss:$16 sps:$4 sm:$0xff]   ;;  %v12251_v5 = vld [vmem:[%s16659_s3 + $0x3e8] ss:$16 sps:$4 sm:$0xff]  }
 0x1fa   :  { %2844 = vmatprep.subr.bf16.mxu0 %v12178_v6  ;;  %2926 = vmatprep.subr.bf16.mxu1 %v12181_v7  ;;  %v12256_v6 = vld [vmem:[%s16661_s5 + $0x4] ss:$16 sps:$4 sm:$0xff]  }
 0x1fb   :  { %v12259_v7 = vld [vmem:[%s16661_s5 + $0x204] ss:$16 sps:$4 sm:$0xff]  }
 0x1fd   :  { %2845 = vmatpush1.bf16.msra.mxu0 %v12176_v8  ;;  %2927 = vmatpush1.bf16.msra.mxu1 %v12179_v9  ;;  %v14544_v8 = vsel %vm1993_vm3, %v11587_v63, %v1997_v3  ;;  %v12254_v9 = vld [vmem:[%s16661_s5] ss:$16 sps:$4 sm:$0xff]   ;;  %v12325_v63 = vld [vmem:[%s16661_s5 + $0x364] ss:$16 sps:$4 sm:$0xff]  }
 0x1fe   :  { %2846 = vmatprep.subr.bf16.mxu0 %v12184_v10  ;;  %2928 = vmatprep.subr.bf16.mxu1 %v12187_v11  ;;  %v12257_v10 = vld [vmem:[%s16661_s5 + $0x200] ss:$16 sps:$4 sm:$0xff]   ;;  %v2005_v11 = vpack.c.bf16 %v14544_v8, %v14544_v8 }
 0x1ff   :  { %v12326_v3 = vld [vmem:[%s16661_s5 + $0x180] ss:$16 sps:$4 sm:$0xff]  }
 0x201   :  { %2847 = vmatpush1.bf16.msra.mxu0 %v12182_v12  ;;  %2929 = vmatpush1.bf16.msra.mxu1 %v12185_v52  ;;  %v12262_v12 = vld [vmem:[%s16661_s5 + $0x24] ss:$16 sps:$4 sm:$0xff]  }
 0x202   :  { %2848 = vmatprep.subr.bf16.mxu0 %v12190_v15  ;;  %2930 = vmatprep.subr.bf16.mxu1 %v12193_v16  ;;  %v12265_v52 = vld [vmem:[%s16661_s5 + $0x224] ss:$16 sps:$4 sm:$0xff]   ;;  %v12260_v15 = vld [vmem:[%s16661_s5 + $0x20] ss:$16 sps:$4 sm:$0xff]  }
 0x203   :  { %v12263_v16 = vld [vmem:[%s16661_s5 + $0x220] ss:$16 sps:$4 sm:$0xff]  }
 0x205   :  { %2849 = vmatpush1.bf16.msra.mxu0 %v12188_v17  ;;  %2931 = vmatpush1.bf16.msra.mxu1 %v12191_v18  ;;  %v12268_v17 = vld [vmem:[%s16661_s5 + $0x44] ss:$16 sps:$4 sm:$0xff]  }
 0x206   :  { %2850 = vmatprep.subr.bf16.mxu0 %v12196_v19  ;;  %2932 = vmatprep.subr.bf16.mxu1 %v12199_v20  ;;  %v12271_v18 = vld [vmem:[%s16661_s5 + $0x244] ss:$16 sps:$4 sm:$0xff]   ;;  %v12266_v19 = vld [vmem:[%s16661_s5 + $0x40] ss:$16 sps:$4 sm:$0xff]  }
 0x207   :  { %v12269_v20 = vld [vmem:[%s16661_s5 + $0x240] ss:$16 sps:$4 sm:$0xff]  }
 0x209   :  { %2851 = vmatpush1.bf16.msra.mxu0 %v12194_v21  ;;  %2933 = vmatpush1.bf16.msra.mxu1 %v12197_v22  ;;  %v12274_v21 = vld [vmem:[%s16661_s5 + $0x64] ss:$16 sps:$4 sm:$0xff]  }
 0x20a   :  { %2852 = vmatprep.subr.bf16.mxu0 %v12202_v23  ;;  %2934 = vmatprep.subr.bf16.mxu1 %v12205_v24  ;;  %v12277_v22 = vld [vmem:[%s16661_s5 + $0x264] ss:$16 sps:$4 sm:$0xff]   ;;  %v12272_v23 = vld [vmem:[%s16661_s5 + $0x60] ss:$16 sps:$4 sm:$0xff]  }
 0x20b   :  { %v12275_v24 = vld [vmem:[%s16661_s5 + $0x260] ss:$16 sps:$4 sm:$0xff]  }
 0x20d   :  { %2853 = vmatpush1.bf16.msra.mxu0 %v12200_v13  ;;  %2935 = vmatpush1.bf16.msra.mxu1 %v12203_v27  ;;  %v12280_v13 = vld [vmem:[%s16661_s5 + $0x84] ss:$16 sps:$4 sm:$0xff]  }
 0x20e   :  { %2854 = vmatprep.subr.bf16.mxu0 %v12208_v28  ;;  %2936 = vmatprep.subr.bf16.mxu1 %v12211_v29  ;;  %v12283_v27 = vld [vmem:[%s16661_s5 + $0x284] ss:$16 sps:$4 sm:$0xff]   ;;  %v12278_v28 = vld [vmem:[%s16661_s5 + $0x80] ss:$16 sps:$4 sm:$0xff]  }
 0x20f   :  { %v12281_v29 = vld [vmem:[%s16661_s5 + $0x280] ss:$16 sps:$4 sm:$0xff]  }
 0x211   :  { %2855 = vmatpush1.bf16.msra.mxu0 %v12206_v14  ;;  %2937 = vmatpush1.bf16.msra.mxu1 %v12209_v30  ;;  %v12286_v14 = vld [vmem:[%s16661_s5 + $0xa4] ss:$16 sps:$4 sm:$0xff]  }
 0x212   :  { %2856 = vmatprep.subr.bf16.mxu0 %v12214_v31  ;;  %2938 = vmatprep.subr.bf16.mxu1 %v12217_v34  ;;  %v12289_v30 = vld [vmem:[%s16661_s5 + $0x2a4] ss:$16 sps:$4 sm:$0xff]   ;;  %v12284_v31 = vld [vmem:[%s16661_s5 + $0xa0] ss:$16 sps:$4 sm:$0xff]  }
 0x213   :  { %v12287_v34 = vld [vmem:[%s16661_s5 + $0x2a0] ss:$16 sps:$4 sm:$0xff]  }
 0x215   :  { %2857 = vmatpush1.bf16.msra.mxu0 %v12212_v35  ;;  %2939 = vmatpush1.bf16.msra.mxu1 %v12215_v36  ;;  %v12292_v35 = vld [vmem:[%s16661_s5 + $0xc4] ss:$16 sps:$4 sm:$0xff]  }
 0x216   :  { %2858 = vmatprep.subr.bf16.mxu0 %v12220_v37  ;;  %2940 = vmatprep.subr.bf16.mxu1 %v12223_v39  ;;  %v12295_v36 = vld [vmem:[%s16661_s5 + $0x2c4] ss:$16 sps:$4 sm:$0xff]   ;;  %v12290_v37 = vld [vmem:[%s16661_s5 + $0xc0] ss:$16 sps:$4 sm:$0xff]  }
 0x217   :  { %v12293_v39 = vld [vmem:[%s16661_s5 + $0x2c0] ss:$16 sps:$4 sm:$0xff]  }
 0x219   :  { %2859 = vmatpush1.bf16.msra.mxu0 %v12218_v40  ;;  %2941 = vmatpush1.bf16.msra.mxu1 %v12221_v41  ;;  %v12298_v40 = vld [vmem:[%s16661_s5 + $0xe4] ss:$16 sps:$4 sm:$0xff]  }
 0x21a   :  { %2860 = vmatprep.subr.bf16.mxu0 %v12226_v43  ;;  %2942 = vmatprep.subr.bf16.mxu1 %v12229_v44  ;;  %v12301_v41 = vld [vmem:[%s16661_s5 + $0x2e4] ss:$16 sps:$4 sm:$0xff]   ;;  %v12296_v43 = vld [vmem:[%s16661_s5 + $0xe0] ss:$16 sps:$4 sm:$0xff]  }
 0x21b   :  { %v12299_v44 = vld [vmem:[%s16661_s5 + $0x2e0] ss:$16 sps:$4 sm:$0xff]  }
 0x21d   :  { %2861 = vmatpush1.bf16.msra.mxu0 %v12224_v45  ;;  %2943 = vmatpush1.bf16.msra.mxu1 %v12227_v46  ;;  %v12304_v45 = vld [vmem:[%s16661_s5 + $0x104] ss:$16 sps:$4 sm:$0xff]  }
 0x21e   :  { %2862 = vmatprep.subr.bf16.mxu0 %v12232_v47  ;;  %2944 = vmatprep.subr.bf16.mxu1 %v12235_v48  ;;  %v12307_v46 = vld [vmem:[%s16661_s5 + $0x304] ss:$16 sps:$4 sm:$0xff]   ;;  %v12302_v47 = vld [vmem:[%s16661_s5 + $0x100] ss:$16 sps:$4 sm:$0xff]  }
 0x21f   :  { %v12305_v48 = vld [vmem:[%s16661_s5 + $0x300] ss:$16 sps:$4 sm:$0xff]  }
 0x221   :  { %2863 = vmatpush1.bf16.msra.mxu0 %v12230_v53  ;;  %2945 = vmatpush1.bf16.msra.mxu1 %v12233_v54  ;;  %v12310_v53 = vld [vmem:[%s16661_s5 + $0x124] ss:$16 sps:$4 sm:$0xff]  }
 0x222   :  { %2864 = vmatprep.subr.bf16.mxu0 %v12238_v55  ;;  %2946 = vmatprep.subr.bf16.mxu1 %v12241_v56  ;;  %v12313_v54 = vld [vmem:[%s16661_s5 + $0x324] ss:$16 sps:$4 sm:$0xff]   ;;  %v12308_v55 = vld [vmem:[%s16661_s5 + $0x120] ss:$16 sps:$4 sm:$0xff]  }
 0x223   :  { %v12311_v56 = vld [vmem:[%s16661_s5 + $0x320] ss:$16 sps:$4 sm:$0xff]  }
 0x225   :  { %2865 = vmatpush1.bf16.msra.mxu0 %v12236_v60  ;;  %2947 = vmatpush1.bf16.msra.mxu1 %v12239_v61  ;;  %v12319_v60 = vld [vmem:[%s16661_s5 + $0x344] ss:$16 sps:$4 sm:$0xff]   ;;  %v12314_v61 = vld [vmem:[%s16661_s5 + $0x140] ss:$16 sps:$4 sm:$0xff]  }
 0x226   :  { %2866 = vmatprep.subr.bf16.mxu0 %v12244_v62  ;;  %2948 = vmatprep.subr.bf16.mxu1 %v12247_v25  ;;  %v12317_v62 = vld [vmem:[%s16661_s5 + $0x340] ss:$16 sps:$4 sm:$0xff]   ;;  %v12322_v25 = vld [vmem:[%s16661_s5 + $0x164] ss:$16 sps:$4 sm:$0xff]  }
 0x229   :  { %2867 = vmatpush1.bf16.msra.mxu0 %v12242_v0  ;;  %2949 = vmatpush1.bf16.msra.mxu1 %v12245_v1  ;;  %v12320_v0 = vld [vmem:[%s16661_s5 + $0x160] ss:$16 sps:$4 sm:$0xff]  }
 0x22a   :  { %2868 = vmatprep.subr.bf16.mxu0 %v12250_v2  ;;  %2950 = vmatprep.subr.bf16.mxu1 %v12253_v38  ;;  %v12323_v1 = vld [vmem:[%s16661_s5 + $0x360] ss:$16 sps:$4 sm:$0xff]   ;;  %v12328_v2 = vld [vmem:[%s16661_s5 + $0x184] ss:$16 sps:$4 sm:$0xff]  }
 0x22b   :  { %v12331_v38 = vld [vmem:[%s16661_s5 + $0x384] ss:$16 sps:$4 sm:$0xff]  }
 0x22d   :  { %2869 = vmatpush1.bf16.msra.mxu0 %v12248_v4  ;;  %2951 = vmatpush1.bf16.msra.mxu1 %v12251_v5  ;;  %v12329_v4 = vld [vmem:[%s16661_s5 + $0x380] ss:$16 sps:$4 sm:$0xff]   ;;  %v12334_v5 = vld [vmem:[%s16661_s5 + $0x1a4] ss:$16 sps:$4 sm:$0xff]  }
 0x22e   :  { %3737 = vmatprep.subr.bf16.mxu0 %v12256_v6  ;;  %3778 = vmatprep.subr.bf16.mxu1 %v12259_v7  ;;  %v12337_v6 = vld [vmem:[%s16661_s5 + $0x3a4] ss:$16 sps:$4 sm:$0xff]   ;;  %v12332_v7 = vld [vmem:[%s16661_s5 + $0x1a0] ss:$16 sps:$4 sm:$0xff]  }
 0x230   :  { %2871 = vmatmul.mubr.bf16.vlgmr.msra.gmra.mrb[4].mxu0 %v2005_v11  ;;  %2953 = vmatmul.mubr.bf16.vlgmr.msra.gmra.mrb[4].mxu1 %v2005_v11  ;;  %v12343_v11 = vld [vmem:[%s16661_s5 + $0x3c4] ss:$16 sps:$4 sm:$0xff]  }
 0x231   :  { %3738 = vmatpush1.bf16.msra.mxu0 %v12254_v9  ;;  %3779 = vmatpush1.bf16.msra.mxu1 %v12257_v10  ;;  %v12335_v9 = vld [vmem:[%s16661_s5 + $0x3a0] ss:$16 sps:$4 sm:$0xff]   ;;  %v12340_v10 = vld [vmem:[%s16661_s5 + $0x1c4] ss:$16 sps:$4 sm:$0xff]  }
 0x232   :  { %3739 = vmatprep.subr.bf16.mxu0 %v12262_v12  ;;  %3780 = vmatprep.subr.bf16.mxu1 %v12265_v52  ;;  %v12338_v12 = vld [vmem:[%s16661_s5 + $0x1c0] ss:$16 sps:$4 sm:$0xff]  }
 0x233   :  { %v12341_v52 = vld [vmem:[%s16661_s5 + $0x3c0] ss:$16 sps:$4 sm:$0xff]  }
 0x235   :  { %3740 = vmatpush1.bf16.msra.mxu0 %v12260_v15  ;;  %3781 = vmatpush1.bf16.msra.mxu1 %v12263_v16  ;;  %v12346_v15 = vld [vmem:[%s16661_s5 + $0x1e4] ss:$16 sps:$4 sm:$0xff]  }
 0x236   :  { %3741 = vmatprep.subr.bf16.mxu0 %v12268_v17  ;;  %3782 = vmatprep.subr.bf16.mxu1 %v12271_v18  ;;  %v12349_v16 = vld [vmem:[%s16661_s5 + $0x3e4] ss:$16 sps:$4 sm:$0xff]   ;;  %v12344_v17 = vld [vmem:[%s16661_s5 + $0x1e0] ss:$16 sps:$4 sm:$0xff]  }
 0x237   :  { %v12347_v18 = vld [vmem:[%s16661_s5 + $0x3e0] ss:$16 sps:$4 sm:$0xff]  }
 0x239   :  { %3742 = vmatpush1.bf16.msra.mxu0 %v12266_v19  ;;  %3783 = vmatpush1.bf16.msra.mxu1 %v12269_v20  ;;  %v12352_v19 = vld [vmem:[%s16661_s5 + $0xc] ss:$16 sps:$4 sm:$0xff]  }
 0x23a   :  { %3743 = vmatprep.subr.bf16.mxu0 %v12274_v21  ;;  %3784 = vmatprep.subr.bf16.mxu1 %v12277_v22  ;;  %v12355_v20 = vld [vmem:[%s16661_s5 + $0x20c] ss:$16 sps:$4 sm:$0xff]   ;;  %v2135_v21 = vld [vmem:[%s16660_s4] sm:$0xf] }
 0x23b   :  { %v2140_v22 = vrot.slane %v2135_v21, %v14318_v32 }
 0x23d   :  { %3744 = vmatpush1.bf16.msra.mxu0 %v12272_v23  ;;  %3785 = vmatpush1.bf16.msra.mxu1 %v12275_v24  ;;  %v2148_v23 = vrot.slane %v2135_v21, %v14491_v50  ;;  %v2144_v24 = vrot.slane %v2135_v21, %v14321_v33 }
 0x23e   :  { %3745 = vmatprep.subr.bf16.mxu0 %v12280_v13  ;;  %3786 = vmatprep.subr.bf16.mxu1 %v12283_v27  ;;  %v2152_v13 = vrot.slane %v2135_v21, %v14324_v26  ;;  %v12395_v21 = vld [vmem:[%s16661_s5 + $0x2e8] ss:$16 sps:$4 sm:$0xff]  }
 0x241   :  { %3746 = vmatpush1.bf16.msra.mxu0 %v12278_v28  ;;  %3787 = vmatpush1.bf16.msra.mxu1 %v12281_v29 }
 0x242   :  { %3747 = vmatprep.subr.bf16.mxu0 %v12286_v14  ;;  %3788 = vmatprep.subr.bf16.mxu1 %v12289_v30 }
 0x245   :  { %3748 = vmatpush1.bf16.msra.mxu0 %v12284_v31  ;;  %3789 = vmatpush1.bf16.msra.mxu1 %v12287_v34 }
 0x246   :  { %3749 = vmatprep.subr.bf16.mxu0 %v12292_v35  ;;  %3790 = vmatprep.subr.bf16.mxu1 %v12295_v36 }
 0x249   :  { %3750 = vmatpush1.bf16.msra.mxu0 %v12290_v37  ;;  %3791 = vmatpush1.bf16.msra.mxu1 %v12293_v39 }
 0x24a   :  { %3751 = vmatprep.subr.bf16.mxu0 %v12298_v40  ;;  %3792 = vmatprep.subr.bf16.mxu1 %v12301_v41 }
 0x24d   :  { %3752 = vmatpush1.bf16.msra.mxu0 %v12296_v43  ;;  %3793 = vmatpush1.bf16.msra.mxu1 %v12299_v44 }
 0x24e   :  { %3753 = vmatprep.subr.bf16.mxu0 %v12304_v45  ;;  %3794 = vmatprep.subr.bf16.mxu1 %v12307_v46 }
 0x251   :  { %3754 = vmatpush1.bf16.msra.mxu0 %v12302_v47  ;;  %3795 = vmatpush1.bf16.msra.mxu1 %v12305_v48  ;;  %v12350_v48 = vld [vmem:[%s16661_s5 + $0x8] ss:$16 sps:$4 sm:$0xff]  }
 0x252   :  { %3755 = vmatprep.subr.bf16.mxu0 %v12310_v53  ;;  %3796 = vmatprep.subr.bf16.mxu1 %v12313_v54  ;;  %v12353_v53 = vld [vmem:[%s16661_s5 + $0x208] ss:$16 sps:$4 sm:$0xff]  }
 0x255   :  { %3756 = vmatpush1.bf16.msra.mxu0 %v12308_v55  ;;  %3797 = vmatpush1.bf16.msra.mxu1 %v12311_v56  ;;  %v12358_v56 = vld [vmem:[%s16661_s5 + $0x2c] ss:$16 sps:$4 sm:$0xff]  }
 0x256   :  { %3757 = vmatprep.subr.bf16.mxu0 %v12316_v58  ;;  %3798 = vmatprep.subr.bf16.mxu1 %v12319_v60  ;;  %v12361_v58 = vld [vmem:[%s16661_s5 + $0x22c] ss:$16 sps:$4 sm:$0xff]   ;;  %v12356_v60 = vld [vmem:[%s16661_s5 + $0x28] ss:$16 sps:$4 sm:$0xff]  }
 0x259   :  { %3758 = vmatpush1.bf16.msra.mxu0 %v12314_v61  ;;  %3799 = vmatpush1.bf16.msra.mxu1 %v12317_v62  ;;  %v12359_v61 = vld [vmem:[%s16661_s5 + $0x228] ss:$16 sps:$4 sm:$0xff]   ;;  %v12364_v62 = vld [vmem:[%s16661_s5 + $0x4c] ss:$16 sps:$4 sm:$0xff]  }
 0x25a   :  { %3759 = vmatprep.subr.bf16.mxu0 %v12322_v25  ;;  %3800 = vmatprep.subr.bf16.mxu1 %v12325_v63  ;;  %v12367_v25 = vld [vmem:[%s16661_s5 + $0x24c] ss:$16 sps:$4 sm:$0xff]   ;;  %v12362_v63 = vld [vmem:[%s16661_s5 + $0x48] ss:$16 sps:$4 sm:$0xff]  }
 0x25d   :  { %3760 = vmatpush1.bf16.msra.mxu0 %v12320_v0  ;;  %3801 = vmatpush1.bf16.msra.mxu1 %v12323_v1  ;;  %v12365_v0 = vld [vmem:[%s16661_s5 + $0x248] ss:$16 sps:$4 sm:$0xff]   ;;  %v12370_v1 = vld [vmem:[%s16661_s5 + $0x6c] ss:$16 sps:$4 sm:$0xff]  }
 0x25e   :  { %3761 = vmatprep.subr.bf16.mxu0 %v12328_v2  ;;  %3802 = vmatprep.subr.bf16.mxu1 %v12331_v38  ;;  %v12373_v2 = vld [vmem:[%s16661_s5 + $0x26c] ss:$16 sps:$4 sm:$0xff]   ;;  %v12368_v38 = vld [vmem:[%s16661_s5 + $0x68] ss:$16 sps:$4 sm:$0xff]  }
 0x261   :  { %3762 = vmatpush1.bf16.msra.mxu0 %v12326_v3  ;;  %3803 = vmatpush1.bf16.msra.mxu1 %v12329_v4  ;;  %v12371_v3 = vld [vmem:[%s16661_s5 + $0x268] ss:$16 sps:$4 sm:$0xff]   ;;  %v12376_v4 = vld [vmem:[%s16661_s5 + $0x8c] ss:$16 sps:$4 sm:$0xff]  }
 0x262   :  { %3763 = vmatprep.subr.bf16.mxu0 %v12334_v5  ;;  %3804 = vmatprep.subr.bf16.mxu1 %v12337_v6  ;;  %v12379_v5 = vld [vmem:[%s16661_s5 + $0x28c] ss:$16 sps:$4 sm:$0xff]   ;;  %v12374_v6 = vld [vmem:[%s16661_s5 + $0x88] ss:$16 sps:$4 sm:$0xff]  }
 0x265   :  { %3764 = vmatpush1.bf16.msra.mxu0 %v12332_v7  ;;  %3805 = vmatpush1.bf16.msra.mxu1 %v12335_v9  ;;  %v12377_v7 = vld [vmem:[%s16661_s5 + $0x288] ss:$16 sps:$4 sm:$0xff]   ;;  %v12382_v9 = vld [vmem:[%s16661_s5 + $0xac] ss:$16 sps:$4 sm:$0xff]  }
 0x266   :  { %3765 = vmatprep.subr.bf16.mxu0 %v12340_v10  ;;  %3806 = vmatprep.subr.bf16.mxu1 %v12343_v11  ;;  %v12385_v10 = vld [vmem:[%s16661_s5 + $0x2ac] ss:$16 sps:$4 sm:$0xff]   ;;  %v12380_v11 = vld [vmem:[%s16661_s5 + $0xa8] ss:$16 sps:$4 sm:$0xff]  }
 0x269   :  { %3766 = vmatpush1.bf16.msra.mxu0 %v12338_v12  ;;  %3807 = vmatpush1.bf16.msra.mxu1 %v12341_v52  ;;  %v12383_v12 = vld [vmem:[%s16661_s5 + $0x2a8] ss:$16 sps:$4 sm:$0xff]   ;;  %v12388_v52 = vld [vmem:[%s16661_s5 + $0xcc] ss:$16 sps:$4 sm:$0xff]  }
 0x26a   :  { %3767 = vmatprep.subr.bf16.mxu0 %v12346_v15  ;;  %3808 = vmatprep.subr.bf16.mxu1 %v12349_v16  ;;  %v12391_v15 = vld [vmem:[%s16661_s5 + $0x2cc] ss:$16 sps:$4 sm:$0xff]   ;;  %v12386_v16 = vld [vmem:[%s16661_s5 + $0xc8] ss:$16 sps:$4 sm:$0xff]  }
 0x26d   :  { %3768 = vmatpush1.bf16.msra.mxu0 %v12344_v17  ;;  %3809 = vmatpush1.bf16.msra.mxu1 %v12347_v18  ;;  %v12389_v17 = vld [vmem:[%s16661_s5 + $0x2c8] ss:$16 sps:$4 sm:$0xff]   ;;  %v12394_v18 = vld [vmem:[%s16661_s5 + $0xec] ss:$16 sps:$4 sm:$0xff]  }
 0x26e   :  { %3819 = vmatprep.subr.bf16.mxu0 %v12352_v19  ;;  %3860 = vmatprep.subr.bf16.mxu1 %v12355_v20  ;;  %v12397_v19 = vld [vmem:[%s16661_s5 + $0x2ec] ss:$16 sps:$4 sm:$0xff]   ;;  %v12392_v20 = vld [vmem:[%s16661_s5 + $0xe8] ss:$16 sps:$4 sm:$0xff]  }
 0x303   :  { %v2872_v27 = vpop.f32.mrb[4].mxu0  ;;  %v2954_v28 = vpop.f32.mrb[4].mxu1 }
 0x304   :  { %v11589_v29 = vadd.f32 %v2872_v27, %v2140_v22  ;;  %v11591_v14 = vadd.f32 %v2954_v28, %v2148_v23  ;;  %v2874_v30 = vpop.f32.mrb[5].mxu0  ;;  %v2956_v31 = vpop.f32.mrb[5].mxu1  ;;  %v12400_v22 = vld [vmem:[%s16661_s5 + $0x10c] ss:$16 sps:$4 sm:$0xff]  }
 0x305   :  { %v11590_v34 = vadd.f32 %v2874_v30, %v2144_v24  ;;  %v11592_v35 = vadd.f32 %v2956_v31, %v2152_v13  ;;  %v2876_v36 = vpop.f32.mrb[6].mxu0  ;;  %v2958_v37 = vpop.f32.mrb[6].mxu1  ;;  %v12403_v23 = vld [vmem:[%s16661_s5 + $0x30c] ss:$16 sps:$4 sm:$0xff]   ;;  %v12398_v24 = vld [vmem:[%s16661_s5 + $0x108] ss:$16 sps:$4 sm:$0xff]  }
 0x306   :  { %v2961_v39 = vmax.f32 %v11589_v29, 0.0  ;;  %v2963_v40 = vmax.f32 %v11591_v14, 0.0  ;;  %v2877_v41 = vpop.f32.mrb[7].mxu0  ;;  %v2959_v43 = vpop.f32.mrb[7].mxu1  ;;  %v12401_v13 = vld [vmem:[%s16661_s5 + $0x308] ss:$16 sps:$4 sm:$0xff]  }
 0x307   :  { %v2962_v44 = vmax.f32 %v11590_v34, 0.0  ;;  %v2964_v45 = vmax.f32 %v11592_v35, 0.0  ;;  %v12406_v27 = vld [vmem:[%s16661_s5 + $0x12c] ss:$16 sps:$4 sm:$0xff]   ;;  %v12404_v29 = vld [vmem:[%s16661_s5 + $0x128] ss:$16 sps:$4 sm:$0xff]  }
 0x308   :  { %v14753_v54 = vpack.c.bf16 %v2961_v39, %v2961_v39  ;;  %v14755_v55 = vpack.c.bf16 %v2963_v40, %v2963_v40  ;;  %v12409_v28 = vld [vmem:[%s16661_s5 + $0x32c] ss:$16 sps:$4 sm:$0xff]   ;;  %v12407_v14 = vld [vmem:[%s16661_s5 + $0x328] ss:$16 sps:$4 sm:$0xff]  }
 0x309   :  { %v2966_v46 = vpack.c.bf16 %v2962_v44, %v2962_v44  ;;  %v2968_v47 = vpack.c.bf16 %v2964_v45, %v2964_v45  ;;  %v12412_v30 = vld [vmem:[%s16661_s5 + $0x14c] ss:$16 sps:$4 sm:$0xff]   ;;  %v12410_v34 = vld [vmem:[%s16661_s5 + $0x148] ss:$16 sps:$4 sm:$0xff]  }
 0x30a   :  { %v12415_v31 = vld [vmem:[%s16661_s5 + $0x34c] ss:$16 sps:$4 sm:$0xff]   ;;  %v12413_v35 = vld [vmem:[%s16661_s5 + $0x348] ss:$16 sps:$4 sm:$0xff]  }
 0x30b   :  { %3769 = vmatprep.mubr.bf16.mxu0 %v2966_v46  ;;  %3810 = vmatprep.mubr.bf16.mxu1 %v2968_v47  ;;  %v12418_v36 = vld [vmem:[%s16661_s5 + $0x16c] ss:$16 sps:$4 sm:$0xff]   ;;  %v12416_v39 = vld [vmem:[%s16661_s5 + $0x168] ss:$16 sps:$4 sm:$0xff]  }
 0x30c   :  { %3770 = vmatmul.mubr.bf16.vlgmr.msra.gmra.mrb[8].mxu0 %v14753_v54  ;;  %3811 = vmatmul.mubr.bf16.vlgmr.msra.gmra.mrb[8].mxu1 %v14755_v55  ;;  %v12421_v37 = vld [vmem:[%s16661_s5 + $0x36c] ss:$16 sps:$4 sm:$0xff]   ;;  %v12419_v40 = vld [vmem:[%s16661_s5 + $0x368] ss:$16 sps:$4 sm:$0xff]  }
 0x30d   :  { %3820 = vmatpush1.bf16.msra.mxu0 %v12350_v48  ;;  %3861 = vmatpush1.bf16.msra.mxu1 %v12353_v53  ;;  %v12424_v41 = vld [vmem:[%s16661_s5 + $0x18c] ss:$16 sps:$4 sm:$0xff]   ;;  %v12422_v44 = vld [vmem:[%s16661_s5 + $0x188] ss:$16 sps:$4 sm:$0xff]  }
 0x30e   :  { %3851 = vmatprep.mubr.bf16.mxu0 %v2966_v46  ;;  %3892 = vmatprep.mubr.bf16.mxu1 %v2968_v47  ;;  %v12427_v43 = vld [vmem:[%s16661_s5 + $0x38c] ss:$16 sps:$4 sm:$0xff]   ;;  %v12425_v45 = vld [vmem:[%s16661_s5 + $0x388] ss:$16 sps:$4 sm:$0xff]  }
 0x30f   :  { %3821 = vmatprep.subr.bf16.mxu0 %v12358_v56  ;;  %3862 = vmatprep.subr.bf16.mxu1 %v12361_v58  ;;  %v12430_v46 = vld [vmem:[%s16661_s5 + $0x1ac] ss:$16 sps:$4 sm:$0xff]   ;;  %v12428_v48 = vld [vmem:[%s16661_s5 + $0x1a8] ss:$16 sps:$4 sm:$0xff]  }
 0x310   :  { %v12433_v47 = vld [vmem:[%s16661_s5 + $0x3ac] ss:$16 sps:$4 sm:$0xff]   ;;  %v12431_v53 = vld [vmem:[%s16661_s5 + $0x3a8] ss:$16 sps:$4 sm:$0xff]  }
 0x311   :  { %3822 = vmatpush1.bf16.msra.mxu0 %v12356_v60  ;;  %3863 = vmatpush1.bf16.msra.mxu1 %v12359_v61  ;;  %v12436_v56 = vld [vmem:[%s16661_s5 + $0x1cc] ss:$16 sps:$4 sm:$0xff]   ;;  %v12434_v60 = vld [vmem:[%s16661_s5 + $0x1c8] ss:$16 sps:$4 sm:$0xff]  }
 0x312   :  { %3823 = vmatprep.subr.bf16.mxu0 %v12364_v62  ;;  %3864 = vmatprep.subr.bf16.mxu1 %v12367_v25  ;;  %v12439_v58 = vld [vmem:[%s16661_s5 + $0x3cc] ss:$16 sps:$4 sm:$0xff]   ;;  %v12437_v61 = vld [vmem:[%s16661_s5 + $0x3c8] ss:$16 sps:$4 sm:$0xff]  }
 0x313   :  { %v12442_v62 = vld [vmem:[%s16661_s5 + $0x1ec] ss:$16 sps:$4 sm:$0xff]  }
 0x314   :  { %v12445_v25 = vld [vmem:[%s16661_s5 + $0x3ec] ss:$16 sps:$4 sm:$0xff]  }
 0x315   :  { %3824 = vmatpush1.bf16.msra.mxu0 %v12362_v63  ;;  %3865 = vmatpush1.bf16.msra.mxu1 %v12365_v0  ;;  %v12440_v63 = vld [vmem:[%s16661_s5 + $0x1e8] ss:$16 sps:$4 sm:$0xff]  }
 0x316   :  { %3825 = vmatprep.subr.bf16.mxu0 %v12370_v1  ;;  %3866 = vmatprep.subr.bf16.mxu1 %v12373_v2  ;;  %v12443_v0 = vld [vmem:[%s16661_s5 + $0x3e8] ss:$16 sps:$4 sm:$0xff]   ;;  %v12448_v1 = vld [vmem:[%s16659_s3 + $0x404] ss:$16 sps:$4 sm:$0xff]   ;;  %v12451_v2 = vld [vmem:[%s16659_s3 + $0x40c] ss:$16 sps:$4 sm:$0xff]  }
 0x319   :  { %3826 = vmatpush1.bf16.msra.mxu0 %v12368_v38  ;;  %3867 = vmatpush1.bf16.msra.mxu1 %v12371_v3  ;;  %v12446_v38 = vld [vmem:[%s16659_s3 + $0x400] ss:$16 sps:$4 sm:$0xff]   ;;  %v12449_v3 = vld [vmem:[%s16659_s3 + $0x408] ss:$16 sps:$4 sm:$0xff]  }
 0x31a   :  { %3827 = vmatprep.subr.bf16.mxu0 %v12376_v4  ;;  %3868 = vmatprep.subr.bf16.mxu1 %v12379_v5  ;;  %v12454_v4 = vld [vmem:[%s16659_s3 + $0x424] ss:$16 sps:$4 sm:$0xff]   ;;  %v12457_v5 = vld [vmem:[%s16659_s3 + $0x42c] ss:$16 sps:$4 sm:$0xff]  }
 0x31d   :  { %3828 = vmatpush1.bf16.msra.mxu0 %v12374_v6  ;;  %3869 = vmatpush1.bf16.msra.mxu1 %v12377_v7  ;;  %v12452_v6 = vld [vmem:[%s16659_s3 + $0x420] ss:$16 sps:$4 sm:$0xff]   ;;  %v12455_v7 = vld [vmem:[%s16659_s3 + $0x428] ss:$16 sps:$4 sm:$0xff]  }
 0x31e   :  { %3829 = vmatprep.subr.bf16.mxu0 %v12382_v9  ;;  %3870 = vmatprep.subr.bf16.mxu1 %v12385_v10  ;;  %v12460_v9 = vld [vmem:[%s16659_s3 + $0x444] ss:$16 sps:$4 sm:$0xff]   ;;  %v12461_v10 = vld [vmem:[%s16659_s3 + $0x448] ss:$16 sps:$4 sm:$0xff]  }
 0x321   :  { %3830 = vmatpush1.bf16.msra.mxu0 %v12380_v11  ;;  %3871 = vmatpush1.bf16.msra.mxu1 %v12383_v12  ;;  %v12466_v11 = vld [vmem:[%s16659_s3 + $0x464] ss:$16 sps:$4 sm:$0xff]   ;;  %v12469_v12 = vld [vmem:[%s16659_s3 + $0x46c] ss:$16 sps:$4 sm:$0xff]  }
 0x322   :  { %3831 = vmatprep.subr.bf16.mxu0 %v12388_v52  ;;  %3872 = vmatprep.subr.bf16.mxu1 %v12391_v15  ;;  %v12464_v52 = vld [vmem:[%s16659_s3 + $0x460] ss:$16 sps:$4 sm:$0xff]   ;;  %v12467_v15 = vld [vmem:[%s16659_s3 + $0x468] ss:$16 sps:$4 sm:$0xff]  }
 0x325   :  { %3832 = vmatpush1.bf16.msra.mxu0 %v12386_v16  ;;  %3873 = vmatpush1.bf16.msra.mxu1 %v12389_v17  ;;  %v12472_v16 = vld [vmem:[%s16659_s3 + $0x484] ss:$16 sps:$4 sm:$0xff]   ;;  %v12475_v17 = vld [vmem:[%s16659_s3 + $0x48c] ss:$16 sps:$4 sm:$0xff]  }
 0x326   :  { %3833 = vmatprep.subr.bf16.mxu0 %v12394_v18  ;;  %3874 = vmatprep.subr.bf16.mxu1 %v12397_v19  ;;  %v12470_v18 = vld [vmem:[%s16659_s3 + $0x480] ss:$16 sps:$4 sm:$0xff]   ;;  %v12473_v19 = vld [vmem:[%s16659_s3 + $0x488] ss:$16 sps:$4 sm:$0xff]  }
 0x329   :  { %3834 = vmatpush1.bf16.msra.mxu0 %v12392_v20  ;;  %3875 = vmatpush1.bf16.msra.mxu1 %v12395_v21  ;;  %v12478_v20 = vld [vmem:[%s16659_s3 + $0x4a4] ss:$16 sps:$4 sm:$0xff]   ;;  %v12481_v21 = vld [vmem:[%s16659_s3 + $0x4ac] ss:$16 sps:$4 sm:$0xff]  }
 0x32a   :  { %3835 = vmatprep.subr.bf16.mxu0 %v12400_v22  ;;  %3876 = vmatprep.subr.bf16.mxu1 %v12403_v23  ;;  %v12476_v22 = vld [vmem:[%s16659_s3 + $0x4a0] ss:$16 sps:$4 sm:$0xff]   ;;  %v12479_v23 = vld [vmem:[%s16659_s3 + $0x4a8] ss:$16 sps:$4 sm:$0xff]  }
 0x32d   :  { %3836 = vmatpush1.bf16.msra.mxu0 %v12398_v24  ;;  %3877 = vmatpush1.bf16.msra.mxu1 %v12401_v13  ;;  %v12484_v24 = vld [vmem:[%s16659_s3 + $0x4c4] ss:$16 sps:$4 sm:$0xff]   ;;  %v12487_v13 = vld [vmem:[%s16659_s3 + $0x4cc] ss:$16 sps:$4 sm:$0xff]  }
 0x32e   :  { %3837 = vmatprep.subr.bf16.mxu0 %v12406_v27  ;;  %3878 = vmatprep.subr.bf16.mxu1 %v12409_v28  ;;  %v12482_v27 = vld [vmem:[%s16659_s3 + $0x4c0] ss:$16 sps:$4 sm:$0xff]   ;;  %v12485_v28 = vld [vmem:[%s16659_s3 + $0x4c8] ss:$16 sps:$4 sm:$0xff]  }
 0x331   :  { %3838 = vmatpush1.bf16.msra.mxu0 %v12404_v29  ;;  %3879 = vmatpush1.bf16.msra.mxu1 %v12407_v14  ;;  %v12490_v29 = vld [vmem:[%s16659_s3 + $0x4e4] ss:$16 sps:$4 sm:$0xff]   ;;  %v12493_v14 = vld [vmem:[%s16659_s3 + $0x4ec] ss:$16 sps:$4 sm:$0xff]  }
 0x332   :  { %3839 = vmatprep.subr.bf16.mxu0 %v12412_v30  ;;  %3880 = vmatprep.subr.bf16.mxu1 %v12415_v31  ;;  %v12488_v30 = vld [vmem:[%s16659_s3 + $0x4e0] ss:$16 sps:$4 sm:$0xff]   ;;  %v12491_v31 = vld [vmem:[%s16659_s3 + $0x4e8] ss:$16 sps:$4 sm:$0xff]  }
 0x335   :  { %3840 = vmatpush1.bf16.msra.mxu0 %v12410_v34  ;;  %3881 = vmatpush1.bf16.msra.mxu1 %v12413_v35  ;;  %v12496_v34 = vld [vmem:[%s16659_s3 + $0x504] ss:$16 sps:$4 sm:$0xff]   ;;  %v12499_v35 = vld [vmem:[%s16659_s3 + $0x50c] ss:$16 sps:$4 sm:$0xff]  }
 0x336   :  { %3841 = vmatprep.subr.bf16.mxu0 %v12418_v36  ;;  %3882 = vmatprep.subr.bf16.mxu1 %v12421_v37  ;;  %v12494_v36 = vld [vmem:[%s16659_s3 + $0x500] ss:$16 sps:$4 sm:$0xff]   ;;  %v12497_v37 = vld [vmem:[%s16659_s3 + $0x508] ss:$16 sps:$4 sm:$0xff]  }
 0x339   :  { %3842 = vmatpush1.bf16.msra.mxu0 %v12416_v39  ;;  %3883 = vmatpush1.bf16.msra.mxu1 %v12419_v40  ;;  %v12502_v39 = vld [vmem:[%s16659_s3 + $0x524] ss:$16 sps:$4 sm:$0xff]   ;;  %v12505_v40 = vld [vmem:[%s16659_s3 + $0x52c] ss:$16 sps:$4 sm:$0xff]  }
 0x33a   :  { %3843 = vmatprep.subr.bf16.mxu0 %v12424_v41  ;;  %3884 = vmatprep.subr.bf16.mxu1 %v12427_v43  ;;  %v12500_v41 = vld [vmem:[%s16659_s3 + $0x520] ss:$16 sps:$4 sm:$0xff]   ;;  %v12503_v43 = vld [vmem:[%s16659_s3 + $0x528] ss:$16 sps:$4 sm:$0xff]  }
 0x33d   :  { %3844 = vmatpush1.bf16.msra.mxu0 %v12422_v44  ;;  %3885 = vmatpush1.bf16.msra.mxu1 %v12425_v45  ;;  %v12508_v44 = vld [vmem:[%s16659_s3 + $0x544] ss:$16 sps:$4 sm:$0xff]   ;;  %v12511_v45 = vld [vmem:[%s16659_s3 + $0x54c] ss:$16 sps:$4 sm:$0xff]  }
 0x33e   :  { %3845 = vmatprep.subr.bf16.mxu0 %v12430_v46  ;;  %3886 = vmatprep.subr.bf16.mxu1 %v12433_v47  ;;  %v12506_v46 = vld [vmem:[%s16659_s3 + $0x540] ss:$16 sps:$4 sm:$0xff]   ;;  %v12509_v47 = vld [vmem:[%s16659_s3 + $0x548] ss:$16 sps:$4 sm:$0xff]  }
 0x341   :  { %3846 = vmatpush1.bf16.msra.mxu0 %v12428_v48  ;;  %3887 = vmatpush1.bf16.msra.mxu1 %v12431_v53  ;;  %v12514_v48 = vld [vmem:[%s16659_s3 + $0x564] ss:$16 sps:$4 sm:$0xff]   ;;  %v12517_v53 = vld [vmem:[%s16659_s3 + $0x56c] ss:$16 sps:$4 sm:$0xff]  }
 0x342   :  { %3847 = vmatprep.subr.bf16.mxu0 %v12436_v56  ;;  %3888 = vmatprep.subr.bf16.mxu1 %v12439_v58  ;;  %v12512_v56 = vld [vmem:[%s16659_s3 + $0x560] ss:$16 sps:$4 sm:$0xff]   ;;  %v12515_v58 = vld [vmem:[%s16659_s3 + $0x568] ss:$16 sps:$4 sm:$0xff]  }
 0x345   :  { %3848 = vmatpush1.bf16.msra.mxu0 %v12434_v60  ;;  %3889 = vmatpush1.bf16.msra.mxu1 %v12437_v61  ;;  %v12520_v60 = vld [vmem:[%s16659_s3 + $0x584] ss:$16 sps:$4 sm:$0xff]   ;;  %v12523_v61 = vld [vmem:[%s16659_s3 + $0x58c] ss:$16 sps:$4 sm:$0xff]  }
 0x346   :  { %3849 = vmatprep.subr.bf16.mxu0 %v12442_v62  ;;  %3890 = vmatprep.subr.bf16.mxu1 %v12445_v25  ;;  %v12518_v62 = vld [vmem:[%s16659_s3 + $0x580] ss:$16 sps:$4 sm:$0xff]   ;;  %v12521_v25 = vld [vmem:[%s16659_s3 + $0x588] ss:$16 sps:$4 sm:$0xff]  }
 0x349   :  { %3850 = vmatpush1.bf16.msra.mxu0 %v12440_v63  ;;  %3891 = vmatpush1.bf16.msra.mxu1 %v12443_v0  ;;  %v12526_v63 = vld [vmem:[%s16659_s3 + $0x5a4] ss:$16 sps:$4 sm:$0xff]   ;;  %v12529_v0 = vld [vmem:[%s16659_s3 + $0x5ac] ss:$16 sps:$4 sm:$0xff]  }
 0x34a   :  { %4727 = vmatprep.subr.bf16.mxu0 %v12448_v1  ;;  %4809 = vmatprep.subr.bf16.mxu1 %v12451_v2  ;;  %v12524_v1 = vld [vmem:[%s16659_s3 + $0x5a0] ss:$16 sps:$4 sm:$0xff]   ;;  %v12527_v2 = vld [vmem:[%s16659_s3 + $0x5a8] ss:$16 sps:$4 sm:$0xff]  }
 0x34c   :  { %3852 = vmatmul.mubr.bf16.vlgmr.msra.gmra.mrb[12].mxu0 %v14753_v54  ;;  %3893 = vmatmul.mubr.bf16.vlgmr.msra.gmra.mrb[12].mxu1 %v14755_v55  ;;  %v12463_v54 = vld [vmem:[%s16659_s3 + $0x44c] ss:$16 sps:$4 sm:$0xff]   ;;  %v12458_v55 = vld [vmem:[%s16659_s3 + $0x440] ss:$16 sps:$4 sm:$0xff]  }
 0x34d   :  { %4728 = vmatpush1.bf16.msra.mxu0 %v12446_v38  ;;  %4810 = vmatpush1.bf16.msra.mxu1 %v12449_v3  ;;  %v12532_v38 = vld [vmem:[%s16659_s3 + $0x5c4] ss:$16 sps:$4 sm:$0xff]   ;;  %v12535_v3 = vld [vmem:[%s16659_s3 + $0x5cc] ss:$16 sps:$4 sm:$0xff]  }
 0x34e   :  { %4729 = vmatprep.subr.bf16.mxu0 %v12454_v4  ;;  %4811 = vmatprep.subr.bf16.mxu1 %v12457_v5  ;;  %v12530_v4 = vld [vmem:[%s16659_s3 + $0x5c0] ss:$16 sps:$4 sm:$0xff]   ;;  %v12533_v5 = vld [vmem:[%s16659_s3 + $0x5c8] ss:$16 sps:$4 sm:$0xff]  }
 0x351   :  { %4730 = vmatpush1.bf16.msra.mxu0 %v12452_v6  ;;  %4812 = vmatpush1.bf16.msra.mxu1 %v12455_v7  ;;  %v12538_v6 = vld [vmem:[%s16659_s3 + $0x5e4] ss:$16 sps:$4 sm:$0xff]   ;;  %v12541_v7 = vld [vmem:[%s16659_s3 + $0x5ec] ss:$16 sps:$4 sm:$0xff]  }
 0x352   :  { %4731 = vmatprep.subr.bf16.mxu0 %v12460_v9  ;;  %4813 = vmatprep.subr.bf16.mxu1 %v12463_v54  ;;  %v12536_v9 = vld [vmem:[%s16659_s3 + $0x5e0] ss:$16 sps:$4 sm:$0xff]   ;;  %v12539_v54 = vld [vmem:[%s16659_s3 + $0x5e8] ss:$16 sps:$4 sm:$0xff]  }
 0x355   :  { %4732 = vmatpush1.bf16.msra.mxu0 %v12458_v55  ;;  %4814 = vmatpush1.bf16.msra.mxu1 %v12461_v10  ;;  %v12544_v55 = vld [vmem:[%s16659_s3 + $0x604] ss:$16 sps:$4 sm:$0xff]   ;;  %v12547_v10 = vld [vmem:[%s16659_s3 + $0x60c] ss:$16 sps:$4 sm:$0xff]  }
 0x356   :  { %4733 = vmatprep.subr.bf16.mxu0 %v12466_v11  ;;  %4815 = vmatprep.subr.bf16.mxu1 %v12469_v12  ;;  %v15142_v11 = vld [vmem:[%s16662_s6] sm:$0xf] }
 0x359   :  { %4734 = vmatpush1.bf16.msra.mxu0 %v12464_v52  ;;  %4816 = vmatpush1.bf16.msra.mxu1 %v12467_v15 }
 0x35a   :  { %4735 = vmatprep.subr.bf16.mxu0 %v12472_v16  ;;  %4817 = vmatprep.subr.bf16.mxu1 %v12475_v17  ;;  %v3910_v16 = vrot.slane %v15142_v11, %v14318_v32 }
 0x35d   :  { %4736 = vmatpush1.bf16.msra.mxu0 %v12470_v18  ;;  %4818 = vmatpush1.bf16.msra.mxu1 %v12473_v19 }
 0x35e   :  { %4737 = vmatprep.subr.bf16.mxu0 %v12478_v20  ;;  %4819 = vmatprep.subr.bf16.mxu1 %v12481_v21  ;;  %v3914_v20 = vrot.slane %v15142_v11, %v14321_v33 }
 0x361   :  { %4738 = vmatpush1.bf16.msra.mxu0 %v12476_v22  ;;  %4820 = vmatpush1.bf16.msra.mxu1 %v12479_v23 }
 0x362   :  { %4739 = vmatprep.subr.bf16.mxu0 %v12484_v24  ;;  %4821 = vmatprep.subr.bf16.mxu1 %v12487_v13 }
 0x365   :  { %4740 = vmatpush1.bf16.msra.mxu0 %v12482_v27  ;;  %4822 = vmatpush1.bf16.msra.mxu1 %v12485_v28 }
 0x366   :  { %4741 = vmatprep.subr.bf16.mxu0 %v12490_v29  ;;  %4823 = vmatprep.subr.bf16.mxu1 %v12493_v14 }
 0x369   :  { %4742 = vmatpush1.bf16.msra.mxu0 %v12488_v30  ;;  %4824 = vmatpush1.bf16.msra.mxu1 %v12491_v31  ;;  %v12542_v30 = vld [vmem:[%s16659_s3 + $0x600] ss:$16 sps:$4 sm:$0xff]   ;;  %v12545_v31 = vld [vmem:[%s16659_s3 + $0x608] ss:$16 sps:$4 sm:$0xff]  }
 0x36a   :  { %4743 = vmatprep.subr.bf16.mxu0 %v12496_v34  ;;  %4825 = vmatprep.subr.bf16.mxu1 %v12499_v35  ;;  %v12553_v34 = vld [vmem:[%s16659_s3 + $0x62c] ss:$16 sps:$4 sm:$0xff]   ;;  %v12548_v35 = vld [vmem:[%s16659_s3 + $0x620] ss:$16 sps:$4 sm:$0xff]  }
 0x36d   :  { %4744 = vmatpush1.bf16.msra.mxu0 %v12494_v36  ;;  %4826 = vmatpush1.bf16.msra.mxu1 %v12497_v37  ;;  %v12551_v36 = vld [vmem:[%s16659_s3 + $0x628] ss:$16 sps:$4 sm:$0xff]   ;;  %v12556_v37 = vld [vmem:[%s16659_s3 + $0x644] ss:$16 sps:$4 sm:$0xff]  }
 0x36e   :  { %4745 = vmatprep.subr.bf16.mxu0 %v12502_v39  ;;  %4827 = vmatprep.subr.bf16.mxu1 %v12505_v40  ;;  %v12559_v39 = vld [vmem:[%s16659_s3 + $0x64c] ss:$16 sps:$4 sm:$0xff]   ;;  %v12554_v40 = vld [vmem:[%s16659_s3 + $0x640] ss:$16 sps:$4 sm:$0xff]  }
 0x371   :  { %4746 = vmatpush1.bf16.msra.mxu0 %v12500_v41  ;;  %4828 = vmatpush1.bf16.msra.mxu1 %v12503_v43  ;;  %v12557_v41 = vld [vmem:[%s16659_s3 + $0x648] ss:$16 sps:$4 sm:$0xff]   ;;  %v12562_v43 = vld [vmem:[%s16659_s3 + $0x664] ss:$16 sps:$4 sm:$0xff]  }
 0x372   :  { %4747 = vmatprep.subr.bf16.mxu0 %v12508_v44  ;;  %4829 = vmatprep.subr.bf16.mxu1 %v12511_v45  ;;  %v12565_v44 = vld [vmem:[%s16659_s3 + $0x66c] ss:$16 sps:$4 sm:$0xff]   ;;  %v12560_v45 = vld [vmem:[%s16659_s3 + $0x660] ss:$16 sps:$4 sm:$0xff]  }
 0x375   :  { %4748 = vmatpush1.bf16.msra.mxu0 %v12506_v46  ;;  %4830 = vmatpush1.bf16.msra.mxu1 %v12509_v47  ;;  %v12563_v46 = vld [vmem:[%s16659_s3 + $0x668] ss:$16 sps:$4 sm:$0xff]   ;;  %v12568_v47 = vld [vmem:[%s16659_s3 + $0x684] ss:$16 sps:$4 sm:$0xff]  }
 0x376   :  { %4749 = vmatprep.subr.bf16.mxu0 %v12514_v48  ;;  %4831 = vmatprep.subr.bf16.mxu1 %v12517_v53  ;;  %v12571_v48 = vld [vmem:[%s16659_s3 + $0x68c] ss:$16 sps:$4 sm:$0xff]   ;;  %v12566_v53 = vld [vmem:[%s16659_s3 + $0x680] ss:$16 sps:$4 sm:$0xff]  }
 0x379   :  { %4750 = vmatpush1.bf16.msra.mxu0 %v12512_v56  ;;  %4832 = vmatpush1.bf16.msra.mxu1 %v12515_v58  ;;  %v12569_v56 = vld [vmem:[%s16659_s3 + $0x688] ss:$16 sps:$4 sm:$0xff]   ;;  %v12574_v58 = vld [vmem:[%s16659_s3 + $0x6a4] ss:$16 sps:$4 sm:$0xff]  }
 0x37a   :  { %4751 = vmatprep.subr.bf16.mxu0 %v12520_v60  ;;  %4833 = vmatprep.subr.bf16.mxu1 %v12523_v61  ;;  %v12577_v60 = vld [vmem:[%s16659_s3 + $0x6ac] ss:$16 sps:$4 sm:$0xff]   ;;  %v12572_v61 = vld [vmem:[%s16659_s3 + $0x6a0] ss:$16 sps:$4 sm:$0xff]  }
 0x37d   :  { %4752 = vmatpush1.bf16.msra.mxu0 %v12518_v62  ;;  %4834 = vmatpush1.bf16.msra.mxu1 %v12521_v25  ;;  %v12575_v62 = vld [vmem:[%s16659_s3 + $0x6a8] ss:$16 sps:$4 sm:$0xff]   ;;  %v12580_v25 = vld [vmem:[%s16659_s3 + $0x6c4] ss:$16 sps:$4 sm:$0xff]  }
 0x37e   :  { %4753 = vmatprep.subr.bf16.mxu0 %v12526_v63  ;;  %4835 = vmatprep.subr.bf16.mxu1 %v12529_v0  ;;  %v12583_v63 = vld [vmem:[%s16659_s3 + $0x6cc] ss:$16 sps:$4 sm:$0xff]   ;;  %v12578_v0 = vld [vmem:[%s16659_s3 + $0x6c0] ss:$16 sps:$4 sm:$0xff]  }
 0x381   :  { %4754 = vmatpush1.bf16.msra.mxu0 %v12524_v1  ;;  %4836 = vmatpush1.bf16.msra.mxu1 %v12527_v2  ;;  %v12581_v1 = vld [vmem:[%s16659_s3 + $0x6c8] ss:$16 sps:$4 sm:$0xff]   ;;  %v12586_v2 = vld [vmem:[%s16659_s3 + $0x6e4] ss:$16 sps:$4 sm:$0xff]  }
 0x382   :  { %4755 = vmatprep.subr.bf16.mxu0 %v12532_v38  ;;  %4837 = vmatprep.subr.bf16.mxu1 %v12535_v3  ;;  %v12589_v38 = vld [vmem:[%s16659_s3 + $0x6ec] ss:$16 sps:$4 sm:$0xff]   ;;  %v12584_v3 = vld [vmem:[%s16659_s3 + $0x6e0] ss:$16 sps:$4 sm:$0xff]  }
 0x385   :  { %4756 = vmatpush1.bf16.msra.mxu0 %v12530_v4  ;;  %4838 = vmatpush1.bf16.msra.mxu1 %v12533_v5  ;;  %v12587_v4 = vld [vmem:[%s16659_s3 + $0x6e8] ss:$16 sps:$4 sm:$0xff]   ;;  %v12592_v5 = vld [vmem:[%s16659_s3 + $0x704] ss:$16 sps:$4 sm:$0xff]  }
 0x386   :  { %4757 = vmatprep.subr.bf16.mxu0 %v12538_v6  ;;  %4839 = vmatprep.subr.bf16.mxu1 %v12541_v7  ;;  %v12595_v6 = vld [vmem:[%s16659_s3 + $0x70c] ss:$16 sps:$4 sm:$0xff]   ;;  %v12590_v7 = vld [vmem:[%s16659_s3 + $0x700] ss:$16 sps:$4 sm:$0xff]  }
 0x389   :  { %4758 = vmatpush1.bf16.msra.mxu0 %v12536_v9  ;;  %4840 = vmatpush1.bf16.msra.mxu1 %v12539_v54  ;;  %v12593_v9 = vld [vmem:[%s16659_s3 + $0x708] ss:$16 sps:$4 sm:$0xff]   ;;  %v12598_v54 = vld [vmem:[%s16659_s3 + $0x724] ss:$16 sps:$4 sm:$0xff]  }
 0x38a   :  { %4768 = vmatprep.subr.bf16.mxu0 %v12544_v55  ;;  %4850 = vmatprep.subr.bf16.mxu1 %v12547_v10  ;;  %v12601_v55 = vld [vmem:[%s16659_s3 + $0x72c] ss:$16 sps:$4 sm:$0xff]   ;;  %v12596_v10 = vld [vmem:[%s16659_s3 + $0x720] ss:$16 sps:$4 sm:$0xff]  }
 0x3df   :  { %v3771_v12 = vpop.f32.mrb[8].mxu0  ;;  %v3812_v52 = vpop.f32.mrb[8].mxu1 }
 0x3e0   :  { %v3813_v15 = vadd.f32 %v3812_v52, %v3771_v12  ;;  %v3773_v17 = vpop.f32.mrb[9].mxu0  ;;  %v3814_v18 = vpop.f32.mrb[9].mxu1  ;;  %v12599_v12 = vld [vmem:[%s16659_s3 + $0x728] ss:$16 sps:$4 sm:$0xff]   ;;  %v12604_v52 = vld [vmem:[%s16659_s3 + $0x744] ss:$16 sps:$4 sm:$0xff]  }
 0x3e1   :  { %v3815_v19 = vadd.f32 %v3814_v18, %v3773_v17  ;;  %v3775_v21 = vpop.f32.mrb[10].mxu0  ;;  %v3816_v22 = vpop.f32.mrb[10].mxu1  ;;  %v12605_v17 = vld [vmem:[%s16659_s3 + $0x748] ss:$16 sps:$4 sm:$0xff]   ;;  %v12610_v18 = vld [vmem:[%s16659_s3 + $0x764] ss:$16 sps:$4 sm:$0xff]  }
 0x3e2   :  { %v3901_v23 = vadd.f32 %v3813_v15, %v14334_v51  ;;  %v3776_v24 = vpop.f32.mrb[11].mxu0  ;;  %v3817_v13 = vpop.f32.mrb[11].mxu1  ;;  %v12607_v15 = vld [vmem:[%s16659_s3 + $0x74c] ss:$16 sps:$4 sm:$0xff]   ;;  %v12611_v21 = vld [vmem:[%s16659_s3 + $0x768] ss:$16 sps:$4 sm:$0xff]  }
 0x3e3   :  { %v3902_v27 = vadd.f32 %v3815_v19, %v14342_v57  ;;  %v12550_v57 = vld [vmem:[%s16659_s3 + $0x624] ss:$16 sps:$4 sm:$0xff]   ;;  %v12613_v19 = vld [vmem:[%s16659_s3 + $0x76c] ss:$16 sps:$4 sm:$0xff]   ;;  %v12614_v24 = vld [vmem:[%s16659_s3 + $0x780] ss:$16 sps:$4 sm:$0xff]  }
 0x3e4   :  { %v15150_v28 = vadd.f32 %v3910_v16, %v3901_v23  ;;  %v12602_v16 = vld [vmem:[%s16659_s3 + $0x740] ss:$16 sps:$4 sm:$0xff]   ;;  %v12616_v22 = vld [vmem:[%s16659_s3 + $0x784] ss:$16 sps:$4 sm:$0xff]   ;;  %v12619_v23 = vld [vmem:[%s16659_s3 + $0x78c] ss:$16 sps:$4 sm:$0xff]  }
 0x3e5   :  { %v15152_v29 = vadd.f32 %v3914_v20, %v3902_v27  ;;  %v12608_v20 = vld [vmem:[%s16659_s3 + $0x760] ss:$16 sps:$4 sm:$0xff]   ;;  %v12617_v13 = vld [vmem:[%s16659_s3 + $0x788] ss:$16 sps:$4 sm:$0xff]   ;;  %v12622_v27 = vld [vmem:[%s16659_s3 + $0x7a4] ss:$16 sps:$4 sm:$0xff]  }
 0x3e6   :  { %v3931_v51 = vpack.c.bf16 %v15150_v28, %v15150_v28 }
 0x3e7   :  { %v3932_v14 = vpack.c.bf16 %v15152_v29, %v15152_v29 }
 0x3e9   :  { %4759 = vmatprep.mubr.bf16.mxu0 %v3932_v14  ;;  %4841 = vmatprep.mubr.bf16.mxu1 %v3932_v14  ;;  %v12625_v14 = vld [vmem:[%s16659_s3 + $0x7ac] ss:$16 sps:$4 sm:$0xff]  }
 0x3ea   :  { %4760 = vmatmul.mubr.bf16.vlgmr.msra.gmra.mrb[16].mxu0 %v3931_v51  ;;  %4842 = vmatmul.mubr.bf16.vlgmr.msra.gmra.mrb[16].mxu1 %v3931_v51  ;;  %v12628_v51 = vld [vmem:[%s16659_s3 + $0x7c4] ss:$16 sps:$4 sm:$0xff]  }
 0x3eb   :  { %4769 = vmatpush1.bf16.msra.mxu0 %v12542_v30  ;;  %4851 = vmatpush1.bf16.msra.mxu1 %v12545_v31  ;;  %v12620_v30 = vld [vmem:[%s16659_s3 + $0x7a0] ss:$16 sps:$4 sm:$0xff]   ;;  %v12623_v31 = vld [vmem:[%s16659_s3 + $0x7a8] ss:$16 sps:$4 sm:$0xff]  }
 0x3ec   :  { %4770 = vmatprep.subr.bf16.mxu0 %v12550_v57  ;;  %4852 = vmatprep.subr.bf16.mxu1 %v12553_v34  ;;  %v12631_v57 = vld [vmem:[%s16659_s3 + $0x7cc] ss:$16 sps:$4 sm:$0xff]  }
 0x3ef   :  { %4771 = vmatpush1.bf16.msra.mxu0 %v12548_v35  ;;  %4853 = vmatpush1.bf16.msra.mxu1 %v12551_v36  ;;  %v12626_v36 = vld [vmem:[%s16659_s3 + $0x7c0] ss:$16 sps:$4 sm:$0xff]  }
 0x3f0   :  { %4772 = vmatprep.subr.bf16.mxu0 %v12556_v37  ;;  %4854 = vmatprep.subr.bf16.mxu1 %v12559_v39  ;;  %v12629_v37 = vld [vmem:[%s16659_s3 + $0x7c8] ss:$16 sps:$4 sm:$0xff]  }
 0x3f3   :  { %4773 = vmatpush1.bf16.msra.mxu0 %v12554_v40  ;;  %4855 = vmatpush1.bf16.msra.mxu1 %v12557_v41  ;;  %v3918_v40 = vrot.slane %v15142_v11, %v14491_v50 }
 0x3f4   :  { %4774 = vmatprep.subr.bf16.mxu0 %v12562_v43  ;;  %4856 = vmatprep.subr.bf16.mxu1 %v12565_v44  ;;  %v12634_v44 = vld [vmem:[%s16659_s3 + $0x7e4] ss:$16 sps:$4 sm:$0xff]  }
 0x3f7   :  { %4775 = vmatpush1.bf16.msra.mxu0 %v12560_v45  ;;  %4857 = vmatpush1.bf16.msra.mxu1 %v12563_v46  ;;  %v12637_v45 = vld [vmem:[%s16659_s3 + $0x7ec] ss:$16 sps:$4 sm:$0xff]  }
 0x3f8   :  { %4776 = vmatprep.subr.bf16.mxu0 %v12568_v47  ;;  %4858 = vmatprep.subr.bf16.mxu1 %v12571_v48  ;;  %v3922_v47 = vrot.slane %v15142_v11, %v14324_v26 }
 0x3fb   :  { %4777 = vmatpush1.bf16.msra.mxu0 %v12566_v53  ;;  %4859 = vmatpush1.bf16.msra.mxu1 %v12569_v56 }
 0x3fc   :  { %4778 = vmatprep.subr.bf16.mxu0 %v12574_v58  ;;  %4860 = vmatprep.subr.bf16.mxu1 %v12577_v60 }
 0x3ff   :  { %4779 = vmatpush1.bf16.msra.mxu0 %v12572_v61  ;;  %4861 = vmatpush1.bf16.msra.mxu1 %v12575_v62  ;;  %v12632_v62 = vld [vmem:[%s16659_s3 + $0x7e0] ss:$16 sps:$4 sm:$0xff]  }
 0x400   :  { %4780 = vmatprep.subr.bf16.mxu0 %v12580_v25  ;;  %4862 = vmatprep.subr.bf16.mxu1 %v12583_v63  ;;  %v12635_v25 = vld [vmem:[%s16659_s3 + $0x7e8] ss:$16 sps:$4 sm:$0xff]  }
 0x403   :  { %4781 = vmatpush1.bf16.msra.mxu0 %v12578_v0  ;;  %4863 = vmatpush1.bf16.msra.mxu1 %v12581_v1  ;;  %v12638_v1 = vld [vmem:[%s16661_s5 + $0x400] ss:$16 sps:$4 sm:$0xff]  }
 0x404   :  { %4782 = vmatprep.subr.bf16.mxu0 %v12586_v2  ;;  %4864 = vmatprep.subr.bf16.mxu1 %v12589_v38  ;;  %v12641_v2 = vld [vmem:[%s16661_s5 + $0x600] ss:$16 sps:$4 sm:$0xff]  }
 0x407   :  { %4783 = vmatpush1.bf16.msra.mxu0 %v12584_v3  ;;  %4865 = vmatpush1.bf16.msra.mxu1 %v12587_v4  ;;  %v12646_v3 = vld [vmem:[%s16661_s5 + $0x424] ss:$16 sps:$4 sm:$0xff]  }
 0x408   :  { %4784 = vmatprep.subr.bf16.mxu0 %v12592_v5  ;;  %4866 = vmatprep.subr.bf16.mxu1 %v12595_v6  ;;  %v12649_v4 = vld [vmem:[%s16661_s5 + $0x624] ss:$16 sps:$4 sm:$0xff]   ;;  %v12644_v5 = vld [vmem:[%s16661_s5 + $0x420] ss:$16 sps:$4 sm:$0xff]  }
 0x409   :  { %v12647_v6 = vld [vmem:[%s16661_s5 + $0x620] ss:$16 sps:$4 sm:$0xff]  }
 0x40b   :  { %4785 = vmatpush1.bf16.msra.mxu0 %v12590_v7  ;;  %4867 = vmatpush1.bf16.msra.mxu1 %v12593_v9  ;;  %v12652_v7 = vld [vmem:[%s16661_s5 + $0x444] ss:$16 sps:$4 sm:$0xff]  }
 0x40c   :  { %4786 = vmatprep.subr.bf16.mxu0 %v12598_v54  ;;  %4868 = vmatprep.subr.bf16.mxu1 %v12601_v55  ;;  %v12655_v9 = vld [vmem:[%s16661_s5 + $0x644] ss:$16 sps:$4 sm:$0xff]   ;;  %v12650_v54 = vld [vmem:[%s16661_s5 + $0x440] ss:$16 sps:$4 sm:$0xff]  }
 0x40d   :  { %v12653_v55 = vld [vmem:[%s16661_s5 + $0x640] ss:$16 sps:$4 sm:$0xff]  }
 0x40f   :  { %4787 = vmatpush1.bf16.msra.mxu0 %v12596_v10  ;;  %4869 = vmatpush1.bf16.msra.mxu1 %v12599_v12  ;;  %v12658_v10 = vld [vmem:[%s16661_s5 + $0x464] ss:$16 sps:$4 sm:$0xff]  }
 0x410   :  { %4788 = vmatprep.subr.bf16.mxu0 %v12604_v52  ;;  %4870 = vmatprep.subr.bf16.mxu1 %v12607_v15  ;;  %v12661_v12 = vld [vmem:[%s16661_s5 + $0x664] ss:$16 sps:$4 sm:$0xff]   ;;  %v12656_v52 = vld [vmem:[%s16661_s5 + $0x460] ss:$16 sps:$4 sm:$0xff]  }
 0x411   :  { %v12659_v15 = vld [vmem:[%s16661_s5 + $0x660] ss:$16 sps:$4 sm:$0xff]  }
 0x413   :  { %4789 = vmatpush1.bf16.msra.mxu0 %v12602_v16  ;;  %4871 = vmatpush1.bf16.msra.mxu1 %v12605_v17  ;;  %v12664_v16 = vld [vmem:[%s16661_s5 + $0x484] ss:$16 sps:$4 sm:$0xff]  }
 0x414   :  { %4790 = vmatprep.subr.bf16.mxu0 %v12610_v18  ;;  %4872 = vmatprep.subr.bf16.mxu1 %v12613_v19  ;;  %v12667_v17 = vld [vmem:[%s16661_s5 + $0x684] ss:$16 sps:$4 sm:$0xff]   ;;  %v12662_v18 = vld [vmem:[%s16661_s5 + $0x480] ss:$16 sps:$4 sm:$0xff]  }
 0x415   :  { %v12665_v19 = vld [vmem:[%s16661_s5 + $0x680] ss:$16 sps:$4 sm:$0xff]  }
 0x417   :  { %4791 = vmatpush1.bf16.msra.mxu0 %v12608_v20  ;;  %4873 = vmatpush1.bf16.msra.mxu1 %v12611_v21  ;;  %v12670_v20 = vld [vmem:[%s16661_s5 + $0x4a4] ss:$16 sps:$4 sm:$0xff]  }
 0x418   :  { %4792 = vmatprep.subr.bf16.mxu0 %v12616_v22  ;;  %4874 = vmatprep.subr.bf16.mxu1 %v12619_v23  ;;  %v12673_v21 = vld [vmem:[%s16661_s5 + $0x6a4] ss:$16 sps:$4 sm:$0xff]   ;;  %v12668_v22 = vld [vmem:[%s16661_s5 + $0x4a0] ss:$16 sps:$4 sm:$0xff]  }
 0x419   :  { %v12671_v23 = vld [vmem:[%s16661_s5 + $0x6a0] ss:$16 sps:$4 sm:$0xff]  }
 0x41b   :  { %4793 = vmatpush1.bf16.msra.mxu0 %v12614_v24  ;;  %4875 = vmatpush1.bf16.msra.mxu1 %v12617_v13  ;;  %v12676_v24 = vld [vmem:[%s16661_s5 + $0x4c4] ss:$16 sps:$4 sm:$0xff]  }
 0x41c   :  { %4794 = vmatprep.subr.bf16.mxu0 %v12622_v27  ;;  %4876 = vmatprep.subr.bf16.mxu1 %v12625_v14  ;;  %v12679_v13 = vld [vmem:[%s16661_s5 + $0x6c4] ss:$16 sps:$4 sm:$0xff]   ;;  %v12674_v27 = vld [vmem:[%s16661_s5 + $0x4c0] ss:$16 sps:$4 sm:$0xff]  }
 0x41d   :  { %v12677_v14 = vld [vmem:[%s16661_s5 + $0x6c0] ss:$16 sps:$4 sm:$0xff]  }
 0x41f   :  { %v3853_v34 = vpop.f32.mrb[12].mxu0  ;;  %v3894_v35 = vpop.f32.mrb[12].mxu1  ;;  %4795 = vmatpush1.bf16.msra.mxu0 %v12620_v30  ;;  %4877 = vmatpush1.bf16.msra.mxu1 %v12623_v31  ;;  %v12682_v30 = vld [vmem:[%s16661_s5 + $0x4e4] ss:$16 sps:$4 sm:$0xff]  }
 0x420   :  { %v3895_v39 = vadd.f32 %v3894_v35, %v3853_v34  ;;  %v3855_v41 = vpop.f32.mrb[13].mxu0  ;;  %v3896_v43 = vpop.f32.mrb[13].mxu1  ;;  %4796 = vmatprep.subr.bf16.mxu0 %v12628_v51  ;;  %4878 = vmatprep.subr.bf16.mxu1 %v12631_v57  ;;  %v12685_v31 = vld [vmem:[%s16661_s5 + $0x6e4] ss:$16 sps:$4 sm:$0xff]   ;;  %v12680_v51 = vld [vmem:[%s16661_s5 + $0x4e0] ss:$16 sps:$4 sm:$0xff]  }
 0x421   :  { %v3897_v46 = vadd.f32 %v3896_v43, %v3855_v41  ;;  %v3857_v48 = vpop.f32.mrb[14].mxu0  ;;  %v3898_v53 = vpop.f32.mrb[14].mxu1  ;;  %v12683_v57 = vld [vmem:[%s16661_s5 + $0x6e0] ss:$16 sps:$4 sm:$0xff]   ;;  %v12688_v34 = vld [vmem:[%s16661_s5 + $0x504] ss:$16 sps:$4 sm:$0xff]  }
 0x422   :  { %v3903_v56 = vadd.f32 %v3895_v39, %v14544_v8  ;;  %v3858_v58 = vpop.f32.mrb[15].mxu0  ;;  %v3899_v60 = vpop.f32.mrb[15].mxu1  ;;  %v12640_v8 = vld [vmem:[%s16661_s5 + $0x404] ss:$16 sps:$4 sm:$0xff]   ;;  %v12692_v41 = vld [vmem:[%s16661_s5 + $0x520] ss:$16 sps:$4 sm:$0xff]  }
 0x423   :  { %v3904_v61 = vadd.f32 %v3897_v46, %v14346_v59  ;;  %4797 = vmatpush1.bf16.msra.mxu0 %v12626_v36  ;;  %4879 = vmatpush1.bf16.msra.mxu1 %v12629_v37  ;;  %v12643_v59 = vld [vmem:[%s16661_s5 + $0x604] ss:$16 sps:$4 sm:$0xff]   ;;  %v12686_v36 = vld [vmem:[%s16661_s5 + $0x500] ss:$16 sps:$4 sm:$0xff]  }
 0x424   :  { %v15350_v63 = vadd.f32 %v3918_v40, %v3903_v56  ;;  %4798 = vmatprep.subr.bf16.mxu0 %v12634_v44  ;;  %4880 = vmatprep.subr.bf16.mxu1 %v12637_v45  ;;  %v12691_v35 = vld [vmem:[%s16661_s5 + $0x704] ss:$16 sps:$4 sm:$0xff]   ;;  %v12689_v37 = vld [vmem:[%s16661_s5 + $0x700] ss:$16 sps:$4 sm:$0xff]  }
 0x425   :  { %v15358_v11 = vadd.f32 %v3922_v47, %v3904_v61  ;;  %v12694_v39 = vld [vmem:[%s16661_s5 + $0x524] ss:$16 sps:$4 sm:$0xff]   ;;  %v12695_v43 = vld [vmem:[%s16661_s5 + $0x720] ss:$16 sps:$4 sm:$0xff]  }
 0x426   :  { %v3933_v38 = vpack.c.bf16 %v15350_v63, %v15350_v63  ;;  %v12697_v40 = vld [vmem:[%s16661_s5 + $0x724] ss:$16 sps:$4 sm:$0xff]   ;;  %v12698_v46 = vld [vmem:[%s16661_s5 + $0x540] ss:$16 sps:$4 sm:$0xff]  }
 0x427   :  { %4799 = vmatpush1.bf16.msra.mxu0 %v12632_v62  ;;  %4881 = vmatpush1.bf16.msra.mxu1 %v12635_v25  ;;  %v3934_v0 = vpack.c.bf16 %v15358_v11, %v15358_v11  ;;  %v12700_v44 = vld [vmem:[%s16661_s5 + $0x544] ss:$16 sps:$4 sm:$0xff]   ;;  %v12701_v47 = vld [vmem:[%s16661_s5 + $0x740] ss:$16 sps:$4 sm:$0xff]  }
 0x428   :  { %5668 = vmatprep.subr.bf16.mxu0 %v12640_v8  ;;  %5709 = vmatprep.subr.bf16.mxu1 %v12643_v59  ;;  %v12703_v45 = vld [vmem:[%s16661_s5 + $0x744] ss:$16 sps:$4 sm:$0xff]   ;;  %v12704_v56 = vld [vmem:[%s16661_s5 + $0x560] ss:$16 sps:$4 sm:$0xff]  }
 0x429   :  { %4800 = vmatprep.mubr.bf16.mxu0 %v3934_v0  ;;  %4882 = vmatprep.mubr.bf16.mxu1 %v3934_v0  ;;  %v12706_v48 = vld [vmem:[%s16661_s5 + $0x564] ss:$16 sps:$4 sm:$0xff]   ;;  %v12707_v58 = vld [vmem:[%s16661_s5 + $0x760] ss:$16 sps:$4 sm:$0xff]  }
 0x42a   :  { %4801 = vmatmul.mubr.bf16.vlgmr.msra.gmra.mrb[16].mxu0 %v3933_v38  ;;  %4883 = vmatmul.mubr.bf16.vlgmr.msra.gmra.mrb[16].mxu1 %v3933_v38  ;;  %v12709_v53 = vld [vmem:[%s16661_s5 + $0x764] ss:$16 sps:$4 sm:$0xff]   ;;  %v12710_v62 = vld [vmem:[%s16661_s5 + $0x580] ss:$16 sps:$4 sm:$0xff]  }
 0x42b   :  { %5669 = vmatpush1.bf16.msra.mxu0 %v12638_v1  ;;  %5710 = vmatpush1.bf16.msra.mxu1 %v12641_v2  ;;  %v12712_v60 = vld [vmem:[%s16661_s5 + $0x584] ss:$16 sps:$4 sm:$0xff]   ;;  %v12713_v25 = vld [vmem:[%s16661_s5 + $0x780] ss:$16 sps:$4 sm:$0xff]  }
 0x42c   :  { %5670 = vmatprep.subr.bf16.mxu0 %v12646_v3  ;;  %5711 = vmatprep.subr.bf16.mxu1 %v12649_v4  ;;  %v12715_v61 = vld [vmem:[%s16661_s5 + $0x784] ss:$16 sps:$4 sm:$0xff]   ;;  %v12716_v0 = vld [vmem:[%s16661_s5 + $0x5a0] ss:$16 sps:$4 sm:$0xff]  }
 0x42d   :  { %v12718_v8 = vld [vmem:[%s16661_s5 + $0x5a4] ss:$16 sps:$4 sm:$0xff]   ;;  %v12719_v1 = vld [vmem:[%s16661_s5 + $0x7a0] ss:$16 sps:$4 sm:$0xff]  }
 0x42e   :  { %v12721_v59 = vld [vmem:[%s16661_s5 + $0x7a4] ss:$16 sps:$4 sm:$0xff]   ;;  %v12722_v3 = vld [vmem:[%s16661_s5 + $0x5c0] ss:$16 sps:$4 sm:$0xff]  }
 0x42f   :  { %5671 = vmatpush1.bf16.msra.mxu0 %v12644_v5  ;;  %5712 = vmatpush1.bf16.msra.mxu1 %v12647_v6  ;;  %v12724_v2 = vld [vmem:[%s16661_s5 + $0x5c4] ss:$16 sps:$4 sm:$0xff]   ;;  %v12725_v4 = vld [vmem:[%s16661_s5 + $0x7c0] ss:$16 sps:$4 sm:$0xff]  }
 0x430   :  { %5672 = vmatprep.subr.bf16.mxu0 %v12652_v7  ;;  %5713 = vmatprep.subr.bf16.mxu1 %v12655_v9  ;;  %v12727_v38 = vld [vmem:[%s16661_s5 + $0x7c4] ss:$16 sps:$4 sm:$0xff]   ;;  %v12728_v7 = vld [vmem:[%s16661_s5 + $0x5e0] ss:$16 sps:$4 sm:$0xff]  }
 0x431   :  { %v12730_v5 = vld [vmem:[%s16661_s5 + $0x5e4] ss:$16 sps:$4 sm:$0xff]   ;;  %v12731_v9 = vld [vmem:[%s16661_s5 + $0x7e0] ss:$16 sps:$4 sm:$0xff]  }
 0x432   :  { %v12733_v6 = vld [vmem:[%s16661_s5 + $0x7e4] ss:$16 sps:$4 sm:$0xff]  }
 0x433   :  { %5673 = vmatpush1.bf16.msra.mxu0 %v12650_v54  ;;  %5714 = vmatpush1.bf16.msra.mxu1 %v12653_v55  ;;  %v12736_v54 = vld [vmem:[%s16661_s5 + $0x40c] ss:$16 sps:$4 sm:$0xff]  }
 0x434   :  { %5674 = vmatprep.subr.bf16.mxu0 %v12658_v10  ;;  %5715 = vmatprep.subr.bf16.mxu1 %v12661_v12  ;;  %v12739_v55 = vld [vmem:[%s16661_s5 + $0x60c] ss:$16 sps:$4 sm:$0xff]   ;;  %v10425_v10 = vld [vmem:[%s16660_s4 + $0x4] sm:$0xf] }
 0x435   :  { %v4070_v12 = vrot.slane %v10425_v10, %v14318_v32 }
 0x437   :  { %5675 = vmatpush1.bf16.msra.mxu0 %v12656_v52  ;;  %5716 = vmatpush1.bf16.msra.mxu1 %v12659_v15  ;;  %v4078_v52 = vrot.slane %v10425_v10, %v14491_v50  ;;  %v4074_v15 = vrot.slane %v10425_v10, %v14321_v33 }
 0x438   :  { %5676 = vmatprep.subr.bf16.mxu0 %v12664_v16  ;;  %5717 = vmatprep.subr.bf16.mxu1 %v12667_v17  ;;  %v4082_v16 = vrot.slane %v10425_v10, %v14324_v26  ;;  %v12779_v10 = vld [vmem:[%s16661_s5 + $0x6e8] ss:$16 sps:$4 sm:$0xff]  }
 0x43b   :  { %5677 = vmatpush1.bf16.msra.mxu0 %v12662_v18  ;;  %5718 = vmatpush1.bf16.msra.mxu1 %v12665_v19 }
 0x43c   :  { %5678 = vmatprep.subr.bf16.mxu0 %v12670_v20  ;;  %5719 = vmatprep.subr.bf16.mxu1 %v12673_v21 }
 0x43f   :  { %5679 = vmatpush1.bf16.msra.mxu0 %v12668_v22  ;;  %5720 = vmatpush1.bf16.msra.mxu1 %v12671_v23 }
 0x440   :  { %5680 = vmatprep.subr.bf16.mxu0 %v12676_v24  ;;  %5721 = vmatprep.subr.bf16.mxu1 %v12679_v13 }
 0x443   :  { %5681 = vmatpush1.bf16.msra.mxu0 %v12674_v27  ;;  %5722 = vmatpush1.bf16.msra.mxu1 %v12677_v14 }
 0x444   :  { %5682 = vmatprep.subr.bf16.mxu0 %v12682_v30  ;;  %5723 = vmatprep.subr.bf16.mxu1 %v12685_v31 }
 0x447   :  { %5683 = vmatpush1.bf16.msra.mxu0 %v12680_v51  ;;  %5724 = vmatpush1.bf16.msra.mxu1 %v12683_v57 }
 0x448   :  { %5684 = vmatprep.subr.bf16.mxu0 %v12688_v34  ;;  %5725 = vmatprep.subr.bf16.mxu1 %v12691_v35 }
 0x44b   :  { %5685 = vmatpush1.bf16.msra.mxu0 %v12686_v36  ;;  %5726 = vmatpush1.bf16.msra.mxu1 %v12689_v37  ;;  %v12734_v37 = vld [vmem:[%s16661_s5 + $0x408] ss:$16 sps:$4 sm:$0xff]  }
 0x44c   :  { %5686 = vmatprep.subr.bf16.mxu0 %v12694_v39  ;;  %5727 = vmatprep.subr.bf16.mxu1 %v12697_v40  ;;  %v12737_v39 = vld [vmem:[%s16661_s5 + $0x608] ss:$16 sps:$4 sm:$0xff]  }
 0x44f   :  { %5687 = vmatpush1.bf16.msra.mxu0 %v12692_v41  ;;  %5728 = vmatpush1.bf16.msra.mxu1 %v12695_v43  ;;  %v12742_v43 = vld [vmem:[%s16661_s5 + $0x42c] ss:$16 sps:$4 sm:$0xff]  }
 0x450   :  { %5688 = vmatprep.subr.bf16.mxu0 %v12700_v44  ;;  %5729 = vmatprep.subr.bf16.mxu1 %v12703_v45  ;;  %v12745_v44 = vld [vmem:[%s16661_s5 + $0x62c] ss:$16 sps:$4 sm:$0xff]   ;;  %v12740_v45 = vld [vmem:[%s16661_s5 + $0x428] ss:$16 sps:$4 sm:$0xff]  }
 0x453   :  { %5689 = vmatpush1.bf16.msra.mxu0 %v12698_v46  ;;  %5730 = vmatpush1.bf16.msra.mxu1 %v12701_v47  ;;  %v12743_v46 = vld [vmem:[%s16661_s5 + $0x628] ss:$16 sps:$4 sm:$0xff]   ;;  %v12748_v47 = vld [vmem:[%s16661_s5 + $0x44c] ss:$16 sps:$4 sm:$0xff]  }
 0x454   :  { %5690 = vmatprep.subr.bf16.mxu0 %v12706_v48  ;;  %5731 = vmatprep.subr.bf16.mxu1 %v12709_v53  ;;  %v12751_v48 = vld [vmem:[%s16661_s5 + $0x64c] ss:$16 sps:$4 sm:$0xff]   ;;  %v12746_v53 = vld [vmem:[%s16661_s5 + $0x448] ss:$16 sps:$4 sm:$0xff]  }
 0x457   :  { %5691 = vmatpush1.bf16.msra.mxu0 %v12704_v56  ;;  %5732 = vmatpush1.bf16.msra.mxu1 %v12707_v58  ;;  %v12749_v56 = vld [vmem:[%s16661_s5 + $0x648] ss:$16 sps:$4 sm:$0xff]   ;;  %v12754_v58 = vld [vmem:[%s16661_s5 + $0x46c] ss:$16 sps:$4 sm:$0xff]  }
 0x458   :  { %5692 = vmatprep.subr.bf16.mxu0 %v12712_v60  ;;  %5733 = vmatprep.subr.bf16.mxu1 %v12715_v61  ;;  %v12757_v60 = vld [vmem:[%s16661_s5 + $0x66c] ss:$16 sps:$4 sm:$0xff]   ;;  %v12752_v61 = vld [vmem:[%s16661_s5 + $0x468] ss:$16 sps:$4 sm:$0xff]  }
 0x45b   :  { %5693 = vmatpush1.bf16.msra.mxu0 %v12710_v62  ;;  %5734 = vmatpush1.bf16.msra.mxu1 %v12713_v25  ;;  %v12755_v62 = vld [vmem:[%s16661_s5 + $0x668] ss:$16 sps:$4 sm:$0xff]   ;;  %v12760_v25 = vld [vmem:[%s16661_s5 + $0x48c] ss:$16 sps:$4 sm:$0xff]  }
 0x45c   :  { %5694 = vmatprep.subr.bf16.mxu0 %v12718_v8  ;;  %5735 = vmatprep.subr.bf16.mxu1 %v12721_v59  ;;  %v12763_v8 = vld [vmem:[%s16661_s5 + $0x68c] ss:$16 sps:$4 sm:$0xff]   ;;  %v12758_v59 = vld [vmem:[%s16661_s5 + $0x488] ss:$16 sps:$4 sm:$0xff]  }
 0x45f   :  { %5695 = vmatpush1.bf16.msra.mxu0 %v12716_v0  ;;  %5736 = vmatpush1.bf16.msra.mxu1 %v12719_v1  ;;  %v12761_v0 = vld [vmem:[%s16661_s5 + $0x688] ss:$16 sps:$4 sm:$0xff]   ;;  %v12766_v1 = vld [vmem:[%s16661_s5 + $0x4ac] ss:$16 sps:$4 sm:$0xff]  }
 0x460   :  { %5696 = vmatprep.subr.bf16.mxu0 %v12724_v2  ;;  %5737 = vmatprep.subr.bf16.mxu1 %v12727_v38  ;;  %v12769_v2 = vld [vmem:[%s16661_s5 + $0x6ac] ss:$16 sps:$4 sm:$0xff]   ;;  %v12764_v38 = vld [vmem:[%s16661_s5 + $0x4a8] ss:$16 sps:$4 sm:$0xff]  }
 0x463   :  { %5697 = vmatpush1.bf16.msra.mxu0 %v12722_v3  ;;  %5738 = vmatpush1.bf16.msra.mxu1 %v12725_v4  ;;  %v12767_v3 = vld [vmem:[%s16661_s5 + $0x6a8] ss:$16 sps:$4 sm:$0xff]   ;;  %v12772_v4 = vld [vmem:[%s16661_s5 + $0x4cc] ss:$16 sps:$4 sm:$0xff]  }
 0x464   :  { %5698 = vmatprep.subr.bf16.mxu0 %v12730_v5  ;;  %5739 = vmatprep.subr.bf16.mxu1 %v12733_v6  ;;  %v12775_v5 = vld [vmem:[%s16661_s5 + $0x6cc] ss:$16 sps:$4 sm:$0xff]   ;;  %v12770_v6 = vld [vmem:[%s16661_s5 + $0x4c8] ss:$16 sps:$4 sm:$0xff]  }
 0x467   :  { %5699 = vmatpush1.bf16.msra.mxu0 %v12728_v7  ;;  %5740 = vmatpush1.bf16.msra.mxu1 %v12731_v9  ;;  %v12773_v7 = vld [vmem:[%s16661_s5 + $0x6c8] ss:$16 sps:$4 sm:$0xff]   ;;  %v12778_v9 = vld [vmem:[%s16661_s5 + $0x4ec] ss:$16 sps:$4 sm:$0xff]  }
 0x468   :  { %5750 = vmatprep.subr.bf16.mxu0 %v12736_v54  ;;  %5791 = vmatprep.subr.bf16.mxu1 %v12739_v55  ;;  %v12781_v54 = vld [vmem:[%s16661_s5 + $0x6ec] ss:$16 sps:$4 sm:$0xff]   ;;  %v12776_v55 = vld [vmem:[%s16661_s5 + $0x4e8] ss:$16 sps:$4 sm:$0xff]  }
 0x4fd   :  { %v4802_v17 = vpop.f32.mrb[16].mxu0  ;;  %v4884_v18 = vpop.f32.mrb[16].mxu1 }
 0x4fe   :  { %v11593_v19 = vadd.f32 %v4802_v17, %v4070_v12  ;;  %v11595_v20 = vadd.f32 %v4884_v18, %v4078_v52  ;;  %v4804_v21 = vpop.f32.mrb[17].mxu0  ;;  %v4886_v22 = vpop.f32.mrb[17].mxu1  ;;  %v12784_v12 = vld [vmem:[%s16661_s5 + $0x50c] ss:$16 sps:$4 sm:$0xff]  }
 0x4ff   :  { %v11594_v23 = vadd.f32 %v4804_v21, %v4074_v15  ;;  %v11596_v24 = vadd.f32 %v4886_v22, %v4082_v16  ;;  %v4806_v13 = vpop.f32.mrb[18].mxu0  ;;  %v4888_v27 = vpop.f32.mrb[18].mxu1  ;;  %v12787_v52 = vld [vmem:[%s16661_s5 + $0x70c] ss:$16 sps:$4 sm:$0xff]   ;;  %v12782_v15 = vld [vmem:[%s16661_s5 + $0x508] ss:$16 sps:$4 sm:$0xff]  }
 0x500   :  { %v4891_v14 = vmax.f32 %v11593_v19, 0.0  ;;  %v4893_v30 = vmax.f32 %v11595_v20, 0.0  ;;  %v4807_v31 = vpop.f32.mrb[19].mxu0  ;;  %v4889_v51 = vpop.f32.mrb[19].mxu1  ;;  %v12785_v16 = vld [vmem:[%s16661_s5 + $0x708] ss:$16 sps:$4 sm:$0xff]  }
 0x501   :  { %v4892_v57 = vmax.f32 %v11594_v23, 0.0  ;;  %v4894_v34 = vmax.f32 %v11596_v24, 0.0  ;;  %v12790_v17 = vld [vmem:[%s16661_s5 + $0x52c] ss:$16 sps:$4 sm:$0xff]   ;;  %v12788_v19 = vld [vmem:[%s16661_s5 + $0x528] ss:$16 sps:$4 sm:$0xff]  }
 0x502   :  { %v15569_v40 = vpack.c.bf16 %v4891_v14, %v4891_v14  ;;  %v15571_v41 = vpack.c.bf16 %v4893_v30, %v4893_v30  ;;  %v12793_v18 = vld [vmem:[%s16661_s5 + $0x72c] ss:$16 sps:$4 sm:$0xff]   ;;  %v12791_v20 = vld [vmem:[%s16661_s5 + $0x728] ss:$16 sps:$4 sm:$0xff]  }
 0x503   :  { %v4896_v35 = vpack.c.bf16 %v4892_v57, %v4892_v57  ;;  %v4898_v36 = vpack.c.bf16 %v4894_v34, %v4894_v34  ;;  %v12796_v21 = vld [vmem:[%s16661_s5 + $0x54c] ss:$16 sps:$4 sm:$0xff]   ;;  %v12794_v23 = vld [vmem:[%s16661_s5 + $0x548] ss:$16 sps:$4 sm:$0xff]  }
 0x504   :  { %v12799_v22 = vld [vmem:[%s16661_s5 + $0x74c] ss:$16 sps:$4 sm:$0xff]   ;;  %v12797_v24 = vld [vmem:[%s16661_s5 + $0x748] ss:$16 sps:$4 sm:$0xff]  }
 0x505   :  { %5700 = vmatprep.mubr.bf16.mxu0 %v4896_v35  ;;  %5741 = vmatprep.mubr.bf16.mxu1 %v4898_v36  ;;  %v12802_v13 = vld [vmem:[%s16661_s5 + $0x56c] ss:$16 sps:$4 sm:$0xff]   ;;  %v12800_v14 = vld [vmem:[%s16661_s5 + $0x568] ss:$16 sps:$4 sm:$0xff]  }
 0x506   :  { %5701 = vmatmul.mubr.bf16.vlgmr.msra.gmra.mrb[20].mxu0 %v15569_v40  ;;  %5742 = vmatmul.mubr.bf16.vlgmr.msra.gmra.mrb[20].mxu1 %v15571_v41  ;;  %v12805_v27 = vld [vmem:[%s16661_s5 + $0x76c] ss:$16 sps:$4 sm:$0xff]   ;;  %v12803_v30 = vld [vmem:[%s16661_s5 + $0x768] ss:$16 sps:$4 sm:$0xff]  }
 0x507   :  { %5751 = vmatpush1.bf16.msra.mxu0 %v12734_v37  ;;  %5792 = vmatpush1.bf16.msra.mxu1 %v12737_v39  ;;  %v12808_v31 = vld [vmem:[%s16661_s5 + $0x58c] ss:$16 sps:$4 sm:$0xff]   ;;  %v12806_v57 = vld [vmem:[%s16661_s5 + $0x588] ss:$16 sps:$4 sm:$0xff]  }
 0x508   :  { %5782 = vmatprep.mubr.bf16.mxu0 %v4896_v35  ;;  %5823 = vmatprep.mubr.bf16.mxu1 %v4898_v36  ;;  %v12811_v51 = vld [vmem:[%s16661_s5 + $0x78c] ss:$16 sps:$4 sm:$0xff]   ;;  %v12809_v34 = vld [vmem:[%s16661_s5 + $0x788] ss:$16 sps:$4 sm:$0xff]  }
 0x509   :  { %5752 = vmatprep.subr.bf16.mxu0 %v12742_v43  ;;  %5793 = vmatprep.subr.bf16.mxu1 %v12745_v44  ;;  %v12814_v35 = vld [vmem:[%s16661_s5 + $0x5ac] ss:$16 sps:$4 sm:$0xff]   ;;  %v12812_v37 = vld [vmem:[%s16661_s5 + $0x5a8] ss:$16 sps:$4 sm:$0xff]  }
 0x50a   :  { %v12817_v36 = vld [vmem:[%s16661_s5 + $0x7ac] ss:$16 sps:$4 sm:$0xff]   ;;  %v12815_v39 = vld [vmem:[%s16661_s5 + $0x7a8] ss:$16 sps:$4 sm:$0xff]  }
 0x50b   :  { %5753 = vmatpush1.bf16.msra.mxu0 %v12740_v45  ;;  %5794 = vmatpush1.bf16.msra.mxu1 %v12743_v46  ;;  %v12820_v43 = vld [vmem:[%s16661_s5 + $0x5cc] ss:$16 sps:$4 sm:$0xff]   ;;  %v12818_v45 = vld [vmem:[%s16661_s5 + $0x5c8] ss:$16 sps:$4 sm:$0xff]  }
 0x50c   :  { %5754 = vmatprep.subr.bf16.mxu0 %v12748_v47  ;;  %5795 = vmatprep.subr.bf16.mxu1 %v12751_v48  ;;  %v12823_v44 = vld [vmem:[%s16661_s5 + $0x7cc] ss:$16 sps:$4 sm:$0xff]   ;;  %v12821_v46 = vld [vmem:[%s16661_s5 + $0x7c8] ss:$16 sps:$4 sm:$0xff]  }
 0x50d   :  { %v12826_v47 = vld [vmem:[%s16661_s5 + $0x5ec] ss:$16 sps:$4 sm:$0xff]  }
 0x50e   :  { %v12829_v48 = vld [vmem:[%s16661_s5 + $0x7ec] ss:$16 sps:$4 sm:$0xff]  }
 0x50f   :  { %5755 = vmatpush1.bf16.msra.mxu0 %v12746_v53  ;;  %5796 = vmatpush1.bf16.msra.mxu1 %v12749_v56  ;;  %v12824_v53 = vld [vmem:[%s16661_s5 + $0x5e8] ss:$16 sps:$4 sm:$0xff]  }
 0x510   :  { %5756 = vmatprep.subr.bf16.mxu0 %v12754_v58  ;;  %5797 = vmatprep.subr.bf16.mxu1 %v12757_v60  ;;  %v12827_v56 = vld [vmem:[%s16661_s5 + $0x7e8] ss:$16 sps:$4 sm:$0xff]   ;;  %v12832_v58 = vld [vmem:[%s16659_s3 + $0x804] ss:$16 sps:$4 sm:$0xff]   ;;  %v12835_v60 = vld [vmem:[%s16659_s3 + $0x80c] ss:$16 sps:$4 sm:$0xff]  }
 0x513   :  { %5757 = vmatpush1.bf16.msra.mxu0 %v12752_v61  ;;  %5798 = vmatpush1.bf16.msra.mxu1 %v12755_v62  ;;  %v12830_v61 = vld [vmem:[%s16659_s3 + $0x800] ss:$16 sps:$4 sm:$0xff]   ;;  %v12833_v62 = vld [vmem:[%s16659_s3 + $0x808] ss:$16 sps:$4 sm:$0xff]  }
 0x514   :  { %5758 = vmatprep.subr.bf16.mxu0 %v12760_v25  ;;  %5799 = vmatprep.subr.bf16.mxu1 %v12763_v8  ;;  %v12838_v25 = vld [vmem:[%s16659_s3 + $0x824] ss:$16 sps:$4 sm:$0xff]   ;;  %v12841_v8 = vld [vmem:[%s16659_s3 + $0x82c] ss:$16 sps:$4 sm:$0xff]  }
 0x517   :  { %5759 = vmatpush1.bf16.msra.mxu0 %v12758_v59  ;;  %5800 = vmatpush1.bf16.msra.mxu1 %v12761_v0  ;;  %v12836_v59 = vld [vmem:[%s16659_s3 + $0x820] ss:$16 sps:$4 sm:$0xff]   ;;  %v12839_v0 = vld [vmem:[%s16659_s3 + $0x828] ss:$16 sps:$4 sm:$0xff]  }
 0x518   :  { %5760 = vmatprep.subr.bf16.mxu0 %v12766_v1  ;;  %5801 = vmatprep.subr.bf16.mxu1 %v12769_v2  ;;  %v12844_v1 = vld [vmem:[%s16659_s3 + $0x844] ss:$16 sps:$4 sm:$0xff]   ;;  %v12845_v2 = vld [vmem:[%s16659_s3 + $0x848] ss:$16 sps:$4 sm:$0xff]  }
 0x51b   :  { %5761 = vmatpush1.bf16.msra.mxu0 %v12764_v38  ;;  %5802 = vmatpush1.bf16.msra.mxu1 %v12767_v3  ;;  %v12850_v38 = vld [vmem:[%s16659_s3 + $0x864] ss:$16 sps:$4 sm:$0xff]   ;;  %v12853_v3 = vld [vmem:[%s16659_s3 + $0x86c] ss:$16 sps:$4 sm:$0xff]  }
 0x51c   :  { %5762 = vmatprep.subr.bf16.mxu0 %v12772_v4  ;;  %5803 = vmatprep.subr.bf16.mxu1 %v12775_v5  ;;  %v12848_v4 = vld [vmem:[%s16659_s3 + $0x860] ss:$16 sps:$4 sm:$0xff]   ;;  %v12851_v5 = vld [vmem:[%s16659_s3 + $0x868] ss:$16 sps:$4 sm:$0xff]  }
 0x51f   :  { %5763 = vmatpush1.bf16.msra.mxu0 %v12770_v6  ;;  %5804 = vmatpush1.bf16.msra.mxu1 %v12773_v7  ;;  %v12856_v6 = vld [vmem:[%s16659_s3 + $0x884] ss:$16 sps:$4 sm:$0xff]   ;;  %v12859_v7 = vld [vmem:[%s16659_s3 + $0x88c] ss:$16 sps:$4 sm:$0xff]  }
 0x520   :  { %5764 = vmatprep.subr.bf16.mxu0 %v12778_v9  ;;  %5805 = vmatprep.subr.bf16.mxu1 %v12781_v54  ;;  %v12854_v9 = vld [vmem:[%s16659_s3 + $0x880] ss:$16 sps:$4 sm:$0xff]   ;;  %v12857_v54 = vld [vmem:[%s16659_s3 + $0x888] ss:$16 sps:$4 sm:$0xff]  }
 0x523   :  { %5765 = vmatpush1.bf16.msra.mxu0 %v12776_v55  ;;  %5806 = vmatpush1.bf16.msra.mxu1 %v12779_v10  ;;  %v12862_v55 = vld [vmem:[%s16659_s3 + $0x8a4] ss:$16 sps:$4 sm:$0xff]   ;;  %v12865_v10 = vld [vmem:[%s16659_s3 + $0x8ac] ss:$16 sps:$4 sm:$0xff]  }
 0x524   :  { %5766 = vmatprep.subr.bf16.mxu0 %v12784_v12  ;;  %5807 = vmatprep.subr.bf16.mxu1 %v12787_v52  ;;  %v12860_v12 = vld [vmem:[%s16659_s3 + $0x8a0] ss:$16 sps:$4 sm:$0xff]   ;;  %v12863_v52 = vld [vmem:[%s16659_s3 + $0x8a8] ss:$16 sps:$4 sm:$0xff]  }
 0x527   :  { %5767 = vmatpush1.bf16.msra.mxu0 %v12782_v15  ;;  %5808 = vmatpush1.bf16.msra.mxu1 %v12785_v16  ;;  %v12868_v15 = vld [vmem:[%s16659_s3 + $0x8c4] ss:$16 sps:$4 sm:$0xff]   ;;  %v12871_v16 = vld [vmem:[%s16659_s3 + $0x8cc] ss:$16 sps:$4 sm:$0xff]  }
 0x528   :  { %5768 = vmatprep.subr.bf16.mxu0 %v12790_v17  ;;  %5809 = vmatprep.subr.bf16.mxu1 %v12793_v18  ;;  %v12866_v17 = vld [vmem:[%s16659_s3 + $0x8c0] ss:$16 sps:$4 sm:$0xff]   ;;  %v12869_v18 = vld [vmem:[%s16659_s3 + $0x8c8] ss:$16 sps:$4 sm:$0xff]  }
 0x52b   :  { %5769 = vmatpush1.bf16.msra.mxu0 %v12788_v19  ;;  %5810 = vmatpush1.bf16.msra.mxu1 %v12791_v20  ;;  %v12874_v19 = vld [vmem:[%s16659_s3 + $0x8e4] ss:$16 sps:$4 sm:$0xff]   ;;  %v12877_v20 = vld [vmem:[%s16659_s3 + $0x8ec] ss:$16 sps:$4 sm:$0xff]  }
 0x52c   :  { %5770 = vmatprep.subr.bf16.mxu0 %v12796_v21  ;;  %5811 = vmatprep.subr.bf16.mxu1 %v12799_v22  ;;  %v12872_v21 = vld [vmem:[%s16659_s3 + $0x8e0] ss:$16 sps:$4 sm:$0xff]   ;;  %v12875_v22 = vld [vmem:[%s16659_s3 + $0x8e8] ss:$16 sps:$4 sm:$0xff]  }
 0x52f   :  { %5771 = vmatpush1.bf16.msra.mxu0 %v12794_v23  ;;  %5812 = vmatpush1.bf16.msra.mxu1 %v12797_v24  ;;  %v12880_v23 = vld [vmem:[%s16659_s3 + $0x904] ss:$16 sps:$4 sm:$0xff]   ;;  %v12883_v24 = vld [vmem:[%s16659_s3 + $0x90c] ss:$16 sps:$4 sm:$0xff]  }
 0x530   :  { %5772 = vmatprep.subr.bf16.mxu0 %v12802_v13  ;;  %5813 = vmatprep.subr.bf16.mxu1 %v12805_v27  ;;  %v12878_v13 = vld [vmem:[%s16659_s3 + $0x900] ss:$16 sps:$4 sm:$0xff]   ;;  %v12881_v27 = vld [vmem:[%s16659_s3 + $0x908] ss:$16 sps:$4 sm:$0xff]  }
 0x533   :  { %5773 = vmatpush1.bf16.msra.mxu0 %v12800_v14  ;;  %5814 = vmatpush1.bf16.msra.mxu1 %v12803_v30  ;;  %v12886_v14 = vld [vmem:[%s16659_s3 + $0x924] ss:$16 sps:$4 sm:$0xff]   ;;  %v12889_v30 = vld [vmem:[%s16659_s3 + $0x92c] ss:$16 sps:$4 sm:$0xff]  }
 0x534   :  { %5774 = vmatprep.subr.bf16.mxu0 %v12808_v31  ;;  %5815 = vmatprep.subr.bf16.mxu1 %v12811_v51  ;;  %v12884_v31 = vld [vmem:[%s16659_s3 + $0x920] ss:$16 sps:$4 sm:$0xff]   ;;  %v12887_v51 = vld [vmem:[%s16659_s3 + $0x928] ss:$16 sps:$4 sm:$0xff]  }
 0x537   :  { %5775 = vmatpush1.bf16.msra.mxu0 %v12806_v57  ;;  %5816 = vmatpush1.bf16.msra.mxu1 %v12809_v34  ;;  %v12892_v57 = vld [vmem:[%s16659_s3 + $0x944] ss:$16 sps:$4 sm:$0xff]   ;;  %v12895_v34 = vld [vmem:[%s16659_s3 + $0x94c] ss:$16 sps:$4 sm:$0xff]  }
 0x538   :  { %5776 = vmatprep.subr.bf16.mxu0 %v12814_v35  ;;  %5817 = vmatprep.subr.bf16.mxu1 %v12817_v36  ;;  %v12890_v35 = vld [vmem:[%s16659_s3 + $0x940] ss:$16 sps:$4 sm:$0xff]   ;;  %v12893_v36 = vld [vmem:[%s16659_s3 + $0x948] ss:$16 sps:$4 sm:$0xff]  }
 0x53b   :  { %5777 = vmatpush1.bf16.msra.mxu0 %v12812_v37  ;;  %5818 = vmatpush1.bf16.msra.mxu1 %v12815_v39  ;;  %v12898_v37 = vld [vmem:[%s16659_s3 + $0x964] ss:$16 sps:$4 sm:$0xff]   ;;  %v12901_v39 = vld [vmem:[%s16659_s3 + $0x96c] ss:$16 sps:$4 sm:$0xff]  }
 0x53c   :  { %5778 = vmatprep.subr.bf16.mxu0 %v12820_v43  ;;  %5819 = vmatprep.subr.bf16.mxu1 %v12823_v44  ;;  %v12896_v43 = vld [vmem:[%s16659_s3 + $0x960] ss:$16 sps:$4 sm:$0xff]   ;;  %v12899_v44 = vld [vmem:[%s16659_s3 + $0x968] ss:$16 sps:$4 sm:$0xff]  }
 0x53f   :  { %5779 = vmatpush1.bf16.msra.mxu0 %v12818_v45  ;;  %5820 = vmatpush1.bf16.msra.mxu1 %v12821_v46  ;;  %v12904_v45 = vld [vmem:[%s16659_s3 + $0x984] ss:$16 sps:$4 sm:$0xff]   ;;  %v12907_v46 = vld [vmem:[%s16659_s3 + $0x98c] ss:$16 sps:$4 sm:$0xff]  }
 0x540   :  { %5780 = vmatprep.subr.bf16.mxu0 %v12826_v47  ;;  %5821 = vmatprep.subr.bf16.mxu1 %v12829_v48  ;;  %v12902_v47 = vld [vmem:[%s16659_s3 + $0x980] ss:$16 sps:$4 sm:$0xff]   ;;  %v12905_v48 = vld [vmem:[%s16659_s3 + $0x988] ss:$16 sps:$4 sm:$0xff]  }
 0x543   :  { %5781 = vmatpush1.bf16.msra.mxu0 %v12824_v53  ;;  %5822 = vmatpush1.bf16.msra.mxu1 %v12827_v56  ;;  %v12910_v53 = vld [vmem:[%s16659_s3 + $0x9a4] ss:$16 sps:$4 sm:$0xff]   ;;  %v12913_v56 = vld [vmem:[%s16659_s3 + $0x9ac] ss:$16 sps:$4 sm:$0xff]  }
 0x544   :  { %6659 = vmatprep.subr.bf16.mxu0 %v12832_v58  ;;  %6741 = vmatprep.subr.bf16.mxu1 %v12835_v60  ;;  %v12908_v58 = vld [vmem:[%s16659_s3 + $0x9a0] ss:$16 sps:$4 sm:$0xff]   ;;  %v12911_v60 = vld [vmem:[%s16659_s3 + $0x9a8] ss:$16 sps:$4 sm:$0xff]  }
 0x546   :  { %5783 = vmatmul.mubr.bf16.vlgmr.msra.gmra.mrb[24].mxu0 %v15569_v40  ;;  %5824 = vmatmul.mubr.bf16.vlgmr.msra.gmra.mrb[24].mxu1 %v15571_v41  ;;  %v12847_v40 = vld [vmem:[%s16659_s3 + $0x84c] ss:$16 sps:$4 sm:$0xff]   ;;  %v12842_v41 = vld [vmem:[%s16659_s3 + $0x840] ss:$16 sps:$4 sm:$0xff]  }
 0x547   :  { %6660 = vmatpush1.bf16.msra.mxu0 %v12830_v61  ;;  %6742 = vmatpush1.bf16.msra.mxu1 %v12833_v62  ;;  %v12916_v61 = vld [vmem:[%s16659_s3 + $0x9c4] ss:$16 sps:$4 sm:$0xff]   ;;  %v12919_v62 = vld [vmem:[%s16659_s3 + $0x9cc] ss:$16 sps:$4 sm:$0xff]  }
 0x548   :  { %6661 = vmatprep.subr.bf16.mxu0 %v12838_v25  ;;  %6743 = vmatprep.subr.bf16.mxu1 %v12841_v8  ;;  %v12914_v25 = vld [vmem:[%s16659_s3 + $0x9c0] ss:$16 sps:$4 sm:$0xff]   ;;  %v12917_v8 = vld [vmem:[%s16659_s3 + $0x9c8] ss:$16 sps:$4 sm:$0xff]  }
 0x54b   :  { %6662 = vmatpush1.bf16.msra.mxu0 %v12836_v59  ;;  %6744 = vmatpush1.bf16.msra.mxu1 %v12839_v0  ;;  %v12922_v59 = vld [vmem:[%s16659_s3 + $0x9e4] ss:$16 sps:$4 sm:$0xff]   ;;  %v12925_v0 = vld [vmem:[%s16659_s3 + $0x9ec] ss:$16 sps:$4 sm:$0xff]  }
 0x54c   :  { %6663 = vmatprep.subr.bf16.mxu0 %v12844_v1  ;;  %6745 = vmatprep.subr.bf16.mxu1 %v12847_v40  ;;  %v12920_v1 = vld [vmem:[%s16659_s3 + $0x9e0] ss:$16 sps:$4 sm:$0xff]   ;;  %v12923_v40 = vld [vmem:[%s16659_s3 + $0x9e8] ss:$16 sps:$4 sm:$0xff]  }
 0x54f   :  { %6664 = vmatpush1.bf16.msra.mxu0 %v12842_v41  ;;  %6746 = vmatpush1.bf16.msra.mxu1 %v12845_v2  ;;  %v12928_v41 = vld [vmem:[%s16659_s3 + $0xa04] ss:$16 sps:$4 sm:$0xff]   ;;  %v12931_v2 = vld [vmem:[%s16659_s3 + $0xa0c] ss:$16 sps:$4 sm:$0xff]  }
 0x550   :  { %6665 = vmatprep.subr.bf16.mxu0 %v12850_v38  ;;  %6747 = vmatprep.subr.bf16.mxu1 %v12853_v3  ;;  %v15958_v38 = vld [vmem:[%s16662_s6 + $0x4] sm:$0xf] }
 0x553   :  { %6666 = vmatpush1.bf16.msra.mxu0 %v12848_v4  ;;  %6748 = vmatpush1.bf16.msra.mxu1 %v12851_v5 }
 0x554   :  { %6667 = vmatprep.subr.bf16.mxu0 %v12856_v6  ;;  %6749 = vmatprep.subr.bf16.mxu1 %v12859_v7  ;;  %v5842_v6 = vrot.slane %v15958_v38, %v14318_v32 }
 0x557   :  { %6668 = vmatpush1.bf16.msra.mxu0 %v12854_v9  ;;  %6750 = vmatpush1.bf16.msra.mxu1 %v12857_v54 }
 0x558   :  { %6669 = vmatprep.subr.bf16.mxu0 %v12862_v55  ;;  %6751 = vmatprep.subr.bf16.mxu1 %v12865_v10  ;;  %v5846_v55 = vrot.slane %v15958_v38, %v14321_v33 }
 0x55b   :  { %6670 = vmatpush1.bf16.msra.mxu0 %v12860_v12  ;;  %6752 = vmatpush1.bf16.msra.mxu1 %v12863_v52 }
 0x55c   :  { %6671 = vmatprep.subr.bf16.mxu0 %v12868_v15  ;;  %6753 = vmatprep.subr.bf16.mxu1 %v12871_v16 }
 0x55f   :  { %6672 = vmatpush1.bf16.msra.mxu0 %v12866_v17  ;;  %6754 = vmatpush1.bf16.msra.mxu1 %v12869_v18 }
 0x560   :  { %6673 = vmatprep.subr.bf16.mxu0 %v12874_v19  ;;  %6755 = vmatprep.subr.bf16.mxu1 %v12877_v20 }
 0x563   :  { %6674 = vmatpush1.bf16.msra.mxu0 %v12872_v21  ;;  %6756 = vmatpush1.bf16.msra.mxu1 %v12875_v22  ;;  %v12926_v21 = vld [vmem:[%s16659_s3 + $0xa00] ss:$16 sps:$4 sm:$0xff]   ;;  %v12929_v22 = vld [vmem:[%s16659_s3 + $0xa08] ss:$16 sps:$4 sm:$0xff]  }
 0x564   :  { %6675 = vmatprep.subr.bf16.mxu0 %v12880_v23  ;;  %6757 = vmatprep.subr.bf16.mxu1 %v12883_v24  ;;  %v12937_v23 = vld [vmem:[%s16659_s3 + $0xa2c] ss:$16 sps:$4 sm:$0xff]   ;;  %v12932_v24 = vld [vmem:[%s16659_s3 + $0xa20] ss:$16 sps:$4 sm:$0xff]  }
 0x567   :  { %6676 = vmatpush1.bf16.msra.mxu0 %v12878_v13  ;;  %6758 = vmatpush1.bf16.msra.mxu1 %v12881_v27  ;;  %v12935_v13 = vld [vmem:[%s16659_s3 + $0xa28] ss:$16 sps:$4 sm:$0xff]   ;;  %v12940_v27 = vld [vmem:[%s16659_s3 + $0xa44] ss:$16 sps:$4 sm:$0xff]  }
 0x568   :  { %6677 = vmatprep.subr.bf16.mxu0 %v12886_v14  ;;  %6759 = vmatprep.subr.bf16.mxu1 %v12889_v30  ;;  %v12943_v14 = vld [vmem:[%s16659_s3 + $0xa4c] ss:$16 sps:$4 sm:$0xff]   ;;  %v12938_v30 = vld [vmem:[%s16659_s3 + $0xa40] ss:$16 sps:$4 sm:$0xff]  }
 0x56b   :  { %6678 = vmatpush1.bf16.msra.mxu0 %v12884_v31  ;;  %6760 = vmatpush1.bf16.msra.mxu1 %v12887_v51  ;;  %v12941_v31 = vld [vmem:[%s16659_s3 + $0xa48] ss:$16 sps:$4 sm:$0xff]   ;;  %v12946_v51 = vld [vmem:[%s16659_s3 + $0xa64] ss:$16 sps:$4 sm:$0xff]  }
 0x56c   :  { %6679 = vmatprep.subr.bf16.mxu0 %v12892_v57  ;;  %6761 = vmatprep.subr.bf16.mxu1 %v12895_v34  ;;  %v12949_v57 = vld [vmem:[%s16659_s3 + $0xa6c] ss:$16 sps:$4 sm:$0xff]   ;;  %v12944_v34 = vld [vmem:[%s16659_s3 + $0xa60] ss:$16 sps:$4 sm:$0xff]  }
 0x56f   :  { %6680 = vmatpush1.bf16.msra.mxu0 %v12890_v35  ;;  %6762 = vmatpush1.bf16.msra.mxu1 %v12893_v36  ;;  %v12947_v35 = vld [vmem:[%s16659_s3 + $0xa68] ss:$16 sps:$4 sm:$0xff]   ;;  %v12952_v36 = vld [vmem:[%s16659_s3 + $0xa84] ss:$16 sps:$4 sm:$0xff]  }
 0x570   :  { %6681 = vmatprep.subr.bf16.mxu0 %v12898_v37  ;;  %6763 = vmatprep.subr.bf16.mxu1 %v12901_v39  ;;  %v12955_v37 = vld [vmem:[%s16659_s3 + $0xa8c] ss:$16 sps:$4 sm:$0xff]   ;;  %v12950_v39 = vld [vmem:[%s16659_s3 + $0xa80] ss:$16 sps:$4 sm:$0xff]  }
 0x573   :  { %6682 = vmatpush1.bf16.msra.mxu0 %v12896_v43  ;;  %6764 = vmatpush1.bf16.msra.mxu1 %v12899_v44  ;;  %v12953_v43 = vld [vmem:[%s16659_s3 + $0xa88] ss:$16 sps:$4 sm:$0xff]   ;;  %v12958_v44 = vld [vmem:[%s16659_s3 + $0xaa4] ss:$16 sps:$4 sm:$0xff]  }
 0x574   :  { %6683 = vmatprep.subr.bf16.mxu0 %v12904_v45  ;;  %6765 = vmatprep.subr.bf16.mxu1 %v12907_v46  ;;  %v12961_v45 = vld [vmem:[%s16659_s3 + $0xaac] ss:$16 sps:$4 sm:$0xff]   ;;  %v12956_v46 = vld [vmem:[%s16659_s3 + $0xaa0] ss:$16 sps:$4 sm:$0xff]  }
 0x577   :  { %6684 = vmatpush1.bf16.msra.mxu0 %v12902_v47  ;;  %6766 = vmatpush1.bf16.msra.mxu1 %v12905_v48  ;;  %v12959_v47 = vld [vmem:[%s16659_s3 + $0xaa8] ss:$16 sps:$4 sm:$0xff]   ;;  %v12964_v48 = vld [vmem:[%s16659_s3 + $0xac4] ss:$16 sps:$4 sm:$0xff]  }
 0x578   :  { %6685 = vmatprep.subr.bf16.mxu0 %v12910_v53  ;;  %6767 = vmatprep.subr.bf16.mxu1 %v12913_v56  ;;  %v12967_v53 = vld [vmem:[%s16659_s3 + $0xacc] ss:$16 sps:$4 sm:$0xff]   ;;  %v12962_v56 = vld [vmem:[%s16659_s3 + $0xac0] ss:$16 sps:$4 sm:$0xff]  }
 0x57b   :  { %6686 = vmatpush1.bf16.msra.mxu0 %v12908_v58  ;;  %6768 = vmatpush1.bf16.msra.mxu1 %v12911_v60  ;;  %v12965_v58 = vld [vmem:[%s16659_s3 + $0xac8] ss:$16 sps:$4 sm:$0xff]   ;;  %v12970_v60 = vld [vmem:[%s16659_s3 + $0xae4] ss:$16 sps:$4 sm:$0xff]  }
 0x57c   :  { %6687 = vmatprep.subr.bf16.mxu0 %v12916_v61  ;;  %6769 = vmatprep.subr.bf16.mxu1 %v12919_v62  ;;  %v12973_v61 = vld [vmem:[%s16659_s3 + $0xaec] ss:$16 sps:$4 sm:$0xff]   ;;  %v12968_v62 = vld [vmem:[%s16659_s3 + $0xae0] ss:$16 sps:$4 sm:$0xff]  }
 0x57f   :  { %6688 = vmatpush1.bf16.msra.mxu0 %v12914_v25  ;;  %6770 = vmatpush1.bf16.msra.mxu1 %v12917_v8  ;;  %v12971_v25 = vld [vmem:[%s16659_s3 + $0xae8] ss:$16 sps:$4 sm:$0xff]   ;;  %v12976_v8 = vld [vmem:[%s16659_s3 + $0xb04] ss:$16 sps:$4 sm:$0xff]  }
 0x580   :  { %6689 = vmatprep.subr.bf16.mxu0 %v12922_v59  ;;  %6771 = vmatprep.subr.bf16.mxu1 %v12925_v0  ;;  %v12979_v59 = vld [vmem:[%s16659_s3 + $0xb0c] ss:$16 sps:$4 sm:$0xff]   ;;  %v12974_v0 = vld [vmem:[%s16659_s3 + $0xb00] ss:$16 sps:$4 sm:$0xff]  }
 0x583   :  { %6690 = vmatpush1.bf16.msra.mxu0 %v12920_v1  ;;  %6772 = vmatpush1.bf16.msra.mxu1 %v12923_v40  ;;  %v12977_v1 = vld [vmem:[%s16659_s3 + $0xb08] ss:$16 sps:$4 sm:$0xff]   ;;  %v12982_v40 = vld [vmem:[%s16659_s3 + $0xb24] ss:$16 sps:$4 sm:$0xff]  }
 0x584   :  { %6700 = vmatprep.subr.bf16.mxu0 %v12928_v41  ;;  %6782 = vmatprep.subr.bf16.mxu1 %v12931_v2  ;;  %v12985_v41 = vld [vmem:[%s16659_s3 + $0xb2c] ss:$16 sps:$4 sm:$0xff]   ;;  %v12980_v2 = vld [vmem:[%s16659_s3 + $0xb20] ss:$16 sps:$4 sm:$0xff]  }
 0x5d9   :  { %v5702_v3 = vpop.f32.mrb[20].mxu0  ;;  %v5743_v4 = vpop.f32.mrb[20].mxu1 }
 0x5da   :  { %v5744_v5 = vadd.f32 %v5743_v4, %v5702_v3  ;;  %v5704_v7 = vpop.f32.mrb[21].mxu0  ;;  %v5745_v9 = vpop.f32.mrb[21].mxu1  ;;  %v12983_v3 = vld [vmem:[%s16659_s3 + $0xb28] ss:$16 sps:$4 sm:$0xff]   ;;  %v12988_v4 = vld [vmem:[%s16659_s3 + $0xb44] ss:$16 sps:$4 sm:$0xff]  }
 0x5db   :  { %v5746_v54 = vadd.f32 %v5745_v9, %v5704_v7  ;;  %v5706_v10 = vpop.f32.mrb[22].mxu0  ;;  %v5747_v12 = vpop.f32.mrb[22].mxu1  ;;  %v12989_v7 = vld [vmem:[%s16659_s3 + $0xb48] ss:$16 sps:$4 sm:$0xff]   ;;  %v12994_v9 = vld [vmem:[%s16659_s3 + $0xb64] ss:$16 sps:$4 sm:$0xff]  }
 0x5dc   :  { %v5832_v52 = vadd.f32 %v5744_v5, %v15150_v28  ;;  %v5707_v15 = vpop.f32.mrb[23].mxu0  ;;  %v5748_v16 = vpop.f32.mrb[23].mxu1  ;;  %v12991_v5 = vld [vmem:[%s16659_s3 + $0xb4c] ss:$16 sps:$4 sm:$0xff]   ;;  %v12995_v10 = vld [vmem:[%s16659_s3 + $0xb68] ss:$16 sps:$4 sm:$0xff]  }
 0x5dd   :  { %v5833_v17 = vadd.f32 %v5746_v54, %v15152_v29  ;;  %v12934_v29 = vld [vmem:[%s16659_s3 + $0xa24] ss:$16 sps:$4 sm:$0xff]   ;;  %v12997_v54 = vld [vmem:[%s16659_s3 + $0xb6c] ss:$16 sps:$4 sm:$0xff]   ;;  %v12998_v15 = vld [vmem:[%s16659_s3 + $0xb80] ss:$16 sps:$4 sm:$0xff]  }
 0x5de   :  { %v15966_v18 = vadd.f32 %v5842_v6, %v5832_v52  ;;  %v12986_v6 = vld [vmem:[%s16659_s3 + $0xb40] ss:$16 sps:$4 sm:$0xff]   ;;  %v13000_v12 = vld [vmem:[%s16659_s3 + $0xb84] ss:$16 sps:$4 sm:$0xff]   ;;  %v13003_v52 = vld [vmem:[%s16659_s3 + $0xb8c] ss:$16 sps:$4 sm:$0xff]  }
 0x5df   :  { %v15968_v19 = vadd.f32 %v5846_v55, %v5833_v17  ;;  %v12992_v55 = vld [vmem:[%s16659_s3 + $0xb60] ss:$16 sps:$4 sm:$0xff]   ;;  %v13001_v16 = vld [vmem:[%s16659_s3 + $0xb88] ss:$16 sps:$4 sm:$0xff]   ;;  %v13006_v17 = vld [vmem:[%s16659_s3 + $0xba4] ss:$16 sps:$4 sm:$0xff]  }
 0x5e0   :  { %v5863_v28 = vpack.c.bf16 %v15966_v18, %v15966_v18 }
 0x5e1   :  { %v5864_v20 = vpack.c.bf16 %v15968_v19, %v15968_v19 }
 0x5e3   :  { %6691 = vmatprep.mubr.bf16.mxu0 %v5864_v20  ;;  %6773 = vmatprep.mubr.bf16.mxu1 %v5864_v20  ;;  %v13009_v20 = vld [vmem:[%s16659_s3 + $0xbac] ss:$16 sps:$4 sm:$0xff]  }
 0x5e4   :  { %6692 = vmatmul.mubr.bf16.vlgmr.msra.gmra.mrb[28].mxu0 %v5863_v28  ;;  %6774 = vmatmul.mubr.bf16.vlgmr.msra.gmra.mrb[28].mxu1 %v5863_v28  ;;  %v13012_v28 = vld [vmem:[%s16659_s3 + $0xbc4] ss:$16 sps:$4 sm:$0xff]  }
 0x5e5   :  { %6701 = vmatpush1.bf16.msra.mxu0 %v12926_v21  ;;  %6783 = vmatpush1.bf16.msra.mxu1 %v12929_v22  ;;  %v13004_v21 = vld [vmem:[%s16659_s3 + $0xba0] ss:$16 sps:$4 sm:$0xff]   ;;  %v13007_v22 = vld [vmem:[%s16659_s3 + $0xba8] ss:$16 sps:$4 sm:$0xff]  }
 0x5e6   :  { %6702 = vmatprep.subr.bf16.mxu0 %v12934_v29  ;;  %6784 = vmatprep.subr.bf16.mxu1 %v12937_v23  ;;  %v13015_v29 = vld [vmem:[%s16659_s3 + $0xbcc] ss:$16 sps:$4 sm:$0xff]  }
 0x5e9   :  { %6703 = vmatpush1.bf16.msra.mxu0 %v12932_v24  ;;  %6785 = vmatpush1.bf16.msra.mxu1 %v12935_v13  ;;  %v13010_v13 = vld [vmem:[%s16659_s3 + $0xbc0] ss:$16 sps:$4 sm:$0xff]  }
 0x5ea   :  { %6704 = vmatprep.subr.bf16.mxu0 %v12940_v27  ;;  %6786 = vmatprep.subr.bf16.mxu1 %v12943_v14  ;;  %v13013_v27 = vld [vmem:[%s16659_s3 + $0xbc8] ss:$16 sps:$4 sm:$0xff]  }
 0x5ed   :  { %6705 = vmatpush1.bf16.msra.mxu0 %v12938_v30  ;;  %6787 = vmatpush1.bf16.msra.mxu1 %v12941_v31  ;;  %v5850_v30 = vrot.slane %v15958_v38, %v14491_v50 }
 0x5ee   :  { %6706 = vmatprep.subr.bf16.mxu0 %v12946_v51  ;;  %6788 = vmatprep.subr.bf16.mxu1 %v12949_v57  ;;  %v13018_v57 = vld [vmem:[%s16659_s3 + $0xbe4] ss:$16 sps:$4 sm:$0xff]  }
 0x5f1   :  { %6707 = vmatpush1.bf16.msra.mxu0 %v12944_v34  ;;  %6789 = vmatpush1.bf16.msra.mxu1 %v12947_v35  ;;  %v13021_v34 = vld [vmem:[%s16659_s3 + $0xbec] ss:$16 sps:$4 sm:$0xff]  }
 0x5f2   :  { %6708 = vmatprep.subr.bf16.mxu0 %v12952_v36  ;;  %6790 = vmatprep.subr.bf16.mxu1 %v12955_v37  ;;  %v5854_v36 = vrot.slane %v15958_v38, %v14324_v26 }
 0x5f5   :  { %6709 = vmatpush1.bf16.msra.mxu0 %v12950_v39  ;;  %6791 = vmatpush1.bf16.msra.mxu1 %v12953_v43 }
 0x5f6   :  { %6710 = vmatprep.subr.bf16.mxu0 %v12958_v44  ;;  %6792 = vmatprep.subr.bf16.mxu1 %v12961_v45 }
 0x5f9   :  { %6711 = vmatpush1.bf16.msra.mxu0 %v12956_v46  ;;  %6793 = vmatpush1.bf16.msra.mxu1 %v12959_v47  ;;  %v13016_v47 = vld [vmem:[%s16659_s3 + $0xbe0] ss:$16 sps:$4 sm:$0xff]  }
 0x5fa   :  { %6712 = vmatprep.subr.bf16.mxu0 %v12964_v48  ;;  %6794 = vmatprep.subr.bf16.mxu1 %v12967_v53  ;;  %v13019_v48 = vld [vmem:[%s16659_s3 + $0xbe8] ss:$16 sps:$4 sm:$0xff]  }
 0x5fd   :  { %6713 = vmatpush1.bf16.msra.mxu0 %v12962_v56  ;;  %6795 = vmatpush1.bf16.msra.mxu1 %v12965_v58  ;;  %v13022_v58 = vld [vmem:[%s16661_s5 + $0x800] ss:$16 sps:$4 sm:$0xff]  }
 0x5fe   :  { %6714 = vmatprep.subr.bf16.mxu0 %v12970_v60  ;;  %6796 = vmatprep.subr.bf16.mxu1 %v12973_v61  ;;  %v13025_v60 = vld [vmem:[%s16661_s5 + $0xa00] ss:$16 sps:$4 sm:$0xff]  }
 0x601   :  { %6715 = vmatpush1.bf16.msra.mxu0 %v12968_v62  ;;  %6797 = vmatpush1.bf16.msra.mxu1 %v12971_v25  ;;  %v13030_v62 = vld [vmem:[%s16661_s5 + $0x824] ss:$16 sps:$4 sm:$0xff]  }
 0x602   :  { %6716 = vmatprep.subr.bf16.mxu0 %v12976_v8  ;;  %6798 = vmatprep.subr.bf16.mxu1 %v12979_v59  ;;  %v13033_v25 = vld [vmem:[%s16661_s5 + $0xa24] ss:$16 sps:$4 sm:$0xff]   ;;  %v13028_v8 = vld [vmem:[%s16661_s5 + $0x820] ss:$16 sps:$4 sm:$0xff]  }
 0x603   :  { %v13031_v59 = vld [vmem:[%s16661_s5 + $0xa20] ss:$16 sps:$4 sm:$0xff]  }
 0x605   :  { %6717 = vmatpush1.bf16.msra.mxu0 %v12974_v0  ;;  %6799 = vmatpush1.bf16.msra.mxu1 %v12977_v1  ;;  %v13036_v0 = vld [vmem:[%s16661_s5 + $0x844] ss:$16 sps:$4 sm:$0xff]  }
 0x606   :  { %6718 = vmatprep.subr.bf16.mxu0 %v12982_v40  ;;  %6800 = vmatprep.subr.bf16.mxu1 %v12985_v41  ;;  %v13039_v1 = vld [vmem:[%s16661_s5 + $0xa44] ss:$16 sps:$4 sm:$0xff]   ;;  %v13034_v40 = vld [vmem:[%s16661_s5 + $0x840] ss:$16 sps:$4 sm:$0xff]  }
 0x607   :  { %v13037_v41 = vld [vmem:[%s16661_s5 + $0xa40] ss:$16 sps:$4 sm:$0xff]  }
 0x609   :  { %6719 = vmatpush1.bf16.msra.mxu0 %v12980_v2  ;;  %6801 = vmatpush1.bf16.msra.mxu1 %v12983_v3  ;;  %v13042_v2 = vld [vmem:[%s16661_s5 + $0x864] ss:$16 sps:$4 sm:$0xff]  }
 0x60a   :  { %6720 = vmatprep.subr.bf16.mxu0 %v12988_v4  ;;  %6802 = vmatprep.subr.bf16.mxu1 %v12991_v5  ;;  %v13045_v3 = vld [vmem:[%s16661_s5 + $0xa64] ss:$16 sps:$4 sm:$0xff]   ;;  %v13040_v4 = vld [vmem:[%s16661_s5 + $0x860] ss:$16 sps:$4 sm:$0xff]  }
 0x60b   :  { %v13043_v5 = vld [vmem:[%s16661_s5 + $0xa60] ss:$16 sps:$4 sm:$0xff]  }
 0x60d   :  { %6721 = vmatpush1.bf16.msra.mxu0 %v12986_v6  ;;  %6803 = vmatpush1.bf16.msra.mxu1 %v12989_v7  ;;  %v13048_v6 = vld [vmem:[%s16661_s5 + $0x884] ss:$16 sps:$4 sm:$0xff]  }
 0x60e   :  { %6722 = vmatprep.subr.bf16.mxu0 %v12994_v9  ;;  %6804 = vmatprep.subr.bf16.mxu1 %v12997_v54  ;;  %v13051_v7 = vld [vmem:[%s16661_s5 + $0xa84] ss:$16 sps:$4 sm:$0xff]   ;;  %v13046_v9 = vld [vmem:[%s16661_s5 + $0x880] ss:$16 sps:$4 sm:$0xff]  }
 0x60f   :  { %v13049_v54 = vld [vmem:[%s16661_s5 + $0xa80] ss:$16 sps:$4 sm:$0xff]  }
 0x611   :  { %6723 = vmatpush1.bf16.msra.mxu0 %v12992_v55  ;;  %6805 = vmatpush1.bf16.msra.mxu1 %v12995_v10  ;;  %v13054_v55 = vld [vmem:[%s16661_s5 + $0x8a4] ss:$16 sps:$4 sm:$0xff]  }
 0x612   :  { %6724 = vmatprep.subr.bf16.mxu0 %v13000_v12  ;;  %6806 = vmatprep.subr.bf16.mxu1 %v13003_v52  ;;  %v13057_v10 = vld [vmem:[%s16661_s5 + $0xaa4] ss:$16 sps:$4 sm:$0xff]   ;;  %v13052_v12 = vld [vmem:[%s16661_s5 + $0x8a0] ss:$16 sps:$4 sm:$0xff]  }
 0x613   :  { %v13055_v52 = vld [vmem:[%s16661_s5 + $0xaa0] ss:$16 sps:$4 sm:$0xff]  }
 0x615   :  { %6725 = vmatpush1.bf16.msra.mxu0 %v12998_v15  ;;  %6807 = vmatpush1.bf16.msra.mxu1 %v13001_v16  ;;  %v13060_v15 = vld [vmem:[%s16661_s5 + $0x8c4] ss:$16 sps:$4 sm:$0xff]  }
 0x616   :  { %6726 = vmatprep.subr.bf16.mxu0 %v13006_v17  ;;  %6808 = vmatprep.subr.bf16.mxu1 %v13009_v20  ;;  %v13063_v16 = vld [vmem:[%s16661_s5 + $0xac4] ss:$16 sps:$4 sm:$0xff]   ;;  %v13058_v17 = vld [vmem:[%s16661_s5 + $0x8c0] ss:$16 sps:$4 sm:$0xff]  }
 0x617   :  { %v13061_v20 = vld [vmem:[%s16661_s5 + $0xac0] ss:$16 sps:$4 sm:$0xff]  }
 0x619   :  { %v5784_v23 = vpop.f32.mrb[24].mxu0  ;;  %v5825_v24 = vpop.f32.mrb[24].mxu1  ;;  %6727 = vmatpush1.bf16.msra.mxu0 %v13004_v21  ;;  %6809 = vmatpush1.bf16.msra.mxu1 %v13007_v22  ;;  %v13066_v21 = vld [vmem:[%s16661_s5 + $0x8e4] ss:$16 sps:$4 sm:$0xff]  }
 0x61a   :  { %v5826_v14 = vadd.f32 %v5825_v24, %v5784_v23  ;;  %v5786_v31 = vpop.f32.mrb[25].mxu0  ;;  %v5827_v51 = vpop.f32.mrb[25].mxu1  ;;  %6728 = vmatprep.subr.bf16.mxu0 %v13012_v28  ;;  %6810 = vmatprep.subr.bf16.mxu1 %v13015_v29  ;;  %v13069_v22 = vld [vmem:[%s16661_s5 + $0xae4] ss:$16 sps:$4 sm:$0xff]   ;;  %v13064_v28 = vld [vmem:[%s16661_s5 + $0x8e0] ss:$16 sps:$4 sm:$0xff]  }
 0x61b   :  { %v5828_v35 = vadd.f32 %v5827_v51, %v5786_v31  ;;  %v5788_v37 = vpop.f32.mrb[26].mxu0  ;;  %v5829_v39 = vpop.f32.mrb[26].mxu1  ;;  %v13067_v29 = vld [vmem:[%s16661_s5 + $0xae0] ss:$16 sps:$4 sm:$0xff]   ;;  %v13072_v23 = vld [vmem:[%s16661_s5 + $0x904] ss:$16 sps:$4 sm:$0xff]  }
 0x61c   :  { %v5834_v43 = vadd.f32 %v5826_v14, %v15350_v63  ;;  %v5789_v44 = vpop.f32.mrb[27].mxu0  ;;  %v5830_v45 = vpop.f32.mrb[27].mxu1  ;;  %v13024_v63 = vld [vmem:[%s16661_s5 + $0x804] ss:$16 sps:$4 sm:$0xff]   ;;  %v13076_v31 = vld [vmem:[%s16661_s5 + $0x920] ss:$16 sps:$4 sm:$0xff]  }
 0x61d   :  { %v5835_v46 = vadd.f32 %v5828_v35, %v15358_v11  ;;  %6729 = vmatpush1.bf16.msra.mxu0 %v13010_v13  ;;  %6811 = vmatpush1.bf16.msra.mxu1 %v13013_v27  ;;  %v13027_v11 = vld [vmem:[%s16661_s5 + $0xa04] ss:$16 sps:$4 sm:$0xff]   ;;  %v13070_v13 = vld [vmem:[%s16661_s5 + $0x900] ss:$16 sps:$4 sm:$0xff]  }
 0x61e   :  { %v16166_v53 = vadd.f32 %v5850_v30, %v5834_v43  ;;  %6730 = vmatprep.subr.bf16.mxu0 %v13018_v57  ;;  %6812 = vmatprep.subr.bf16.mxu1 %v13021_v34  ;;  %v13075_v24 = vld [vmem:[%s16661_s5 + $0xb04] ss:$16 sps:$4 sm:$0xff]   ;;  %v13073_v27 = vld [vmem:[%s16661_s5 + $0xb00] ss:$16 sps:$4 sm:$0xff]  }
 0x61f   :  { %v16174_v38 = vadd.f32 %v5854_v36, %v5835_v46  ;;  %v13078_v14 = vld [vmem:[%s16661_s5 + $0x924] ss:$16 sps:$4 sm:$0xff]   ;;  %v13079_v51 = vld [vmem:[%s16661_s5 + $0xb20] ss:$16 sps:$4 sm:$0xff]  }
 0x620   :  { %v5865_v61 = vpack.c.bf16 %v16166_v53, %v16166_v53  ;;  %v13081_v30 = vld [vmem:[%s16661_s5 + $0xb24] ss:$16 sps:$4 sm:$0xff]   ;;  %v13082_v35 = vld [vmem:[%s16661_s5 + $0x940] ss:$16 sps:$4 sm:$0xff]  }
 0x621   :  { %6731 = vmatpush1.bf16.msra.mxu0 %v13016_v47  ;;  %6813 = vmatpush1.bf16.msra.mxu1 %v13019_v48  ;;  %v5866_v56 = vpack.c.bf16 %v16174_v38, %v16174_v38  ;;  %v13084_v57 = vld [vmem:[%s16661_s5 + $0x944] ss:$16 sps:$4 sm:$0xff]   ;;  %v13085_v36 = vld [vmem:[%s16661_s5 + $0xb40] ss:$16 sps:$4 sm:$0xff]  }
 0x622   :  { %7600 = vmatprep.subr.bf16.mxu0 %v13024_v63  ;;  %7641 = vmatprep.subr.bf16.mxu1 %v13027_v11  ;;  %v13087_v34 = vld [vmem:[%s16661_s5 + $0xb44] ss:$16 sps:$4 sm:$0xff]   ;;  %v13088_v43 = vld [vmem:[%s16661_s5 + $0x960] ss:$16 sps:$4 sm:$0xff]  }
 0x623   :  { %6732 = vmatprep.mubr.bf16.mxu0 %v5866_v56  ;;  %6814 = vmatprep.mubr.bf16.mxu1 %v5866_v56  ;;  %v13090_v37 = vld [vmem:[%s16661_s5 + $0x964] ss:$16 sps:$4 sm:$0xff]   ;;  %v13091_v44 = vld [vmem:[%s16661_s5 + $0xb60] ss:$16 sps:$4 sm:$0xff]  }
 0x624   :  { %6733 = vmatmul.mubr.bf16.vlgmr.msra.gmra.mrb[28].mxu0 %v5865_v61  ;;  %6815 = vmatmul.mubr.bf16.vlgmr.msra.gmra.mrb[28].mxu1 %v5865_v61  ;;  %v13093_v39 = vld [vmem:[%s16661_s5 + $0xb64] ss:$16 sps:$4 sm:$0xff]   ;;  %v13094_v47 = vld [vmem:[%s16661_s5 + $0x980] ss:$16 sps:$4 sm:$0xff]  }
 0x625   :  { %7601 = vmatpush1.bf16.msra.mxu0 %v13022_v58  ;;  %7642 = vmatpush1.bf16.msra.mxu1 %v13025_v60  ;;  %v13096_v45 = vld [vmem:[%s16661_s5 + $0x984] ss:$16 sps:$4 sm:$0xff]   ;;  %v13097_v48 = vld [vmem:[%s16661_s5 + $0xb80] ss:$16 sps:$4 sm:$0xff]  }
 0x626   :  { %7602 = vmatprep.subr.bf16.mxu0 %v13030_v62  ;;  %7643 = vmatprep.subr.bf16.mxu1 %v13033_v25  ;;  %v13099_v46 = vld [vmem:[%s16661_s5 + $0xb84] ss:$16 sps:$4 sm:$0xff]   ;;  %v13100_v56 = vld [vmem:[%s16661_s5 + $0x9a0] ss:$16 sps:$4 sm:$0xff]  }
 0x627   :  { %v13102_v63 = vld [vmem:[%s16661_s5 + $0x9a4] ss:$16 sps:$4 sm:$0xff]   ;;  %v13103_v58 = vld [vmem:[%s16661_s5 + $0xba0] ss:$16 sps:$4 sm:$0xff]  }
 0x628   :  { %v13105_v11 = vld [vmem:[%s16661_s5 + $0xba4] ss:$16 sps:$4 sm:$0xff]   ;;  %v13106_v62 = vld [vmem:[%s16661_s5 + $0x9c0] ss:$16 sps:$4 sm:$0xff]  }
 0x629   :  { %7603 = vmatpush1.bf16.msra.mxu0 %v13028_v8  ;;  %7644 = vmatpush1.bf16.msra.mxu1 %v13031_v59  ;;  %v13108_v60 = vld [vmem:[%s16661_s5 + $0x9c4] ss:$16 sps:$4 sm:$0xff]   ;;  %v13109_v25 = vld [vmem:[%s16661_s5 + $0xbc0] ss:$16 sps:$4 sm:$0xff]  }
 0x62a   :  { %7604 = vmatprep.subr.bf16.mxu0 %v13036_v0  ;;  %7645 = vmatprep.subr.bf16.mxu1 %v13039_v1  ;;  %v13111_v61 = vld [vmem:[%s16661_s5 + $0xbc4] ss:$16 sps:$4 sm:$0xff]   ;;  %v13112_v0 = vld [vmem:[%s16661_s5 + $0x9e0] ss:$16 sps:$4 sm:$0xff]  }
 0x62b   :  { %v13114_v8 = vld [vmem:[%s16661_s5 + $0x9e4] ss:$16 sps:$4 sm:$0xff]   ;;  %v13115_v1 = vld [vmem:[%s16661_s5 + $0xbe0] ss:$16 sps:$4 sm:$0xff]  }
 0x62c   :  { %v13117_v59 = vld [vmem:[%s16661_s5 + $0xbe4] ss:$16 sps:$4 sm:$0xff]  }
 0x62d   :  { %7605 = vmatpush1.bf16.msra.mxu0 %v13034_v40  ;;  %7646 = vmatpush1.bf16.msra.mxu1 %v13037_v41  ;;  %v13120_v40 = vld [vmem:[%s16661_s5 + $0x80c] ss:$16 sps:$4 sm:$0xff]  }
 0x62e   :  { %7606 = vmatprep.subr.bf16.mxu0 %v13042_v2  ;;  %7647 = vmatprep.subr.bf16.mxu1 %v13045_v3  ;;  %v13123_v41 = vld [vmem:[%s16661_s5 + $0xa0c] ss:$16 sps:$4 sm:$0xff]   ;;  %v10939_v2 = vld [vmem:[%s16660_s4 + $0x8] sm:$0xf] }
 0x62f   :  { %v6002_v3 = vrot.slane %v10939_v2, %v14318_v32 }
 0x631   :  { %7607 = vmatpush1.bf16.msra.mxu0 %v13040_v4  ;;  %7648 = vmatpush1.bf16.msra.mxu1 %v13043_v5  ;;  %v6010_v4 = vrot.slane %v10939_v2, %v14491_v50  ;;  %v6006_v5 = vrot.slane %v10939_v2, %v14321_v33 }
 0x632   :  { %7608 = vmatprep.subr.bf16.mxu0 %v13048_v6  ;;  %7649 = vmatprep.subr.bf16.mxu1 %v13051_v7  ;;  %v6014_v6 = vrot.slane %v10939_v2, %v14324_v26  ;;  %v13163_v2 = vld [vmem:[%s16661_s5 + $0xae8] ss:$16 sps:$4 sm:$0xff]  }
 0x635   :  { %7609 = vmatpush1.bf16.msra.mxu0 %v13046_v9  ;;  %7650 = vmatpush1.bf16.msra.mxu1 %v13049_v54 }
 0x636   :  { %7610 = vmatprep.subr.bf16.mxu0 %v13054_v55  ;;  %7651 = vmatprep.subr.bf16.mxu1 %v13057_v10 }
 0x639   :  { %7611 = vmatpush1.bf16.msra.mxu0 %v13052_v12  ;;  %7652 = vmatpush1.bf16.msra.mxu1 %v13055_v52 }
 0x63a   :  { %7612 = vmatprep.subr.bf16.mxu0 %v13060_v15  ;;  %7653 = vmatprep.subr.bf16.mxu1 %v13063_v16 }
 0x63d   :  { %7613 = vmatpush1.bf16.msra.mxu0 %v13058_v17  ;;  %7654 = vmatpush1.bf16.msra.mxu1 %v13061_v20 }
 0x63e   :  { %7614 = vmatprep.subr.bf16.mxu0 %v13066_v21  ;;  %7655 = vmatprep.subr.bf16.mxu1 %v13069_v22 }
 0x641   :  { %7615 = vmatpush1.bf16.msra.mxu0 %v13064_v28  ;;  %7656 = vmatpush1.bf16.msra.mxu1 %v13067_v29 }
 0x642   :  { %7616 = vmatprep.subr.bf16.mxu0 %v13072_v23  ;;  %7657 = vmatprep.subr.bf16.mxu1 %v13075_v24 }
 0x645   :  { %7617 = vmatpush1.bf16.msra.mxu0 %v13070_v13  ;;  %7658 = vmatpush1.bf16.msra.mxu1 %v13073_v27  ;;  %v13118_v27 = vld [vmem:[%s16661_s5 + $0x808] ss:$16 sps:$4 sm:$0xff]  }
 0x646   :  { %7618 = vmatprep.subr.bf16.mxu0 %v13078_v14  ;;  %7659 = vmatprep.subr.bf16.mxu1 %v13081_v30  ;;  %v13121_v14 = vld [vmem:[%s16661_s5 + $0xa08] ss:$16 sps:$4 sm:$0xff]  }
 0x649   :  { %7619 = vmatpush1.bf16.msra.mxu0 %v13076_v31  ;;  %7660 = vmatpush1.bf16.msra.mxu1 %v13079_v51  ;;  %v13126_v51 = vld [vmem:[%s16661_s5 + $0x82c] ss:$16 sps:$4 sm:$0xff]  }
 0x64a   :  { %7620 = vmatprep.subr.bf16.mxu0 %v13084_v57  ;;  %7661 = vmatprep.subr.bf16.mxu1 %v13087_v34  ;;  %v13129_v57 = vld [vmem:[%s16661_s5 + $0xa2c] ss:$16 sps:$4 sm:$0xff]   ;;  %v13124_v34 = vld [vmem:[%s16661_s5 + $0x828] ss:$16 sps:$4 sm:$0xff]  }
 0x64d   :  { %7621 = vmatpush1.bf16.msra.mxu0 %v13082_v35  ;;  %7662 = vmatpush1.bf16.msra.mxu1 %v13085_v36  ;;  %v13127_v35 = vld [vmem:[%s16661_s5 + $0xa28] ss:$16 sps:$4 sm:$0xff]   ;;  %v13132_v36 = vld [vmem:[%s16661_s5 + $0x84c] ss:$16 sps:$4 sm:$0xff]  }
 0x64e   :  { %7622 = vmatprep.subr.bf16.mxu0 %v13090_v37  ;;  %7663 = vmatprep.subr.bf16.mxu1 %v13093_v39  ;;  %v13135_v37 = vld [vmem:[%s16661_s5 + $0xa4c] ss:$16 sps:$4 sm:$0xff]   ;;  %v13130_v39 = vld [vmem:[%s16661_s5 + $0x848] ss:$16 sps:$4 sm:$0xff]  }
 0x651   :  { %7623 = vmatpush1.bf16.msra.mxu0 %v13088_v43  ;;  %7664 = vmatpush1.bf16.msra.mxu1 %v13091_v44  ;;  %v13133_v43 = vld [vmem:[%s16661_s5 + $0xa48] ss:$16 sps:$4 sm:$0xff]   ;;  %v13138_v44 = vld [vmem:[%s16661_s5 + $0x86c] ss:$16 sps:$4 sm:$0xff]  }
 0x652   :  { %7624 = vmatprep.subr.bf16.mxu0 %v13096_v45  ;;  %7665 = vmatprep.subr.bf16.mxu1 %v13099_v46  ;;  %v13141_v45 = vld [vmem:[%s16661_s5 + $0xa6c] ss:$16 sps:$4 sm:$0xff]   ;;  %v13136_v46 = vld [vmem:[%s16661_s5 + $0x868] ss:$16 sps:$4 sm:$0xff]  }
 0x655   :  { %7625 = vmatpush1.bf16.msra.mxu0 %v13094_v47  ;;  %7666 = vmatpush1.bf16.msra.mxu1 %v13097_v48  ;;  %v13139_v47 = vld [vmem:[%s16661_s5 + $0xa68] ss:$16 sps:$4 sm:$0xff]   ;;  %v13144_v48 = vld [vmem:[%s16661_s5 + $0x88c] ss:$16 sps:$4 sm:$0xff]  }
 0x656   :  { %7626 = vmatprep.subr.bf16.mxu0 %v13102_v63  ;;  %7667 = vmatprep.subr.bf16.mxu1 %v13105_v11  ;;  %v13147_v63 = vld [vmem:[%s16661_s5 + $0xa8c] ss:$16 sps:$4 sm:$0xff]   ;;  %v13142_v11 = vld [vmem:[%s16661_s5 + $0x888] ss:$16 sps:$4 sm:$0xff]  }
 0x659   :  { %7627 = vmatpush1.bf16.msra.mxu0 %v13100_v56  ;;  %7668 = vmatpush1.bf16.msra.mxu1 %v13103_v58  ;;  %v13145_v56 = vld [vmem:[%s16661_s5 + $0xa88] ss:$16 sps:$4 sm:$0xff]   ;;  %v13150_v58 = vld [vmem:[%s16661_s5 + $0x8ac] ss:$16 sps:$4 sm:$0xff]  }
 0x65a   :  { %7628 = vmatprep.subr.bf16.mxu0 %v13108_v60  ;;  %7669 = vmatprep.subr.bf16.mxu1 %v13111_v61  ;;  %v13153_v60 = vld [vmem:[%s16661_s5 + $0xaac] ss:$16 sps:$4 sm:$0xff]   ;;  %v13148_v61 = vld [vmem:[%s16661_s5 + $0x8a8] ss:$16 sps:$4 sm:$0xff]  }
 0x65d   :  { %7629 = vmatpush1.bf16.msra.mxu0 %v13106_v62  ;;  %7670 = vmatpush1.bf16.msra.mxu1 %v13109_v25  ;;  %v13151_v62 = vld [vmem:[%s16661_s5 + $0xaa8] ss:$16 sps:$4 sm:$0xff]   ;;  %v13156_v25 = vld [vmem:[%s16661_s5 + $0x8cc] ss:$16 sps:$4 sm:$0xff]  }
 0x65e   :  { %7630 = vmatprep.subr.bf16.mxu0 %v13114_v8  ;;  %7671 = vmatprep.subr.bf16.mxu1 %v13117_v59  ;;  %v13159_v8 = vld [vmem:[%s16661_s5 + $0xacc] ss:$16 sps:$4 sm:$0xff]   ;;  %v13154_v59 = vld [vmem:[%s16661_s5 + $0x8c8] ss:$16 sps:$4 sm:$0xff]  }
 0x661   :  { %7631 = vmatpush1.bf16.msra.mxu0 %v13112_v0  ;;  %7672 = vmatpush1.bf16.msra.mxu1 %v13115_v1  ;;  %v13157_v0 = vld [vmem:[%s16661_s5 + $0xac8] ss:$16 sps:$4 sm:$0xff]   ;;  %v13162_v1 = vld [vmem:[%s16661_s5 + $0x8ec] ss:$16 sps:$4 sm:$0xff]  }
 0x662   :  { %7682 = vmatprep.subr.bf16.mxu0 %v13120_v40  ;;  %7723 = vmatprep.subr.bf16.mxu1 %v13123_v41  ;;  %v13165_v40 = vld [vmem:[%s16661_s5 + $0xaec] ss:$16 sps:$4 sm:$0xff]   ;;  %v13160_v41 = vld [vmem:[%s16661_s5 + $0x8e8] ss:$16 sps:$4 sm:$0xff]  }
 0x6f7   :  { %v6734_v7 = vpop.f32.mrb[28].mxu0  ;;  %v6816_v9 = vpop.f32.mrb[28].mxu1 }
 0x6f8   :  { %v11597_v54 = vadd.f32 %v6734_v7, %v6002_v3  ;;  %v11599_v55 = vadd.f32 %v6816_v9, %v6010_v4  ;;  %v6736_v10 = vpop.f32.mrb[29].mxu0  ;;  %v6818_v12 = vpop.f32.mrb[29].mxu1  ;;  %v13168_v3 = vld [vmem:[%s16661_s5 + $0x90c] ss:$16 sps:$4 sm:$0xff]  }
 0x6f9   :  { %v11598_v52 = vadd.f32 %v6736_v10, %v6006_v5  ;;  %v11600_v15 = vadd.f32 %v6818_v12, %v6014_v6  ;;  %v6738_v16 = vpop.f32.mrb[30].mxu0  ;;  %v6820_v17 = vpop.f32.mrb[30].mxu1  ;;  %v13171_v4 = vld [vmem:[%s16661_s5 + $0xb0c] ss:$16 sps:$4 sm:$0xff]   ;;  %v13166_v5 = vld [vmem:[%s16661_s5 + $0x908] ss:$16 sps:$4 sm:$0xff]  }
 0x6fa   :  { %v6823_v20 = vmax.f32 %v11597_v54, 0.0  ;;  %v6825_v21 = vmax.f32 %v11599_v55, 0.0  ;;  %v6739_v22 = vpop.f32.mrb[31].mxu0  ;;  %v6821_v28 = vpop.f32.mrb[31].mxu1  ;;  %v13169_v6 = vld [vmem:[%s16661_s5 + $0xb08] ss:$16 sps:$4 sm:$0xff]  }
 0x6fb   :  { %v6824_v29 = vmax.f32 %v11598_v52, 0.0  ;;  %v6826_v23 = vmax.f32 %v11600_v15, 0.0  ;;  %v13174_v7 = vld [vmem:[%s16661_s5 + $0x92c] ss:$16 sps:$4 sm:$0xff]   ;;  %v13172_v54 = vld [vmem:[%s16661_s5 + $0x928] ss:$16 sps:$4 sm:$0xff]  }
 0x6fc   :  { %v16385_v30 = vpack.c.bf16 %v6823_v20, %v6823_v20  ;;  %v16387_v31 = vpack.c.bf16 %v6825_v21, %v6825_v21  ;;  %v13177_v9 = vld [vmem:[%s16661_s5 + $0xb2c] ss:$16 sps:$4 sm:$0xff]   ;;  %v13175_v55 = vld [vmem:[%s16661_s5 + $0xb28] ss:$16 sps:$4 sm:$0xff]  }
 0x6fd   :  { %v6828_v24 = vpack.c.bf16 %v6824_v29, %v6824_v29  ;;  %v6830_v13 = vpack.c.bf16 %v6826_v23, %v6826_v23  ;;  %v13180_v10 = vld [vmem:[%s16661_s5 + $0x94c] ss:$16 sps:$4 sm:$0xff]   ;;  %v13178_v52 = vld [vmem:[%s16661_s5 + $0x948] ss:$16 sps:$4 sm:$0xff]  }
 0x6fe   :  { %v13183_v12 = vld [vmem:[%s16661_s5 + $0xb4c] ss:$16 sps:$4 sm:$0xff]   ;;  %v13181_v15 = vld [vmem:[%s16661_s5 + $0xb48] ss:$16 sps:$4 sm:$0xff]  }
 0x6ff   :  { %7632 = vmatprep.mubr.bf16.mxu0 %v6828_v24  ;;  %7673 = vmatprep.mubr.bf16.mxu1 %v6830_v13  ;;  %v13186_v16 = vld [vmem:[%s16661_s5 + $0x96c] ss:$16 sps:$4 sm:$0xff]   ;;  %v13184_v20 = vld [vmem:[%s16661_s5 + $0x968] ss:$16 sps:$4 sm:$0xff]  }
 0x700   :  { %7633 = vmatmul.mubr.bf16.vlgmr.msra.gmra.mrb[32].mxu0 %v16385_v30  ;;  %7674 = vmatmul.mubr.bf16.vlgmr.msra.gmra.mrb[32].mxu1 %v16387_v31  ;;  %v13189_v17 = vld [vmem:[%s16661_s5 + $0xb6c] ss:$16 sps:$4 sm:$0xff]   ;;  %v13187_v21 = vld [vmem:[%s16661_s5 + $0xb68] ss:$16 sps:$4 sm:$0xff]  }
 0x701   :  { %7683 = vmatpush1.bf16.msra.mxu0 %v13118_v27  ;;  %7724 = vmatpush1.bf16.msra.mxu1 %v13121_v14  ;;  %v13192_v22 = vld [vmem:[%s16661_s5 + $0x98c] ss:$16 sps:$4 sm:$0xff]   ;;  %v13190_v29 = vld [vmem:[%s16661_s5 + $0x988] ss:$16 sps:$4 sm:$0xff]  }
 0x702   :  { %7714 = vmatprep.mubr.bf16.mxu0 %v6828_v24  ;;  %7755 = vmatprep.mubr.bf16.mxu1 %v6830_v13  ;;  %v13195_v28 = vld [vmem:[%s16661_s5 + $0xb8c] ss:$16 sps:$4 sm:$0xff]   ;;  %v13193_v23 = vld [vmem:[%s16661_s5 + $0xb88] ss:$16 sps:$4 sm:$0xff]  }
 0x703   :  { %7684 = vmatprep.subr.bf16.mxu0 %v13126_v51  ;;  %7725 = vmatprep.subr.bf16.mxu1 %v13129_v57  ;;  %v13198_v24 = vld [vmem:[%s16661_s5 + $0x9ac] ss:$16 sps:$4 sm:$0xff]   ;;  %v13196_v27 = vld [vmem:[%s16661_s5 + $0x9a8] ss:$16 sps:$4 sm:$0xff]  }
 0x704   :  { %v13201_v13 = vld [vmem:[%s16661_s5 + $0xbac] ss:$16 sps:$4 sm:$0xff]   ;;  %v13199_v14 = vld [vmem:[%s16661_s5 + $0xba8] ss:$16 sps:$4 sm:$0xff]  }
 0x705   :  { %7685 = vmatpush1.bf16.msra.mxu0 %v13124_v34  ;;  %7726 = vmatpush1.bf16.msra.mxu1 %v13127_v35  ;;  %v13204_v51 = vld [vmem:[%s16661_s5 + $0x9cc] ss:$16 sps:$4 sm:$0xff]   ;;  %v13202_v34 = vld [vmem:[%s16661_s5 + $0x9c8] ss:$16 sps:$4 sm:$0xff]  }
 0x706   :  { %7686 = vmatprep.subr.bf16.mxu0 %v13132_v36  ;;  %7727 = vmatprep.subr.bf16.mxu1 %v13135_v37  ;;  %v13207_v57 = vld [vmem:[%s16661_s5 + $0xbcc] ss:$16 sps:$4 sm:$0xff]   ;;  %v13205_v35 = vld [vmem:[%s16661_s5 + $0xbc8] ss:$16 sps:$4 sm:$0xff]  }
 0x707   :  { %v13210_v36 = vld [vmem:[%s16661_s5 + $0x9ec] ss:$16 sps:$4 sm:$0xff]  }
 0x708   :  { %v13213_v37 = vld [vmem:[%s16661_s5 + $0xbec] ss:$16 sps:$4 sm:$0xff]  }
 0x709   :  { %7687 = vmatpush1.bf16.msra.mxu0 %v13130_v39  ;;  %7728 = vmatpush1.bf16.msra.mxu1 %v13133_v43  ;;  %v7799_v39 = vld [vmem:[#allocation2] sm:$0xff] }
 0x70a   :  { %7688 = vmatprep.subr.bf16.mxu0 %v13138_v44  ;;  %7729 = vmatprep.subr.bf16.mxu1 %v13141_v45  ;;  %v7803_v43 = vld [vmem:[#allocation2 + $0x20] sm:$0xff]  ;;  %v7800_v44 = vld [vmem:[#allocation2 + $0x8] sm:$0xff] }
 0x70b   :  { %v7804_v45 = vld [vmem:[#allocation2 + $0x28] sm:$0xff] }
 0x70d   :  { %7689 = vmatpush1.bf16.msra.mxu0 %v13136_v46  ;;  %7730 = vmatpush1.bf16.msra.mxu1 %v13139_v47  ;;  %v13208_v46 = vld [vmem:[%s16661_s5 + $0x9e8] ss:$16 sps:$4 sm:$0xff]  }
 0x70e   :  { %7690 = vmatprep.subr.bf16.mxu0 %v13144_v48  ;;  %7731 = vmatprep.subr.bf16.mxu1 %v13147_v63  ;;  %v13211_v47 = vld [vmem:[%s16661_s5 + $0xbe8] ss:$16 sps:$4 sm:$0xff]   ;;  %v11326_v48 = vcombine.high %v7799_v39, %v7803_v43  ;;  %v11328_v63 = vcombine.high %v7800_v44, %v7804_v45 }
 0x711   :  { %7691 = vmatpush1.bf16.msra.mxu0 %v13142_v11  ;;  %7732 = vmatpush1.bf16.msra.mxu1 %v13145_v56  ;;  %v7807_v11 = vld [vmem:[#allocation2 + $0x40] sm:$0xff] }
 0x712   :  { %7692 = vmatprep.subr.bf16.mxu0 %v13150_v58  ;;  %7733 = vmatprep.subr.bf16.mxu1 %v13153_v60  ;;  %v7811_v56 = vld [vmem:[#allocation2 + $0x60] sm:$0xff]  ;;  %v7808_v58 = vld [vmem:[#allocation2 + $0x48] sm:$0xff] }
 0x713   :  { %v7812_v60 = vld [vmem:[#allocation2 + $0x68] sm:$0xff] }
 0x715   :  { %7693 = vmatpush1.bf16.msra.mxu0 %v13148_v61  ;;  %7734 = vmatpush1.bf16.msra.mxu1 %v13151_v62  ;;  %v11325_v61 = vcombine.low %v7799_v39, %v7803_v43  ;;  %v11327_v62 = vcombine.low %v7800_v44, %v7804_v45  ;;  %v7855_v44 = vld [vmem:[#allocation2 + $0x1c0] sm:$0xff] }
 0x716   :  { %7694 = vmatprep.subr.bf16.mxu0 %v13156_v25  ;;  %7735 = vmatprep.subr.bf16.mxu1 %v13159_v8  ;;  %v11334_v25 = vcombine.high %v7807_v11, %v7811_v56  ;;  %v11336_v8 = vcombine.high %v7808_v58, %v7812_v60  ;;  %v7859_v45 = vld [vmem:[#allocation2 + $0x1e0] sm:$0xff] }
 0x719   :  { %7695 = vmatpush1.bf16.msra.mxu0 %v13154_v59  ;;  %7736 = vmatpush1.bf16.msra.mxu1 %v13157_v0  ;;  %v7815_v59 = vld [vmem:[#allocation2 + $0x80] sm:$0xff] }
 0x71a   :  { %7696 = vmatprep.subr.bf16.mxu0 %v13162_v1  ;;  %7737 = vmatprep.subr.bf16.mxu1 %v13165_v40  ;;  %v7819_v0 = vld [vmem:[#allocation2 + $0xa0] sm:$0xff]  ;;  %v7816_v1 = vld [vmem:[#allocation2 + $0x88] sm:$0xff] }
 0x71b   :  { %v7820_v40 = vld [vmem:[#allocation2 + $0xa8] sm:$0xff] }
 0x71d   :  { %7697 = vmatpush1.bf16.msra.mxu0 %v13160_v41  ;;  %7738 = vmatpush1.bf16.msra.mxu1 %v13163_v2  ;;  %v11333_v41 = vcombine.low %v7807_v11, %v7811_v56  ;;  %v11335_v2 = vcombine.low %v7808_v58, %v7812_v60  ;;  %v11382_v11 = vcombine.high %v7855_v44, %v7859_v45  ;;  %v7863_v58 = vld [vmem:[#allocation2 + $0x200] sm:$0xff] }
 0x71e   :  { %7698 = vmatprep.subr.bf16.mxu0 %v13168_v3  ;;  %7739 = vmatprep.subr.bf16.mxu1 %v13171_v4  ;;  %v11342_v3 = vcombine.high %v7815_v59, %v7819_v0  ;;  %v11344_v4 = vcombine.high %v7816_v1, %v7820_v40  ;;  %v7867_v60 = vld [vmem:[#allocation2 + $0x220] sm:$0xff] }
 0x721   :  { %7699 = vmatpush1.bf16.msra.mxu0 %v13166_v5  ;;  %7740 = vmatpush1.bf16.msra.mxu1 %v13169_v6  ;;  %v7823_v5 = vld [vmem:[#allocation2 + $0xc0] sm:$0xff] }
 0x722   :  { %7700 = vmatprep.subr.bf16.mxu0 %v13174_v7  ;;  %7741 = vmatprep.subr.bf16.mxu1 %v13177_v9  ;;  %v7827_v6 = vld [vmem:[#allocation2 + $0xe0] sm:$0xff]  ;;  %v7824_v7 = vld [vmem:[#allocation2 + $0xc8] sm:$0xff] }
 0x723   :  { %v7828_v9 = vld [vmem:[#allocation2 + $0xe8] sm:$0xff] }
 0x725   :  { %7701 = vmatpush1.bf16.msra.mxu0 %v13172_v54  ;;  %7742 = vmatpush1.bf16.msra.mxu1 %v13175_v55  ;;  %v11341_v54 = vcombine.low %v7815_v59, %v7819_v0  ;;  %v11343_v55 = vcombine.low %v7816_v1, %v7820_v40  ;;  %v7871_v59 = vld [vmem:[#allocation2 + $0x240] sm:$0xff]  ;;  %v11390_v0 = vcombine.high %v7863_v58, %v7867_v60 }
 0x726   :  { %7702 = vmatprep.subr.bf16.mxu0 %v13180_v10  ;;  %7743 = vmatprep.subr.bf16.mxu1 %v13183_v12  ;;  %v7831_v10 = vld [vmem:[#allocation2 + $0x100] sm:$0xff] }
 0x727   :  { %v7835_v12 = vld [vmem:[#allocation2 + $0x120] sm:$0xff] }
 0x728   :  { %v7875_v40 = vld [vmem:[#allocation2 + $0x260] sm:$0xff] }
 0x729   :  { %7703 = vmatpush1.bf16.msra.mxu0 %v13178_v52  ;;  %7744 = vmatpush1.bf16.msra.mxu1 %v13181_v15  ;;  %v7832_v52 = vld [vmem:[#allocation2 + $0x108] sm:$0xff] }
 0x72a   :  { %7704 = vmatprep.subr.bf16.mxu0 %v13186_v16  ;;  %7745 = vmatprep.subr.bf16.mxu1 %v13189_v17  ;;  %v7836_v15 = vld [vmem:[#allocation2 + $0x128] sm:$0xff]  ;;  %v11349_v16 = vcombine.low %v7823_v5, %v7827_v6  ;;  %v11351_v17 = vcombine.low %v7824_v7, %v7828_v9 }
 0x72d   :  { %7705 = vmatpush1.bf16.msra.mxu0 %v13184_v20  ;;  %7746 = vmatpush1.bf16.msra.mxu1 %v13187_v21  ;;  %v11358_v20 = vcombine.high %v7831_v10, %v7835_v12  ;;  %v11360_v21 = vcombine.high %v7832_v52, %v7836_v15 }
 0x72e   :  { %7706 = vmatprep.subr.bf16.mxu0 %v13192_v22  ;;  %7747 = vmatprep.subr.bf16.mxu1 %v13195_v28  ;;  %v7839_v22 = vld [vmem:[#allocation2 + $0x140] sm:$0xff] }
 0x72f   :  { %v7843_v28 = vld [vmem:[#allocation2 + $0x160] sm:$0xff] }
 0x731   :  { %7707 = vmatpush1.bf16.msra.mxu0 %v13190_v29  ;;  %7748 = vmatpush1.bf16.msra.mxu1 %v13193_v23  ;;  %v7840_v29 = vld [vmem:[#allocation2 + $0x148] sm:$0xff] }
 0x732   :  { %7708 = vmatprep.subr.bf16.mxu0 %v13198_v24  ;;  %7749 = vmatprep.subr.bf16.mxu1 %v13201_v13  ;;  %v7844_v23 = vld [vmem:[#allocation2 + $0x168] sm:$0xff]  ;;  %v11357_v24 = vcombine.low %v7831_v10, %v7835_v12  ;;  %v11359_v13 = vcombine.low %v7832_v52, %v7836_v15  ;;  %v7879_v10 = vld [vmem:[#allocation2 + $0x280] sm:$0xff] }
 0x733   :  { %v7883_v12 = vld [vmem:[#allocation2 + $0x2a0] sm:$0xff]  ;;  %v7880_v52 = vld [vmem:[#allocation2 + $0x288] sm:$0xff] }
 0x734   :  { %v7884_v15 = vld [vmem:[#allocation2 + $0x2a8] sm:$0xff] }
 0x735   :  { %7709 = vmatpush1.bf16.msra.mxu0 %v13196_v27  ;;  %7750 = vmatpush1.bf16.msra.mxu1 %v13199_v14  ;;  %v11366_v27 = vcombine.high %v7839_v22, %v7843_v28  ;;  %v11368_v14 = vcombine.high %v7840_v29, %v7844_v23 }
 0x736   :  { %7710 = vmatprep.subr.bf16.mxu0 %v13204_v51  ;;  %7751 = vmatprep.subr.bf16.mxu1 %v13207_v57  ;;  %v7847_v51 = vld [vmem:[#allocation2 + $0x180] sm:$0xff] }
 0x737   :  { %v7851_v57 = vld [vmem:[#allocation2 + $0x1a0] sm:$0xff] }
 0x738   :  { %v11374_v39 = vcombine.high %v7847_v51, %v7851_v57 }
 0x739   :  { %7711 = vmatpush1.bf16.msra.mxu0 %v13202_v34  ;;  %7752 = vmatpush1.bf16.msra.mxu1 %v13205_v35  ;;  %v7848_v34 = vld [vmem:[#allocation2 + $0x188] sm:$0xff] }
 0x73a   :  { %7712 = vmatprep.subr.bf16.mxu0 %v13210_v36  ;;  %7753 = vmatprep.subr.bf16.mxu1 %v13213_v37  ;;  %v7852_v35 = vld [vmem:[#allocation2 + $0x1a8] sm:$0xff]  ;;  %v11365_v36 = vcombine.low %v7839_v22, %v7843_v28  ;;  %v11367_v37 = vcombine.low %v7840_v29, %v7844_v23  ;;  %v7887_v22 = vld [vmem:[#allocation2 + $0x2c0] sm:$0xff] }
 0x73b   :  { %v11376_v43 = vcombine.high %v7848_v34, %v7852_v35  ;;  %v7891_v28 = vld [vmem:[#allocation2 + $0x2e0] sm:$0xff]  ;;  %v7888_v29 = vld [vmem:[#allocation2 + $0x2c8] sm:$0xff] }
 0x73c   :  { %v7892_v23 = vld [vmem:[#allocation2 + $0x2e8] sm:$0xff] }
 0x73d   :  { %7713 = vmatpush1.bf16.msra.mxu0 %v13208_v46  ;;  %7754 = vmatpush1.bf16.msra.mxu1 %v13211_v47  ;;  %v7856_v46 = vld [vmem:[#allocation2 + $0x1c8] sm:$0xff] }
 0x73e   :  { %9377 = vmatprep.subr.bf16.mxu0 %v11326_v48  ;;  %9459 = vmatprep.subr.bf16.mxu1 %v11328_v63  ;;  %v7860_v47 = vld [vmem:[#allocation2 + $0x1e8] sm:$0xff]  ;;  %v11373_v48 = vcombine.low %v7847_v51, %v7851_v57  ;;  %v11375_v63 = vcombine.low %v7848_v34, %v7852_v35  ;;  %v7895_v51 = vld [vmem:[#allocation2 + $0x300] sm:$0xff] }
 0x73f   :  { %v11384_v56 = vcombine.high %v7856_v46, %v7860_v47  ;;  %v7899_v57 = vld [vmem:[#allocation2 + $0x320] sm:$0xff]  ;;  %v7896_v34 = vld [vmem:[#allocation2 + $0x308] sm:$0xff] }
 0x740   :  { %7715 = vmatmul.mubr.bf16.vlgmr.msra.gmra.mrb[36].mxu0 %v16385_v30  ;;  %7756 = vmatmul.mubr.bf16.vlgmr.msra.gmra.mrb[36].mxu1 %v16387_v31  ;;  %v11350_v30 = vcombine.high %v7823_v5, %v7827_v6  ;;  %v11352_v31 = vcombine.high %v7824_v7, %v7828_v9  ;;  %v16577_v5 = vld [vmem:[#allocation2 + $0x408] sm:$0xff]  ;;  %v11389_v6 = vcombine.low %v7863_v58, %v7867_v60  ;;  %v7911_v58 = vld [vmem:[#allocation2 + $0x380] sm:$0xff] }
 0x741   :  { %9378 = vmatpush1.bf16.msra.mxu0 %v11325_v61  ;;  %9460 = vmatpush1.bf16.msra.mxu1 %v11327_v62  ;;  %v7864_v61 = vld [vmem:[#allocation2 + $0x208] sm:$0xff]  ;;  %v7915_v60 = vld [vmem:[#allocation2 + $0x3a0] sm:$0xff] }
 0x742   :  { %9379 = vmatprep.subr.bf16.mxu0 %v11334_v25  ;;  %9461 = vmatprep.subr.bf16.mxu1 %v11336_v8  ;;  %v7868_v62 = vld [vmem:[#allocation2 + $0x228] sm:$0xff]  ;;  %v11381_v25 = vcombine.low %v7855_v44, %v7859_v45  ;;  %v11383_v8 = vcombine.low %v7856_v46, %v7860_v47  ;;  %v7903_v44 = vld [vmem:[#allocation2 + $0x340] sm:$0xff] }
 0x743   :  { %v11392_v1 = vcombine.high %v7864_v61, %v7868_v62  ;;  %v16579_v7 = vld [vmem:[#allocation2 + $0x428] sm:$0xff]  ;;  %v11391_v9 = vcombine.low %v7864_v61, %v7868_v62  ;;  %v7907_v45 = vld [vmem:[#allocation2 + $0x360] sm:$0xff] }
 0x744   :  { %v7900_v35 = vld [vmem:[#allocation2 + $0x328] sm:$0xff] }
 0x745   :  { %9380 = vmatpush1.bf16.msra.mxu0 %v11333_v41  ;;  %9462 = vmatpush1.bf16.msra.mxu1 %v11335_v2  ;;  %v7872_v41 = vld [vmem:[#allocation2 + $0x248] sm:$0xff] }
 0x746   :  { %9381 = vmatprep.subr.bf16.mxu0 %v11342_v3  ;;  %9463 = vmatprep.subr.bf16.mxu1 %v11344_v4  ;;  %v7876_v2 = vld [vmem:[#allocation2 + $0x268] sm:$0xff]  ;;  %v16573_v3 = vld [vmem:[#allocation2 + $0x400] sm:$0xff] }
 0x747   :  { %v16575_v4 = vld [vmem:[#allocation2 + $0x420] sm:$0xff]  ;;  %v7904_v46 = vld [vmem:[#allocation2 + $0x348] sm:$0xff] }
 0x748   :  { %v7908_v47 = vld [vmem:[#allocation2 + $0x368] sm:$0xff] }
 0x749   :  { %9382 = vmatpush1.bf16.msra.mxu0 %v11341_v54  ;;  %9464 = vmatpush1.bf16.msra.mxu1 %v11343_v55  ;;  %v11453_v54 = vcombine.low %v16573_v3, %v16575_v4  ;;  %v11455_v55 = vcombine.low %v16577_v5, %v16579_v7  ;;  %v7912_v61 = vld [vmem:[#allocation2 + $0x388] sm:$0xff] }
 0x74a   :  { %9383 = vmatprep.subr.bf16.mxu0 %v11350_v30  ;;  %9465 = vmatprep.subr.bf16.mxu1 %v11352_v31  ;;  %v11398_v30 = vcombine.high %v7871_v59, %v7875_v40  ;;  %v11400_v31 = vcombine.high %v7872_v41, %v7876_v2  ;;  %v7916_v62 = vld [vmem:[#allocation2 + $0x3a8] sm:$0xff] }
 0x74d   :  { %9384 = vmatpush1.bf16.msra.mxu0 %v11349_v16  ;;  %9466 = vmatpush1.bf16.msra.mxu1 %v11351_v17  ;;  %v11397_v16 = vcombine.low %v7871_v59, %v7875_v40  ;;  %v11399_v17 = vcombine.low %v7872_v41, %v7876_v2  ;;  %v11438_v59 = vcombine.high %v7911_v58, %v7915_v60  ;;  %v7923_v40 = vld [vmem:[#allocation2 + $0x3e0] sm:$0xff]  ;;  %v7920_v41 = vld [vmem:[#allocation2 + $0x3c8] sm:$0xff] }
 0x74e   :  { %9385 = vmatprep.subr.bf16.mxu0 %v11358_v20  ;;  %9467 = vmatprep.subr.bf16.mxu1 %v11360_v21  ;;  %v11406_v20 = vcombine.high %v7879_v10, %v7883_v12  ;;  %v11408_v21 = vcombine.high %v7880_v52, %v7884_v15  ;;  %v7924_v2 = vld [vmem:[#allocation2 + $0x3e8] sm:$0xff] }
 0x751   :  { %9386 = vmatpush1.bf16.msra.mxu0 %v11357_v24  ;;  %9468 = vmatpush1.bf16.msra.mxu1 %v11359_v13  ;;  %v11405_v24 = vcombine.low %v7879_v10, %v7883_v12  ;;  %v11407_v13 = vcombine.low %v7880_v52, %v7884_v15  ;;  %v11447_v12 = vcombine.low %v7920_v41, %v7924_v2 }
 0x752   :  { %9387 = vmatprep.subr.bf16.mxu0 %v11366_v27  ;;  %9469 = vmatprep.subr.bf16.mxu1 %v11368_v14  ;;  %v11414_v27 = vcombine.high %v7887_v22, %v7891_v28  ;;  %v11416_v14 = vcombine.high %v7888_v29, %v7892_v23  ;;  %v11454_v52 = vcombine.high %v16573_v3, %v16575_v4 }
 0x753   :  { %v11456_v15 = vcombine.high %v16577_v5, %v16579_v7  ;;  %v7959_v5 = vld [vmem:[#allocation2 + $0x500] sm:$0xff] }
 0x754   :  { %v7963_v7 = vld [vmem:[#allocation2 + $0x520] sm:$0xff] }
 0x755   :  { %9388 = vmatpush1.bf16.msra.mxu0 %v11365_v36  ;;  %9470 = vmatpush1.bf16.msra.mxu1 %v11367_v37  ;;  %v11413_v36 = vcombine.low %v7887_v22, %v7891_v28  ;;  %v11415_v37 = vcombine.low %v7888_v29, %v7892_v23 }
 0x756   :  { %9389 = vmatprep.subr.bf16.mxu0 %v11374_v39  ;;  %9471 = vmatprep.subr.bf16.mxu1 %v11376_v43  ;;  %v11422_v39 = vcombine.high %v7895_v51, %v7899_v57  ;;  %v11424_v43 = vcombine.high %v7896_v34, %v7900_v35 }
 0x759   :  { %9390 = vmatpush1.bf16.msra.mxu0 %v11373_v48  ;;  %9472 = vmatpush1.bf16.msra.mxu1 %v11375_v63  ;;  %v11421_v48 = vcombine.low %v7895_v51, %v7899_v57  ;;  %v11423_v63 = vcombine.low %v7896_v34, %v7900_v35 }
 0x75a   :  { %9391 = vmatprep.subr.bf16.mxu0 %v11382_v11  ;;  %9473 = vmatprep.subr.bf16.mxu1 %v11384_v56  ;;  %v11430_v11 = vcombine.high %v7903_v44, %v7907_v45  ;;  %v11432_v56 = vcombine.high %v7904_v46, %v7908_v47 }
 0x75d   :  { %9392 = vmatpush1.bf16.msra.mxu0 %v11381_v25  ;;  %9474 = vmatpush1.bf16.msra.mxu1 %v11383_v8  ;;  %v11429_v25 = vcombine.low %v7903_v44, %v7907_v45  ;;  %v11431_v8 = vcombine.low %v7904_v46, %v7908_v47  ;;  %v7940_v44 = vld [vmem:[#allocation2 + $0x468] sm:$0xff] }
 0x75e   :  { %9393 = vmatprep.subr.bf16.mxu0 %v11390_v0  ;;  %9475 = vmatprep.subr.bf16.mxu1 %v11392_v1  ;;  %v11440_v0 = vcombine.high %v7912_v61, %v7916_v62  ;;  %v7919_v1 = vld [vmem:[#allocation2 + $0x3c0] sm:$0xff] }
 0x75f   :  { %v11445_v10 = vcombine.low %v7919_v1, %v7923_v40 }
 0x761   :  { %9394 = vmatpush1.bf16.msra.mxu0 %v11389_v6  ;;  %9476 = vmatpush1.bf16.msra.mxu1 %v11391_v9  ;;  %v11437_v6 = vcombine.low %v7911_v58, %v7915_v60  ;;  %v11439_v9 = vcombine.low %v7912_v61, %v7916_v62  ;;  %v7951_v62 = vld [vmem:[#allocation2 + $0x4c0] sm:$0xff] }
 0x762   :  { %9395 = vmatprep.subr.bf16.mxu0 %v11398_v30  ;;  %9477 = vmatprep.subr.bf16.mxu1 %v11400_v31  ;;  %v11446_v30 = vcombine.high %v7919_v1, %v7923_v40  ;;  %v11448_v31 = vcombine.high %v7920_v41, %v7924_v2  ;;  %v11486_v2 = vcombine.high %v7959_v5, %v7963_v7 }
 0x765   :  { %9396 = vmatpush1.bf16.msra.mxu0 %v11397_v16  ;;  %9478 = vmatpush1.bf16.msra.mxu1 %v11399_v17  ;;  %v16592_v16 = vld [vmem:[%s16662_s6 + $0x8] sm:$0xf] }
 0x766   :  { %9397 = vmatprep.subr.bf16.mxu0 %v11406_v20  ;;  %9479 = vmatprep.subr.bf16.mxu1 %v11408_v21  ;;  %v7774_v22 = vrot.slane %v16592_v16, %v14318_v32 }
 0x769   :  { %9398 = vmatpush1.bf16.msra.mxu0 %v11405_v24  ;;  %9480 = vmatpush1.bf16.msra.mxu1 %v11407_v13  ;;  %v7778_v24 = vrot.slane %v16592_v16, %v14321_v33 }
 0x76a   :  { %9399 = vmatprep.subr.bf16.mxu0 %v11414_v27  ;;  %9481 = vmatprep.subr.bf16.mxu1 %v11416_v14 }
 0x76d   :  { %9400 = vmatpush1.bf16.msra.mxu0 %v11413_v36  ;;  %9482 = vmatpush1.bf16.msra.mxu1 %v11415_v37  ;;  %v7935_v36 = vld [vmem:[#allocation2 + $0x440] sm:$0xff] }
 0x76e   :  { %9401 = vmatprep.subr.bf16.mxu0 %v11422_v39  ;;  %9483 = vmatprep.subr.bf16.mxu1 %v11424_v43  ;;  %v7939_v39 = vld [vmem:[#allocation2 + $0x460] sm:$0xff]  ;;  %v7936_v43 = vld [vmem:[#allocation2 + $0x448] sm:$0xff] }
 0x76f   :  { %v11462_v47 = vcombine.high %v7935_v36, %v7939_v39  ;;  %v11463_v58 = vcombine.low %v7936_v43, %v7940_v44 }
 0x771   :  { %9402 = vmatpush1.bf16.msra.mxu0 %v11421_v48  ;;  %9484 = vmatpush1.bf16.msra.mxu1 %v11423_v63  ;;  %v11464_v48 = vcombine.high %v7936_v43, %v7940_v44  ;;  %v7943_v63 = vld [vmem:[#allocation2 + $0x480] sm:$0xff]  ;;  %v7992_v44 = vld [vmem:[#allocation2 + $0x608] sm:$0xff] }
 0x772   :  { %9403 = vmatprep.subr.bf16.mxu0 %v11430_v11  ;;  %9485 = vmatprep.subr.bf16.mxu1 %v11432_v56  ;;  %v7944_v11 = vld [vmem:[#allocation2 + $0x488] sm:$0xff]  ;;  %v11461_v56 = vcombine.low %v7935_v36, %v7939_v39  ;;  %v7991_v39 = vld [vmem:[#allocation2 + $0x600] sm:$0xff] }
 0x773   :  { %v7995_v43 = vld [vmem:[#allocation2 + $0x620] sm:$0xff] }
 0x775   :  { %9404 = vmatpush1.bf16.msra.mxu0 %v11429_v25  ;;  %9486 = vmatpush1.bf16.msra.mxu1 %v11431_v8  ;;  %v7955_v25 = vld [vmem:[#allocation2 + $0x4e0] sm:$0xff]  ;;  %v7952_v8 = vld [vmem:[#allocation2 + $0x4c8] sm:$0xff] }
 0x776   :  { %9405 = vmatprep.subr.bf16.mxu0 %v11438_v59  ;;  %9487 = vmatprep.subr.bf16.mxu1 %v11440_v0  ;;  %v7956_v59 = vld [vmem:[#allocation2 + $0x4e8] sm:$0xff]  ;;  %v11478_v3 = vcombine.high %v7951_v62, %v7955_v25  ;;  %v11477_v40 = vcombine.low %v7951_v62, %v7955_v25 }
 0x777   :  { %v11480_v4 = vcombine.high %v7952_v8, %v7956_v59  ;;  %v11479_v41 = vcombine.low %v7952_v8, %v7956_v59  ;;  %v8007_v59 = vld [vmem:[#allocation2 + $0x680] sm:$0xff] }
 0x779   :  { %9406 = vmatpush1.bf16.msra.mxu0 %v11437_v6  ;;  %9488 = vmatpush1.bf16.msra.mxu1 %v11439_v9  ;;  %v7967_v9 = vld [vmem:[#allocation2 + $0x540] sm:$0xff] }
 0x77a   :  { %9407 = vmatprep.subr.bf16.mxu0 %v11446_v30  ;;  %9489 = vmatprep.subr.bf16.mxu1 %v11448_v31  ;;  %v7971_v30 = vld [vmem:[#allocation2 + $0x560] sm:$0xff]  ;;  %v7968_v31 = vld [vmem:[#allocation2 + $0x548] sm:$0xff] }
 0x77d   :  { %9408 = vmatpush1.bf16.msra.mxu0 %v11445_v10  ;;  %9490 = vmatpush1.bf16.msra.mxu1 %v11447_v12  ;;  %v7972_v10 = vld [vmem:[#allocation2 + $0x568] sm:$0xff]  ;;  %v11485_v12 = vcombine.low %v7959_v5, %v7963_v7 }
 0x77e   :  { %9418 = vmatprep.subr.bf16.mxu0 %v11454_v52  ;;  %9500 = vmatprep.subr.bf16.mxu1 %v11456_v15  ;;  %v11494_v15 = vcombine.high %v7967_v9, %v7971_v30 }
 0x7d3   :  { %v7634_v17 = vpop.f32.mrb[32].mxu0  ;;  %v7675_v20 = vpop.f32.mrb[32].mxu1 }
 0x7d4   :  { %v7676_v21 = vadd.f32 %v7675_v20, %v7634_v17  ;;  %v7636_v28 = vpop.f32.mrb[33].mxu0  ;;  %v7677_v29 = vpop.f32.mrb[33].mxu1  ;;  %v11496_v17 = vcombine.high %v7968_v31, %v7972_v10  ;;  %v7975_v20 = vld [vmem:[#allocation2 + $0x580] sm:$0xff] }
 0x7d5   :  { %v7678_v23 = vadd.f32 %v7677_v29, %v7636_v28  ;;  %v7638_v13 = vpop.f32.mrb[34].mxu0  ;;  %v7679_v27 = vpop.f32.mrb[34].mxu1  ;;  %v7980_v28 = vld [vmem:[#allocation2 + $0x5a8] sm:$0xff]  ;;  %v11493_v29 = vcombine.low %v7967_v9, %v7971_v30 }
 0x7d6   :  { %v7764_v14 = vadd.f32 %v7676_v21, %v15966_v18  ;;  %v7639_v51 = vpop.f32.mrb[35].mxu0  ;;  %v7680_v57 = vpop.f32.mrb[35].mxu1  ;;  %v7947_v18 = vld [vmem:[#allocation2 + $0x4a0] sm:$0xff] }
 0x7d7   :  { %v7765_v34 = vadd.f32 %v7678_v23, %v15968_v19  ;;  %v7948_v19 = vld [vmem:[#allocation2 + $0x4a8] sm:$0xff]  ;;  %v11470_v60 = vcombine.high %v7943_v63, %v7947_v18  ;;  %v11469_v0 = vcombine.low %v7943_v63, %v7947_v18  ;;  %v7979_v21 = vld [vmem:[#allocation2 + $0x5a0] sm:$0xff]  ;;  %v11495_v23 = vcombine.low %v7968_v31, %v7972_v10 }
 0x7d8   :  { %v7791_v35 = vadd.f32 %v7774_v22, %v7764_v14  ;;  %v11472_v61 = vcombine.high %v7944_v11, %v7948_v19  ;;  %v11471_v1 = vcombine.low %v7944_v11, %v7948_v19  ;;  %v7976_v22 = vld [vmem:[#allocation2 + $0x588] sm:$0xff]  ;;  %v7983_v27 = vld [vmem:[#allocation2 + $0x5c0] sm:$0xff]  ;;  %v11518_v18 = vcombine.high %v7991_v39, %v7995_v43 }
 0x7d9   :  { %v7792_v37 = vadd.f32 %v7778_v24, %v7765_v34  ;;  %v11502_v24 = vcombine.high %v7975_v20, %v7979_v21  ;;  %v11504_v13 = vcombine.high %v7976_v22, %v7980_v28  ;;  %v7987_v14 = vld [vmem:[#allocation2 + $0x5e0] sm:$0xff]  ;;  %v7984_v51 = vld [vmem:[#allocation2 + $0x5c8] sm:$0xff]  ;;  %v11501_v34 = vcombine.low %v7975_v20, %v7979_v21 }
 0x7da   :  { %v16602_v46 = vpack.c.bf16 %v7791_v35, %v7791_v35  ;;  %v7988_v57 = vld [vmem:[#allocation2 + $0x5e8] sm:$0xff]  ;;  %v11503_v35 = vcombine.low %v7976_v22, %v7980_v28  ;;  %v11510_v36 = vcombine.high %v7983_v27, %v7987_v14  ;;  %v7999_v19 = vld [vmem:[#allocation2 + $0x640] sm:$0xff] }
 0x7db   :  { %v16600_v45 = vpack.c.bf16 %v7792_v37, %v7792_v37  ;;  %v11512_v37 = vcombine.high %v7984_v51, %v7988_v57  ;;  %v11511_v63 = vcombine.low %v7984_v51, %v7988_v57  ;;  %v8023_v10 = vld [vmem:[#allocation2 + $0x700] sm:$0xff] }
 0x7dc   :  { %v8031_v28 = vld [vmem:[#allocation2 + $0x740] sm:$0xff] }
 0x7dd   :  { %9409 = vmatprep.mubr.bf16.mxu0 %v16600_v45  ;;  %9491 = vmatprep.mubr.bf16.mxu1 %v16600_v45  ;;  %v8039_v57 = vld [vmem:[#allocation2 + $0x780] sm:$0xff] }
 0x7de   :  { %9410 = vmatmul.mubr.bf16.vlgmr.msra.gmra.mrb[40].mxu0 %v16602_v46  ;;  %9492 = vmatmul.mubr.bf16.vlgmr.msra.gmra.mrb[40].mxu1 %v16602_v46 }
 0x7df   :  { %9419 = vmatpush1.bf16.msra.mxu0 %v11453_v54  ;;  %9501 = vmatpush1.bf16.msra.mxu1 %v11455_v55  ;;  %v7960_v54 = vld [vmem:[#allocation2 + $0x508] sm:$0xff] }
 0x7e0   :  { %9420 = vmatprep.subr.bf16.mxu0 %v11462_v47  ;;  %9502 = vmatprep.subr.bf16.mxu1 %v11464_v48  ;;  %v7964_v55 = vld [vmem:[#allocation2 + $0x528] sm:$0xff]  ;;  %v11509_v48 = vcombine.low %v7983_v27, %v7987_v14 }
 0x7e1   :  { %v11488_v6 = vcombine.high %v7960_v54, %v7964_v55  ;;  %v11487_v52 = vcombine.low %v7960_v54, %v7964_v55  ;;  %v7996_v47 = vld [vmem:[#allocation2 + $0x628] sm:$0xff]  ;;  %v8015_v55 = vld [vmem:[#allocation2 + $0x6c0] sm:$0xff] }
 0x7e2   :  { %v11520_v11 = vcombine.high %v7992_v44, %v7996_v47  ;;  %v11519_v62 = vcombine.low %v7992_v44, %v7996_v47  ;;  %v8047_v47 = vld [vmem:[#allocation2 + $0x7c0] sm:$0xff] }
 0x7e3   :  { %9421 = vmatpush1.bf16.msra.mxu0 %v11461_v56  ;;  %9503 = vmatpush1.bf16.msra.mxu1 %v11463_v58  ;;  %v8003_v56 = vld [vmem:[#allocation2 + $0x660] sm:$0xff]  ;;  %v8000_v58 = vld [vmem:[#allocation2 + $0x648] sm:$0xff] }
 0x7e4   :  { %9422 = vmatprep.subr.bf16.mxu0 %v11470_v60  ;;  %9504 = vmatprep.subr.bf16.mxu1 %v11472_v61  ;;  %v8004_v60 = vld [vmem:[#allocation2 + $0x668] sm:$0xff]  ;;  %v11517_v61 = vcombine.low %v7991_v39, %v7995_v43  ;;  %v11526_v25 = vcombine.high %v7999_v19, %v8003_v56 }
 0x7e5   :  { %v11528_v8 = vcombine.high %v8000_v58, %v8004_v60  ;;  %v11527_v5 = vcombine.low %v8000_v58, %v8004_v60 }
 0x7e7   :  { %9423 = vmatpush1.bf16.msra.mxu0 %v11469_v0  ;;  %9505 = vmatpush1.bf16.msra.mxu1 %v11471_v1  ;;  %v8011_v0 = vld [vmem:[#allocation2 + $0x6a0] sm:$0xff]  ;;  %v8008_v1 = vld [vmem:[#allocation2 + $0x688] sm:$0xff] }
 0x7e8   :  { %9424 = vmatprep.subr.bf16.mxu0 %v11478_v3  ;;  %9506 = vmatprep.subr.bf16.mxu1 %v11480_v4  ;;  %v8012_v3 = vld [vmem:[#allocation2 + $0x6a8] sm:$0xff]  ;;  %v11525_v4 = vcombine.low %v7999_v19, %v8003_v56  ;;  %v11534_v7 = vcombine.high %v8007_v59, %v8011_v0  ;;  %v7782_v56 = vrot.slane %v16592_v16, %v14491_v50 }
 0x7e9   :  { %v11536_v54 = vcombine.high %v8008_v1, %v8012_v3  ;;  %v11535_v9 = vcombine.low %v8008_v1, %v8012_v3  ;;  %v7786_v3 = vrot.slane %v16592_v16, %v14324_v26 }
 0x7eb   :  { %9425 = vmatpush1.bf16.msra.mxu0 %v11477_v40  ;;  %9507 = vmatpush1.bf16.msra.mxu1 %v11479_v41  ;;  %v8019_v40 = vld [vmem:[#allocation2 + $0x6e0] sm:$0xff]  ;;  %v8016_v41 = vld [vmem:[#allocation2 + $0x6c8] sm:$0xff] }
 0x7ec   :  { %9426 = vmatprep.subr.bf16.mxu0 %v11486_v2  ;;  %9508 = vmatprep.subr.bf16.mxu1 %v11488_v6  ;;  %v8020_v2 = vld [vmem:[#allocation2 + $0x6e8] sm:$0xff]  ;;  %v11533_v6 = vcombine.low %v8007_v59, %v8011_v0  ;;  %v11542_v30 = vcombine.high %v8015_v55, %v8019_v40  ;;  %v7801_v0 = vld [vmem:[#allocation2 + $0x10] sm:$0xff] }
 0x7ed   :  { %v11544_v31 = vcombine.high %v8016_v41, %v8020_v2  ;;  %v11543_v20 = vcombine.low %v8016_v41, %v8020_v2 }
 0x7ef   :  { %9427 = vmatpush1.bf16.msra.mxu0 %v11485_v12  ;;  %9509 = vmatpush1.bf16.msra.mxu1 %v11487_v52  ;;  %v8027_v12 = vld [vmem:[#allocation2 + $0x720] sm:$0xff]  ;;  %v8024_v52 = vld [vmem:[#allocation2 + $0x708] sm:$0xff] }
 0x7f0   :  { %9428 = vmatprep.subr.bf16.mxu0 %v11494_v15  ;;  %9510 = vmatprep.subr.bf16.mxu1 %v11496_v17  ;;  %v8028_v15 = vld [vmem:[#allocation2 + $0x728] sm:$0xff]  ;;  %v11541_v17 = vcombine.low %v8015_v55, %v8019_v40  ;;  %v11550_v21 = vcombine.high %v8023_v10, %v8027_v12  ;;  %v7806_v55 = vld [vmem:[#allocation2 + $0x38] sm:$0xff] }
 0x7f1   :  { %v11552_v22 = vcombine.high %v8024_v52, %v8028_v15  ;;  %v11551_v27 = vcombine.low %v8024_v52, %v8028_v15  ;;  %v7809_v52 = vld [vmem:[#allocation2 + $0x50] sm:$0xff] }
 0x7f2   :  { %v7813_v15 = vld [vmem:[#allocation2 + $0x70] sm:$0xff] }
 0x7f3   :  { %9429 = vmatpush1.bf16.msra.mxu0 %v11493_v29  ;;  %9511 = vmatpush1.bf16.msra.mxu1 %v11495_v23  ;;  %v8035_v29 = vld [vmem:[#allocation2 + $0x760] sm:$0xff]  ;;  %v8032_v23 = vld [vmem:[#allocation2 + $0x748] sm:$0xff] }
 0x7f4   :  { %9430 = vmatprep.subr.bf16.mxu0 %v11502_v24  ;;  %9512 = vmatprep.subr.bf16.mxu1 %v11504_v13  ;;  %v8036_v24 = vld [vmem:[#allocation2 + $0x768] sm:$0xff]  ;;  %v11549_v13 = vcombine.low %v8023_v10, %v8027_v12  ;;  %v11558_v14 = vcombine.high %v8031_v28, %v8035_v29 }
 0x7f5   :  { %v11560_v51 = vcombine.high %v8032_v23, %v8036_v24  ;;  %v11559_v39 = vcombine.low %v8032_v23, %v8036_v24  ;;  %v7817_v23 = vld [vmem:[#allocation2 + $0x90] sm:$0xff] }
 0x7f6   :  { %v7821_v24 = vld [vmem:[#allocation2 + $0xb0] sm:$0xff] }
 0x7f7   :  { %9431 = vmatpush1.bf16.msra.mxu0 %v11501_v34  ;;  %9513 = vmatpush1.bf16.msra.mxu1 %v11503_v35  ;;  %v8043_v34 = vld [vmem:[#allocation2 + $0x7a0] sm:$0xff]  ;;  %v8040_v35 = vld [vmem:[#allocation2 + $0x788] sm:$0xff] }
 0x7f8   :  { %9432 = vmatprep.subr.bf16.mxu0 %v11510_v36  ;;  %9514 = vmatprep.subr.bf16.mxu1 %v11512_v37  ;;  %v8044_v36 = vld [vmem:[#allocation2 + $0x7a8] sm:$0xff]  ;;  %v11557_v37 = vcombine.low %v8031_v28, %v8035_v29  ;;  %v11566_v43 = vcombine.high %v8039_v57, %v8043_v34  ;;  %v11565_v58 = vcombine.low %v8039_v57, %v8043_v34 }
 0x7f9   :  { %v11568_v44 = vcombine.high %v8040_v35, %v8044_v36  ;;  %v11567_v60 = vcombine.low %v8040_v35, %v8044_v36  ;;  %v11338_v28 = vcombine.high %v7809_v52, %v7813_v15  ;;  %v11346_v57 = vcombine.high %v7817_v23, %v7821_v24  ;;  %v7825_v35 = vld [vmem:[#allocation2 + $0xd0] sm:$0xff] }
 0x7fa   :  { %v7829_v36 = vld [vmem:[#allocation2 + $0xf0] sm:$0xff] }
 0x7fb   :  { %9433 = vmatpush1.bf16.msra.mxu0 %v11509_v48  ;;  %9515 = vmatpush1.bf16.msra.mxu1 %v11511_v63  ;;  %v8051_v48 = vld [vmem:[#allocation2 + $0x7e0] sm:$0xff]  ;;  %v8048_v63 = vld [vmem:[#allocation2 + $0x7c8] sm:$0xff] }
 0x7fc   :  { %9434 = vmatprep.subr.bf16.mxu0 %v11518_v18  ;;  %9516 = vmatprep.subr.bf16.mxu1 %v11520_v11  ;;  %v8052_v18 = vld [vmem:[#allocation2 + $0x7e8] sm:$0xff] }
 0x7fd   :  { %v11576_v59 = vcombine.high %v8048_v63, %v8052_v18 }
 0x7ff   :  { %9435 = vmatpush1.bf16.msra.mxu0 %v11517_v61  ;;  %9517 = vmatpush1.bf16.msra.mxu1 %v11519_v62 }
 0x800   :  { %9436 = vmatprep.subr.bf16.mxu0 %v11526_v25  ;;  %9518 = vmatprep.subr.bf16.mxu1 %v11528_v8  ;;  %v11574_v8 = vcombine.high %v8047_v47, %v8051_v48 }
 0x803   :  { %9437 = vmatpush1.bf16.msra.mxu0 %v11525_v4  ;;  %9519 = vmatpush1.bf16.msra.mxu1 %v11527_v5 }
 0x804   :  { %9438 = vmatprep.subr.bf16.mxu0 %v11534_v7  ;;  %9520 = vmatprep.subr.bf16.mxu1 %v11536_v54  ;;  %v7805_v7 = vld [vmem:[#allocation2 + $0x30] sm:$0xff]  ;;  %v7802_v54 = vld [vmem:[#allocation2 + $0x18] sm:$0xff] }
 0x805   :  { %v11330_v10 = vcombine.high %v7801_v0, %v7805_v7  ;;  %v11332_v16 = vcombine.high %v7802_v54, %v7806_v55 }
 0x807   :  { %9439 = vmatpush1.bf16.msra.mxu0 %v11533_v6  ;;  %9521 = vmatpush1.bf16.msra.mxu1 %v11535_v9  ;;  %v11573_v9 = vcombine.low %v8047_v47, %v8051_v48  ;;  %v11354_v47 = vcombine.high %v7825_v35, %v7829_v36 }
 0x808   :  { %9440 = vmatprep.subr.bf16.mxu0 %v11542_v30  ;;  %9522 = vmatprep.subr.bf16.mxu1 %v11544_v31  ;;  %v11575_v30 = vcombine.low %v8048_v63, %v8052_v18  ;;  %v7833_v63 = vld [vmem:[#allocation2 + $0x110] sm:$0xff] }
 0x809   :  { %v7837_v18 = vld [vmem:[#allocation2 + $0x130] sm:$0xff] }
 0x80b   :  { %9441 = vmatpush1.bf16.msra.mxu0 %v11541_v17  ;;  %9523 = vmatpush1.bf16.msra.mxu1 %v11543_v20  ;;  %v7810_v17 = vld [vmem:[#allocation2 + $0x58] sm:$0xff] }
 0x80c   :  { %9442 = vmatprep.subr.bf16.mxu0 %v11550_v21  ;;  %9524 = vmatprep.subr.bf16.mxu1 %v11552_v22  ;;  %v7814_v20 = vld [vmem:[#allocation2 + $0x78] sm:$0xff]  ;;  %v11331_v22 = vcombine.low %v7802_v54, %v7806_v55 }
 0x80d   :  { %v11340_v29 = vcombine.high %v7810_v17, %v7814_v20  ;;  %v7854_v54 = vld [vmem:[#allocation2 + $0x1b8] sm:$0xff] }
 0x80f   :  { %9443 = vmatpush1.bf16.msra.mxu0 %v11549_v13  ;;  %9525 = vmatpush1.bf16.msra.mxu1 %v11551_v27  ;;  %v7818_v13 = vld [vmem:[#allocation2 + $0x98] sm:$0xff] }
 0x810   :  { %9444 = vmatprep.subr.bf16.mxu0 %v11558_v14  ;;  %9526 = vmatprep.subr.bf16.mxu1 %v11560_v51  ;;  %v7822_v27 = vld [vmem:[#allocation2 + $0xb8] sm:$0xff]  ;;  %v11337_v14 = vcombine.low %v7809_v52, %v7813_v15  ;;  %v11339_v51 = vcombine.low %v7810_v17, %v7814_v20  ;;  %v7865_v15 = vld [vmem:[#allocation2 + $0x210] sm:$0xff] }
 0x811   :  { %v11348_v34 = vcombine.high %v7818_v13, %v7822_v27  ;;  %v7869_v17 = vld [vmem:[#allocation2 + $0x230] sm:$0xff]  ;;  %v7866_v20 = vld [vmem:[#allocation2 + $0x218] sm:$0xff] }
 0x813   :  { %v7716_v11 = vpop.f32.mrb[36].mxu0  ;;  %v7757_v19 = vpop.f32.mrb[36].mxu1  ;;  %9445 = vmatpush1.bf16.msra.mxu0 %v11557_v37  ;;  %9527 = vmatpush1.bf16.msra.mxu1 %v11559_v39  ;;  %v7826_v37 = vld [vmem:[#allocation2 + $0xd8] sm:$0xff] }
 0x814   :  { %v7758_v61 = vadd.f32 %v7757_v19, %v7716_v11  ;;  %v7718_v62 = vpop.f32.mrb[37].mxu0  ;;  %v7759_v25 = vpop.f32.mrb[37].mxu1  ;;  %9446 = vmatprep.subr.bf16.mxu0 %v11566_v43  ;;  %9528 = vmatprep.subr.bf16.mxu1 %v11568_v44  ;;  %v7830_v39 = vld [vmem:[#allocation2 + $0xf8] sm:$0xff]  ;;  %v11345_v43 = vcombine.low %v7817_v23, %v7821_v24  ;;  %v11347_v44 = vcombine.low %v7818_v13, %v7822_v27  ;;  %v7873_v24 = vld [vmem:[#allocation2 + $0x250] sm:$0xff] }
 0x815   :  { %v7760_v1 = vadd.f32 %v7759_v25, %v7718_v62  ;;  %v7720_v4 = vpop.f32.mrb[38].mxu0  ;;  %v7761_v5 = vpop.f32.mrb[38].mxu1  ;;  %v11356_v48 = vcombine.high %v7826_v37, %v7830_v39  ;;  %v7838_v11 = vld [vmem:[#allocation2 + $0x138] sm:$0xff]  ;;  %v11353_v19 = vcombine.low %v7825_v35, %v7829_v36  ;;  %v7845_v62 = vld [vmem:[#allocation2 + $0x170] sm:$0xff] }
 0x816   :  { %v7766_v40 = vadd.f32 %v7758_v61, %v16166_v53  ;;  %v7721_v41 = vpop.f32.mrb[39].mxu0  ;;  %v7762_v2 = vpop.f32.mrb[39].mxu1  ;;  %v11329_v53 = vcombine.low %v7801_v0, %v7805_v7  ;;  %v7841_v61 = vld [vmem:[#allocation2 + $0x150] sm:$0xff]  ;;  %v7842_v25 = vld [vmem:[#allocation2 + $0x158] sm:$0xff] }
 0x817   :  { %v7767_v6 = vadd.f32 %v7760_v1, %v16174_v38  ;;  %9447 = vmatpush1.bf16.msra.mxu0 %v11565_v58  ;;  %9529 = vmatpush1.bf16.msra.mxu1 %v11567_v60  ;;  %v11362_v58 = vcombine.high %v7833_v63, %v7837_v18  ;;  %v11370_v1 = vcombine.high %v7841_v61, %v7845_v62  ;;  %v7849_v4 = vld [vmem:[#allocation2 + $0x190] sm:$0xff]  ;;  %v7850_v7 = vld [vmem:[#allocation2 + $0x198] sm:$0xff] }
 0x818   :  { %v7793_v31 = vadd.f32 %v7782_v56, %v7766_v40  ;;  %9448 = vmatprep.subr.bf16.mxu0 %v11574_v8  ;;  %9530 = vmatprep.subr.bf16.mxu1 %v11576_v59  ;;  %v11355_v56 = vcombine.low %v7826_v37, %v7830_v39  ;;  %v7846_v8 = vld [vmem:[#allocation2 + $0x178] sm:$0xff]  ;;  %v11361_v59 = vcombine.low %v7833_v63, %v7837_v18  ;;  %v7853_v5 = vld [vmem:[#allocation2 + $0x1b0] sm:$0xff] }
 0x819   :  { %v7794_v12 = vadd.f32 %v7786_v3, %v7767_v6  ;;  %v11372_v3 = vcombine.high %v7842_v25, %v7846_v8  ;;  %v11369_v55 = vcombine.low %v7841_v61, %v7845_v62  ;;  %v11371_v40 = vcombine.low %v7842_v25, %v7846_v8  ;;  %v7857_v6 = vld [vmem:[#allocation2 + $0x1d0] sm:$0xff]  ;;  %v7874_v27 = vld [vmem:[#allocation2 + $0x258] sm:$0xff] }
 0x81a   :  { %v16622_v38 = vpack.c.bf16 %v7793_v31, %v7793_v31  ;;  %v11378_v41 = vcombine.high %v7849_v4, %v7853_v5  ;;  %v11380_v2 = vcombine.high %v7850_v7, %v7854_v54  ;;  %v7862_v31 = vld [vmem:[#allocation2 + $0x1f8] sm:$0xff]  ;;  %v7877_v13 = vld [vmem:[#allocation2 + $0x270] sm:$0xff] }
 0x81b   :  { %v16620_v21 = vpack.c.bf16 %v7794_v12, %v7794_v12  ;;  %9449 = vmatpush1.bf16.msra.mxu0 %v11573_v9  ;;  %9531 = vmatpush1.bf16.msra.mxu1 %v11575_v30  ;;  %v7861_v9 = vld [vmem:[#allocation2 + $0x1f0] sm:$0xff]  ;;  %v7858_v30 = vld [vmem:[#allocation2 + $0x1d8] sm:$0xff] }
 0x81c   :  { %9541 = vmatprep.subr.bf16.mxu0 %v11330_v10  ;;  %9623 = vmatprep.subr.bf16.mxu1 %v11332_v16  ;;  %v11377_v10 = vcombine.low %v7849_v4, %v7853_v5  ;;  %v11379_v16 = vcombine.low %v7850_v7, %v7854_v54  ;;  %v11386_v12 = vcombine.high %v7857_v6, %v7861_v9  ;;  %v7881_v36 = vld [vmem:[#allocation2 + $0x290] sm:$0xff]  ;;  %v7882_v39 = vld [vmem:[#allocation2 + $0x298] sm:$0xff] }
 0x81d   :  { %9450 = vmatprep.mubr.bf16.mxu0 %v16620_v21  ;;  %9532 = vmatprep.mubr.bf16.mxu1 %v16620_v21  ;;  %v11388_v52 = vcombine.high %v7858_v30, %v7862_v31  ;;  %v7885_v37 = vld [vmem:[#allocation2 + $0x2b0] sm:$0xff]  ;;  %v7898_v8 = vld [vmem:[#allocation2 + $0x318] sm:$0xff] }
 0x81e   :  { %9451 = vmatmul.mubr.bf16.vlgmr.msra.gmra.mrb[40].mxu0 %v16622_v38  ;;  %9533 = vmatmul.mubr.bf16.vlgmr.msra.gmra.mrb[40].mxu1 %v16622_v38  ;;  %v7889_v18 = vld [vmem:[#allocation2 + $0x2d0] sm:$0xff]  ;;  %v7906_v54 = vld [vmem:[#allocation2 + $0x358] sm:$0xff] }
 0x81f   :  { %9542 = vmatpush1.bf16.msra.mxu0 %v11329_v53  ;;  %9573 = vmatprep.mubr.bf16.mxu0 %v16600_v45  ;;  %v7870_v53 = vld [vmem:[#allocation2 + $0x238] sm:$0xff]  ;;  %v7897_v62 = vld [vmem:[#allocation2 + $0x310] sm:$0xff] }
 0x820   :  { %9624 = vmatpush1.bf16.msra.mxu1 %v11331_v22  ;;  %9655 = vmatprep.mubr.bf16.mxu1 %v16600_v45  ;;  %v7834_v45 = vld [vmem:[#allocation2 + $0x118] sm:$0xff]  ;;  %v11385_v22 = vcombine.low %v7857_v6, %v7861_v9  ;;  %v11396_v23 = vcombine.high %v7866_v20, %v7870_v53  ;;  %v7901_v25 = vld [vmem:[#allocation2 + $0x330] sm:$0xff] }
 0x821   :  { %9543 = vmatprep.subr.bf16.mxu0 %v11338_v28  ;;  %9625 = vmatprep.subr.bf16.mxu1 %v11340_v29  ;;  %v11364_v60 = vcombine.high %v7834_v45, %v7838_v11  ;;  %v11363_v0 = vcombine.low %v7834_v45, %v7838_v11  ;;  %v11387_v28 = vcombine.low %v7858_v30, %v7862_v31  ;;  %v7893_v45 = vld [vmem:[#allocation2 + $0x2f0] sm:$0xff]  ;;  %v7890_v11 = vld [vmem:[#allocation2 + $0x2d8] sm:$0xff] }
 0x822   :  { %v11394_v29 = vcombine.high %v7865_v15, %v7869_v17  ;;  %v7905_v5 = vld [vmem:[#allocation2 + $0x350] sm:$0xff]  ;;  %v7914_v31 = vld [vmem:[#allocation2 + $0x398] sm:$0xff] }
 0x823   :  { %9544 = vmatpush1.bf16.msra.mxu0 %v11337_v14  ;;  %v7878_v14 = vld [vmem:[#allocation2 + $0x278] sm:$0xff]  ;;  %v7909_v7 = vld [vmem:[#allocation2 + $0x370] sm:$0xff] }
 0x824   :  { %9626 = vmatpush1.bf16.msra.mxu1 %v11339_v51  ;;  %9545 = vmatprep.subr.bf16.mxu0 %v11346_v57  ;;  %v11393_v51 = vcombine.low %v7865_v15, %v7869_v17  ;;  %v11395_v57 = vcombine.low %v7866_v20, %v7870_v53  ;;  %v11404_v35 = vcombine.high %v7874_v27, %v7878_v14  ;;  %v7913_v9 = vld [vmem:[#allocation2 + $0x390] sm:$0xff]  ;;  %v7922_v53 = vld [vmem:[#allocation2 + $0x3d8] sm:$0xff] }
 0x825   :  { %9627 = vmatprep.subr.bf16.mxu1 %v11348_v34  ;;  %v11402_v34 = vcombine.high %v7873_v24, %v7877_v13  ;;  %v7917_v30 = vld [vmem:[#allocation2 + $0x3b0] sm:$0xff] }
 0x826   :  { %v7921_v17 = vld [vmem:[#allocation2 + $0x3d0] sm:$0xff] }
 0x827   :  { %9546 = vmatpush1.bf16.msra.mxu0 %v11345_v43  ;;  %v7886_v43 = vld [vmem:[#allocation2 + $0x2b8] sm:$0xff]  ;;  %v7925_v20 = vld [vmem:[#allocation2 + $0x3f0] sm:$0xff] }
 0x828   :  { %9628 = vmatpush1.bf16.msra.mxu1 %v11347_v44  ;;  %9547 = vmatprep.subr.bf16.mxu0 %v11354_v47  ;;  %v11401_v44 = vcombine.low %v7873_v24, %v7877_v13  ;;  %v11403_v47 = vcombine.low %v7874_v27, %v7878_v14  ;;  %v11412_v63 = vcombine.high %v7882_v39, %v7886_v43  ;;  %v7929_v13 = vld [vmem:[#allocation2 + $0x410] sm:$0xff]  ;;  %v7930_v14 = vld [vmem:[#allocation2 + $0x418] sm:$0xff] }
 0x829   :  { %9629 = vmatprep.subr.bf16.mxu1 %v11356_v48  ;;  %v11410_v48 = vcombine.high %v7881_v36, %v7885_v37  ;;  %v7933_v27 = vld [vmem:[#allocation2 + $0x430] sm:$0xff] }
 0x82b   :  { %9548 = vmatpush1.bf16.msra.mxu0 %v11353_v19  ;;  %v7894_v19 = vld [vmem:[#allocation2 + $0x2f8] sm:$0xff] }
 0x82c   :  { %9630 = vmatpush1.bf16.msra.mxu1 %v11355_v56  ;;  %9549 = vmatprep.subr.bf16.mxu0 %v11362_v58  ;;  %v11409_v56 = vcombine.low %v7881_v36, %v7885_v37  ;;  %v11411_v58 = vcombine.low %v7882_v39, %v7886_v43  ;;  %v11420_v61 = vcombine.high %v7890_v11, %v7894_v19  ;;  %v7937_v37 = vld [vmem:[#allocation2 + $0x450] sm:$0xff] }
 0x82d   :  { %9631 = vmatprep.subr.bf16.mxu1 %v11364_v60  ;;  %v11418_v60 = vcombine.high %v7889_v18, %v7893_v45  ;;  %v7941_v39 = vld [vmem:[#allocation2 + $0x470] sm:$0xff]  ;;  %v11457_v43 = vcombine.low %v7929_v13, %v7933_v27 }
 0x82f   :  { %9550 = vmatpush1.bf16.msra.mxu0 %v11361_v59  ;;  %v7902_v59 = vld [vmem:[#allocation2 + $0x338] sm:$0xff] }
 0x830   :  { %9632 = vmatpush1.bf16.msra.mxu1 %v11363_v0  ;;  %9551 = vmatprep.subr.bf16.mxu0 %v11370_v1  ;;  %v11417_v0 = vcombine.low %v7889_v18, %v7893_v45  ;;  %v11419_v1 = vcombine.low %v7890_v11, %v7894_v19  ;;  %v11428_v4 = vcombine.high %v7898_v8, %v7902_v59  ;;  %v7945_v18 = vld [vmem:[#allocation2 + $0x490] sm:$0xff]  ;;  %v7946_v19 = vld [vmem:[#allocation2 + $0x498] sm:$0xff] }
 0x831   :  { %9633 = vmatprep.subr.bf16.mxu1 %v11372_v3  ;;  %v11426_v3 = vcombine.high %v7897_v62, %v7901_v25  ;;  %v7949_v45 = vld [vmem:[#allocation2 + $0x4b0] sm:$0xff] }
 0x833   :  { %9552 = vmatpush1.bf16.msra.mxu0 %v11369_v55  ;;  %v7910_v55 = vld [vmem:[#allocation2 + $0x378] sm:$0xff] }
 0x834   :  { %9634 = vmatpush1.bf16.msra.mxu1 %v11371_v40  ;;  %9553 = vmatprep.subr.bf16.mxu0 %v11378_v41  ;;  %v11425_v40 = vcombine.low %v7897_v62, %v7901_v25  ;;  %v11427_v41 = vcombine.low %v7898_v8, %v7902_v59  ;;  %v11436_v6 = vcombine.high %v7906_v54, %v7910_v55  ;;  %v7953_v25 = vld [vmem:[#allocation2 + $0x4d0] sm:$0xff]  ;;  %v7954_v59 = vld [vmem:[#allocation2 + $0x4d8] sm:$0xff] }
 0x835   :  { %9635 = vmatprep.subr.bf16.mxu1 %v11380_v2  ;;  %v11434_v2 = vcombine.high %v7905_v5, %v7909_v7  ;;  %v7957_v8 = vld [vmem:[#allocation2 + $0x4f0] sm:$0xff] }
 0x837   :  { %9554 = vmatpush1.bf16.msra.mxu0 %v11377_v10  ;;  %v7918_v10 = vld [vmem:[#allocation2 + $0x3b8] sm:$0xff] }
 0x838   :  { %9636 = vmatpush1.bf16.msra.mxu1 %v11379_v16  ;;  %9555 = vmatprep.subr.bf16.mxu0 %v11386_v12  ;;  %v11433_v16 = vcombine.low %v7905_v5, %v7909_v7  ;;  %v11435_v12 = vcombine.low %v7906_v54, %v7910_v55  ;;  %v11444_v15 = vcombine.high %v7914_v31, %v7918_v10  ;;  %v7961_v5 = vld [vmem:[#allocation2 + $0x510] sm:$0xff]  ;;  %v7962_v54 = vld [vmem:[#allocation2 + $0x518] sm:$0xff] }
 0x839   :  { %9637 = vmatprep.subr.bf16.mxu1 %v11388_v52  ;;  %v11442_v52 = vcombine.high %v7913_v9, %v7917_v30  ;;  %v7965_v7 = vld [vmem:[#allocation2 + $0x530] sm:$0xff]  ;;  %v7966_v55 = vld [vmem:[#allocation2 + $0x538] sm:$0xff] }
 0x83b   :  { %9556 = vmatpush1.bf16.msra.mxu0 %v11385_v22  ;;  %v7926_v22 = vld [vmem:[#allocation2 + $0x3f8] sm:$0xff] }
 0x83c   :  { %9638 = vmatpush1.bf16.msra.mxu1 %v11387_v28  ;;  %9557 = vmatprep.subr.bf16.mxu0 %v11394_v29  ;;  %v11441_v28 = vcombine.low %v7913_v9, %v7917_v30  ;;  %v11443_v29 = vcombine.low %v7914_v31, %v7918_v10  ;;  %v11452_v24 = vcombine.high %v7922_v53, %v7926_v22  ;;  %v7973_v9 = vld [vmem:[#allocation2 + $0x570] sm:$0xff]  ;;  %v7970_v30 = vld [vmem:[#allocation2 + $0x558] sm:$0xff] }
 0x83d   :  { %9639 = vmatprep.subr.bf16.mxu1 %v11396_v23  ;;  %v11450_v23 = vcombine.high %v7921_v17, %v7925_v20  ;;  %v7974_v31 = vld [vmem:[#allocation2 + $0x578] sm:$0xff]  ;;  %v11489_v10 = vcombine.low %v7961_v5, %v7965_v7 }
 0x83f   :  { %9558 = vmatpush1.bf16.msra.mxu0 %v11393_v51  ;;  %v7934_v51 = vld [vmem:[#allocation2 + $0x438] sm:$0xff] }
 0x840   :  { %9640 = vmatpush1.bf16.msra.mxu1 %v11395_v57  ;;  %9559 = vmatprep.subr.bf16.mxu0 %v11402_v34  ;;  %v11449_v57 = vcombine.low %v7921_v17, %v7925_v20  ;;  %v11451_v34 = vcombine.low %v7922_v53, %v7926_v22  ;;  %v11460_v36 = vcombine.high %v7930_v14, %v7934_v51  ;;  %v7981_v17 = vld [vmem:[#allocation2 + $0x5b0] sm:$0xff]  ;;  %v7978_v20 = vld [vmem:[#allocation2 + $0x598] sm:$0xff] }
 0x841   :  { %9641 = vmatprep.subr.bf16.mxu1 %v11404_v35  ;;  %v11458_v35 = vcombine.high %v7929_v13, %v7933_v27  ;;  %v7982_v53 = vld [vmem:[#allocation2 + $0x5b8] sm:$0xff]  ;;  %v7989_v13 = vld [vmem:[#allocation2 + $0x5f0] sm:$0xff] }
 0x842   :  { %v7986_v27 = vld [vmem:[#allocation2 + $0x5d8] sm:$0xff] }
 0x843   :  { %9560 = vmatpush1.bf16.msra.mxu0 %v11401_v44  ;;  %v7938_v44 = vld [vmem:[#allocation2 + $0x458] sm:$0xff] }
 0x844   :  { %9642 = vmatpush1.bf16.msra.mxu1 %v11403_v47  ;;  %9561 = vmatprep.subr.bf16.mxu0 %v11410_v48  ;;  %v7942_v47 = vld [vmem:[#allocation2 + $0x478] sm:$0xff]  ;;  %v11459_v48 = vcombine.low %v7930_v14, %v7934_v51 }
 0x845   :  { %9643 = vmatprep.subr.bf16.mxu1 %v11412_v63  ;;  %v11466_v63 = vcombine.high %v7937_v37, %v7941_v39  ;;  %v11468_v11 = vcombine.high %v7938_v44, %v7942_v47  ;;  %v7990_v14 = vld [vmem:[#allocation2 + $0x5f8] sm:$0xff] }
 0x847   :  { %9562 = vmatpush1.bf16.msra.mxu0 %v11409_v56  ;;  %v7950_v56 = vld [vmem:[#allocation2 + $0x4b8] sm:$0xff] }
 0x848   :  { %9644 = vmatpush1.bf16.msra.mxu1 %v11411_v58  ;;  %9563 = vmatprep.subr.bf16.mxu0 %v11418_v60  ;;  %v11465_v58 = vcombine.low %v7937_v37, %v7941_v39  ;;  %v11467_v60 = vcombine.low %v7938_v44, %v7942_v47  ;;  %v11476_v62 = vcombine.high %v7946_v19, %v7950_v56  ;;  %v7997_v37 = vld [vmem:[#allocation2 + $0x630] sm:$0xff]  ;;  %v7994_v39 = vld [vmem:[#allocation2 + $0x618] sm:$0xff] }
 0x849   :  { %9645 = vmatprep.subr.bf16.mxu1 %v11420_v61  ;;  %v11474_v61 = vcombine.high %v7945_v18, %v7949_v45  ;;  %v11515_v47 = vcombine.low %v7986_v27, %v7990_v14 }
 0x84b   :  { %9564 = vmatpush1.bf16.msra.mxu0 %v11417_v0  ;;  %v7958_v0 = vld [vmem:[#allocation2 + $0x4f8] sm:$0xff] }
 0x84c   :  { %9646 = vmatpush1.bf16.msra.mxu1 %v11419_v1  ;;  %9565 = vmatprep.subr.bf16.mxu0 %v11426_v3  ;;  %v11473_v1 = vcombine.low %v7945_v18, %v7949_v45  ;;  %v11482_v3 = vcombine.high %v7953_v25, %v7957_v8  ;;  %v8001_v18 = vld [vmem:[#allocation2 + $0x650] sm:$0xff] }
 0x84d   :  { %9647 = vmatprep.subr.bf16.mxu1 %v11428_v4  ;;  %v11484_v4 = vcombine.high %v7954_v59, %v7958_v0  ;;  %v8005_v45 = vld [vmem:[#allocation2 + $0x670] sm:$0xff] }
 0x84f   :  { %9566 = vmatpush1.bf16.msra.mxu0 %v11425_v40  ;;  %v11483_v40 = vcombine.low %v7954_v59, %v7958_v0  ;;  %v8014_v59 = vld [vmem:[#allocation2 + $0x6b8] sm:$0xff]  ;;  %v11529_v0 = vcombine.low %v8001_v18, %v8005_v45 }
 0x850   :  { %9648 = vmatpush1.bf16.msra.mxu1 %v11427_v41  ;;  %9567 = vmatprep.subr.bf16.mxu0 %v11434_v2  ;;  %v11490_v41 = vcombine.high %v7961_v5, %v7965_v7  ;;  %v11492_v2 = vcombine.high %v7962_v54, %v7966_v55  ;;  %v8021_v5 = vld [vmem:[#allocation2 + $0x6f0] sm:$0xff]  ;;  %v8018_v7 = vld [vmem:[#allocation2 + $0x6d8] sm:$0xff] }
 0x851   :  { %9649 = vmatprep.subr.bf16.mxu1 %v11436_v6  ;;  %v7969_v6 = vld [vmem:[#allocation2 + $0x550] sm:$0xff] }
 0x852   :  { %v11497_v22 = vcombine.low %v7969_v6, %v7973_v9 }
 0x853   :  { %9568 = vmatpush1.bf16.msra.mxu0 %v11433_v16  ;;  %v11491_v16 = vcombine.low %v7962_v54, %v7966_v55  ;;  %v8022_v54 = vld [vmem:[#allocation2 + $0x6f8] sm:$0xff] }
 0x854   :  { %9650 = vmatpush1.bf16.msra.mxu1 %v11435_v12  ;;  %9569 = vmatprep.subr.bf16.mxu0 %v11442_v52  ;;  %v11498_v12 = vcombine.high %v7969_v6, %v7973_v9  ;;  %v11500_v52 = vcombine.high %v7970_v30, %v7974_v31  ;;  %v8029_v6 = vld [vmem:[#allocation2 + $0x730] sm:$0xff]  ;;  %v8026_v9 = vld [vmem:[#allocation2 + $0x718] sm:$0xff] }
 0x855   :  { %9651 = vmatprep.subr.bf16.mxu1 %v11444_v15  ;;  %v7977_v15 = vld [vmem:[#allocation2 + $0x590] sm:$0xff] }
 0x856   :  { %v11505_v51 = vcombine.low %v7977_v15, %v7981_v17 }
 0x857   :  { %9570 = vmatpush1.bf16.msra.mxu0 %v11441_v28  ;;  %v11499_v28 = vcombine.low %v7970_v30, %v7974_v31  ;;  %v8030_v30 = vld [vmem:[#allocation2 + $0x738] sm:$0xff] }
 0x858   :  { %9652 = vmatpush1.bf16.msra.mxu1 %v11443_v29  ;;  %9571 = vmatprep.subr.bf16.mxu0 %v11450_v23  ;;  %v11506_v29 = vcombine.high %v7977_v15, %v7981_v17  ;;  %v11508_v23 = vcombine.high %v7978_v20, %v7982_v53  ;;  %v8037_v15 = vld [vmem:[#allocation2 + $0x770] sm:$0xff]  ;;  %v8034_v17 = vld [vmem:[#allocation2 + $0x758] sm:$0xff] }
 0x859   :  { %9653 = vmatprep.subr.bf16.mxu1 %v11452_v24  ;;  %v7985_v24 = vld [vmem:[#allocation2 + $0x5d0] sm:$0xff] }
 0x85a   :  { %v11513_v44 = vcombine.low %v7985_v24, %v7989_v13 }
 0x85b   :  { %9572 = vmatpush1.bf16.msra.mxu0 %v11449_v57  ;;  %v11507_v57 = vcombine.low %v7978_v20, %v7982_v53  ;;  %v8038_v20 = vld [vmem:[#allocation2 + $0x778] sm:$0xff] }
 0x85c   :  { %9654 = vmatpush1.bf16.msra.mxu1 %v11451_v34  ;;  %9582 = vmatprep.subr.bf16.mxu0 %v11458_v35  ;;  %v11514_v34 = vcombine.high %v7985_v24, %v7989_v13  ;;  %v11516_v35 = vcombine.high %v7986_v27, %v7990_v14  ;;  %v8045_v24 = vld [vmem:[#allocation2 + $0x7b0] sm:$0xff]  ;;  %v8042_v13 = vld [vmem:[#allocation2 + $0x798] sm:$0xff] }
 0x85d   :  { %9664 = vmatprep.subr.bf16.mxu1 %v11460_v36  ;;  %v7993_v36 = vld [vmem:[#allocation2 + $0x610] sm:$0xff]  ;;  %v8046_v27 = vld [vmem:[#allocation2 + $0x7b8] sm:$0xff] }
 0x85e   :  { %9574 = vmatmul.mubr.bf16.vlgmr.msra.gmra.mrb[44].mxu0 %v16602_v46 }
 0x85f   :  { %9656 = vmatmul.mubr.bf16.vlgmr.msra.gmra.mrb[44].mxu1 %v16602_v46  ;;  %9583 = vmatpush1.bf16.msra.mxu0 %v11457_v43  ;;  %v11475_v46 = vcombine.low %v7946_v19, %v7950_v56  ;;  %v7998_v43 = vld [vmem:[#allocation2 + $0x638] sm:$0xff]  ;;  %v11521_v56 = vcombine.low %v7993_v36, %v7997_v37 }
 0x860   :  { %9614 = vmatprep.mubr.bf16.mxu0 %v16620_v21  ;;  %9665 = vmatpush1.bf16.msra.mxu1 %v11459_v48  ;;  %v11522_v48 = vcombine.high %v7993_v36, %v7997_v37  ;;  %v8006_v19 = vld [vmem:[#allocation2 + $0x678] sm:$0xff]  ;;  %v8053_v36 = vld [vmem:[#allocation2 + $0x7f0] sm:$0xff] }
 0x861   :  { %9696 = vmatprep.mubr.bf16.mxu1 %v16620_v21  ;;  %9584 = vmatprep.subr.bf16.mxu0 %v11466_v63  ;;  %v11481_v21 = vcombine.low %v7953_v25, %v7957_v8  ;;  %v11524_v63 = vcombine.high %v7994_v39, %v7998_v43  ;;  %v8013_v25 = vld [vmem:[#allocation2 + $0x6b0] sm:$0xff]  ;;  %v8010_v8 = vld [vmem:[#allocation2 + $0x698] sm:$0xff] }
 0x862   :  { %9666 = vmatprep.subr.bf16.mxu1 %v11468_v11  ;;  %v8002_v11 = vld [vmem:[#allocation2 + $0x658] sm:$0xff] }
 0x863   :  { %9585 = vmatpush1.bf16.msra.mxu0 %v11465_v58  ;;  %v11523_v58 = vcombine.low %v7994_v39, %v7998_v43  ;;  %v8050_v37 = vld [vmem:[#allocation2 + $0x7d8] sm:$0xff] }
 0x864   :  { %9667 = vmatpush1.bf16.msra.mxu1 %v11467_v60  ;;  %9586 = vmatprep.subr.bf16.mxu0 %v11474_v61  ;;  %v11530_v60 = vcombine.high %v8001_v18, %v8005_v45  ;;  %v11532_v61 = vcombine.high %v8002_v11, %v8006_v19  ;;  %v8054_v39 = vld [vmem:[#allocation2 + $0x7f8] sm:$0xff]  ;;  %v8055_v45 = vld [vmem:[%s16664_s8] sm:$0xff] }
 0x865   :  { %9668 = vmatprep.subr.bf16.mxu1 %v11476_v62  ;;  %v8009_v62 = vld [vmem:[#allocation2 + $0x690] sm:$0xff]  ;;  %v11579_v18 = vcombine.low %v8050_v37, %v8054_v39 }
 0x866   :  { %v11537_v55 = vcombine.low %v8009_v62, %v8013_v25 }
 0x867   :  { %9587 = vmatpush1.bf16.msra.mxu0 %v11473_v1  ;;  %v11531_v1 = vcombine.low %v8002_v11, %v8006_v19  ;;  %v8060_v11 = vrot.slane %v8055_v45, %v14318_v32  ;;  %v8068_v19 = vrot.slane %v8055_v45, %v14491_v50 }
 0x868   :  { %9669 = vmatpush1.bf16.msra.mxu1 %v11475_v46  ;;  %9588 = vmatprep.subr.bf16.mxu0 %v11482_v3  ;;  %v11538_v46 = vcombine.high %v8009_v62, %v8013_v25  ;;  %v11540_v3 = vcombine.high %v8010_v8, %v8014_v59 }
 0x869   :  { %9670 = vmatprep.subr.bf16.mxu1 %v11484_v4  ;;  %v8017_v4 = vld [vmem:[#allocation2 + $0x6d0] sm:$0xff] }
 0x86a   :  { %v11545_v31 = vcombine.low %v8017_v4, %v8021_v5 }
 0x86b   :  { %9589 = vmatpush1.bf16.msra.mxu0 %v11481_v21  ;;  %v11539_v21 = vcombine.low %v8010_v8, %v8014_v59 }
 0x86c   :  { %9671 = vmatpush1.bf16.msra.mxu1 %v11483_v40  ;;  %9590 = vmatprep.subr.bf16.mxu0 %v11490_v41  ;;  %v11546_v40 = vcombine.high %v8017_v4, %v8021_v5  ;;  %v11548_v41 = vcombine.high %v8018_v7, %v8022_v54 }
 0x86d   :  { %9672 = vmatprep.subr.bf16.mxu1 %v11492_v2  ;;  %v8025_v2 = vld [vmem:[#allocation2 + $0x710] sm:$0xff] }
 0x86e   :  { %v11553_v53 = vcombine.low %v8025_v2, %v8029_v6 }
 0x86f   :  { %9591 = vmatpush1.bf16.msra.mxu0 %v11489_v10  ;;  %v11547_v10 = vcombine.low %v8018_v7, %v8022_v54 }
 0x870   :  { %9673 = vmatpush1.bf16.msra.mxu1 %v11491_v16  ;;  %9592 = vmatprep.subr.bf16.mxu0 %v11498_v12  ;;  %v11554_v16 = vcombine.high %v8025_v2, %v8029_v6  ;;  %v11556_v12 = vcombine.high %v8026_v9, %v8030_v30  ;;  %v8079_v2 = vsub.s32 5, %v13421_v42  ;;  %v8087_v6 = vsub.s32 7, %v13421_v42 }
 0x871   :  { %9674 = vmatprep.subr.bf16.mxu1 %v11500_v52  ;;  %v8033_v52 = vld [vmem:[#allocation2 + $0x750] sm:$0xff] }
 0x872   :  { %v11561_v14 = vcombine.low %v8033_v52, %v8037_v15 }
 0x873   :  { %9593 = vmatpush1.bf16.msra.mxu0 %v11497_v22  ;;  %v11555_v22 = vcombine.low %v8026_v9, %v8030_v30 }
 0x874   :  { %9675 = vmatpush1.bf16.msra.mxu1 %v11499_v28  ;;  %9594 = vmatprep.subr.bf16.mxu0 %v11506_v29  ;;  %v11562_v28 = vcombine.high %v8033_v52, %v8037_v15  ;;  %v11564_v29 = vcombine.high %v8034_v17, %v8038_v20 }
 0x875   :  { %9676 = vmatprep.subr.bf16.mxu1 %v11508_v23  ;;  %v8041_v23 = vld [vmem:[#allocation2 + $0x790] sm:$0xff] }
 0x876   :  { %v11569_v43 = vcombine.low %v8041_v23, %v8045_v24 }
 0x877   :  { %9595 = vmatpush1.bf16.msra.mxu0 %v11505_v51  ;;  %v11563_v51 = vcombine.low %v8034_v17, %v8038_v20 }
 0x878   :  { %9677 = vmatpush1.bf16.msra.mxu1 %v11507_v57  ;;  %9596 = vmatprep.subr.bf16.mxu0 %v11514_v34  ;;  %v11570_v57 = vcombine.high %v8041_v23, %v8045_v24  ;;  %v11572_v34 = vcombine.high %v8042_v13, %v8046_v27 }
 0x879   :  { %9678 = vmatprep.subr.bf16.mxu1 %v11516_v35  ;;  %v8049_v35 = vld [vmem:[#allocation2 + $0x7d0] sm:$0xff] }
 0x87b   :  { %9597 = vmatpush1.bf16.msra.mxu0 %v11513_v44  ;;  %v11571_v44 = vcombine.low %v8042_v13, %v8046_v27 }
 0x87c   :  { %9679 = vmatpush1.bf16.msra.mxu1 %v11515_v47  ;;  %9598 = vmatprep.subr.bf16.mxu0 %v11522_v48  ;;  %v11578_v47 = vcombine.high %v8049_v35, %v8053_v36  ;;  %v11580_v48 = vcombine.high %v8050_v37, %v8054_v39 }
 0x87d   :  { %9680 = vmatprep.subr.bf16.mxu1 %v11524_v63  ;;  %v11577_v63 = vcombine.low %v8049_v35, %v8053_v36 }
 0x87f   :  { %9599 = vmatpush1.bf16.msra.mxu0 %v11521_v56  ;;  %v8064_v56 = vrot.slane %v8055_v45, %v14321_v33 }
 0x880   :  { %9681 = vmatpush1.bf16.msra.mxu1 %v11523_v58  ;;  %9600 = vmatprep.subr.bf16.mxu0 %v11530_v60  ;;  %v8072_v58 = vrot.slane %v8055_v45, %v14324_v26 }
 0x881   :  { %9682 = vmatprep.subr.bf16.mxu1 %v11532_v61 }
 0x883   :  { %9601 = vmatpush1.bf16.msra.mxu0 %v11529_v0 }
 0x884   :  { %9683 = vmatpush1.bf16.msra.mxu1 %v11531_v1  ;;  %9602 = vmatprep.subr.bf16.mxu0 %v11538_v46 }
 0x885   :  { %9684 = vmatprep.subr.bf16.mxu1 %v11540_v3 }
 0x887   :  { %9603 = vmatpush1.bf16.msra.mxu0 %v11537_v55 }
 0x888   :  { %9685 = vmatpush1.bf16.msra.mxu1 %v11539_v21  ;;  %9604 = vmatprep.subr.bf16.mxu0 %v11546_v40  ;;  %v8075_v40 = vsub.s32 4, %v13421_v42 }
 0x889   :  { %9686 = vmatprep.subr.bf16.mxu1 %v11548_v41  ;;  %v8083_v41 = vsub.s32 6, %v13421_v42 }
 0x88a   :  { %v8076_v9 = vrot.slane %v8055_v45, %v8075_v40 }
 0x88b   :  { %9605 = vmatpush1.bf16.msra.mxu0 %v11545_v31  ;;  %v8084_v30 = vrot.slane %v8055_v45, %v8083_v41  ;;  %v8080_v31 = vrot.slane %v8055_v45, %v8079_v2 }
 0x88c   :  { %9687 = vmatpush1.bf16.msra.mxu1 %v11547_v10  ;;  %9606 = vmatprep.subr.bf16.mxu0 %v11554_v16  ;;  %v8088_v10 = vrot.slane %v8055_v45, %v8087_v6 }
 0x88d   :  { %9688 = vmatprep.subr.bf16.mxu1 %v11556_v12 }
 0x88f   :  { %9607 = vmatpush1.bf16.msra.mxu0 %v11553_v53 }
 0x890   :  { %9689 = vmatpush1.bf16.msra.mxu1 %v11555_v22  ;;  %9608 = vmatprep.subr.bf16.mxu0 %v11562_v28 }
 0x891   :  { %9690 = vmatprep.subr.bf16.mxu1 %v11564_v29 }
 0x893   :  { %9609 = vmatpush1.bf16.msra.mxu0 %v11561_v14 }
 0x894   :  { %9691 = vmatpush1.bf16.msra.mxu1 %v11563_v51  ;;  %9610 = vmatprep.subr.bf16.mxu0 %v11570_v57 }
 0x895   :  { %9692 = vmatprep.subr.bf16.mxu1 %v11572_v34 }
 0x897   :  { %9611 = vmatpush1.bf16.msra.mxu0 %v11569_v43 }
 0x898   :  { %9693 = vmatpush1.bf16.msra.mxu1 %v11571_v44  ;;  %9612 = vmatprep.subr.bf16.mxu0 %v11578_v47 }
 0x899   :  { %9694 = vmatprep.subr.bf16.mxu1 %v11580_v48 }
 0x89b   :  { %9613 = vmatpush1.bf16.msra.mxu0 %v11577_v63 }
 0x89c   :  { %9695 = vmatpush1.bf16.msra.mxu1 %v11579_v18 }
 0x89e   :  { %9615 = vmatmul.mubr.bf16.vlgmr.msra.gmra.mrb[44].mxu0 %v16622_v38 }
 0x89f   :  { %9697 = vmatmul.mubr.bf16.vlgmr.msra.gmra.mrb[44].mxu1 %v16622_v38 }
 0x8f1   :  { %v9452_v60 = vpop.f32.mrb[40].mxu0  ;;  %v9534_v61 = vpop.f32.mrb[40].mxu1 }
 0x8f2   :  { %v11601_v62 = vadd.f32 %v9452_v60, %v8060_v11  ;;  %v11603_v25 = vadd.f32 %v9534_v61, %v8068_v19  ;;  %v9454_v8 = vpop.f32.mrb[41].mxu0  ;;  %v9536_v59 = vpop.f32.mrb[41].mxu1 }
 0x8f3   :  { %v11602_v0 = vadd.f32 %v9454_v8, %v8064_v56  ;;  %v11604_v38 = vadd.f32 %v9536_v59, %v8072_v58  ;;  %v9456_v1 = vpop.f32.mrb[42].mxu0  ;;  %v9538_v46 = vpop.f32.mrb[42].mxu1 }
 0x8f4   :  { %v9705_v3 = vmax.f32 %v11601_v62, 0.0  ;;  %v9707_v4 = vmax.f32 %v11603_v25, 0.0  ;;  %v9457_v5 = vpop.f32.mrb[43].mxu0  ;;  %v9539_v32 = vpop.f32.mrb[43].mxu1 }
 0x8f5   :  { %v9706_v7 = vmax.f32 %v11602_v0, 0.0  ;;  %v9708_v50 = vmax.f32 %v11604_v38, 0.0 }
 0x8f7   :  { %v11581_v54 = vpack.c.bf16 %v9706_v7, %v9705_v3  ;;  %v11582_v33 = vpack.c.bf16 %v9708_v50, %v9707_v4 }
 0x8f9   :  { %v9739_v26 = vrot.slane %v11581_v54, %v13439_v49  ;;  %v9746_v55 = vrot.slane %v11582_v33, %v13439_v49 }
 0x8fb   :  { %v9761_v21 = vcombine.low %v9739_v26, %v9746_v55 }
 0x8fd   :  { %v9769_v37 = vrot.slane %v9761_v21, %v13439_v49 }
 0x971   :  { %v9616_v16 = vpop.f32.mrb[44].mxu0 }
 0x972   :  { %v11605_v12 = vadd.f32 %v9616_v16, %v8076_v9  ;;  %v9698_v52 = vpop.f32.mrb[44].mxu1  ;;  %v9618_v15 = vpop.f32.mrb[45].mxu0 }
 0x973   :  { %v11607_v17 = vadd.f32 %v9698_v52, %v8084_v30  ;;  %v11606_v20 = vadd.f32 %v9618_v15, %v8080_v31  ;;  %v9700_v53 = vpop.f32.mrb[45].mxu1  ;;  %v9620_v22 = vpop.f32.mrb[46].mxu0 }
 0x974   :  { %v9709_v28 = vmax.f32 %v11605_v12, 0.0  ;;  %v11608_v29 = vadd.f32 %v9700_v53, %v8088_v10  ;;  %v9702_v23 = vpop.f32.mrb[46].mxu1  ;;  %v9621_v24 = vpop.f32.mrb[47].mxu0 }
 0x975   :  { %v9711_v13 = vmax.f32 %v11607_v17, 0.0  ;;  %v9710_v27 = vmax.f32 %v11606_v20, 0.0  ;;  %v9703_v14 = vpop.f32.mrb[47].mxu1 }
 0x976   :  { %v9712_v42 = vmax.f32 %v11608_v29, 0.0 }
 0x977   :  { %v11583_v51 = vpack.c.bf16 %v9710_v27, %v9709_v28 }
 0x978   :  { %v11584_v57 = vpack.c.bf16 %v9712_v42, %v9711_v13 }
 0x979   :  { %v9753_v34 = vrot.slane %v11583_v51, %v13439_v49 }
 0x97a   :  { %v9760_v35 = vrot.slane %v11584_v57, %v13439_v49 }
 0x97c   :  { %v9762_v36 = vcombine.low %v9753_v34, %v9760_v35 }
 0x97e   :  { %v9776_v39 = vrot.slane %v9762_v36, %v13439_v49 }
 0x980   :  { %v9777_v43 = vcombine.low %v9769_v37, %v9776_v39 }
 0x982   :  { %9779 = vst [vmem:[%s16665_s9] sm:$0xff] %v9777_v43 }
 0x983   :  { %9784 = vsyncpa [#allocation3], 1 }

</bundles_post_ra>
